<compile_context>
chip_gen: v6e
topology: v6e:2x2x1
jax: 0.10.0
libtpu: 0.0.40
codegen_flags: <defaults>
</compile_context>

<pallas_src>
import functools
from collections import OrderedDict

import jax
import jax.numpy as jnp
from jax import lax
from jax.experimental import pallas as pl
from jax.experimental.pallas import tpu as pltpu


def _vgg_block1_kernel(x_ref, mask_ref, mean_ref, istd_ref,
                       w1_ref, b1_ref, w2_ref, b2_ref,
                       f1_ref, f2_ref,
                       xpad1, xpad2,
                       *, H, W):
    """Fused z_score -> conv1_1+ReLU -> conv1_2+ReLU for one batch element.

    x_ref   : (1, H*(W+2), Cin)  width-padded, z-unnormalized input slab (f32)
    mask_ref: (H*(W+2), 1)       1.0 on real pixels, 0.0 on the 2 pad columns
    mean/istd: (1, Cin)          ImageNet mean and 1/std (padded channels: 0/1)
    w*_ref  : (3, 3, Cin, Cout)  conv weights, bf16
    b*_ref  : (1, Cout)          conv biases, f32
    f1_ref  : (1, H*(W+2), C1)   relu1_1 (slab layout, junk columns zeroed)
    f2_ref  : (1, H*(W+2), C2)   relu1_2 (slab layout, junk columns unused)
    xpad1/2 : ((H+3)*(W+2), C)   bf16 scratch slabs with top/bottom halo rows
    """
    WP = W + 2                  # padded width
    HX = H * WP                 # rows of the working slab
    OFF = WP + 1                # flat offset of padded position (1, 1)
    NPAD = xpad1.shape[0]       # (H+3)*(W+2): +1 spare padded row keeps the
                                # largest shifted tap window in bounds

    mask = mask_ref[...]        # (HX, 1) float {0,1}

    def zero_halo(buf, cols):
        # Only the rows NOT rewritten below need zeros; doing it every step
        # keeps the kernel correct under "parallel" (megacore) grid scheduling.
        buf[0:OFF, :] = jnp.zeros((OFF, cols), jnp.bfloat16)
        buf[OFF + HX:NPAD, :] = jnp.zeros((NPAD - OFF - HX, cols), jnp.bfloat16)

    zero_halo(xpad1, xpad1.shape[1])
    zero_halo(xpad2, xpad2.shape[1])

    # ---- z-score and stage the input into its padded slab (in-kernel pad) ----
    # Junk (pad) columns are forced to 0 so they become the left/right halo
    # zeros of the padded image; the slab write covers every interior cell.
    xn = (x_ref[0] - mean_ref[...]) * istd_ref[...] * mask
    xpad1[OFF:OFF + HX, :] = xn.astype(jnp.bfloat16)

    def conv3x3(src, w_ref, b_ref):
        # 3x3 SAME conv as 9 shifted contiguous slab windows -> 2D bf16 matmuls
        # accumulated in f32.  src is a scratch Ref; slicing it is a cheap
        # leading-dim (sublane-offset) window, not a relayout.
        cout = w_ref.shape[3]
        acc = jnp.zeros((HX, cout), jnp.float32)
        for dy in range(3):
            for dx in range(3):
                off = dy * WP + dx
                acc = acc + jnp.dot(src[off:off + HX, :], w_ref[dy, dx],
                                    preferred_element_type=jnp.float32)
        return acc + b_ref[...]

    # ---- conv1_1 + bias + ReLU (target 'relu1_1') ----
    a1 = jnp.maximum(conv3x3(xpad1, w1_ref, b1_ref), 0.0) * mask
    f1_ref[0] = a1
    # relu1_1 never leaves VMEM on its way into conv1_2: write it straight into
    # the next padded slab (masked junk columns land exactly on halo cells).
    xpad2[OFF:OFF + HX, :] = a1.astype(jnp.bfloat16)

    # ---- conv1_2 + bias + ReLU (target 'relu1_2') ----
    f2_ref[0] = jnp.maximum(conv3x3(xpad2, w2_ref, b2_ref), 0.0)


def vgg_block1_pallas(x_nchw, w1_t, b1, w2_t, b2, vgg_mean, vgg_std):
    """Runs z_score -> conv1_1 -> relu1_1 -> conv1_2 -> relu1_2.

    x_nchw : (B, 3, H, W) float32, values in [0, 1]
    w*_t   : PyTorch-layout conv weights (Cout, Cin, 3, 3); b*: (Cout,)
    Returns an OrderedDict {'relu1_1': (B,C1,H,W), 'relu1_2': (B,C2,H,W)}.
    """
    B, C_img, H, W = x_nchw.shape
    C1 = w1_t.shape[0]
    C2 = w2_t.shape[0]
    CIN = 8                      # pad 3 image channels -> 8 (sublane-friendly K)
    WP = W + 2
    HX = H * WP
    NPAD = (H + 3) * WP

    # ---- layout plumbing (wrapper-side; constant-size, no activation pad) ----
    x_nhwc = jnp.transpose(x_nchw, (0, 2, 3, 1)).astype(jnp.float32)
    x_slab = jnp.pad(x_nhwc, ((0, 0), (0, 0), (0, 2), (0, CIN - C_img)))
    x_slab = x_slab.reshape(B, HX, CIN)

    w1 = jnp.transpose(w1_t, (2, 3, 1, 0))                     # (3,3,Cin,C1)
    w1 = jnp.pad(w1, ((0, 0), (0, 0), (0, CIN - C_img), (0, 0))).astype(jnp.bfloat16)
    w2 = jnp.transpose(w2_t, (2, 3, 1, 0)).astype(jnp.bfloat16)  # (3,3,C1,C2)
    b1r = b1.reshape(1, C1).astype(jnp.float32)
    b2r = b2.reshape(1, C2).astype(jnp.float32)

    mean = jnp.pad(vgg_mean.reshape(-1), (0, CIN - C_img)).reshape(1, CIN)
    istd = jnp.pad(1.0 / vgg_std.reshape(-1), (0, CIN - C_img),
                   constant_values=1.0).reshape(1, CIN)
    mean = mean.astype(jnp.float32)
    istd = istd.astype(jnp.float32)

    colmask = (jnp.arange(HX) % WP < W).astype(jnp.float32).reshape(HX, 1)

    kernel = functools.partial(_vgg_block1_kernel, H=H, W=W)

    grid_spec = pltpu.PrefetchScalarGridSpec(
        num_scalar_prefetch=0,
        grid=(B,),
        in_specs=[
            pl.BlockSpec((1, HX, CIN), lambda b: (b, 0, 0)),     # x slab
            pl.BlockSpec((HX, 1), lambda b: (0, 0)),             # column mask
            pl.BlockSpec((1, CIN), lambda b: (0, 0)),            # mean
            pl.BlockSpec((1, CIN), lambda b: (0, 0)),            # 1/std
            pl.BlockSpec((3, 3, CIN, C1), lambda b: (0, 0, 0, 0)),
            pl.BlockSpec((1, C1), lambda b: (0, 0)),
            pl.BlockSpec((3, 3, C1, C2), lambda b: (0, 0, 0, 0)),
            pl.BlockSpec((1, C2), lambda b: (0, 0)),
        ],
        out_specs=[
            pl.BlockSpec((1, HX, C1), lambda b: (b, 0, 0)),      # relu1_1 slab
            pl.BlockSpec((1, HX, C2), lambda b: (b, 0, 0)),      # relu1_2 slab
        ],
        scratch_shapes=[
            pltpu.VMEM((NPAD, CIN), jnp.bfloat16),               # padded input
            pltpu.VMEM((NPAD, C1), jnp.bfloat16),                # padded relu1_1
        ],
    )

    f1, f2 = pl.pallas_call(
        kernel,
        out_shape=(jax.ShapeDtypeStruct((B, HX, C1), jnp.float32),
                   jax.ShapeDtypeStruct((B, HX, C2), jnp.float32)),
        grid_spec=grid_spec,
        compiler_params=pltpu.CompilerParams(
            dimension_semantics=("parallel",)),   # B=2 -> both v7x TensorCores
    )(x_slab, colmask, mean, istd, w1, b1r, w2, b2r)

    def unflatten(f, c):
        # (B, H*(W+2), C) slab -> drop the 2 pad columns -> NCHW
        return jnp.transpose(f.reshape(B, H, WP, c)[:, :, :W, :], (0, 3, 1, 2))

    return OrderedDict([("relu1_1", unflatten(f1, C1)),
                        ("relu1_2", unflatten(f2, C2))])


def vgg_block1_reference(x_nchw, w1_t, b1, w2_t, b2, vgg_mean, vgg_std):
    """Pure-JAX f32 reference of the same forward pass."""
    x = (x_nchw - vgg_mean.reshape(1, 3, 1, 1)) / vgg_std.reshape(1, 3, 1, 1)
    x = jnp.transpose(x, (0, 2, 3, 1))

    def conv_relu(h, w_t, bias):
        w = jnp.transpose(w_t, (2, 3, 1, 0))
        y = lax.conv_general_dilated(h, w, window_strides=(1, 1), padding="SAME",
                                     dimension_numbers=("NHWC", "HWIO", "NHWC"))
        return jnp.maximum(y + bias, 0.0)

    h1 = conv_relu(x, w1_t, b1)
    h2 = conv_relu(h1, w2_t, b2)
    to_nchw = lambda t: jnp.transpose(t, (0, 3, 1, 2))
    return OrderedDict([("relu1_1", to_nchw(h1)), ("relu1_2", to_nchw(h2))])


if __name__ == "__main__":
    # Small shapes consistent with the module: a (2, 3, 16, 16) image in [0, 1];
    # VGG block-1 has 64 output channels (conv1_1: 3->64, conv1_2: 64->64).
    B, C_IMG, H, W = 2, 3, 16, 16
    C1 = C2 = 64

    key = jax.random.PRNGKey(0)
    kx, kw1, kb1, kw2, kb2 = jax.random.split(key, 5)
    x = jax.random.uniform(kx, (B, C_IMG, H, W), dtype=jnp.float32)
    w1_t = jax.random.normal(kw1, (C1, C_IMG, 3, 3), dtype=jnp.float32) * 0.2
    b1 = jax.random.normal(kb1, (C1,), dtype=jnp.float32) * 0.1
    w2_t = jax.random.normal(kw2, (C2, C1, 3, 3), dtype=jnp.float32) * 0.04
    b2 = jax.random.normal(kb2, (C2,), dtype=jnp.float32) * 0.1

    vgg_mean = jnp.array([0.485, 0.456, 0.406], dtype=jnp.float32)
    vgg_std = jnp.array([0.229, 0.224, 0.225], dtype=jnp.float32)

    out = vgg_block1_pallas(x, w1_t, b1, w2_t, b2, vgg_mean, vgg_std)
    out = jax.block_until_ready(out)

    ref = vgg_block1_reference(x, w1_t, b1, w2_t, b2, vgg_mean, vgg_std)

    for name in ("relu1_1", "relu1_2"):
        assert out[name].shape == ref[name].shape, name
        # bf16 taps/weights with f32 accumulation -> slightly loosened tolerance
        assert jnp.allclose(out[name], ref[name], atol=3e-2, rtol=3e-2), name

    print("KERNEL_OK")
</pallas_src>

<mosaic_0001>
module attributes {stable_mosaic.version = 11 : i64} {
  func.func @_vgg_block1_kernel(%arg0: i32, %arg1: memref<1x288x8xf32, #tpu.memory_space<vmem>>, %arg2: memref<288x1xf32, #tpu.memory_space<vmem>>, %arg3: memref<1x8xf32, #tpu.memory_space<vmem>>, %arg4: memref<1x8xf32, #tpu.memory_space<vmem>>, %arg5: memref<3x3x8x64xbf16, #tpu.memory_space<vmem>>, %arg6: memref<1x64xf32, #tpu.memory_space<vmem>>, %arg7: memref<3x3x64x64xbf16, #tpu.memory_space<vmem>>, %arg8: memref<1x64xf32, #tpu.memory_space<vmem>>, %arg9: memref<1x288x64xf32, #tpu.memory_space<vmem>>, %arg10: memref<1x288x64xf32, #tpu.memory_space<vmem>>, %arg11: memref<342x8xbf16, #tpu.memory_space<vmem>>, %arg12: memref<342x64xbf16, #tpu.memory_space<vmem>>) attributes {dimension_semantics = [#tpu.dimension_semantics<parallel>], iteration_bounds = array<i64: 2>, scalar_prefetch = 0 : i64, scratch_operands = 2 : i64, tpu.core_type = #tpu.core_type<tc>, window_params = [{transform_indices = @transform_0, window_bounds = array<i64: 1, 288, 8>}, {pipeline_mode = #tpu.pipeline_mode<synchronous>, transform_indices = @transform_1, window_bounds = array<i64: 288, 1>}, {pipeline_mode = #tpu.pipeline_mode<synchronous>, transform_indices = @transform_2, window_bounds = array<i64: 1, 8>}, {pipeline_mode = #tpu.pipeline_mode<synchronous>, transform_indices = @transform_3, window_bounds = array<i64: 1, 8>}, {pipeline_mode = #tpu.pipeline_mode<synchronous>, transform_indices = @transform_4, window_bounds = array<i64: 3, 3, 8, 64>}, {pipeline_mode = #tpu.pipeline_mode<synchronous>, transform_indices = @transform_5, window_bounds = array<i64: 1, 64>}, {pipeline_mode = #tpu.pipeline_mode<synchronous>, transform_indices = @transform_6, window_bounds = array<i64: 3, 3, 64, 64>}, {pipeline_mode = #tpu.pipeline_mode<synchronous>, transform_indices = @transform_7, window_bounds = array<i64: 1, 64>}, {transform_indices = @transform_8, window_bounds = array<i64: 1, 288, 64>}, {transform_indices = @transform_9, window_bounds = array<i64: 1, 288, 64>}]} {
    %c0 = arith.constant 0 : index
    %c0_0 = arith.constant 0 : index
    %0 = vector.load %arg2[%c0, %c0_0] : memref<288x1xf32, #tpu.memory_space<vmem>>, vector<288x1xf32>
    %cst = arith.constant 0.000000e+00 : bf16
    %1 = vector.broadcast %cst : bf16 to vector<19x8xbf16>
    %c0_1 = arith.constant 0 : index
    %c0_2 = arith.constant 0 : index
    %2 = vector.load %arg11[%c0_1, %c0_2] : memref<342x8xbf16, #tpu.memory_space<vmem>>, vector<19x8xbf16>
    tpu.vector_store %arg11[%c0_1, %c0_2], %1 {strides = array<i32>} : memref<342x8xbf16, #tpu.memory_space<vmem>>, vector<19x8xbf16>,
    %cst_3 = arith.constant 0.000000e+00 : bf16
    %3 = vector.broadcast %cst_3 : bf16 to vector<35x8xbf16>
    %c307 = arith.constant 307 : index
    %c0_4 = arith.constant 0 : index
    %4 = vector.load %arg11[%c307, %c0_4] : memref<342x8xbf16, #tpu.memory_space<vmem>>, vector<35x8xbf16>
    tpu.vector_store %arg11[%c307, %c0_4], %3 {strides = array<i32>} : memref<342x8xbf16, #tpu.memory_space<vmem>>, vector<35x8xbf16>,
    %cst_5 = arith.constant 0.000000e+00 : bf16
    %5 = vector.broadcast %cst_5 : bf16 to vector<19x64xbf16>
    %c0_6 = arith.constant 0 : index
    %c0_7 = arith.constant 0 : index
    %6 = vector.load %arg12[%c0_6, %c0_7] : memref<342x64xbf16, #tpu.memory_space<vmem>>, vector<19x64xbf16>
    tpu.vector_store %arg12[%c0_6, %c0_7], %5 {strides = array<i32>} : memref<342x64xbf16, #tpu.memory_space<vmem>>, vector<19x64xbf16>,
    %cst_8 = arith.constant 0.000000e+00 : bf16
    %7 = vector.broadcast %cst_8 : bf16 to vector<35x64xbf16>
    %c307_9 = arith.constant 307 : index
    %c0_10 = arith.constant 0 : index
    %8 = vector.load %arg12[%c307_9, %c0_10] : memref<342x64xbf16, #tpu.memory_space<vmem>>, vector<35x64xbf16>
    tpu.vector_store %arg12[%c307_9, %c0_10], %7 {strides = array<i32>} : memref<342x64xbf16, #tpu.memory_space<vmem>>, vector<35x64xbf16>,
    %c0_11 = arith.constant 0 : index
    %c0_12 = arith.constant 0 : index
    %c0_13 = arith.constant 0 : index
    %9 = vector.load %arg1[%c0_11, %c0_12, %c0_13] : memref<1x288x8xf32, #tpu.memory_space<vmem>>, vector<1x288x8xf32>
    %10 = vector.shape_cast %9 : vector<1x288x8xf32> to vector<288x8xf32>
    %c0_14 = arith.constant 0 : index
    %c0_15 = arith.constant 0 : index
    %11 = vector.load %arg3[%c0_14, %c0_15] : memref<1x8xf32, #tpu.memory_space<vmem>>, vector<1x8xf32>
    %12 = vector.broadcast %11 : vector<1x8xf32> to vector<288x8xf32>
    %13 = arith.subf %10, %12 : vector<288x8xf32>
    %c0_16 = arith.constant 0 : index
    %c0_17 = arith.constant 0 : index
    %14 = vector.load %arg4[%c0_16, %c0_17] : memref<1x8xf32, #tpu.memory_space<vmem>>, vector<1x8xf32>
    %15 = vector.broadcast %14 : vector<1x8xf32> to vector<288x8xf32>
    %16 = arith.mulf %13, %15 : vector<288x8xf32>
    %17 = vector.broadcast %0 : vector<288x1xf32> to vector<288x8xf32>
    %18 = arith.mulf %16, %17 : vector<288x8xf32>
    %19 = arith.truncf %18 : vector<288x8xf32> to vector<288x8xbf16>
    %c19 = arith.constant 19 : index
    %c0_18 = arith.constant 0 : index
    %20 = vector.load %arg11[%c19, %c0_18] : memref<342x8xbf16, #tpu.memory_space<vmem>>, vector<288x8xbf16>
    tpu.vector_store %arg11[%c19, %c0_18], %19 {strides = array<i32>} : memref<342x8xbf16, #tpu.memory_space<vmem>>, vector<288x8xbf16>,
    %cst_19 = arith.constant 0.000000e+00 : f32
    %21 = vector.broadcast %cst_19 : f32 to vector<288x64xf32>
    %c0_20 = arith.constant 0 : index
    %c0_21 = arith.constant 0 : index
    %22 = vector.load %arg11[%c0_20, %c0_21] : memref<342x8xbf16, #tpu.memory_space<vmem>>, vector<288x8xbf16>
    %c0_22 = arith.constant 0 : index
    %c0_23 = arith.constant 0 : index
    %c0_24 = arith.constant 0 : index
    %c0_25 = arith.constant 0 : index
    %23 = vector.load %arg5[%c0_22, %c0_23, %c0_24, %c0_25] : memref<3x3x8x64xbf16, #tpu.memory_space<vmem>>, vector<1x1x8x64xbf16>
    %24 = vector.shape_cast %23 : vector<1x1x8x64xbf16> to vector<8x64xbf16>
    %cst_26 = arith.constant dense<0.000000e+00> : vector<288x64xf32>
    %25 = tpu.matmul %22, %24, %cst_26 {dimension_numbers = #tpu.dot_dimension_numbers<[1], [0], [0], [1], [0, 0, 1, 1], [], []>} : vector<288x8xbf16>, vector<8x64xbf16>, vector<288x64xf32> -> vector<288x64xf32>
    %26 = arith.addf %21, %25 : vector<288x64xf32>
    %c1 = arith.constant 1 : index
    %c0_27 = arith.constant 0 : index
    %27 = vector.load %arg11[%c1, %c0_27] : memref<342x8xbf16, #tpu.memory_space<vmem>>, vector<288x8xbf16>
    %c0_28 = arith.constant 0 : index
    %c1_29 = arith.constant 1 : index
    %c0_30 = arith.constant 0 : index
    %c0_31 = arith.constant 0 : index
    %28 = vector.load %arg5[%c0_28, %c1_29, %c0_30, %c0_31] : memref<3x3x8x64xbf16, #tpu.memory_space<vmem>>, vector<1x1x8x64xbf16>
    %29 = vector.shape_cast %28 : vector<1x1x8x64xbf16> to vector<8x64xbf16>
    %cst_32 = arith.constant dense<0.000000e+00> : vector<288x64xf32>
    %30 = tpu.matmul %27, %29, %cst_32 {dimension_numbers = #tpu.dot_dimension_numbers<[1], [0], [0], [1], [0, 0, 1, 1], [], []>} : vector<288x8xbf16>, vector<8x64xbf16>, vector<288x64xf32> -> vector<288x64xf32>
    %31 = arith.addf %26, %30 : vector<288x64xf32>
    %c2 = arith.constant 2 : index
    %c0_33 = arith.constant 0 : index
    %32 = vector.load %arg11[%c2, %c0_33] : memref<342x8xbf16, #tpu.memory_space<vmem>>, vector<288x8xbf16>
    %c0_34 = arith.constant 0 : index
    %c2_35 = arith.constant 2 : index
    %c0_36 = arith.constant 0 : index
    %c0_37 = arith.constant 0 : index
    %33 = vector.load %arg5[%c0_34, %c2_35, %c0_36, %c0_37] : memref<3x3x8x64xbf16, #tpu.memory_space<vmem>>, vector<1x1x8x64xbf16>
    %34 = vector.shape_cast %33 : vector<1x1x8x64xbf16> to vector<8x64xbf16>
    %cst_38 = arith.constant dense<0.000000e+00> : vector<288x64xf32>
    %35 = tpu.matmul %32, %34, %cst_38 {dimension_numbers = #tpu.dot_dimension_numbers<[1], [0], [0], [1], [0, 0, 1, 1], [], []>} : vector<288x8xbf16>, vector<8x64xbf16>, vector<288x64xf32> -> vector<288x64xf32>
    %36 = arith.addf %31, %35 : vector<288x64xf32>
    %c18 = arith.constant 18 : index
    %c0_39 = arith.constant 0 : index
    %37 = vector.load %arg11[%c18, %c0_39] : memref<342x8xbf16, #tpu.memory_space<vmem>>, vector<288x8xbf16>
    %c1_40 = arith.constant 1 : index
    %c0_41 = arith.constant 0 : index
    %c0_42 = arith.constant 0 : index
    %c0_43 = arith.constant 0 : index
    %38 = vector.load %arg5[%c1_40, %c0_41, %c0_42, %c0_43] : memref<3x3x8x64xbf16, #tpu.memory_space<vmem>>, vector<1x1x8x64xbf16>
    %39 = vector.shape_cast %38 : vector<1x1x8x64xbf16> to vector<8x64xbf16>
    %cst_44 = arith.constant dense<0.000000e+00> : vector<288x64xf32>
    %40 = tpu.matmul %37, %39, %cst_44 {dimension_numbers = #tpu.dot_dimension_numbers<[1], [0], [0], [1], [0, 0, 1, 1], [], []>} : vector<288x8xbf16>, vector<8x64xbf16>, vector<288x64xf32> -> vector<288x64xf32>
    %41 = arith.addf %36, %40 : vector<288x64xf32>
    %c19_45 = arith.constant 19 : index
    %c0_46 = arith.constant 0 : index
    %42 = vector.load %arg11[%c19_45, %c0_46] : memref<342x8xbf16, #tpu.memory_space<vmem>>, vector<288x8xbf16>
    %c1_47 = arith.constant 1 : index
    %c1_48 = arith.constant 1 : index
    %c0_49 = arith.constant 0 : index
    %c0_50 = arith.constant 0 : index
    %43 = vector.load %arg5[%c1_47, %c1_48, %c0_49, %c0_50] : memref<3x3x8x64xbf16, #tpu.memory_space<vmem>>, vector<1x1x8x64xbf16>
    %44 = vector.shape_cast %43 : vector<1x1x8x64xbf16> to vector<8x64xbf16>
    %cst_51 = arith.constant dense<0.000000e+00> : vector<288x64xf32>
    %45 = tpu.matmul %42, %44, %cst_51 {dimension_numbers = #tpu.dot_dimension_numbers<[1], [0], [0], [1], [0, 0, 1, 1], [], []>} : vector<288x8xbf16>, vector<8x64xbf16>, vector<288x64xf32> -> vector<288x64xf32>
    %46 = arith.addf %41, %45 : vector<288x64xf32>
    %c20 = arith.constant 20 : index
    %c0_52 = arith.constant 0 : index
    %47 = vector.load %arg11[%c20, %c0_52] : memref<342x8xbf16, #tpu.memory_space<vmem>>, vector<288x8xbf16>
    %c1_53 = arith.constant 1 : index
    %c2_54 = arith.constant 2 : index
    %c0_55 = arith.constant 0 : index
    %c0_56 = arith.constant 0 : index
    %48 = vector.load %arg5[%c1_53, %c2_54, %c0_55, %c0_56] : memref<3x3x8x64xbf16, #tpu.memory_space<vmem>>, vector<1x1x8x64xbf16>
    %49 = vector.shape_cast %48 : vector<1x1x8x64xbf16> to vector<8x64xbf16>
    %cst_57 = arith.constant dense<0.000000e+00> : vector<288x64xf32>
    %50 = tpu.matmul %47, %49, %cst_57 {dimension_numbers = #tpu.dot_dimension_numbers<[1], [0], [0], [1], [0, 0, 1, 1], [], []>} : vector<288x8xbf16>, vector<8x64xbf16>, vector<288x64xf32> -> vector<288x64xf32>
    %51 = arith.addf %46, %50 : vector<288x64xf32>
    %c36 = arith.constant 36 : index
    %c0_58 = arith.constant 0 : index
    %52 = vector.load %arg11[%c36, %c0_58] : memref<342x8xbf16, #tpu.memory_space<vmem>>, vector<288x8xbf16>
    %c2_59 = arith.constant 2 : index
    %c0_60 = arith.constant 0 : index
    %c0_61 = arith.constant 0 : index
    %c0_62 = arith.constant 0 : index
    %53 = vector.load %arg5[%c2_59, %c0_60, %c0_61, %c0_62] : memref<3x3x8x64xbf16, #tpu.memory_space<vmem>>, vector<1x1x8x64xbf16>
    %54 = vector.shape_cast %53 : vector<1x1x8x64xbf16> to vector<8x64xbf16>
    %cst_63 = arith.constant dense<0.000000e+00> : vector<288x64xf32>
    %55 = tpu.matmul %52, %54, %cst_63 {dimension_numbers = #tpu.dot_dimension_numbers<[1], [0], [0], [1], [0, 0, 1, 1], [], []>} : vector<288x8xbf16>, vector<8x64xbf16>, vector<288x64xf32> -> vector<288x64xf32>
    %56 = arith.addf %51, %55 : vector<288x64xf32>
    %c37 = arith.constant 37 : index
    %c0_64 = arith.constant 0 : index
    %57 = vector.load %arg11[%c37, %c0_64] : memref<342x8xbf16, #tpu.memory_space<vmem>>, vector<288x8xbf16>
    %c2_65 = arith.constant 2 : index
    %c1_66 = arith.constant 1 : index
    %c0_67 = arith.constant 0 : index
    %c0_68 = arith.constant 0 : index
    %58 = vector.load %arg5[%c2_65, %c1_66, %c0_67, %c0_68] : memref<3x3x8x64xbf16, #tpu.memory_space<vmem>>, vector<1x1x8x64xbf16>
    %59 = vector.shape_cast %58 : vector<1x1x8x64xbf16> to vector<8x64xbf16>
    %cst_69 = arith.constant dense<0.000000e+00> : vector<288x64xf32>
    %60 = tpu.matmul %57, %59, %cst_69 {dimension_numbers = #tpu.dot_dimension_numbers<[1], [0], [0], [1], [0, 0, 1, 1], [], []>} : vector<288x8xbf16>, vector<8x64xbf16>, vector<288x64xf32> -> vector<288x64xf32>
    %61 = arith.addf %56, %60 : vector<288x64xf32>
    %c38 = arith.constant 38 : index
    %c0_70 = arith.constant 0 : index
    %62 = vector.load %arg11[%c38, %c0_70] : memref<342x8xbf16, #tpu.memory_space<vmem>>, vector<288x8xbf16>
    %c2_71 = arith.constant 2 : index
    %c2_72 = arith.constant 2 : index
    %c0_73 = arith.constant 0 : index
    %c0_74 = arith.constant 0 : index
    %63 = vector.load %arg5[%c2_71, %c2_72, %c0_73, %c0_74] : memref<3x3x8x64xbf16, #tpu.memory_space<vmem>>, vector<1x1x8x64xbf16>
    %64 = vector.shape_cast %63 : vector<1x1x8x64xbf16> to vector<8x64xbf16>
    %cst_75 = arith.constant dense<0.000000e+00> : vector<288x64xf32>
    %65 = tpu.matmul %62, %64, %cst_75 {dimension_numbers = #tpu.dot_dimension_numbers<[1], [0], [0], [1], [0, 0, 1, 1], [], []>} : vector<288x8xbf16>, vector<8x64xbf16>, vector<288x64xf32> -> vector<288x64xf32>
    %66 = arith.addf %61, %65 : vector<288x64xf32>
    %c0_76 = arith.constant 0 : index
    %c0_77 = arith.constant 0 : index
    %67 = vector.load %arg6[%c0_76, %c0_77] : memref<1x64xf32, #tpu.memory_space<vmem>>, vector<1x64xf32>
    %68 = vector.broadcast %67 : vector<1x64xf32> to vector<288x64xf32>
    %69 = arith.addf %66, %68 : vector<288x64xf32>
    %cst_78 = arith.constant 0.000000e+00 : f32
    %70 = vector.broadcast %cst_78 : f32 to vector<288x64xf32>
    %71 = arith.maximumf %69, %70 : vector<288x64xf32>
    %72 = vector.broadcast %0 : vector<288x1xf32> to vector<288x64xf32>
    %73 = arith.mulf %71, %72 : vector<288x64xf32>
    %c0_79 = arith.constant 0 : index
    %c0_80 = arith.constant 0 : index
    %c0_81 = arith.constant 0 : index
    %74 = vector.load %arg9[%c0_79, %c0_80, %c0_81] : memref<1x288x64xf32, #tpu.memory_space<vmem>>, vector<1x288x64xf32>
    %75 = vector.shape_cast %74 : vector<1x288x64xf32> to vector<288x64xf32>
    %76 = vector.shape_cast %73 : vector<288x64xf32> to vector<1x288x64xf32>
    tpu.vector_store %arg9[%c0_79, %c0_80, %c0_81], %76 {strides = array<i32>} : memref<1x288x64xf32, #tpu.memory_space<vmem>>, vector<1x288x64xf32>,
    %77 = arith.truncf %73 : vector<288x64xf32> to vector<288x64xbf16>
    %c19_82 = arith.constant 19 : index
    %c0_83 = arith.constant 0 : index
    %78 = vector.load %arg12[%c19_82, %c0_83] : memref<342x64xbf16, #tpu.memory_space<vmem>>, vector<288x64xbf16>
    tpu.vector_store %arg12[%c19_82, %c0_83], %77 {strides = array<i32>} : memref<342x64xbf16, #tpu.memory_space<vmem>>, vector<288x64xbf16>,
    %cst_84 = arith.constant 0.000000e+00 : f32
    %79 = vector.broadcast %cst_84 : f32 to vector<288x64xf32>
    %c0_85 = arith.constant 0 : index
    %c0_86 = arith.constant 0 : index
    %80 = vector.load %arg12[%c0_85, %c0_86] : memref<342x64xbf16, #tpu.memory_space<vmem>>, vector<288x64xbf16>
    %c0_87 = arith.constant 0 : index
    %c0_88 = arith.constant 0 : index
    %c0_89 = arith.constant 0 : index
    %c0_90 = arith.constant 0 : index
    %81 = vector.load %arg7[%c0_87, %c0_88, %c0_89, %c0_90] : memref<3x3x64x64xbf16, #tpu.memory_space<vmem>>, vector<1x1x64x64xbf16>
    %82 = vector.shape_cast %81 : vector<1x1x64x64xbf16> to vector<64x64xbf16>
    %cst_91 = arith.constant dense<0.000000e+00> : vector<288x64xf32>
    %83 = tpu.matmul %80, %82, %cst_91 {dimension_numbers = #tpu.dot_dimension_numbers<[1], [0], [0], [1], [0, 0, 1, 1], [], []>} : vector<288x64xbf16>, vector<64x64xbf16>, vector<288x64xf32> -> vector<288x64xf32>
    %84 = arith.addf %79, %83 : vector<288x64xf32>
    %c1_92 = arith.constant 1 : index
    %c0_93 = arith.constant 0 : index
    %85 = vector.load %arg12[%c1_92, %c0_93] : memref<342x64xbf16, #tpu.memory_space<vmem>>, vector<288x64xbf16>
    %c0_94 = arith.constant 0 : index
    %c1_95 = arith.constant 1 : index
    %c0_96 = arith.constant 0 : index
    %c0_97 = arith.constant 0 : index
    %86 = vector.load %arg7[%c0_94, %c1_95, %c0_96, %c0_97] : memref<3x3x64x64xbf16, #tpu.memory_space<vmem>>, vector<1x1x64x64xbf16>
    %87 = vector.shape_cast %86 : vector<1x1x64x64xbf16> to vector<64x64xbf16>
    %cst_98 = arith.constant dense<0.000000e+00> : vector<288x64xf32>
    %88 = tpu.matmul %85, %87, %cst_98 {dimension_numbers = #tpu.dot_dimension_numbers<[1], [0], [0], [1], [0, 0, 1, 1], [], []>} : vector<288x64xbf16>, vector<64x64xbf16>, vector<288x64xf32> -> vector<288x64xf32>
    %89 = arith.addf %84, %88 : vector<288x64xf32>
    %c2_99 = arith.constant 2 : index
    %c0_100 = arith.constant 0 : index
    %90 = vector.load %arg12[%c2_99, %c0_100] : memref<342x64xbf16, #tpu.memory_space<vmem>>, vector<288x64xbf16>
    %c0_101 = arith.constant 0 : index
    %c2_102 = arith.constant 2 : index
    %c0_103 = arith.constant 0 : index
    %c0_104 = arith.constant 0 : index
    %91 = vector.load %arg7[%c0_101, %c2_102, %c0_103, %c0_104] : memref<3x3x64x64xbf16, #tpu.memory_space<vmem>>, vector<1x1x64x64xbf16>
    %92 = vector.shape_cast %91 : vector<1x1x64x64xbf16> to vector<64x64xbf16>
    %cst_105 = arith.constant dense<0.000000e+00> : vector<288x64xf32>
    %93 = tpu.matmul %90, %92, %cst_105 {dimension_numbers = #tpu.dot_dimension_numbers<[1], [0], [0], [1], [0, 0, 1, 1], [], []>} : vector<288x64xbf16>, vector<64x64xbf16>, vector<288x64xf32> -> vector<288x64xf32>
    %94 = arith.addf %89, %93 : vector<288x64xf32>
    %c18_106 = arith.constant 18 : index
    %c0_107 = arith.constant 0 : index
    %95 = vector.load %arg12[%c18_106, %c0_107] : memref<342x64xbf16, #tpu.memory_space<vmem>>, vector<288x64xbf16>
    %c1_108 = arith.constant 1 : index
    %c0_109 = arith.constant 0 : index
    %c0_110 = arith.constant 0 : index
    %c0_111 = arith.constant 0 : index
    %96 = vector.load %arg7[%c1_108, %c0_109, %c0_110, %c0_111] : memref<3x3x64x64xbf16, #tpu.memory_space<vmem>>, vector<1x1x64x64xbf16>
    %97 = vector.shape_cast %96 : vector<1x1x64x64xbf16> to vector<64x64xbf16>
    %cst_112 = arith.constant dense<0.000000e+00> : vector<288x64xf32>
    %98 = tpu.matmul %95, %97, %cst_112 {dimension_numbers = #tpu.dot_dimension_numbers<[1], [0], [0], [1], [0, 0, 1, 1], [], []>} : vector<288x64xbf16>, vector<64x64xbf16>, vector<288x64xf32> -> vector<288x64xf32>
    %99 = arith.addf %94, %98 : vector<288x64xf32>
    %c19_113 = arith.constant 19 : index
    %c0_114 = arith.constant 0 : index
    %100 = vector.load %arg12[%c19_113, %c0_114] : memref<342x64xbf16, #tpu.memory_space<vmem>>, vector<288x64xbf16>
    %c1_115 = arith.constant 1 : index
    %c1_116 = arith.constant 1 : index
    %c0_117 = arith.constant 0 : index
    %c0_118 = arith.constant 0 : index
    %101 = vector.load %arg7[%c1_115, %c1_116, %c0_117, %c0_118] : memref<3x3x64x64xbf16, #tpu.memory_space<vmem>>, vector<1x1x64x64xbf16>
    %102 = vector.shape_cast %101 : vector<1x1x64x64xbf16> to vector<64x64xbf16>
    %cst_119 = arith.constant dense<0.000000e+00> : vector<288x64xf32>
    %103 = tpu.matmul %100, %102, %cst_119 {dimension_numbers = #tpu.dot_dimension_numbers<[1], [0], [0], [1], [0, 0, 1, 1], [], []>} : vector<288x64xbf16>, vector<64x64xbf16>, vector<288x64xf32> -> vector<288x64xf32>
    %104 = arith.addf %99, %103 : vector<288x64xf32>
    %c20_120 = arith.constant 20 : index
    %c0_121 = arith.constant 0 : index
    %105 = vector.load %arg12[%c20_120, %c0_121] : memref<342x64xbf16, #tpu.memory_space<vmem>>, vector<288x64xbf16>
    %c1_122 = arith.constant 1 : index
    %c2_123 = arith.constant 2 : index
    %c0_124 = arith.constant 0 : index
    %c0_125 = arith.constant 0 : index
    %106 = vector.load %arg7[%c1_122, %c2_123, %c0_124, %c0_125] : memref<3x3x64x64xbf16, #tpu.memory_space<vmem>>, vector<1x1x64x64xbf16>
    %107 = vector.shape_cast %106 : vector<1x1x64x64xbf16> to vector<64x64xbf16>
    %cst_126 = arith.constant dense<0.000000e+00> : vector<288x64xf32>
    %108 = tpu.matmul %105, %107, %cst_126 {dimension_numbers = #tpu.dot_dimension_numbers<[1], [0], [0], [1], [0, 0, 1, 1], [], []>} : vector<288x64xbf16>, vector<64x64xbf16>, vector<288x64xf32> -> vector<288x64xf32>
    %109 = arith.addf %104, %108 : vector<288x64xf32>
    %c36_127 = arith.constant 36 : index
    %c0_128 = arith.constant 0 : index
    %110 = vector.load %arg12[%c36_127, %c0_128] : memref<342x64xbf16, #tpu.memory_space<vmem>>, vector<288x64xbf16>
    %c2_129 = arith.constant 2 : index
    %c0_130 = arith.constant 0 : index
    %c0_131 = arith.constant 0 : index
    %c0_132 = arith.constant 0 : index
    %111 = vector.load %arg7[%c2_129, %c0_130, %c0_131, %c0_132] : memref<3x3x64x64xbf16, #tpu.memory_space<vmem>>, vector<1x1x64x64xbf16>
    %112 = vector.shape_cast %111 : vector<1x1x64x64xbf16> to vector<64x64xbf16>
    %cst_133 = arith.constant dense<0.000000e+00> : vector<288x64xf32>
    %113 = tpu.matmul %110, %112, %cst_133 {dimension_numbers = #tpu.dot_dimension_numbers<[1], [0], [0], [1], [0, 0, 1, 1], [], []>} : vector<288x64xbf16>, vector<64x64xbf16>, vector<288x64xf32> -> vector<288x64xf32>
    %114 = arith.addf %109, %113 : vector<288x64xf32>
    %c37_134 = arith.constant 37 : index
    %c0_135 = arith.constant 0 : index
    %115 = vector.load %arg12[%c37_134, %c0_135] : memref<342x64xbf16, #tpu.memory_space<vmem>>, vector<288x64xbf16>
    %c2_136 = arith.constant 2 : index
    %c1_137 = arith.constant 1 : index
    %c0_138 = arith.constant 0 : index
    %c0_139 = arith.constant 0 : index
    %116 = vector.load %arg7[%c2_136, %c1_137, %c0_138, %c0_139] : memref<3x3x64x64xbf16, #tpu.memory_space<vmem>>, vector<1x1x64x64xbf16>
    %117 = vector.shape_cast %116 : vector<1x1x64x64xbf16> to vector<64x64xbf16>
    %cst_140 = arith.constant dense<0.000000e+00> : vector<288x64xf32>
    %118 = tpu.matmul %115, %117, %cst_140 {dimension_numbers = #tpu.dot_dimension_numbers<[1], [0], [0], [1], [0, 0, 1, 1], [], []>} : vector<288x64xbf16>, vector<64x64xbf16>, vector<288x64xf32> -> vector<288x64xf32>
    %119 = arith.addf %114, %118 : vector<288x64xf32>
    %c38_141 = arith.constant 38 : index
    %c0_142 = arith.constant 0 : index
    %120 = vector.load %arg12[%c38_141, %c0_142] : memref<342x64xbf16, #tpu.memory_space<vmem>>, vector<288x64xbf16>
    %c2_143 = arith.constant 2 : index
    %c2_144 = arith.constant 2 : index
    %c0_145 = arith.constant 0 : index
    %c0_146 = arith.constant 0 : index
    %121 = vector.load %arg7[%c2_143, %c2_144, %c0_145, %c0_146] : memref<3x3x64x64xbf16, #tpu.memory_space<vmem>>, vector<1x1x64x64xbf16>
    %122 = vector.shape_cast %121 : vector<1x1x64x64xbf16> to vector<64x64xbf16>
    %cst_147 = arith.constant dense<0.000000e+00> : vector<288x64xf32>
    %123 = tpu.matmul %120, %122, %cst_147 {dimension_numbers = #tpu.dot_dimension_numbers<[1], [0], [0], [1], [0, 0, 1, 1], [], []>} : vector<288x64xbf16>, vector<64x64xbf16>, vector<288x64xf32> -> vector<288x64xf32>
    %124 = arith.addf %119, %123 : vector<288x64xf32>
    %c0_148 = arith.constant 0 : index
    %c0_149 = arith.constant 0 : index
    %125 = vector.load %arg8[%c0_148, %c0_149] : memref<1x64xf32, #tpu.memory_space<vmem>>, vector<1x64xf32>
    %126 = vector.broadcast %125 : vector<1x64xf32> to vector<288x64xf32>
    %127 = arith.addf %124, %126 : vector<288x64xf32>
    %cst_150 = arith.constant 0.000000e+00 : f32
    %128 = vector.broadcast %cst_150 : f32 to vector<288x64xf32>
    %129 = arith.maximumf %127, %128 : vector<288x64xf32>
    %c0_151 = arith.constant 0 : index
    %c0_152 = arith.constant 0 : index
    %c0_153 = arith.constant 0 : index
    %130 = vector.load %arg10[%c0_151, %c0_152, %c0_153] : memref<1x288x64xf32, #tpu.memory_space<vmem>>, vector<1x288x64xf32>
    %131 = vector.shape_cast %130 : vector<1x288x64xf32> to vector<288x64xf32>
    %132 = vector.shape_cast %129 : vector<288x64xf32> to vector<1x288x64xf32>
    tpu.vector_store %arg10[%c0_151, %c0_152, %c0_153], %132 {strides = array<i32>} : memref<1x288x64xf32, #tpu.memory_space<vmem>>, vector<1x288x64xf32>,
    return
  }
  func.func @transform_0(%arg0: i32) -> (i32, i32, i32) {
    %c0_i32 = arith.constant 0 : i32
    %c0_i32_0 = arith.constant 0 : i32
    %c0_i32_1 = arith.constant 0 : i32
    return %arg0, %c0_i32, %c0_i32_0 : i32, i32, i32
  }
  func.func @transform_1(%arg0: i32) -> (i32, i32) {
    %c0_i32 = arith.constant 0 : i32
    %c0_i32_0 = arith.constant 0 : i32
    %c0_i32_1 = arith.constant 0 : i32
    return %c0_i32, %c0_i32_0 : i32, i32
  }
  func.func @transform_2(%arg0: i32) -> (i32, i32) {
    %c0_i32 = arith.constant 0 : i32
    %c0_i32_0 = arith.constant 0 : i32
    %c0_i32_1 = arith.constant 0 : i32
    return %c0_i32, %c0_i32_0 : i32, i32
  }
  func.func @transform_3(%arg0: i32) -> (i32, i32) {
    %c0_i32 = arith.constant 0 : i32
    %c0_i32_0 = arith.constant 0 : i32
    %c0_i32_1 = arith.constant 0 : i32
    return %c0_i32, %c0_i32_0 : i32, i32
  }
  func.func @transform_4(%arg0: i32) -> (i32, i32, i32, i32) {
    %c0_i32 = arith.constant 0 : i32
    %c0_i32_0 = arith.constant 0 : i32
    %c0_i32_1 = arith.constant 0 : i32
    %c0_i32_2 = arith.constant 0 : i32
    %c0_i32_3 = arith.constant 0 : i32
    return %c0_i32, %c0_i32_0, %c0_i32_1, %c0_i32_2 : i32, i32, i32, i32
  }
  func.func @transform_5(%arg0: i32) -> (i32, i32) {
    %c0_i32 = arith.constant 0 : i32
    %c0_i32_0 = arith.constant 0 : i32
    %c0_i32_1 = arith.constant 0 : i32
    return %c0_i32, %c0_i32_0 : i32, i32
  }
  func.func @transform_6(%arg0: i32) -> (i32, i32, i32, i32) {
    %c0_i32 = arith.constant 0 : i32
    %c0_i32_0 = arith.constant 0 : i32
    %c0_i32_1 = arith.constant 0 : i32
    %c0_i32_2 = arith.constant 0 : i32
    %c0_i32_3 = arith.constant 0 : i32
    return %c0_i32, %c0_i32_0, %c0_i32_1, %c0_i32_2 : i32, i32, i32, i32
  }
  func.func @transform_7(%arg0: i32) -> (i32, i32) {
    %c0_i32 = arith.constant 0 : i32
    %c0_i32_0 = arith.constant 0 : i32
    %c0_i32_1 = arith.constant 0 : i32
    return %c0_i32, %c0_i32_0 : i32, i32
  }
  func.func @transform_8(%arg0: i32) -> (i32, i32, i32) {
    %c0_i32 = arith.constant 0 : i32
    %c0_i32_0 = arith.constant 0 : i32
    %c0_i32_1 = arith.constant 0 : i32
    return %arg0, %c0_i32, %c0_i32_0 : i32, i32, i32
  }
  func.func @transform_9(%arg0: i32) -> (i32, i32, i32) {
    %c0_i32 = arith.constant 0 : i32
    %c0_i32_0 = arith.constant 0 : i32
    %c0_i32_1 = arith.constant 0 : i32
    return %arg0, %c0_i32, %c0_i32_0 : i32, i32, i32
  }
}

</mosaic_0001>

<bundles_post_ra>
// kernel: tpu_custom_call.1
= control target key start
LH: loop header
LB: loop body
LE: loop exit
PB: predicated region body
PF: predicated region fallthrough
CT: control target
= control target key end

     0   :  { %s11420_s30 = smov 0   ;;  %s15939_s0 = inlined_call_operand.vmem [shape: f32[2,288,8], index: 0, kind: input, shape index: {}]   ;;  %s15940_s1 = inlined_call_operand.vmem [shape: f32[288,1], index: 1, kind: input, shape index: {}]   ;;  %s15941_s2 = inlined_call_operand.vmem [shape: f32[1,8], index: 2, kind: input, shape index: {}]   ;;  %s15942_s3 = inlined_call_operand.vmem [shape: f32[1,8], index: 3, kind: input, shape index: {}]   ;;  %s15943_s4 = inlined_call_operand.vmem [shape: bf16[3,3,8,64], index: 4, kind: input, shape index: {}]   ;;  %s15944_s5 = inlined_call_operand.vmem [shape: f32[1,64], index: 5, kind: input, shape index: {}]   ;;  %s15945_s6 = inlined_call_operand.vmem [shape: bf16[3,3,64,64], index: 6, kind: input, shape index: {}]   ;;  %s15946_s7 = inlined_call_operand.vmem [shape: f32[1,64], index: 7, kind: input, shape index: {}]   ;;  %s15947_s8 = inlined_call_operand.vmem [shape: f32[2,288,64], index: 8, kind: output, shape index: {0}]   ;;  %s15948_s9 = inlined_call_operand.vmem [shape: f32[2,288,64], index: 9, kind: output, shape index: {1}]  }
   0x1 LB: > { %s9346_s10 = sadd.s32 4294967295, %s11367_s30   ;;  %p9350_p0 = scmp.ge.s32.totalorder %s11367_s30, 1  ;;  %s11367_s30 = sphi %s11420_s30, %s20_s30  }
   0x2   : > { %p290_p1 = scmp.lt.s32.totalorder %s11367_s30, 3 }
   0x4   : > { %p291_p2 = pnand %p9350_p0, %p290_p1 }
   0x6   : > { %294 = sbr.rel (%p291_p2) target bundleno = 1334 (0x536), region = 52 }
   0xb   : > { %vm403_vm0 = vcmask 519168   ;;  %v349_v0 = vld [vmem:[%s15940_s1 + $0x10] sm:$0xff]  ;;  %v347_v1 = vld [vmem:[%s15940_s1] sm:$0xff]  ;;  %v11369_v2 = vmov 0   ;;  %vm383_vm1 = vcmask 60416   ;;  %v350_v3 = vld [vmem:[%s15940_s1 + $0x18] sm:$0xff] }
   0xc   : > { %11187 = vset.pattern.permute.xlu1 %v11369_v2  ;;  %404 = vst.msk [vmem:[#allocation3] sm:$0xf] %vm403_vm0, %v11369_v2  ;;  %405 = vst.msk [vmem:[#allocation3 + $0x4] sm:$0xf] %vm403_vm0, %v11369_v2  ;;  %11186 = vset.pattern.permute.xlu0 %v11369_v2  ;;  %v348_v4 = vld [vmem:[%s15940_s1 + $0x8] sm:$0xff]  ;;  %v351_v6 = vld [vmem:[%s15940_s1 + $0x20] sm:$0xff] }
   0xd   : > { %416 = vst.msk [vmem:[#allocation3 + $0x9c] sm:$0xf] %vm403_vm0, %v11369_v2  ;;  %417 = vst.msk [vmem:[#allocation3 + $0xa0] sm:$0xf] %vm403_vm0, %v11369_v2  ;;  %555 = vperm.xlu1 %11187, %v349_v0   ;;  %545 = vperm.xlu0 %11186, %v347_v1   ;;  %v352_v5 = vld [vmem:[%s15940_s1 + $0x28] sm:$0xff]  ;;  %vm386_vm2 = vcmask 58368  }
   0xe   : > { %384 = vst.msk [vmem:[#allocation2] sm:$0xf] %vm383_vm1, %v11369_v2  ;;  %385 = vst.msk [vmem:[#allocation2 + $0x4] sm:$0xf] %vm383_vm1, %v11369_v2  ;;  %vm387_vm3 = vsmask.f32 1280 }
   0xf   : > { %398 = vst.msk [vmem:[#allocation2 + $0x9c] sm:$0xf] %vm383_vm1, %v11369_v2  ;;  %399 = vst.msk [vmem:[#allocation2 + $0xa0] sm:$0xf] %vm383_vm1, %v11369_v2  ;;  %v354_v7 = vld [vmem:[%s15940_s1 + $0x38] sm:$0xff]  ;;  %v353_v8 = vld [vmem:[%s15940_s1 + $0x30] sm:$0xff] }
  0x10   : > { %vm392_vm4 = vcmask 60417   ;;  %vm393_vm5 = vsmask.f32 7942  ;;  %vm11461_vm6 = vmand %vm386_vm2, %vm387_vm3  ;;  %v389_v10 = vld [vmem:[#allocation2 + $0x8] sm:$0x3]  ;;  %vm411_vm7 = vcmask 519169  }
  0x11   : > { %560 = vperm.xlu1 %11187, %v350_v3   ;;  %550 = vperm.xlu0 %11186, %v348_v4   ;;  %v390_v11 = vsel %vm11461_vm6, 0, %v389_v10  ;;  %vm11468_vm8 = vmand %vm392_vm4, %vm393_vm5  ;;  %v395_v13 = vld [vmem:[#allocation2 + $0x98] sm:$0xe]  ;;  %v413_v14 = vld [vmem:[#allocation3 + $0x98] sm:$0xe]  ;;  %v15999_v18 = vmov 0 }
  0x12   : > { %v356_v15 = vld [vmem:[%s15940_s1 + $0x48] sm:$0xff]  ;;  %v355_v16 = vld [vmem:[%s15940_s1 + $0x40] sm:$0xff]  ;;  %391 = vst [vmem:[#allocation2 + $0x8] sm:$0x3] %v390_v11  ;;  %v396_v17 = vsel %vm11468_vm8, 0, %v395_v13  ;;  %vm11481_vm9 = vmand %vm411_vm7, %vm393_vm5  ;;  %vm1643_vm10 = vcmask 1043456  }
  0x13   : > { %397 = vst [vmem:[#allocation2 + $0x98] sm:$0xe] %v396_v17  ;;  %v16000_v18 = vsel %vm11481_vm9, 4294967295, %v15999_v18  ;;  %v414_v19 = vsel %vm11481_vm9, 0, %v413_v14  ;;  %v358_v20 = vld [vmem:[%s15940_s1 + $0x58] sm:$0xff]  ;;  %v357_v21 = vld [vmem:[%s15940_s1 + $0x50] sm:$0xff] }
  0x14   : > { %16001 = vst [vmem:[#allocation4_spill] sm:$0xff] %v16000_v18  ;;  %415 = vst [vmem:[#allocation3 + $0x98] sm:$0xe] %v414_v19  ;;  %v1342_v22 = vld [vmem:[%s15943_s4] sm:$0xf]  ;;  %v360_v23 = vld [vmem:[%s15940_s1 + $0x68] sm:$0xff] }
  0x15   : > { %570 = vperm.xlu1 %11187, %v352_v5   ;;  %565 = vperm.xlu0 %11186, %v351_v6   ;;  %v1861_v24 = vsel %vm1643_vm10, %v1342_v22, 0  ;;  %v1306_v25 = vld [vmem:[#allocation2] sm:$0xf]  ;;  %v1307_v27 = vld [vmem:[#allocation2 + $0x4] sm:$0xf]  ;;  %vm1588_vm11 = vcmask 64512  }
  0x16   : > { %v359_v26 = vld [vmem:[%s15940_s1 + $0x60] sm:$0xff]  ;;  %11168 = vmatprep.subr.msk.bf16.mxu1 %vm1643_vm10, %v1342_v22  ;;  %v11504_v28 = vcombine.low %v1306_v25, %v1307_v27  ;;  %v362_v29 = vld [vmem:[%s15940_s1 + $0x78] sm:$0xff]  ;;  %v361_v30 = vld [vmem:[%s15940_s1 + $0x70] sm:$0xff]  ;;  %p331_p3 = scmp.lt.s32.totalorder %s9346_s10, 1  ;;  %vm867_vm12 = vsmask.f32 5392 }
  0x17   : > { %10468 = vmatpush3.bf16.msra.mxu1 %v1861_v24  ;;  %v9392_v31 = vld [vmem:[%s15943_s4 + $0x4] sm:$0xf]  ;;  %v364_v32 = vld [vmem:[%s15940_s1 + $0x88] sm:$0xff]  ;;  %v366_v35 = vld [vmem:[%s15940_s1 + $0x98] sm:$0xff]  ;;  %vm1439_vm14 = vsmask.f32 7424 }
  0x18   : > { %10469 = vmatprep.mubr.msk.bf16.mxu1 %vm1588_vm11, %v11504_v28  ;;  %11167 = vmatprep.subr.msk.bf16.mxu0 %vm1643_vm10, %v9392_v31  ;;  %v363_v33 = vld [vmem:[%s15940_s1 + $0x80] sm:$0xff]  ;;  %v1645_v34 = vsel %vm1643_vm10, %v9392_v31, 0  ;;  %v365_v36 = vld [vmem:[%s15940_s1 + $0x90] sm:$0xff]  ;;  %v368_v37 = vld [vmem:[%s15940_s1 + $0xa8] sm:$0xff]  ;;  %s16281_s10 = smov (!%p331_p3, %s9346_s10), 1  ;;  %vm2046_vm15 = vcmask 1046528  }
  0x19   : > { %580 = vperm.xlu1 %11187, %v354_v7   ;;  %575 = vperm.xlu0 %11186, %v353_v8   ;;  %v367_v38 = vld [vmem:[%s15940_s1 + $0xa0] sm:$0xff]  ;;  %v370_v39 = vld [vmem:[%s15940_s1 + $0xb8] sm:$0xff]  ;;  %v369_v40 = vld [vmem:[%s15940_s1 + $0xb0] sm:$0xff]  ;;  %s11590_s13 = smul.u32 288, %s16281_s10  ;;  %vm2799_vm2 = vsmask.f32 6400 }
  0x1a   : > { %10430 = vmatpush3.bf16.msra.mxu0 %v1645_v34  ;;  %v11546_v41 = vld [vmem:[%s15943_s4 + $0x8] sm:$0xf]  ;;  %v371_v43 = vld [vmem:[%s15940_s1 + $0xc0] sm:$0xff]  ;;  %v374_v44 = vld [vmem:[%s15940_s1 + $0xd8] sm:$0xff]  ;;  %vm4446_vm4 = vcmask 1044480  }
  0x1b   : > { %v372_v42 = vld [vmem:[%s15940_s1 + $0xc8] sm:$0xff]  ;;  %11169 = vmatprep.subr.msk.bf16.mxu0 %vm1643_vm10, %v11546_v41  ;;  %v373_v45 = vld [vmem:[%s15940_s1 + $0xd0] sm:$0xff]  ;;  %v375_v47 = vld [vmem:[%s15940_s1 + $0xe0] sm:$0xff]  ;;  %s11596_s16 = scalar_lea.vmem %s15939_s0, %s11590_s13  ;;  %vm3999_vm5 = vsmask.f32 5376  ;;  %s13754_s10 = scalar_lea.vmem %s15947_s8, %s11590_s13 }
  0x1c   : > { %v376_v46 = vld [vmem:[%s15940_s1 + $0xe8] sm:$0xff]  ;;  %v378_v48 = vld [vmem:[%s15940_s1 + $0xf8] sm:$0xff]  ;;  %v377_v49 = vld [vmem:[%s15940_s1 + $0xf0] sm:$0xff]  ;;  %s15756_s26 = scalar_lea.vmem %s15948_s9, %s11590_s13 }
  0x1d   : > { %590 = vperm.xlu1 %11187, %v356_v15   ;;  %585 = vperm.xlu0 %11186, %v355_v16   ;;  %v380_v50 = vld [vmem:[%s15940_s1 + $0x108] sm:$0xff]  ;;  %v379_v51 = vld [vmem:[%s15940_s1 + $0x100] sm:$0xff]  ;;  %v382_v52 = vld [vmem:[%s15940_s1 + $0x118] sm:$0xff] }
  0x1e   : > { %v381_v53 = vld [vmem:[%s15940_s1 + $0x110] sm:$0xff]  ;;  %v11601_v54 = vld [vmem:[%s15941_s2] ss:$0 sm:$0xff]  ;;  %v424_v57 = vld [vmem:[%s11596_s16 + $0x18] sm:$0xff] }
  0x1f   : > { %v423_v55 = vld [vmem:[%s11596_s16 + $0x10] sm:$0xff]  ;;  %v421_v56 = vld [vmem:[%s11596_s16] sm:$0xff]  ;;  %v422_v58 = vld [vmem:[%s11596_s16 + $0x8] sm:$0xff]  ;;  %v467_v63 = vsub.f32 %v424_v57, %v11601_v54 }
  0x20   : > { %v426_v59 = vld [vmem:[%s11596_s16 + $0x28] sm:$0xff]  ;;  %v425_v60 = vld [vmem:[%s11596_s16 + $0x20] sm:$0xff]  ;;  %v466_v61 = vsub.f32 %v423_v55, %v11601_v54  ;;  %v464_v62 = vsub.f32 %v421_v56, %v11601_v54  ;;  %v428_v0 = vld [vmem:[%s11596_s16 + $0x38] sm:$0xff]  ;;  %v465_v3 = vsub.f32 %v422_v58, %v11601_v54 }
  0x21   : > { %600 = vperm.xlu1 %11187, %v358_v20   ;;  %595 = vperm.xlu0 %11186, %v357_v21   ;;  %v427_v1 = vld [vmem:[%s11596_s16 + $0x30] sm:$0xff]  ;;  %v11617_v2 = vld [vmem:[%s15942_s3] ss:$0 sm:$0xff]  ;;  %v469_v4 = vsub.f32 %v426_v59, %v11601_v54  ;;  %v468_v5 = vsub.f32 %v425_v60, %v11601_v54  ;;  %v430_v6 = vld [vmem:[%s11596_s16 + $0x48] sm:$0xff]  ;;  %v471_v8 = vsub.f32 %v428_v0, %v11601_v54  ;;  %v1443_v21 = vshll.u32 %v11504_v28, 16 }
  0x22   : > { %v429_v7 = vld [vmem:[%s11596_s16 + $0x40] sm:$0xff]  ;;  %v470_v10 = vsub.f32 %v427_v1, %v11601_v54  ;;  %v432_v11 = vld [vmem:[%s11596_s16 + $0x58] sm:$0xff]  ;;  %v431_v13 = vld [vmem:[%s11596_s16 + $0x50] sm:$0xff]  ;;  %v11630_v15 = vmul.f32 %v11617_v2, %v466_v61  ;;  %v11633_v16 = vmul.f32 %v11617_v2, %v464_v62  ;;  %v11636_v17 = vmul.f32 %v11617_v2, %v467_v63 }
  0x23   : > { %v434_v14 = vld [vmem:[%s11596_s16 + $0x68] sm:$0xff]  ;;  %v433_v19 = vld [vmem:[%s11596_s16 + $0x60] sm:$0xff]  ;;  %v436_v20 = vld [vmem:[%s11596_s16 + $0x78] sm:$0xff]  ;;  %v11642_v22 = vmul.f32 %v11617_v2, %v465_v3  ;;  %v473_v24 = vsub.f32 %v430_v6, %v11601_v54  ;;  %v472_v25 = vsub.f32 %v429_v7, %v11601_v54  ;;  %v474_v31 = vsub.f32 %v431_v13, %v11601_v54 }
  0x24   : > { %v438_v27 = vld [vmem:[%s11596_s16 + $0x88] sm:$0xff]  ;;  %v440_v34 = vld [vmem:[%s11596_s16 + $0x98] sm:$0xff]  ;;  %v443_v57 = vld [vmem:[%s11596_s16 + $0xb0] sm:$0xff] }
  0x25   : > { %610 = vperm.xlu1 %11187, %v360_v23   ;;  %605 = vperm.xlu0 %11186, %v359_v26   ;;  %v11645_v23 = vmul.f32 %v11617_v2, %v469_v4  ;;  %v435_v26 = vld [vmem:[%s11596_s16 + $0x70] sm:$0xff]  ;;  %v446_v58 = vld [vmem:[%s11596_s16 + $0xc8] sm:$0xff]  ;;  %v445_v63 = vld [vmem:[%s11596_s16 + $0xc0] sm:$0xff] }
  0x26   : > { %v448_v0 = vld [vmem:[%s11596_s16 + $0xd8] sm:$0xff]  ;;  %v447_v6 = vld [vmem:[%s11596_s16 + $0xd0] sm:$0xff]  ;;  %v450_v7 = vld [vmem:[%s11596_s16 + $0xe8] sm:$0xff]  ;;  %v489_v13 = vsub.f32 %v446_v58, %v11601_v54 }
  0x27   : > { %vm11839_vm13 = vmor %vm387_vm3, %vm867_vm12 }
  0x29   : > { %620 = vperm.xlu1 %11187, %v362_v29   ;;  %615 = vperm.xlu0 %11186, %v361_v30   ;;  %v11652_v29 = vmul.f32 %v11617_v2, %v468_v5  ;;  %v475_v30 = vsub.f32 %v432_v11, %v11601_v54  ;;  %v486_v11 = vsub.f32 %v443_v57, %v11601_v54 }
  0x2d   : > { %630 = vperm.xlu1 %11187, %v364_v32   ;;  %625 = vperm.xlu0 %11186, %v363_v33   ;;  %v477_v32 = vsub.f32 %v434_v14, %v11601_v54  ;;  %v437_v33 = vld [vmem:[%s11596_s16 + $0x80] sm:$0xff] }
  0x2e   : > { %v449_v14 = vld [vmem:[%s11596_s16 + $0xe0] sm:$0xff] }
  0x2f   : > { %v11696_v55 = vmul.f32 %v11617_v2, %v477_v32  ;;  %v493_v32 = vsub.f32 %v450_v7, %v11601_v54 }
  0x31   : > { %640 = vperm.xlu1 %11187, %v366_v35   ;;  %635 = vperm.xlu0 %11186, %v365_v36   ;;  %v11660_v35 = vmul.f32 %v11617_v2, %v471_v8  ;;  %v11663_v36 = vmul.f32 %v11617_v2, %v470_v10 }
  0x35   : > { %650 = vperm.xlu1 %11187, %v368_v37   ;;  %645 = vperm.xlu0 %11186, %v367_v38   ;;  %v476_v37 = vsub.f32 %v433_v19, %v11601_v54  ;;  %v479_v38 = vsub.f32 %v436_v20, %v11601_v54  ;;  %v452_v19 = vld [vmem:[%s11596_s16 + $0xf8] sm:$0xff]  ;;  %v451_v20 = vld [vmem:[%s11596_s16 + $0xf0] sm:$0xff] }
  0x37   : > { %v11702_v59 = vmul.f32 %v11617_v2, %v476_v37  ;;  %v11705_v60 = vmul.f32 %v11617_v2, %v479_v38 }
  0x39   : > { %660 = vperm.xlu1 %11187, %v370_v39   ;;  %655 = vperm.xlu0 %11186, %v369_v40   ;;  %v439_v39 = vld [vmem:[%s11596_s16 + $0x90] sm:$0xff]  ;;  %v11671_v40 = vld [vmem:[%s15943_s4 + $0xc] sm:$0xf] }
  0x3a   : > { %11170 = vmatprep.subr.msk.bf16.mxu1 %vm1643_vm10, %v11671_v40  ;;  %v482_v56 = vsub.f32 %v439_v39, %v11601_v54  ;;  %v492_v39 = vsub.f32 %v449_v14, %v11601_v54 }
  0x3d   : > { %670 = vperm.xlu1 %11187, %v372_v42   ;;  %665 = vperm.xlu0 %11186, %v371_v43   ;;  %v478_v42 = vsub.f32 %v435_v26, %v11601_v54  ;;  %v1441_v43 = vshrl.u32 %v11504_v28, 16  ;;  %v483_v28 = vsub.f32 %v440_v34, %v11601_v54  ;;  %v491_v26 = vsub.f32 %v448_v0, %v11601_v54 }
  0x3e   : > { %v11792_v0 = vmul.f32 %v11617_v2, %v492_v39 }
  0x3f   : > { %v11712_v1 = vmul.f32 %v11617_v2, %v478_v42  ;;  %v11726_v10 = vmul.f32 %v11617_v2, %v483_v28  ;;  %v495_v42 = vsub.f32 %v452_v19, %v11601_v54 }
  0x41   : > { %680 = vperm.xlu1 %11187, %v374_v44   ;;  %675 = vperm.xlu0 %11186, %v373_v45   ;;  %v1445_v44 = vrot.slane %v1443_v21, 1  ;;  %v481_v45 = vsub.f32 %v438_v27, %v11601_v54  ;;  %v11735_v21 = vsel %vm1643_vm10, %v11546_v41, 0  ;;  %v454_v41 = vld [vmem:[%s11596_s16 + $0x108] sm:$0xff] }
  0x43   : > { %v11714_v3 = vor.u32 %v1445_v44, %v1441_v43  ;;  %v11717_v4 = vmul.f32 %v11617_v2, %v481_v45  ;;  %v494_v43 = vsub.f32 %v451_v20, %v11601_v54  ;;  %v11802_v20 = vld [vmem:[%s11596_s16 + $0x110] sm:$0xff] }
  0x45   : > { %690 = vperm.xlu1 %11187, %v376_v46   ;;  %685 = vperm.xlu0 %11186, %v375_v47   ;;  %v442_v46 = vld [vmem:[%s11596_s16 + $0xa8] sm:$0xff]  ;;  %v441_v47 = vld [vmem:[%s11596_s16 + $0xa0] sm:$0xff] }
  0x46   : > { %v485_v61 = vsub.f32 %v442_v46, %v11601_v54  ;;  %v484_v62 = vsub.f32 %v441_v47, %v11601_v54  ;;  %v11767_v46 = vmul.f32 %v11617_v2, %v486_v11  ;;  %v11770_v47 = vmul.f32 %v11617_v2, %v489_v13 }
  0x48   : > { %v11743_v27 = vmul.f32 %v11617_v2, %v485_v61  ;;  %v11785_v61 = vmul.f32 %v11617_v2, %v493_v32 }
  0x49   : > { %700 = vperm.xlu1 %11187, %v378_v48   ;;  %695 = vperm.xlu0 %11186, %v377_v49   ;;  %v11681_v48 = vmul.f32 %v11617_v2, %v473_v24  ;;  %v11684_v49 = vmul.f32 %v11617_v2, %v472_v25  ;;  %v11738_v24 = vmul.f32 %v11617_v2, %v482_v56 }
  0x4a   : > { %v488_v25 = vsub.f32 %v445_v63, %v11601_v54  ;;  %v497_v56 = vsub.f32 %v454_v41, %v11601_v54 }
  0x4c   : > { %v11774_v28 = vmul.f32 %v11617_v2, %v488_v25 }
  0x4d   : > { %710 = vperm.xlu1 %11187, %v380_v50   ;;  %705 = vperm.xlu0 %11186, %v379_v51   ;;  %v480_v50 = vsub.f32 %v437_v33, %v11601_v54  ;;  %v444_v51 = vld [vmem:[%s11596_s16 + $0xb8] sm:$0xff]  ;;  %v453_v33 = vld [vmem:[%s11596_s16 + $0x100] sm:$0xff] }
  0x4e   : > { %v487_v5 = vsub.f32 %v444_v51, %v11601_v54  ;;  %v11777_v51 = vmul.f32 %v11617_v2, %v491_v26 }
  0x4f   : > { %v11723_v8 = vmul.f32 %v11617_v2, %v480_v50  ;;  %v456_v50 = vld [vmem:[%s11596_s16 + $0x118] sm:$0xff] }
  0x50   : > { %v11757_v38 = vmul.f32 %v11617_v2, %v487_v5  ;;  %v11795_v5 = vmul.f32 %v11617_v2, %v495_v42  ;;  %v499_v7 = vsub.f32 %v456_v50, %v11601_v54 }
  0x51   : > { %720 = vperm.xlu1 %11187, %v382_v52   ;;  %715 = vperm.xlu0 %11186, %v381_v53   ;;  %v11690_v52 = vmul.f32 %v11617_v2, %v475_v30  ;;  %v11693_v53 = vmul.f32 %v11617_v2, %v474_v31  ;;  %v11746_v30 = vmul.f32 %v11617_v2, %v484_v62 }
  0x52   : > { %v490_v31 = vsub.f32 %v447_v6, %v11601_v54  ;;  %v11798_v6 = vmul.f32 %v11617_v2, %v494_v43  ;;  %v1265_v43 = vld [vmem:[#allocation2 + $0x8] sm:$0xe] }
  0x54   : > { %v11782_v58 = vmul.f32 %v11617_v2, %v490_v31  ;;  %v11809_v31 = vmul.f32 %v11617_v2, %v497_v56 }
  0x88   : > { %v11752_v34 = vpop.permute.xlu1 %555  ;;  %v11754_v37 = vpop.permute.xlu0 %545 }
  0x89   : > { %16002 = vst [vmem:[#allocation5_spill] sm:$0xff] %v11752_v34  ;;  %16003 = vst [vmem:[#allocation6_spill] sm:$0xff] %v11754_v37  ;;  %v725_v44 = vmul.f32 %v11752_v34, %v11630_v15  ;;  %v723_v45 = vmul.f32 %v11754_v37, %v11633_v16  ;;  %v496_v15 = vsub.f32 %v453_v33, %v11601_v54 }
  0x8b   : > { %v9990_v16 = vpack.c.bf16 %v725_v44, %v725_v44  ;;  %v9988_v57 = vpack.c.bf16 %v723_v45, %v723_v45  ;;  %v11812_v32 = vmul.f32 %v11617_v2, %v496_v15 }
  0x8c   : > { %v11787_v62 = vpop.permute.xlu1 %560  ;;  %v11789_v63 = vpop.permute.xlu0 %550 }
  0x8d   : > { %16004 = vst [vmem:[#allocation7_spill] sm:$0xff] %v11787_v62  ;;  %16005 = vst [vmem:[#allocation8_spill] sm:$0xff] %v11789_v63  ;;  %v889_v11 = vshrl.u32 %v9990_v16, 16  ;;  %v892_v13 = vshll.u32 %v9990_v16, 16  ;;  %v870_v14 = vshrl.u32 %v9988_v57, 16  ;;  %v873_v19 = vshll.u32 %v9988_v57, 16 }
  0x8e   : > { %v726_v25 = vmul.f32 %v11787_v62, %v11636_v17  ;;  %v724_v26 = vmul.f32 %v11789_v63, %v11642_v22  ;;  %v11819_v17 = vmul.f32 %v11617_v2, %v499_v7  ;;  %v11831_v22 = vsel %vm1643_vm10, %v11671_v40, 0 }
  0x8f   : > { %v891_v41 = vrot.slane %v889_v11, 6  ;;  %v894_v33 = vrot.slane %v892_v13, 7  ;;  %v872_v39 = vrot.slane %v870_v14, 6  ;;  %v875_v42 = vrot.slane %v873_v19, 7 }
  0x90   : > { %v9991_v44 = vpack.c.bf16 %v726_v25, %v726_v25  ;;  %v9989_v45 = vpack.c.bf16 %v724_v26, %v724_v26  ;;  %v11814_v50 = vpop.permute.xlu1 %570  ;;  %v11816_v16 = vpop.permute.xlu0 %565 }
  0x91   : > { %16006 = vst [vmem:[#allocation9_spill] sm:$0xff] %v11814_v50  ;;  %16007 = vst [vmem:[#allocation10_spill] sm:$0xff] %v11816_v16  ;;  %v895_v56 = vor.u32 %v894_v33, %v891_v41  ;;  %v876_v15 = vor.u32 %v875_v42, %v872_v39  ;;  %v728_v57 = vmul.f32 %v11814_v50, %v11645_v23 }
  0x92   : > { %v727_v11 = vmul.f32 %v11816_v16, %v11652_v29  ;;  %v899_v13 = vshrl.u32 %v9991_v44, 16  ;;  %v902_v14 = vshll.u32 %v9991_v44, 16  ;;  %v879_v19 = vshrl.u32 %v9989_v45, 16 }
  0x93   : > { %v882_v25 = vshll.u32 %v9989_v45, 16  ;;  %v897_v26 = vrot.slane %v895_v56, 4  ;;  %v1266_v2 = vsel %vm11468_vm8, %v876_v15, %v1265_v43  ;;  %v9993_v7 = vpack.c.bf16 %v728_v57, %v728_v57 }
  0x94   : > { %1267 = vst [vmem:[#allocation2 + $0x8] sm:$0xe] %v1266_v2  ;;  %v901_v41 = vrot.slane %v899_v13, 6  ;;  %v904_v33 = vrot.slane %v902_v14, 7  ;;  %v881_v23 = vrot.slane %v879_v19, 6  ;;  %v11833_v42 = vpop.permute.xlu1 %580  ;;  %v11835_v29 = vpop.permute.xlu0 %575  ;;  %v16010_v44 = vmov 0 }
  0x95   : > { %v884_v39 = vrot.slane %v882_v25, 7  ;;  %16008 = vst [vmem:[#allocation11_spill] sm:$0xff] %v11833_v42  ;;  %16009 = vst [vmem:[#allocation12_spill] sm:$0xff] %v11835_v29  ;;  %v16011_v44 = vsel %vm11839_vm13, 4294967295, %v16010_v44  ;;  %v919_v12 = vshrl.u32 %v9993_v7, 16  ;;  %v922_v43 = vshll.u32 %v9993_v7, 16 }
  0x96   : > { %16012 = vst [vmem:[#allocation13_spill] sm:$0xff] %v16011_v44  ;;  %v9992_v45 = vpack.c.bf16 %v727_v11, %v727_v11  ;;  %v730_v40 = vmul.f32 %v11833_v42, %v11660_v35  ;;  %v877_v57 = vrot.slane %v876_v15, 4  ;;  %v905_v13 = vor.u32 %v904_v33, %v901_v41 }
  0x97   : > { %v885_v14 = vor.u32 %v884_v39, %v881_v23  ;;  %v729_v19 = vmul.f32 %v11835_v29, %v11663_v36  ;;  %v921_v25 = vrot.slane %v919_v12, 6  ;;  %v924_v2 = vrot.slane %v922_v43, 7 }
  0x98   : > { %v909_v50 = vshrl.u32 %v9992_v45, 16  ;;  %v912_v16 = vshll.u32 %v9992_v45, 16  ;;  %v906_v18 = vsel %vm11839_vm13, %v897_v26, %v905_v13  ;;  %v907_v63 = vrot.slane %v905_v13, 4  ;;  %v11851_v62 = vpop.permute.xlu1 %590  ;;  %v11853_v35 = vpop.permute.xlu0 %585 }
  0x99   : > { %v886_v11 = vsel %vm11839_vm13, %v877_v57, %v885_v14  ;;  %v887_v7 = vrot.slane %v885_v14, 4  ;;  %16013 = vst [vmem:[#allocation14_spill] sm:$0xff] %v11851_v62  ;;  %16014 = vst [vmem:[#allocation15_spill] sm:$0xff] %v11853_v35  ;;  %v925_v36 = vor.u32 %v924_v2, %v921_v25  ;;  %v9995_v33 = vpack.c.bf16 %v730_v40, %v730_v40 }
  0x9a   : > { %1270 = vst.msk [vmem:[#allocation2 + $0x14] sm:$0xf] %vm383_vm1, %v906_v18  ;;  %1268 = vst.msk [vmem:[#allocation2 + $0xc] sm:$0xf] %vm383_vm1, %v886_v11  ;;  %v911_v15 = vrot.slane %v909_v50, 6  ;;  %v914_v41 = vrot.slane %v912_v16, 7  ;;  %v9994_v23 = vpack.c.bf16 %v729_v19, %v729_v19  ;;  %v732_v39 = vmul.f32 %v11851_v62, %v11681_v48 }
  0x9b   : > { %v896_v26 = vsel %vm11839_vm13, %v887_v7, %v895_v56  ;;  %v731_v12 = vmul.f32 %v11853_v35, %v11684_v49  ;;  %v927_v43 = vrot.slane %v925_v36, 4  ;;  %v939_v45 = vshrl.u32 %v9995_v33, 16 }
  0x9c   : > { %1269 = vst.msk [vmem:[#allocation2 + $0x10] sm:$0xf] %vm383_vm1, %v896_v26  ;;  %v915_v18 = vor.u32 %v914_v41, %v911_v15  ;;  %v942_v57 = vshll.u32 %v9995_v33, 16  ;;  %v929_v13 = vshrl.u32 %v9994_v23, 16  ;;  %v932_v50 = vshll.u32 %v9994_v23, 16  ;;  %v11864_v14 = vpop.permute.xlu1 %600  ;;  %v11866_v56 = vpop.permute.xlu0 %595 }
  0x9d   : > { %v9997_v16 = vpack.c.bf16 %v732_v39, %v732_v39  ;;  %v9996_v40 = vpack.c.bf16 %v731_v12, %v731_v12  ;;  %16015 = vst [vmem:[#allocation16_spill] sm:$0xff] %v11864_v14  ;;  %16016 = vst [vmem:[#allocation17_spill] sm:$0xff] %v11866_v56  ;;  %v941_v25 = vrot.slane %v939_v45, 6 }
  0x9e   : > { %v916_v48 = vsel %vm11839_vm13, %v907_v63, %v915_v18  ;;  %v917_v19 = vrot.slane %v915_v18, 4  ;;  %v944_v49 = vrot.slane %v942_v57, 7  ;;  %v931_v2 = vrot.slane %v929_v13, 6 }
  0x9f   : > { %1271 = vst.msk [vmem:[#allocation2 + $0x18] sm:$0xf] %vm383_vm1, %v916_v48  ;;  %v934_v11 = vrot.slane %v932_v50, 7  ;;  %v959_v7 = vshrl.u32 %v9997_v16, 16  ;;  %v962_v15 = vshll.u32 %v9997_v16, 16  ;;  %v949_v26 = vshrl.u32 %v9996_v40, 16 }
  0xa0   : > { %v926_v41 = vsel %vm11839_vm13, %v917_v19, %v925_v36  ;;  %v945_v33 = vor.u32 %v944_v49, %v941_v25  ;;  %v952_v23 = vshll.u32 %v9996_v40, 16  ;;  %v734_v18 = vmul.f32 %v11864_v14, %v11690_v52  ;;  %v11876_v45 = vpop.permute.xlu1 %610  ;;  %v11878_v57 = vpop.permute.xlu0 %605 }
  0xa1   : > { %1272 = vst.msk [vmem:[#allocation2 + $0x1c] sm:$0xf] %vm383_vm1, %v926_v41  ;;  %v935_v39 = vor.u32 %v934_v11, %v931_v2  ;;  %v961_v12 = vrot.slane %v959_v7, 6  ;;  %v964_v63 = vrot.slane %v962_v15, 7  ;;  %16017 = vst [vmem:[#allocation18_spill] sm:$0xff] %v11876_v45  ;;  %v11880_v13 = vld [vmem:[#allocation2 + $0x8] sm:$0xff]   ;;  %v733_v40 = vmul.f32 %v11866_v56, %v11693_v53 }
  0xa2   : > { %16018 = vst [vmem:[#allocation19_spill] sm:$0xff] %v11878_v57  ;;  %v947_v50 = vrot.slane %v945_v33, 4  ;;  %v951_v16 = vrot.slane %v949_v26, 6  ;;  %v954_v36 = vrot.slane %v952_v23, 7  ;;  %v9999_v49 = vpack.c.bf16 %v734_v18, %v734_v18  ;;  %10470 = vmatmul.mubr.msk.bf16.vlgmr.msra.gmra.mxu1 %vm1588_vm11, %v11880_v13 }
  0xa3   : > { %v936_v48 = vsel %vm11839_vm13, %v927_v43, %v935_v39  ;;  %v937_v19 = vrot.slane %v935_v39, 4  ;;  %v965_v25 = vor.u32 %v964_v63, %v961_v12  ;;  %v11888_v52 = vld [vmem:[#allocation2 + $0x10] sm:$0xff]   ;;  %v9998_v11 = vpack.c.bf16 %v733_v40, %v733_v40  ;;  %10544 = vmatpush3.bf16.msra.mxu1 %v11831_v22 }
  0xa4   : > { %1273 = vst.msk [vmem:[#allocation2 + $0x20] sm:$0xf] %vm383_vm1, %v936_v48  ;;  %v955_v2 = vor.u32 %v954_v36, %v951_v16  ;;  %v736_v7 = vmul.f32 %v11876_v45, %v11696_v55  ;;  %v735_v53 = vmul.f32 %v11878_v57, %v11702_v59  ;;  %v979_v41 = vshrl.u32 %v9999_v49, 16  ;;  %v11898_v23 = vpop.permute.xlu1 %620  ;;  %v11900_v39 = vpop.permute.xlu0 %615  ;;  %10473 = vmatprep.mubr.msk.bf16.mxu1 %vm1588_vm11, %v11888_v52 }
  0xa5   : > { %v946_v43 = vsel %vm11839_vm13, %v937_v19, %v945_v33  ;;  %v967_v15 = vrot.slane %v965_v25, 4  ;;  %v982_v26 = vshll.u32 %v9999_v49, 16  ;;  %16019 = vst [vmem:[#allocation20_spill] sm:$0xff] %v11898_v23  ;;  %16020 = vst [vmem:[#allocation21_spill] sm:$0xff] %v11900_v39  ;;  %v969_v22 = vshrl.u32 %v9998_v11, 16 }
  0xa6   : > { %1274 = vst.msk [vmem:[#allocation2 + $0x24] sm:$0xf] %vm383_vm1, %v946_v43  ;;  %v956_v55 = vsel %vm11839_vm13, %v947_v50, %v955_v2  ;;  %v957_v59 = vrot.slane %v955_v2, 4  ;;  %v972_v12 = vshll.u32 %v9998_v11, 16  ;;  %v981_v33 = vrot.slane %v979_v41, 6 }
  0xa7   : > { %1275 = vst.msk [vmem:[#allocation2 + $0x28] sm:$0xf] %vm383_vm1, %v956_v55  ;;  %v984_v63 = vrot.slane %v982_v26, 7  ;;  %v10001_v18 = vpack.c.bf16 %v736_v7, %v736_v7  ;;  %v10000_v16 = vpack.c.bf16 %v735_v53, %v735_v53  ;;  %v971_v40 = vrot.slane %v969_v22, 6 }
  0xa8   : > { %v966_v36 = vsel %vm11839_vm13, %v957_v59, %v965_v25  ;;  %v974_v48 = vrot.slane %v972_v12, 7  ;;  %v738_v19 = vmul.f32 %v11898_v23, %v11705_v60  ;;  %v11913_v43 = vpop.permute.xlu1 %630  ;;  %v11915_v41 = vld [vmem:[#allocation2 + $0x18] sm:$0xff]   ;;  %v737_v25 = vmul.f32 %v11900_v39, %v11712_v1  ;;  %v11919_v12 = vpop.permute.xlu0 %625 }
  0xa9   : > { %1276 = vst.msk [vmem:[#allocation2 + $0x2c] sm:$0xf] %vm383_vm1, %v966_v36  ;;  %v985_v50 = vor.u32 %v984_v63, %v981_v33  ;;  %v999_v49 = vshrl.u32 %v10001_v18, 16  ;;  %v1002_v2 = vshll.u32 %v10001_v18, 16  ;;  %v989_v11 = vshrl.u32 %v10000_v16, 16  ;;  %16021 = vst [vmem:[#allocation22_spill] sm:$0xff] %v11913_v43 }
  0xaa   : > { %v975_v7 = vor.u32 %v974_v48, %v971_v40  ;;  %v992_v53 = vshll.u32 %v10000_v16, 16  ;;  %v10003_v26 = vpack.c.bf16 %v738_v19, %v738_v19  ;;  %16022 = vst [vmem:[#allocation23_spill] sm:$0xff] %v11919_v12  ;;  %10474 = vmatmul.mubr.msk.bf16.gmra.mxu1 %vm1588_vm11, %v11915_v41  ;;  %v10002_v1 = vpack.c.bf16 %v737_v25, %v737_v25 }
  0xab   : > { %v987_v55 = vrot.slane %v985_v50, 4  ;;  %v1001_v59 = vrot.slane %v999_v49, 6  ;;  %v1004_v22 = vrot.slane %v1002_v2, 7  ;;  %v991_v60 = vrot.slane %v989_v11, 6 }
  0xac   : > { %v976_v33 = vsel %vm11839_vm13, %v967_v15, %v975_v7  ;;  %v977_v63 = vrot.slane %v975_v7, 4  ;;  %v994_v18 = vrot.slane %v992_v53, 7  ;;  %v1019_v36 = vshrl.u32 %v10003_v26, 16 }
  0xad   : > { %1277 = vst.msk [vmem:[#allocation2 + $0x30] sm:$0xf] %vm383_vm1, %v976_v33  ;;  %v1005_v16 = vor.u32 %v1004_v22, %v1001_v59  ;;  %v1022_v40 = vshll.u32 %v10003_v26, 16  ;;  %v1448_v48 = vshll.u32 %v11880_v13, 16  ;;  %v11927_v19 = vld [vmem:[#allocation2 + $0x20] sm:$0xff]   ;;  %v1452_v45 = vshrl.u32 %v11880_v13, 16  ;;  %v11933_v59 = vpop.permute.xlu1 %640 }
  0xae   : > { %v986_v49 = vsel %vm11839_vm13, %v977_v63, %v985_v50  ;;  %v995_v2 = vor.u32 %v994_v18, %v991_v60  ;;  %v1021_v11 = vrot.slane %v1019_v36, 6  ;;  %v1009_v53 = vshrl.u32 %v10002_v1, 16  ;;  %16023 = vst [vmem:[#allocation24_spill] sm:$0xff] %v11933_v59  ;;  %10477 = vmatprep.mubr.msk.bf16.mxu1 %vm1588_vm11, %v11927_v19 }
  0xaf   : > { %1278 = vst.msk [vmem:[#allocation2 + $0x34] sm:$0xf] %vm383_vm1, %v986_v49  ;;  %v1007_v15 = vrot.slane %v1005_v16, 4  ;;  %v1024_v7 = vrot.slane %v1022_v40, 7  ;;  %v1012_v33 = vshll.u32 %v10002_v1, 16  ;;  %v1450_v50 = vrot.slane %v1448_v48, 1  ;;  %v11946_v40 = vpop.permute.xlu0 %635 }
  0xb0   : > { %v996_v26 = vsel %vm11839_vm13, %v987_v55, %v995_v2  ;;  %v997_v25 = vrot.slane %v995_v2, 4  ;;  %v740_v22 = vmul.f32 %v11913_v43, %v11717_v4  ;;  %v11941_v13 = vld [vmem:[#allocation2 + $0x28] sm:$0xff]   ;;  %v1011_v63 = vrot.slane %v1009_v53, 6  ;;  %16024 = vst [vmem:[#allocation25_spill] sm:$0xff] %v11946_v40 }
  0xb1   : > { %1279 = vst.msk [vmem:[#allocation2 + $0x38] sm:$0xf] %vm383_vm1, %v996_v26  ;;  %v1025_v60 = vor.u32 %v1024_v7, %v1021_v11  ;;  %v1014_v18 = vrot.slane %v1012_v33, 7  ;;  %v739_v36 = vmul.f32 %v11919_v12, %v11723_v8  ;;  %v1451_v1 = vsel %vm1439_vm14, %v11714_v3, %v1450_v50 }
  0xb2   : > { %v1006_v55 = vsel %vm11839_vm13, %v997_v25, %v1005_v16  ;;  %v1454_v48 = vor.u32 %v1452_v45, %v1450_v50  ;;  %v10005_v4 = vpack.c.bf16 %v740_v22, %v740_v22  ;;  %10431 = vmatprep.mubr.msk.bf16.mxu0 %vm1588_vm11, %v1451_v1  ;;  %v1456_v7 = vshll.u32 %v11888_v52, 16  ;;  %10478 = vmatmul.mubr.msk.bf16.gmra.mxu1 %vm1588_vm11, %v11941_v13  ;;  %v11963_v50 = vpop.permute.xlu1 %650 }
  0xb3   : > { %1280 = vst.msk [vmem:[#allocation2 + $0x3c] sm:$0xf] %vm383_vm1, %v1006_v55  ;;  %v1027_v49 = vrot.slane %v1025_v60, 4  ;;  %v1015_v2 = vor.u32 %v1014_v18, %v1011_v63  ;;  %v10004_v11 = vpack.c.bf16 %v739_v36, %v739_v36  ;;  %v742_v16 = vmul.f32 %v11933_v59, %v11726_v10  ;;  %16025 = vst [vmem:[#allocation26_spill] sm:$0xff] %v11963_v50 }
  0xb4   : > { %v1039_v8 = vshrl.u32 %v10005_v4, 16  ;;  %v1042_v53 = vshll.u32 %v10005_v4, 16  ;;  %v741_v3 = vmul.f32 %v11946_v40, %v11738_v24  ;;  %v1458_v18 = vrot.slane %v1456_v7, 1 }
  0xb5   : > { %v1016_v45 = vsel %vm11839_vm13, %v1007_v15, %v1015_v2  ;;  %v1017_v33 = vrot.slane %v1015_v2, 4  ;;  %v1029_v26 = vshrl.u32 %v10004_v11, 16  ;;  %v1032_v25 = vshll.u32 %v10004_v11, 16  ;;  %v11973_v15 = vld [vmem:[%s15943_s4 + $0x10] sm:$0xf] }
  0xb6   : > { %1281 = vst.msk [vmem:[#allocation2 + $0x40] sm:$0xf] %vm383_vm1, %v1016_v45  ;;  %v1041_v22 = vrot.slane %v1039_v8, 6  ;;  %v1044_v63 = vrot.slane %v1042_v53, 7  ;;  %v10007_v36 = vpack.c.bf16 %v742_v16, %v742_v16  ;;  %v11966_v55 = vld [vmem:[#allocation2 + $0x30] sm:$0xff]   ;;  %v10006_v4 = vpack.c.bf16 %v741_v3, %v741_v3  ;;  %v11977_v53 = vpop.permute.xlu0 %645 }
  0xb7   : > { %v1026_v10 = vsel %vm11839_vm13, %v1017_v33, %v1025_v60  ;;  %v1031_v24 = vrot.slane %v1029_v26, 6  ;;  %v1034_v1 = vrot.slane %v1032_v25, 7  ;;  %v1459_v11 = vsel %vm1439_vm14, %v1454_v48, %v1458_v18  ;;  %16026 = vst [vmem:[#allocation27_spill] sm:$0xff] %v11977_v53  ;;  %10481 = vmatprep.mubr.msk.bf16.mxu1 %vm1588_vm11, %v11966_v55 }
  0xb8   : > { %1282 = vst.msk [vmem:[#allocation2 + $0x44] sm:$0xf] %vm383_vm1, %v1026_v10  ;;  %v1045_v2 = vor.u32 %v1044_v63, %v1041_v22  ;;  %v1059_v7 = vshrl.u32 %v10007_v36, 16  ;;  %v1062_v8 = vshll.u32 %v10007_v36, 16  ;;  %10432 = vmatmul.mubr.msk.bf16.vlgmr.msra.gmra.mxu0 %vm1588_vm11, %v1459_v11  ;;  %v1049_v16 = vshrl.u32 %v10006_v4, 16 }
  0xb9   : > { %v1035_v60 = vor.u32 %v1034_v1, %v1031_v24  ;;  %v1052_v3 = vshll.u32 %v10006_v4, 16  ;;  %v1460_v45 = vshrl.u32 %v11888_v52, 16  ;;  %10506 = vmatpush3.bf16.msra.mxu0 %v11735_v21  ;;  %v1464_v48 = vshll.u32 %v11915_v41, 16  ;;  %v11987_v24 = vpop.permute.xlu1 %660 }
  0xba   : > { %v1047_v33 = vrot.slane %v1045_v2, 4  ;;  %v1061_v26 = vrot.slane %v1059_v7, 6  ;;  %v1064_v25 = vrot.slane %v1062_v8, 7  ;;  %v1051_v36 = vrot.slane %v1049_v16, 6  ;;  %16027 = vst [vmem:[#allocation28_spill] sm:$0xff] %v11987_v24  ;;  %v11989_v1 = vld [vmem:[#allocation2 + $0x38] sm:$0xff]   ;;  %11171 = vmatprep.subr.msk.bf16.mxu0 %vm1643_vm10, %v11973_v15 }
  0xbb   : > { %v1036_v22 = vsel %vm11839_vm13, %v1027_v49, %v1035_v60  ;;  %v1037_v63 = vrot.slane %v1035_v60, 4  ;;  %v1054_v10 = vrot.slane %v1052_v3, 7  ;;  %v1462_v52 = vor.u32 %v1460_v45, %v1458_v18  ;;  %10482 = vmatmul.mubr.msk.bf16.gmra.mxu1 %vm1588_vm11, %v11989_v1  ;;  %v12006_v45 = vpop.permute.xlu0 %655 }
  0xbc   : > { %1283 = vst.msk [vmem:[#allocation2 + $0x48] sm:$0xf] %vm383_vm1, %v1036_v22  ;;  %v1065_v21 = vor.u32 %v1064_v25, %v1061_v26  ;;  %v1466_v4 = vrot.slane %v1464_v48, 1  ;;  %v744_v11 = vmul.f32 %v11963_v50, %v11743_v27  ;;  %v743_v8 = vmul.f32 %v11977_v53, %v11746_v30  ;;  %16028 = vst [vmem:[#allocation29_spill] sm:$0xff] %v12006_v45 }
  0xbd   : > { %v1046_v49 = vsel %vm11839_vm13, %v1037_v63, %v1045_v2  ;;  %v1055_v7 = vor.u32 %v1054_v10, %v1051_v36  ;;  %v1468_v60 = vshrl.u32 %v11915_v41, 16  ;;  %v1472_v27 = vshll.u32 %v11927_v19, 16 }
  0xbe   : > { %1284 = vst.msk [vmem:[#allocation2 + $0x4c] sm:$0xf] %vm383_vm1, %v1046_v49  ;;  %v1067_v16 = vrot.slane %v1065_v21, 4  ;;  %v1467_v18 = vsel %vm1439_vm14, %v1462_v52, %v1466_v4  ;;  %v10009_v3 = vpack.c.bf16 %v744_v11, %v744_v11  ;;  %v10008_v30 = vpack.c.bf16 %v743_v8, %v743_v8 }
  0xbf   : > { %v1056_v2 = vsel %vm11839_vm13, %v1047_v33, %v1055_v7  ;;  %v1057_v26 = vrot.slane %v1055_v7, 4  ;;  %10435 = vmatprep.mubr.msk.bf16.mxu0 %vm1588_vm11, %v1467_v18  ;;  %v1470_v25 = vor.u32 %v1468_v60, %v1466_v4  ;;  %v12011_v48 = vld [vmem:[#allocation2 + $0x40] sm:$0xff]   ;;  %v1474_v36 = vrot.slane %v1472_v27, 1  ;;  %v12020_v7 = vpop.permute.xlu1 %670  ;;  %v12029_v50 = vpop.permute.xlu0 %665 }
  0xc0   : > { %1285 = vst.msk [vmem:[#allocation2 + $0x50] sm:$0xf] %vm383_vm1, %v1056_v2  ;;  %v1079_v22 = vshrl.u32 %v10009_v3, 16  ;;  %v1082_v63 = vshll.u32 %v10009_v3, 16  ;;  %v746_v10 = vmul.f32 %v11987_v24, %v11757_v38  ;;  %v1069_v11 = vshrl.u32 %v10008_v30, 16  ;;  %16029 = vst [vmem:[#allocation30_spill] sm:$0xff] %v12020_v7  ;;  %10485 = vmatprep.mubr.msk.bf16.mxu1 %vm1588_vm11, %v12011_v48 }
  0xc1   : > { %v1066_v52 = vsel %vm11839_vm13, %v1057_v26, %v1065_v21  ;;  %v1072_v33 = vshll.u32 %v10008_v30, 16  ;;  %v745_v49 = vmul.f32 %v12006_v45, %v11767_v46  ;;  %v1475_v60 = vsel %vm1439_vm14, %v1470_v25, %v1474_v36  ;;  %16030 = vst [vmem:[#allocation31_spill] sm:$0xff] %v12029_v50 }
  0xc2   : > { %1286 = vst.msk [vmem:[#allocation2 + $0x54] sm:$0xf] %vm383_vm1, %v1066_v52  ;;  %v1081_v4 = vrot.slane %v1079_v22, 6  ;;  %v1084_v8 = vrot.slane %v1082_v63, 7  ;;  %v10011_v38 = vpack.c.bf16 %v746_v10, %v746_v10  ;;  %v1071_v18 = vrot.slane %v1069_v11, 6  ;;  %10436 = vmatmul.mubr.msk.bf16.gmra.mxu0 %vm1588_vm11, %v1475_v60 }
  0xc3   : > { %v1074_v3 = vrot.slane %v1072_v33, 7  ;;  %v10010_v21 = vpack.c.bf16 %v745_v49, %v745_v49  ;;  %v1476_v27 = vshrl.u32 %v11927_v19, 16  ;;  %v1480_v30 = vshll.u32 %v11941_v13, 16  ;;  %v12035_v53 = vpop.permute.xlu1 %680 }
  0xc4   : > { %v1085_v46 = vor.u32 %v1084_v8, %v1081_v4  ;;  %v1099_v2 = vshrl.u32 %v10011_v38, 16  ;;  %v1102_v26 = vshll.u32 %v10011_v38, 16  ;;  %16031 = vst [vmem:[#allocation32_spill] sm:$0xff] %v12035_v53  ;;  %v2062_v40 = vrot.slane %v12011_v48, 1 }
  0xc5   : > { %v1075_v52 = vor.u32 %v1074_v3, %v1071_v18  ;;  %v1089_v22 = vshrl.u32 %v10010_v21, 16  ;;  %v1092_v63 = vshll.u32 %v10010_v21, 16  ;;  %v1478_v24 = vor.u32 %v1476_v27, %v1474_v36  ;;  %v12031_v25 = vld [vmem:[#allocation2 + $0x48] sm:$0xff]  }
  0xc6   : > { %v1087_v10 = vrot.slane %v1085_v46, 4  ;;  %v1101_v11 = vrot.slane %v1099_v2, 6  ;;  %v1104_v33 = vrot.slane %v1102_v26, 7  ;;  %v1482_v60 = vrot.slane %v1480_v30, 1  ;;  %10486 = vmatmul.mubr.msk.bf16.gmra.mxu1 %vm1588_vm11, %v12031_v25 }
  0xc7   : > { %v1076_v49 = vsel %vm11839_vm13, %v1067_v16, %v1075_v52  ;;  %v1077_v4 = vrot.slane %v1075_v52, 4  ;;  %v1091_v8 = vrot.slane %v1089_v22, 6  ;;  %v1094_v38 = vrot.slane %v1092_v63, 7  ;;  %v12048_v16 = vld [vmem:[%s15943_s4 + $0x14] sm:$0xf]  ;;  %v12062_v22 = vpop.permute.xlu0 %675 }
  0xc8   : > { %1287 = vst.msk [vmem:[#allocation2 + $0x58] sm:$0xf] %vm383_vm1, %v1076_v49  ;;  %v1105_v36 = vor.u32 %v1104_v33, %v1101_v11  ;;  %v1483_v18 = vsel %vm1439_vm14, %v1478_v24, %v1482_v60  ;;  %v748_v3 = vmul.f32 %v12020_v7, %v11770_v47  ;;  %v747_v21 = vmul.f32 %v12029_v50, %v11774_v28  ;;  %v12261_v50 = vld [vmem:[#allocation2 + $0x40] sm:$0xff]  }
  0xc9   : > { %v1086_v27 = vsel %vm11839_vm13, %v1077_v4, %v1085_v46  ;;  %v1095_v2 = vor.u32 %v1094_v38, %v1091_v8  ;;  %10439 = vmatprep.mubr.msk.bf16.mxu0 %vm1588_vm11, %v1483_v18  ;;  %v1484_v26 = vshrl.u32 %v11941_v13, 16  ;;  %v1488_v24 = vshll.u32 %v11966_v55, 16  ;;  %v12055_v30 = vld [vmem:[#allocation2 + $0x50] sm:$0xff]   ;;  %11172 = vmatprep.subr.msk.bf16.mxu1 %vm1643_vm10, %v12048_v16  ;;  %16032 = vst [vmem:[#allocation33_spill] sm:$0xff] %v12062_v22 }
  0xca   : > { %1288 = vst.msk [vmem:[#allocation2 + $0x5c] sm:$0xf] %vm383_vm1, %v1086_v27  ;;  %v1107_v47 = vrot.slane %v1105_v36, 4  ;;  %v10013_v28 = vpack.c.bf16 %v748_v3, %v748_v3  ;;  %v10012_v52 = vpack.c.bf16 %v747_v21, %v747_v21  ;;  %v750_v46 = vmul.f32 %v12035_v53, %v11777_v51  ;;  %10489 = vmatprep.mubr.msk.bf16.mxu1 %vm1588_vm11, %v12055_v30  ;;  %v12274_v43 = vld [vmem:[#allocation2 + $0x50] sm:$0xff]  }
  0xcb   : > { %v1096_v63 = vsel %vm11839_vm13, %v1087_v10, %v1095_v2  ;;  %v1097_v11 = vrot.slane %v1095_v2, 4  ;;  %v1486_v33 = vor.u32 %v1484_v26, %v1482_v60  ;;  %v1490_v49 = vrot.slane %v1488_v24, 1  ;;  %v12074_v60 = vpop.permute.xlu1 %690  ;;  %v12082_v7 = vpop.permute.xlu0 %685 }
  0xcc   : > { %1289 = vst.msk [vmem:[#allocation2 + $0x60] sm:$0xf] %vm383_vm1, %v1096_v63  ;;  %v1119_v4 = vshrl.u32 %v10013_v28, 16  ;;  %v1122_v8 = vshll.u32 %v10013_v28, 16  ;;  %v1109_v38 = vshrl.u32 %v10012_v52, 16  ;;  %v1112_v18 = vshll.u32 %v10012_v52, 16 }
  0xcd   : > { %v1106_v51 = vsel %vm11839_vm13, %v1097_v11, %v1105_v36  ;;  %v1491_v3 = vsel %vm1439_vm14, %v1486_v33, %v1490_v49  ;;  %v10015_v21 = vpack.c.bf16 %v750_v46, %v750_v46  ;;  %v749_v10 = vmul.f32 %v12062_v22, %v11782_v58  ;;  %16033 = vst [vmem:[#allocation34_spill] sm:$0xff] %v12074_v60 }
  0xce   : > { %1290 = vst.msk [vmem:[#allocation2 + $0x64] sm:$0xf] %vm383_vm1, %v1106_v51  ;;  %v1121_v27 = vrot.slane %v1119_v4, 6  ;;  %v1124_v2 = vrot.slane %v1122_v8, 7  ;;  %v1111_v26 = vrot.slane %v1109_v38, 6  ;;  %v1114_v24 = vrot.slane %v1112_v18, 7  ;;  %10440 = vmatmul.mubr.msk.bf16.gmra.mxu0 %vm1588_vm11, %v1491_v3 }
  0xcf   : > { %v1139_v28 = vshrl.u32 %v10015_v21, 16  ;;  %v1142_v52 = vshll.u32 %v10015_v21, 16  ;;  %v10014_v63 = vpack.c.bf16 %v749_v10, %v749_v10  ;;  %v1492_v36 = vshrl.u32 %v11966_v55, 16  ;;  %16034 = vst [vmem:[#allocation35_spill] sm:$0xff] %v12082_v7 }
  0xd0   : > { %v1125_v11 = vor.u32 %v1124_v2, %v1121_v27  ;;  %v1115_v46 = vor.u32 %v1114_v24, %v1111_v26  ;;  %v1496_v33 = vshll.u32 %v11989_v1, 16  ;;  %v752_v58 = vmul.f32 %v12074_v60, %v11785_v61  ;;  %v11347_v27 = vld [vmem:[%s15942_s3] ss:$0 sm:$0xff] }
  0xd1   : > { %v1141_v4 = vrot.slane %v1139_v28, 6  ;;  %v1144_v8 = vrot.slane %v1142_v52, 7  ;;  %v1129_v38 = vshrl.u32 %v10014_v63, 16  ;;  %v1132_v18 = vshll.u32 %v10014_v63, 16  ;;  %v12086_v10 = vld [vmem:[#allocation2 + $0x58] sm:$0xff]   ;;  %v12097_v63 = vpop.permute.xlu1 %700 }
  0xd2   : > { %v1127_v51 = vrot.slane %v1125_v11, 4  ;;  %v1116_v3 = vsel %vm11839_vm13, %v1107_v47, %v1115_v46  ;;  %v1117_v21 = vrot.slane %v1115_v46, 4  ;;  %v16035_v61 = vsub.f32 %v11802_v20, %v11601_v54  ;;  %16036 = vst [vmem:[#allocation36_spill] sm:$0xff] %v12097_v63  ;;  %10490 = vmatmul.mubr.msk.bf16.gmra.mxu1 %vm1588_vm11, %v12086_v10  ;;  %v12287_v23 = vld [vmem:[#allocation2 + $0x58] sm:$0xff]  }
  0xd3   : > { %1291 = vst.msk [vmem:[#allocation2 + $0x68] sm:$0xf] %vm383_vm1, %v1116_v3  ;;  %v1131_v26 = vrot.slane %v1129_v38, 6  ;;  %v1134_v24 = vrot.slane %v1132_v18, 7  ;;  %v1494_v28 = vor.u32 %v1492_v36, %v1490_v49  ;;  %v1498_v52 = vrot.slane %v1496_v33, 1  ;;  %v12112_v18 = vpop.permute.xlu0 %695 }
  0xd4   : > { %v12094_v2 = vmul.f32 %v11347_v27, %v16035_v61  ;;  %v1126_v47 = vsel %vm11839_vm13, %v1117_v21, %v1125_v11  ;;  %v10017_v46 = vpack.c.bf16 %v752_v58, %v752_v58  ;;  %v751_v60 = vmul.f32 %v12082_v7, %v11792_v0  ;;  %16037 = vst [vmem:[#allocation37_spill] sm:$0xff] %v12112_v18  ;;  %v12253_v7 = vld [vmem:[#allocation2 + $0x8] sm:$0xc] }
  0xd5   : > { %v1500_v53 = vshrl.u32 %v11989_v1, 16  ;;  %1292 = vst.msk [vmem:[#allocation2 + $0x6c] sm:$0xf] %vm383_vm1, %v1126_v47  ;;  %v1145_v54 = vor.u32 %v1144_v8, %v1141_v4  ;;  %v1135_v20 = vor.u32 %v1134_v24, %v1131_v26  ;;  %v1499_v49 = vsel %vm1439_vm14, %v1494_v28, %v1498_v52  ;;  %v12109_v33 = vld [vmem:[#allocation2 + $0x60] sm:$0xff]  }
  0xd6   : > { %v1504_v36 = vshll.u32 %v12011_v48, 16  ;;  %10443 = vmatprep.mubr.msk.bf16.mxu0 %vm1588_vm11, %v1499_v49  ;;  %v1159_v11 = vshrl.u32 %v10017_v46, 16  ;;  %v1162_v58 = vshll.u32 %v10017_v46, 16  ;;  %v10016_v0 = vpack.c.bf16 %v751_v60, %v751_v60  ;;  %10493 = vmatprep.mubr.msk.bf16.mxu1 %vm1588_vm11, %v12109_v33 }
  0xd7   : > { %v1502_v38 = vor.u32 %v1500_v53, %v1498_v52  ;;  %v1136_v3 = vsel %vm11839_vm13, %v1127_v51, %v1135_v20  ;;  %v1137_v21 = vrot.slane %v1135_v20, 4  ;;  %v754_v8 = vmul.f32 %v12097_v63, %v11795_v5  ;;  %v12126_v52 = vpop.permute.xlu1 %710 }
  0xd8   : > { %v1506_v4 = vrot.slane %v1504_v36, 1  ;;  %1293 = vst.msk [vmem:[#allocation2 + $0x70] sm:$0xf] %vm383_vm1, %v1136_v3  ;;  %v1161_v27 = vrot.slane %v1159_v11, 6  ;;  %v1164_v61 = vrot.slane %v1162_v58, 7  ;;  %v1149_v26 = vshrl.u32 %v10016_v0, 16 }
  0xd9   : > { %v1152_v60 = vshll.u32 %v10016_v0, 16  ;;  %v1146_v53 = vsel %vm11839_vm13, %v1137_v21, %v1145_v54  ;;  %v10019_v51 = vpack.c.bf16 %v754_v8, %v754_v8  ;;  %v753_v28 = vmul.f32 %v12112_v18, %v11798_v6  ;;  %16038 = vst [vmem:[#allocation38_spill] sm:$0xff] %v12126_v52 }
  0xda   : > { %v1507_v24 = vsel %vm1439_vm14, %v1502_v38, %v1506_v4  ;;  %v1147_v5 = vrot.slane %v1145_v54, 4  ;;  %1294 = vst.msk [vmem:[#allocation2 + $0x74] sm:$0xf] %vm383_vm1, %v1146_v53  ;;  %v1151_v47 = vrot.slane %v1149_v26, 6  ;;  %v1508_v20 = vshrl.u32 %v12011_v48, 16  ;;  %v12134_v54 = vpop.permute.xlu0 %705 }
  0xdb   : > { %v1154_v46 = vrot.slane %v1152_v60, 7  ;;  %10444 = vmatmul.mubr.msk.bf16.gmra.mxu0 %vm1588_vm11, %v1507_v24  ;;  %v1179_v49 = vshrl.u32 %v10019_v51, 16  ;;  %v1182_v36 = vshll.u32 %v10019_v51, 16  ;;  %v10018_v11 = vpack.c.bf16 %v753_v28, %v753_v28  ;;  %16039 = vst [vmem:[#allocation39_spill] sm:$0xff] %v12134_v54 }
  0xdc   : > { %v1512_v58 = vshll.u32 %v12031_v25, 16  ;;  %v1165_v0 = vor.u32 %v1164_v61, %v1161_v27  ;;  %v1510_v3 = vor.u32 %v1508_v20, %v1506_v4  ;;  %v756_v6 = vmul.f32 %v12126_v52, %v11809_v31  ;;  %v12136_v21 = vld [vmem:[#allocation2 + $0x68] sm:$0xff]  }
  0xdd   : > { %v1155_v38 = vor.u32 %v1154_v46, %v1151_v47  ;;  %v1181_v8 = vrot.slane %v1179_v49, 6  ;;  %v1184_v26 = vrot.slane %v1182_v36, 7  ;;  %v1169_v60 = vshrl.u32 %v10018_v11, 16  ;;  %10494 = vmatmul.mubr.msk.bf16.gmra.mxu1 %vm1588_vm11, %v12136_v21  ;;  %v12145_v47 = vpop.permute.xlu1 %720 }
  0xde   : > { %v1172_v53 = vshll.u32 %v10018_v11, 16  ;;  %v1514_v28 = vrot.slane %v1512_v58, 1  ;;  %v10021_v63 = vpack.c.bf16 %v756_v6, %v756_v6  ;;  %v755_v61 = vmul.f32 %v12134_v54, %v11812_v32  ;;  %16040 = vst [vmem:[#allocation40_spill] sm:$0xff] %v12145_v47  ;;  %v12243_v54 = vld [vmem:[#allocation2 + $0x30] sm:$0xff]  }
  0xdf   : > { %v1156_v24 = vsel %vm11839_vm13, %v1147_v5, %v1155_v38  ;;  %v1157_v51 = vrot.slane %v1155_v38, 4  ;;  %v1185_v31 = vor.u32 %v1184_v26, %v1181_v8  ;;  %v1171_v4 = vrot.slane %v1169_v60, 6  ;;  %v12158_v60 = vpop.permute.xlu0 %715 }
  0xe0   : > { %1295 = vst.msk [vmem:[#allocation2 + $0x78] sm:$0xf] %vm383_vm1, %v1156_v24  ;;  %v1174_v27 = vrot.slane %v1172_v53, 7  ;;  %v1515_v5 = vsel %vm1439_vm14, %v1510_v3, %v1514_v28  ;;  %v1199_v20 = vshrl.u32 %v10021_v63, 16  ;;  %v1202_v49 = vshll.u32 %v10021_v63, 16  ;;  %16041 = vst [vmem:[#allocation41_spill] sm:$0xff] %v12158_v60 }
  0xe1   : > { %v1166_v46 = vsel %vm11839_vm13, %v1157_v51, %v1165_v0  ;;  %v1167_v36 = vrot.slane %v1165_v0, 4  ;;  %10447 = vmatprep.mubr.msk.bf16.mxu0 %vm1588_vm11, %v1515_v5  ;;  %v10020_v58 = vpack.c.bf16 %v755_v61, %v755_v61  ;;  %v1516_v38 = vshrl.u32 %v12031_v25, 16  ;;  %v12153_v6 = vld [vmem:[#allocation2 + $0x70] sm:$0xff]  }
  0xe2   : > { %1296 = vst.msk [vmem:[#allocation2 + $0x7c] sm:$0xf] %vm383_vm1, %v1166_v46  ;;  %v1175_v11 = vor.u32 %v1174_v27, %v1171_v4  ;;  %v1201_v32 = vrot.slane %v1199_v20, 6  ;;  %v1204_v8 = vrot.slane %v1202_v49, 7  ;;  %v1520_v26 = vshll.u32 %v12055_v30, 16  ;;  %10497 = vmatprep.mubr.msk.bf16.mxu1 %vm1588_vm11, %v12153_v6 }
  0xe3   : > { %v758_v3 = vmul.f32 %v12145_v47, %v11819_v17  ;;  %v1189_v53 = vshrl.u32 %v10020_v58, 16  ;;  %v1192_v24 = vshll.u32 %v10020_v58, 16  ;;  %v1187_v51 = vrot.slane %v1185_v31, 4 }
  0xe4   : > { %v1176_v63 = vsel %vm11839_vm13, %v1167_v36, %v1175_v11  ;;  %v1177_v0 = vrot.slane %v1175_v11, 4  ;;  %v1518_v4 = vor.u32 %v1516_v38, %v1514_v28  ;;  %v1522_v27 = vrot.slane %v1520_v26, 1  ;;  %v2040_v26 = vld [vmem:[#allocation2] sm:$0xe] }
  0xe5   : > { %1297 = vst.msk [vmem:[#allocation2 + $0x80] sm:$0xf] %vm383_vm1, %v1176_v63  ;;  %v10023_v61 = vpack.c.bf16 %v758_v3, %v758_v3  ;;  %v1191_v46 = vrot.slane %v1189_v53, 6  ;;  %v1194_v5 = vrot.slane %v1192_v24, 7  ;;  %v757_v20 = vmul.f32 %v12158_v60, %v12094_v2 }
  0xe6   : > { %v1186_v17 = vsel %vm11839_vm13, %v1177_v0, %v1185_v31  ;;  %v1205_v49 = vor.u32 %v1204_v8, %v1201_v32  ;;  %v1523_v36 = vsel %vm1439_vm14, %v1518_v4, %v1522_v27  ;;  %v1524_v38 = vshrl.u32 %v12055_v30, 16 }
  0xe7   : > { %1298 = vst.msk [vmem:[#allocation2 + $0x84] sm:$0xf] %vm383_vm1, %v1186_v17  ;;  %v1219_v11 = vshrl.u32 %v10023_v61, 16  ;;  %v1222_v58 = vshll.u32 %v10023_v61, 16  ;;  %v1195_v52 = vor.u32 %v1194_v5, %v1191_v46  ;;  %10448 = vmatmul.mubr.msk.bf16.gmra.mxu0 %vm1588_vm11, %v1523_v36  ;;  %v10022_v28 = vpack.c.bf16 %v757_v20, %v757_v20  ;;  %v1303_v61 = vld [vmem:[#allocation2 + $0x98] sm:$0x3] }
  0xe8   : > { %v1528_v31 = vshll.u32 %v12086_v10, 16  ;;  %v1532_v2 = vshrl.u32 %v12086_v10, 16  ;;  %v1536_v0 = vshll.u32 %v12109_v33, 16  ;;  %v1526_v46 = vor.u32 %v1524_v38, %v1522_v27  ;;  %v12189_v38 = vld [vmem:[#allocation2 + $0xc] sm:$0xf] }
  0xe9   : > { %v1221_v3 = vrot.slane %v1219_v11, 6  ;;  %v1224_v63 = vrot.slane %v1222_v58, 7  ;;  %v1196_v32 = vsel %vm11839_vm13, %v1187_v51, %v1195_v52  ;;  %v1197_v8 = vrot.slane %v1195_v52, 4  ;;  %v12178_v4 = vld [vmem:[#allocation2 + $0x78] sm:$0xff]  }
  0xea   : > { %v1209_v53 = vshrl.u32 %v10022_v28, 16  ;;  %v1212_v24 = vshll.u32 %v10022_v28, 16  ;;  %1299 = vst.msk [vmem:[#allocation2 + $0x88] sm:$0xf] %vm383_vm1, %v1196_v32  ;;  %v1530_v5 = vrot.slane %v1528_v31, 1  ;;  %v1538_v20 = vrot.slane %v1536_v0, 1  ;;  %10498 = vmatmul.mubr.msk.bf16.gmra.mxu1 %vm1588_vm11, %v12178_v4 }
  0xeb   : > { %v1225_v17 = vor.u32 %v1224_v63, %v1221_v3  ;;  %v1206_v36 = vsel %vm11839_vm13, %v1197_v8, %v1205_v49  ;;  %v1540_v47 = vshrl.u32 %v12109_v33, 16  ;;  %v1544_v27 = vshll.u32 %v12136_v21, 16  ;;  %v11348_v31 = vld [vmem:[#allocation2 + $0x4] sm:$0xf] }
  0xec   : > { %v1211_v11 = vrot.slane %v1209_v53, 6  ;;  %v1214_v58 = vrot.slane %v1212_v24, 7  ;;  %1300 = vst.msk [vmem:[#allocation2 + $0x8c] sm:$0xf] %vm383_vm1, %v1206_v36  ;;  %v1531_v51 = vsel %vm1439_vm14, %v1526_v46, %v1530_v5  ;;  %v1534_v28 = vor.u32 %v1532_v2, %v1530_v5  ;;  %v12198_v5 = vld [vmem:[#allocation2 + $0x10] sm:$0xff]  }
  0xed   : > { %v1227_v52 = vrot.slane %v1225_v17, 4  ;;  %v9449_v3 = vcombine.low %v2040_v26, %v11348_v31  ;;  %v1207_v63 = vrot.slane %v1205_v49, 4  ;;  %10451 = vmatprep.mubr.msk.bf16.mxu0 %vm1588_vm11, %v1531_v51  ;;  %v1552_v32 = vshll.u32 %v12153_v6, 16 }
  0xee   : > { %v1215_v0 = vor.u32 %v1214_v58, %v1211_v11  ;;  %v12193_v8 = vld [vmem:[#allocation2 + $0x80] sm:$0xff]   ;;  %v1539_v24 = vsel %vm1439_vm14, %v1534_v28, %v1538_v20  ;;  %v1542_v2 = vor.u32 %v1540_v47, %v1538_v20  ;;  %v1546_v46 = vrot.slane %v1544_v27, 1  ;;  %v2354_v11 = vld [vmem:[#allocation2 + $0x8] sm:$0xe] }
  0xef   : > { %v1304_v53 = vsel %vm11461_vm6, %v1227_v52, %v1303_v61  ;;  %10452 = vmatmul.mubr.msk.bf16.gmra.mxu0 %vm1588_vm11, %v1539_v24  ;;  %v1554_v36 = vrot.slane %v1552_v32, 1  ;;  %10501 = vmatprep.mubr.msk.bf16.mxu1 %vm1588_vm11, %v12193_v8  ;;  %v1560_v9 = vshll.u32 %v12178_v4, 16  ;;  %v1548_v61 = vshrl.u32 %v12136_v21, 16  ;;  %v12221_v32 = vld [vmem:[#allocation2 + $0x20] sm:$0xff]  }
  0xf0   : > { %1305 = vst [vmem:[#allocation2 + $0x98] sm:$0x3] %v1304_v53  ;;  %v1216_v49 = vsel %vm11839_vm13, %v1207_v63, %v1215_v0  ;;  %v1217_v26 = vrot.slane %v1215_v0, 4  ;;  %v1547_v47 = vsel %vm1439_vm14, %v1542_v2, %v1546_v46  ;;  %v1568_v20 = vshll.u32 %v12193_v8, 16  ;;  %v12219_v0 = vld [vmem:[#allocation2 + $0x18] sm:$0xff]  }
  0xf1   : > { %1301 = vst.msk [vmem:[#allocation2 + $0x90] sm:$0xf] %vm383_vm1, %v1216_v49  ;;  %10455 = vmatprep.mubr.msk.bf16.mxu0 %vm1588_vm11, %v1547_v47  ;;  %v1556_v52 = vshrl.u32 %v12153_v6, 16  ;;  %v1562_v51 = vrot.slane %v1560_v9, 1  ;;  %v12215_v28 = vcombine.low %v2354_v11, %v12189_v38  ;;  %v2047_v27 = vrot.slane %v9449_v3, 1  ;;  %v11349_v11 = vld [vmem:[#allocation2 + $0x8] sm:$0xff]  }
  0xf2   : > { %v1226_v58 = vsel %vm11839_vm13, %v1217_v26, %v1225_v17  ;;  %v1550_v31 = vor.u32 %v1548_v61, %v1546_v46  ;;  %v2487_v63 = vrot.slane %v12198_v5, 1  ;;  %v12228_v2 = vsel %vm1643_vm10, %v11973_v15, 0  ;;  %v12238_v15 = vld [vmem:[#allocation2 + $0x28] sm:$0xff]  }
  0xf3   : > { %1302 = vst.msk [vmem:[#allocation2 + $0x94] sm:$0xf] %vm383_vm1, %v1226_v58  ;;  %v1558_v53 = vor.u32 %v1556_v52, %v1554_v36  ;;  %v12223_v17 = vld [vmem:[#allocation2 + $0x88] sm:$0xff]   ;;  %v2486_v24 = vrot.slane %v12215_v28, 1  ;;  %v1564_v46 = vshrl.u32 %v12178_v4, 16  ;;  %v1570_v49 = vrot.slane %v1568_v20, 1 }
  0xf4   : > { %v1555_v3 = vsel %vm1439_vm14, %v1550_v31, %v1554_v36  ;;  %v1572_v26 = vshrl.u32 %v12193_v8, 16  ;;  %10502 = vmatmul.mubr.msk.bf16.gmra.mxu1 %vm1588_vm11, %v12223_v17  ;;  %v1576_v61 = vshll.u32 %v12223_v17, 16  ;;  %v2048_v58 = vrot.slane %v11349_v11, 1  ;;  %v11350_v31 = vld [vmem:[#allocation2 + $0x10] sm:$0xff]  }
  0xf5   : > { %v1563_v9 = vsel %vm1439_vm14, %v1558_v53, %v1562_v51  ;;  %v2488_v47 = vsel %vm2046_vm15, %v2486_v24, %v2487_v63  ;;  %v1566_v52 = vor.u32 %v1564_v46, %v1562_v51  ;;  %v2489_v36 = vrot.slane %v12219_v0, 1 }
  0xf6   : > { %10545 = vmatprep.mubr.msk.bf16.mxu1 %vm1588_vm11, %v2488_v47  ;;  %v2491_v20 = vrot.slane %v12221_v32, 1  ;;  %v2050_v53 = vrot.slane %v11350_v31, 1  ;;  %v1578_v24 = vrot.slane %v1576_v61, 1  ;;  %v1574_v51 = vor.u32 %v1572_v26, %v1570_v49  ;;  %v12251_v47 = vld [vmem:[#allocation2 + $0x38] sm:$0xff]  }
  0xf7   : > { %10456 = vmatmul.mubr.msk.bf16.gmra.mxu0 %vm1588_vm11, %v1555_v3  ;;  %v1571_v11 = vsel %vm1439_vm14, %v1566_v52, %v1570_v49  ;;  %v2052_v46 = vrot.slane %v11915_v41, 1  ;;  %v1580_v31 = vshrl.u32 %v12223_v17, 16  ;;  %v12258_v3 = vsel %vm2046_vm15, %v2047_v27, %v2048_v58  ;;  %v12272_v27 = vld [vmem:[#allocation2 + $0x48] sm:$0xff]  }
  0xf8   : > { %v12246_v60 = vld [vmem:[#allocation2 + $0x90] ss:$0 sps:$4 sm:$0x11]   ;;  %10459 = vmatprep.mubr.msk.bf16.mxu0 %vm1588_vm11, %v1563_v9  ;;  %v2493_v61 = vrot.slane %v12238_v15, 1  ;;  %v2490_v9 = vsel %vm2046_vm15, %v2487_v63, %v2489_v36  ;;  %v2495_v49 = vrot.slane %v12243_v54, 1  ;;  %v2054_v41 = vrot.slane %v11927_v19, 1 }
  0xf9   : > { %v1584_v18 = vshll.u32 %v12246_v60, 16  ;;  %v2056_v26 = vrot.slane %v11941_v13, 1  ;;  %v1579_v52 = vsel %vm1439_vm14, %v1574_v51, %v1578_v24  ;;  %v2492_v22 = vsel %vm2046_vm15, %v2489_v36, %v2491_v20 }
  0xfa   : > { %v12270_v45 = vsel %vm2046_vm15, %v2048_v58, %v2050_v53  ;;  %v9527_v63 = vcombine.low %v12253_v7, %v12189_v38  ;;  %v1582_v59 = vor.u32 %v1580_v31, %v1578_v24  ;;  %v12279_v19 = vsel %vm2046_vm15, %v2050_v53, %v2052_v46  ;;  %v12298_v53 = vld [vmem:[#allocation2 + $0x60] sm:$0xff]   ;;  %v12300_v24 = vld [vmem:[#allocation2 + $0x68] sm:$0xff]   ;;  %v12309_v31 = vld [vmem:[#allocation2 + $0x70] sm:$0xff]  }
  0xfb   : > { %v1586_v12 = vrot.slane %v1584_v18, 1  ;;  %v2497_v13 = vrot.slane %v12251_v47, 1  ;;  %v2494_v36 = vsel %vm2046_vm15, %v2491_v20, %v2493_v61  ;;  %v2499_v58 = vrot.slane %v12261_v50, 1 }
  0xfc   : > { %10546 = vmatmul.mubr.msk.bf16.vlgmr.msra.gmra.mxu1 %vm1588_vm11, %v2490_v9  ;;  %v2060_v51 = vrot.slane %v11989_v1, 1  ;;  %v2496_v7 = vsel %vm2046_vm15, %v2493_v61, %v2495_v49  ;;  %v12292_v18 = vsel %vm2046_vm15, %v2052_v46, %v2054_v41  ;;  %v12295_v38 = vsel %vm2046_vm15, %v2054_v41, %v2056_v26 }
  0xfd   : > { %10549 = vmatprep.mubr.msk.bf16.mxu1 %vm1588_vm11, %v2492_v22  ;;  %v2058_v20 = vrot.slane %v11966_v55, 1  ;;  %v2501_v1 = vrot.slane %v12272_v27, 1  ;;  %v2503_v48 = vrot.slane %v12274_v43, 1  ;;  %v2064_v46 = vrot.slane %v12031_v25, 1 }
  0xfe   : > { %v12306_v22 = vsel %vm2046_vm15, %v2060_v51, %v2062_v40  ;;  %vm3246_vm1 = vcmask 1045504   ;;  %v1587_v55 = vsel %vm1439_vm14, %v1582_v59, %v1586_v12  ;;  %v2498_v61 = vsel %vm2046_vm15, %v2495_v49, %v2497_v13 }
  0xff   : > { %10460 = vmatmul.mubr.msk.bf16.gmra.mxu0 %vm1588_vm11, %v1571_v11  ;;  %v2066_v11 = vrot.slane %v12055_v30, 1  ;;  %v2068_v9 = vrot.slane %v12086_v10, 1  ;;  %v2500_v41 = vsel %vm2046_vm15, %v2497_v13, %v2499_v58  ;;  %v12318_v57 = vsel %vm2046_vm15, %v2062_v40, %v2064_v46 }
 0x100   : > { %10463 = vmatprep.mubr.msk.bf16.mxu0 %vm1588_vm11, %v1579_v52  ;;  %v2505_v25 = vrot.slane %v12287_v23, 1  ;;  %v2070_v39 = vrot.slane %v12109_v33, 1  ;;  %v2507_v62 = vrot.slane %v12298_v53, 1  ;;  %v2509_v59 = vrot.slane %v12300_v24, 1 }
 0x101   : > { %v12324_v52 = vsel %vm2046_vm15, %v2064_v46, %v2066_v11  ;;  %v12327_v12 = vsel %vm2046_vm15, %v2066_v11, %v2068_v9  ;;  %v12331_v30 = vsel %vm2046_vm15, %v2056_v26, %v2058_v20  ;;  %v15979_v40 = vrot.slane %v12309_v31, 1 }
 0x102   : > { %v12335_v10 = vsel %vm2046_vm15, %v2068_v9, %v2070_v39  ;;  %v2072_v33 = vrot.slane %v12136_v21, 1  ;;  %v12339_v49 = vsel %vm2046_vm15, %v2058_v20, %v2060_v51  ;;  %v12342_v13 = vsel %vm2046_vm15, %v2499_v58, %v2501_v1  ;;  %v12356_v51 = vld [vmem:[#allocation2 + $0x78] sm:$0xff]  }
 0x103   : > { %v2074_v46 = vrot.slane %v12153_v6, 1  ;;  %v2076_v11 = vrot.slane %v12178_v4, 1  ;;  %v12348_v26 = vsel %vm2046_vm15, %v2501_v1, %v2503_v48  ;;  %v12351_v9 = vsel %vm2046_vm15, %v2503_v48, %v2505_v25  ;;  %v12384_v1 = vld [vmem:[#allocation2 + $0x80] sm:$0xff]  }
 0x104   : > { %10550 = vmatmul.mubr.msk.bf16.gmra.mxu1 %vm1588_vm11, %v2494_v36  ;;  %v12354_v21 = vsel %vm2046_vm15, %v2070_v39, %v2072_v33  ;;  %v2078_v58 = vrot.slane %v12193_v8, 1  ;;  %v12361_v6 = vsel %vm2046_vm15, %v2505_v25, %v2507_v62  ;;  %v12364_v4 = vsel %vm2046_vm15, %v2507_v62, %v2509_v59 }
 0x105   : > { %10553 = vmatprep.mubr.msk.bf16.mxu1 %vm1588_vm11, %v2496_v7  ;;  %v12367_v36 = vsel %vm2046_vm15, %v2072_v33, %v2074_v46  ;;  %v12370_v20 = vsel %vm2046_vm15, %v2074_v46, %v2076_v11  ;;  %v12376_v39 = vsel %vm2046_vm15, %v2509_v59, %v15979_v40  ;;  %v2080_v7 = vrot.slane %v12223_v17, 1 }
 0x106   : > { %v12379_v8 = vsel %vm2046_vm15, %v2076_v11, %v2078_v58  ;;  %v3247_v62 = vrot.slane %v9527_v63, 2  ;;  %v3248_v48 = vrot.slane %v12198_v5, 2  ;;  %v2082_v25 = vrot.slane %v12246_v60, 1 }
 0x107   : > { %10464 = vmatmul.mubr.msk.bf16.gmra.mxu0 %vm1588_vm11, %v1587_v55  ;;  %v3339_v55 = vsel %vm1643_vm10, %v12048_v16, 0  ;;  %v2801_v59 = vshrl.u32 %v12215_v28, 16  ;;  %v12393_v46 = vsel %vm2046_vm15, %v2078_v58, %v2080_v7  ;;  %v2804_v17 = vshll.u32 %v12215_v28, 16 }
 0x108   : > { %10507 = vmatprep.mubr.msk.bf16.mxu0 %vm1588_vm11, %v12258_v3  ;;  %10620 = vmatpush3.bf16.msra.mxu1 %v3339_v55  ;;  %v2809_v3 = vshrl.u32 %v12198_v5, 16  ;;  %v12398_v63 = vsel %vm3246_vm1, %v3247_v62, %v3248_v48  ;;  %v12401_v11 = vsel %vm2046_vm15, %v2080_v7, %v2082_v25  ;;  %v2812_v60 = vshll.u32 %v12198_v5, 16 }
 0x109   : > { %v2803_v16 = vrot.slane %v2801_v59, 1  ;;  %v2806_v40 = vrot.slane %v2804_v17, 2  ;;  %v3250_v33 = vrot.slane %v12219_v0, 2  ;;  %v3252_v58 = vrot.slane %v12221_v32, 2 }
 0x10a   : > { %v2811_v14 = vrot.slane %v2809_v3, 1  ;;  %v2814_v28 = vrot.slane %v2812_v60, 2  ;;  %v2818_v35 = vshrl.u32 %v12219_v0, 16  ;;  %v2821_v62 = vshll.u32 %v12219_v0, 16  ;;  %v12421_v3 = vld [vmem:[%s15943_s4 + $0x18] sm:$0xf] }
 0x10b   : > { %v2807_v7 = vor.u32 %v2806_v40, %v2803_v16  ;;  %v12411_v25 = vsel %vm3246_vm1, %v3248_v48, %v3250_v33  ;;  %v12414_v5 = vsel %vm3246_vm1, %v3250_v33, %v3252_v58  ;;  %v2827_v59 = vshrl.u32 %v12221_v32, 16 }
 0x10c   : > { %10554 = vmatmul.mubr.msk.bf16.gmra.mxu1 %vm1588_vm11, %v2498_v61  ;;  %v2815_v17 = vor.u32 %v2814_v28, %v2811_v14  ;;  %v2820_v0 = vrot.slane %v2818_v35, 1  ;;  %v2823_v60 = vrot.slane %v2821_v62, 2  ;;  %v2830_v61 = vshll.u32 %v12221_v32, 16 }
 0x10d   : > { %10557 = vmatprep.mubr.msk.bf16.mxu1 %vm1588_vm11, %v2500_v41  ;;  %v2829_v40 = vrot.slane %v2827_v59, 1  ;;  %v3254_v48 = vrot.slane %v12238_v15, 2  ;;  %v3256_v33 = vrot.slane %v12243_v54, 2  ;;  %v2836_v41 = vshrl.u32 %v12238_v15, 16 }
 0x10e   : > { %v12433_v35 = vsel %vm2799_vm2, %v2807_v7, %v2815_v17  ;;  %v2824_v14 = vor.u32 %v2823_v60, %v2820_v0  ;;  %v2832_v32 = vrot.slane %v2830_v61, 2  ;;  %v2839_v16 = vshll.u32 %v12238_v15, 16 }
 0x10f   : > { %10508 = vmatmul.mubr.msk.bf16.vlgmr.msra.gmra.mxu0 %vm1588_vm11, %v12270_v45  ;;  %v12439_v45 = vld [vmem:[%s15943_s4 + $0x1c] sm:$0xf]  ;;  %v2838_v28 = vrot.slane %v2836_v41, 1  ;;  %v2845_v62 = vshrl.u32 %v12243_v54, 16  ;;  %v2848_v0 = vshll.u32 %v12243_v54, 16  ;;  %v3260_v61 = vrot.slane %v12261_v50, 2 }
 0x110   : > { %10582 = vmatpush3.bf16.msra.mxu0 %v12228_v2  ;;  %10511 = vmatprep.mubr.msk.bf16.mxu0 %vm1588_vm11, %v12279_v19  ;;  %v12444_v2 = vsel %vm3246_vm1, %v3252_v58, %v3254_v48  ;;  %v12447_v19 = vsel %vm3246_vm1, %v3254_v48, %v3256_v33  ;;  %v12453_v15 = vsel %vm2799_vm2, %v2815_v17, %v2824_v14  ;;  %v2841_v59 = vrot.slane %v2839_v16, 2 }
 0x111   : > { %11173 = vmatprep.subr.msk.bf16.mxu0 %vm1643_vm10, %v12421_v3  ;;  %11174 = vmatprep.subr.msk.bf16.mxu1 %vm1643_vm10, %v12439_v45  ;;  %v2833_v7 = vor.u32 %v2832_v32, %v2829_v40  ;;  %v2847_v60 = vrot.slane %v2845_v62, 1  ;;  %v3258_v58 = vrot.slane %v12251_v47, 2  ;;  %v2854_v48 = vshrl.u32 %v12251_v47, 16 }
 0x112   : > { %v2842_v55 = vor.u32 %v2841_v59, %v2838_v28  ;;  %v2850_v56 = vrot.slane %v2848_v0, 2  ;;  %v2857_v42 = vshll.u32 %v12251_v47, 16  ;;  %v2863_v32 = vshrl.u32 %v12261_v50, 16 }
 0x113   : > { %v12460_v41 = vsel %vm2799_vm2, %v2824_v14, %v2833_v7  ;;  %v12466_v17 = vsel %vm3246_vm1, %v3256_v33, %v3258_v58  ;;  %v12469_v54 = vsel %vm3246_vm1, %v3258_v58, %v3260_v61  ;;  %v2856_v40 = vrot.slane %v2854_v48, 1 }
 0x114   : > { %10558 = vmatmul.mubr.msk.bf16.gmra.mxu1 %vm1588_vm11, %v12342_v13  ;;  %v12475_v14 = vsel %vm2799_vm2, %v2833_v7, %v2842_v55  ;;  %v2851_v16 = vor.u32 %v2850_v56, %v2847_v60  ;;  %v2859_v47 = vrot.slane %v2857_v42, 2  ;;  %v2866_v28 = vshll.u32 %v12261_v50, 16 }
 0x115   : > { %10561 = vmatprep.mubr.msk.bf16.mxu1 %vm1588_vm11, %v12348_v26  ;;  %v2865_v13 = vrot.slane %v2863_v32, 1  ;;  %v3262_v33 = vrot.slane %v12272_v27, 2  ;;  %v3264_v62 = vrot.slane %v12274_v43, 2  ;;  %v2872_v59 = vshrl.u32 %v12272_v27, 16 }
 0x116   : > { %v12486_v26 = vsel %vm2799_vm2, %v2842_v55, %v2851_v16  ;;  %v2860_v56 = vor.u32 %v2859_v47, %v2856_v40  ;;  %v2868_v42 = vrot.slane %v2866_v28, 2  ;;  %v2875_v50 = vshll.u32 %v12272_v27, 16 }
 0x117   : > { %10512 = vmatmul.mubr.msk.bf16.gmra.mxu0 %vm1588_vm11, %v12292_v18  ;;  %v12490_v7 = vsel %vm3246_vm1, %v3260_v61, %v3262_v33  ;;  %v12493_v18 = vsel %vm3246_vm1, %v3262_v33, %v3264_v62  ;;  %v2874_v0 = vrot.slane %v2872_v59, 1  ;;  %v2881_v60 = vshrl.u32 %v12274_v43, 16 }
 0x118   : > { %10515 = vmatprep.mubr.msk.bf16.mxu0 %vm1588_vm11, %v12295_v38  ;;  %v12497_v58 = vsel %vm2799_vm2, %v2851_v16, %v2860_v56  ;;  %v2869_v38 = vor.u32 %v2868_v42, %v2865_v13  ;;  %v2877_v48 = vrot.slane %v2875_v50, 2  ;;  %v2884_v55 = vshll.u32 %v12274_v43, 16 }
 0x119   : > { %v2883_v40 = vrot.slane %v2881_v60, 1  ;;  %v3266_v32 = vrot.slane %v12287_v23, 2  ;;  %v3268_v27 = vrot.slane %v12298_v53, 2  ;;  %v2890_v61 = vshrl.u32 %v12287_v23, 16 }
 0x11a   : > { %v12504_v47 = vsel %vm2799_vm2, %v2860_v56, %v2869_v38  ;;  %v2878_v28 = vor.u32 %v2877_v48, %v2874_v0  ;;  %v2886_v33 = vrot.slane %v2884_v55, 2  ;;  %v2893_v59 = vshll.u32 %v12287_v23, 16 }
 0x11b   : > { %v12510_v16 = vsel %vm3246_vm1, %v3264_v62, %v3266_v32  ;;  %v12513_v43 = vsel %vm3246_vm1, %v3266_v32, %v3268_v27  ;;  %v2892_v13 = vrot.slane %v2890_v61, 1  ;;  %v2899_v42 = vshrl.u32 %v12298_v53, 16 }
 0x11c   : > { %10562 = vmatmul.mubr.msk.bf16.gmra.mxu1 %vm1588_vm11, %v12351_v9  ;;  %v12519_v56 = vsel %vm2799_vm2, %v2869_v38, %v2878_v28  ;;  %v2887_v50 = vor.u32 %v2886_v33, %v2883_v40  ;;  %v2895_v23 = vrot.slane %v2893_v59, 2  ;;  %v2902_v0 = vshll.u32 %v12298_v53, 16 }
 0x11d   : > { %10565 = vmatprep.mubr.msk.bf16.mxu1 %vm1588_vm11, %v12361_v6  ;;  %v2901_v9 = vrot.slane %v2899_v42, 1  ;;  %v3270_v62 = vrot.slane %v12300_v24, 2  ;;  %v3272_v60 = vrot.slane %v12309_v31, 2  ;;  %v2908_v48 = vshrl.u32 %v12300_v24, 16  ;;  %v12544_v42 = vld [vmem:[#allocation2 + $0x90] sm:$0xff]  }
 0x11e   : > { %v12530_v6 = vsel %vm2799_vm2, %v2878_v28, %v2887_v50  ;;  %v2896_v38 = vor.u32 %v2895_v23, %v2892_v13  ;;  %v2904_v55 = vrot.slane %v2902_v0, 2  ;;  %v2911_v53 = vshll.u32 %v12300_v24, 16  ;;  %v11224_v13 = vld [vmem:[#allocation2 + $0x88] sm:$0xff]  }
 0x11f   : > { %10516 = vmatmul.mubr.msk.bf16.gmra.mxu0 %vm1588_vm11, %v12331_v30  ;;  %v12534_v40 = vsel %vm3246_vm1, %v3268_v27, %v3270_v62  ;;  %v12537_v30 = vsel %vm3246_vm1, %v3270_v62, %v3272_v60  ;;  %v2910_v32 = vrot.slane %v2908_v48, 1  ;;  %v2917_v61 = vshrl.u32 %v12309_v31, 16 }
 0x120   : > { %10519 = vmatprep.mubr.msk.bf16.mxu0 %vm1588_vm11, %v12339_v49  ;;  %v12541_v33 = vsel %vm2799_vm2, %v2887_v50, %v2896_v38  ;;  %v2905_v49 = vor.u32 %v2904_v55, %v2901_v9  ;;  %v2913_v59 = vrot.slane %v2911_v53, 2  ;;  %v2920_v28 = vshll.u32 %v12309_v31, 16 }
 0x121   : > { %v2919_v24 = vrot.slane %v2917_v61, 1  ;;  %v3274_v27 = vrot.slane %v12356_v51, 2  ;;  %v3276_v23 = vrot.slane %v12384_v1, 2  ;;  %v2926_v0 = vshrl.u32 %v12356_v51, 16 }
 0x122   : > { %v12550_v62 = vsel %vm2799_vm2, %v2896_v38, %v2905_v49  ;;  %v2914_v48 = vor.u32 %v2913_v59, %v2910_v32  ;;  %v2922_v50 = vrot.slane %v2920_v28, 2  ;;  %v2929_v9 = vshll.u32 %v12356_v51, 16 }
 0x123   : > { %v12556_v55 = vsel %vm3246_vm1, %v3272_v60, %v3274_v27  ;;  %v12559_v53 = vsel %vm3246_vm1, %v3274_v27, %v3276_v23  ;;  %v2928_v61 = vrot.slane %v2926_v0, 1  ;;  %v2935_v44 = vshrl.u32 %v12384_v1, 16 }
 0x124   : > { %10566 = vmatmul.mubr.msk.bf16.gmra.mxu1 %vm1588_vm11, %v12364_v4  ;;  %v12565_v38 = vsel %vm2799_vm2, %v2905_v49, %v2914_v48  ;;  %v2923_v32 = vor.u32 %v2922_v50, %v2919_v24  ;;  %v2931_v59 = vrot.slane %v2929_v9, 2  ;;  %v2938_v28 = vshll.u32 %v12384_v1, 16 }
 0x125   : > { %10569 = vmatprep.mubr.msk.bf16.mxu1 %vm1588_vm11, %v12376_v39  ;;  %v2937_v4 = vrot.slane %v2935_v44, 1  ;;  %v3278_v60 = vrot.slane %v11224_v13, 2  ;;  %v15989_v27 = vrot.slane %v12544_v42, 2  ;;  %v2944_v0 = vshrl.u32 %v11224_v13, 16 }
 0x126   : > { %v12574_v39 = vsel %vm2799_vm2, %v2914_v48, %v2923_v32  ;;  %v2932_v49 = vor.u32 %v2931_v59, %v2928_v61  ;;  %v2940_v29 = vrot.slane %v2938_v28, 2  ;;  %v2947_v24 = vshll.u32 %v11224_v13, 16 }
 0x127   : > { %10520 = vmatmul.mubr.msk.bf16.gmra.mxu0 %vm1588_vm11, %v12306_v22  ;;  %v12577_v50 = vsel %vm3246_vm1, %v3276_v23, %v3278_v60  ;;  %v12582_v44 = vsel %vm3246_vm1, %v3278_v60, %v15989_v27  ;;  %v2946_v22 = vrot.slane %v2944_v0, 1  ;;  %v2953_v9 = vshrl.u32 %v12544_v42, 16 }
 0x128   : > { %10523 = vmatprep.mubr.msk.bf16.mxu0 %vm1588_vm11, %v12318_v57  ;;  %v12586_v37 = vsel %vm2799_vm2, %v2923_v32, %v2932_v49  ;;  %v2941_v57 = vor.u32 %v2940_v29, %v2937_v4  ;;  %v2949_v48 = vrot.slane %v2947_v24, 2  ;;  %v2956_v61 = vshll.u32 %v12544_v42, 16 }
 0x129   : > { %v2955_v59 = vrot.slane %v2953_v9, 1  ;;  %v16042_v28 = vrot.slane %v12356_v51, 1  ;;  %v16043_v23 = vrot.slane %v12309_v31, 1  ;;  %v16044_v32 = vrot.slane %v12384_v1, 1 }
 0x12a   : > { %v12595_v60 = vsel %vm2799_vm2, %v2932_v49, %v2941_v57  ;;  %v2950_v0 = vor.u32 %v2949_v48, %v2946_v22  ;;  %v2958_v27 = vrot.slane %v2956_v61, 2  ;;  %v2519_v51 = vrot.slane %v12544_v42, 1  ;;  %v12681_v61 = vld [vmem:[#allocation2 + $0x60] sm:$0xff]  }
 0x12b   : > { %v2514_v34 = vsel %vm2046_vm15, %v16043_v23, %v16042_v28  ;;  %v16045_v29 = vmov %v16042_v28  ;;  %v16046_v22 = vmov %v16044_v32  ;;  %v3778_v48 = vsel %vm1643_vm10, %v12421_v3, 0  ;;  %v12685_v28 = vld [vmem:[#allocation2 + $0x70] sm:$0xff]   ;;  %v12694_v3 = vld [vmem:[%s15943_s4 + $0x20] sm:$0xf] }
 0x12c   : > { %10570 = vmatmul.mubr.msk.bf16.gmra.mxu1 %vm1588_vm11, %v2514_v34  ;;  %v2516_v4 = vsel %vm2046_vm15, %v16045_v29, %v16044_v32  ;;  %v12605_v24 = vsel %vm2799_vm2, %v2941_v57, %v2950_v0  ;;  %v12607_v31 = vor.u32 %v2958_v27, %v2955_v59  ;;  %v2517_v34 = vrot.slane %v11224_v13, 1  ;;  %v11226_v57 = vld [vmem:[#allocation2 + $0x98] ss:$0 sps:$4 sm:$0x11]   ;;  %v12683_v59 = vld [vmem:[#allocation2 + $0x68] sm:$0xff]  }
 0x12d   : > { %10573 = vmatprep.mubr.msk.bf16.mxu1 %vm1588_vm11, %v2516_v4  ;;  %v12696_v32 = vld [vmem:[#allocation2 + $0x78] sm:$0xff]   ;;  %vm406_vm6 = vcmask 517120  }
 0x12e   : > { %v12615_v49 = vsel %vm2799_vm2, %v2950_v0, %v12607_v31  ;;  %v2518_v9 = vsel %vm2046_vm15, %v16046_v22, %v2517_v34  ;;  %v2520_v27 = vsel %vm2046_vm15, %v2517_v34, %v2519_v51  ;;  %vm13358_vm7 = vmand %vm406_vm6, %vm387_vm3  ;;  %vm4869_vm3 = vcmask 523264  }
 0x12f   : > { %10524 = vmatmul.mubr.msk.bf16.gmra.mxu0 %vm1588_vm11, %v12324_v52  ;;  %v2521_v52 = vrot.slane %v11226_v57, 1 }
 0x130   : > { %10527 = vmatprep.mubr.msk.bf16.mxu0 %vm1588_vm11, %v12327_v12 }
 0x131   : > { %v2522_v12 = vsel %vm2046_vm15, %v2519_v51, %v2521_v52  ;;  %v12723_v52 = vld [vmem:[#allocation2 + $0x98] sm:$0xff]  }
 0x134   : > { %10574 = vmatmul.mubr.msk.bf16.gmra.mxu1 %vm1588_vm11, %v2518_v9 }
 0x135   : > { %10577 = vmatprep.mubr.msk.bf16.mxu1 %vm1588_vm11, %v2520_v27  ;;  %v12721_v27 = vld [vmem:[#allocation2 + $0x90] sm:$0xff]  }
 0x137   : > { %10528 = vmatmul.mubr.msk.bf16.gmra.mxu0 %vm1588_vm11, %v12335_v10  ;;  %v4225_v10 = vsel %vm1643_vm10, %v12439_v45, 0  ;;  %v12671_v45 = vld [vmem:[#allocation2 + $0x50] sm:$0xff]  }
 0x138   : > { %10531 = vmatprep.mubr.msk.bf16.mxu0 %vm1588_vm11, %v12354_v21  ;;  %v4440_v21 = vld [vmem:[#allocation2 + $0x10] sm:$0x8] }
 0x13c   : > { %10578 = vmatmul.mubr.msk.bf16.gmra.mxu1 %vm1588_vm11, %v2522_v12 }
 0x13d   : > { %10621 = vmatprep.mubr.msk.bf16.mxu1 %vm1588_vm11, %v12398_v63  ;;  %v12663_v63 = vld [vmem:[#allocation2 + $0x30] sm:$0xff]  }
 0x13e   : > { %v4454_v0 = vrot.slane %v12663_v63, 3 }
 0x13f   : > { %10532 = vmatmul.mubr.msk.bf16.gmra.mxu0 %vm1588_vm11, %v12367_v36  ;;  %v12652_v36 = vld [vmem:[#allocation2 + $0x14] sm:$0xf] }
 0x140   : > { %10535 = vmatprep.mubr.msk.bf16.mxu0 %vm1588_vm11, %v12370_v20  ;;  %v12656_v20 = vld [vmem:[#allocation2 + $0x18] sm:$0xff]   ;;  %v9605_v1 = vcombine.low %v4440_v21, %v12652_v36 }
 0x144   : > { %10622 = vmatmul.mubr.msk.bf16.vlgmr.msra.gmra.mxu1 %vm1588_vm11, %v12411_v25  ;;  %v12665_v25 = vld [vmem:[#allocation2 + $0x38] sm:$0xff]  }
 0x145   : > { %10625 = vmatprep.mubr.msk.bf16.mxu1 %vm1588_vm11, %v12414_v5  ;;  %10696 = vmatpush3.bf16.msra.mxu1 %v4225_v10  ;;  %v12667_v5 = vld [vmem:[#allocation2 + $0x40] sm:$0xff]   ;;  %v4456_v34 = vrot.slane %v12665_v25, 3  ;;  %v4462_v10 = vrot.slane %v12671_v45, 3 }
 0x146   : > { %v4458_v51 = vrot.slane %v12667_v5, 3 }
 0x147   : > { %10536 = vmatmul.mubr.msk.bf16.gmra.mxu0 %vm1588_vm11, %v12379_v8  ;;  %v12658_v8 = vld [vmem:[#allocation2 + $0x20] sm:$0xff]  }
 0x148   : > { %10539 = vmatprep.mubr.msk.bf16.mxu0 %vm1588_vm11, %v12393_v46  ;;  %v12661_v46 = vld [vmem:[#allocation2 + $0x28] sm:$0xff]   ;;  %v4450_v13 = vrot.slane %v12658_v8, 3  ;;  %v12729_v12 = vsel %vm4446_vm4, %v4456_v34, %v4458_v51 }
 0x149   : > { %v4452_v23 = vrot.slane %v12661_v46, 3  ;;  %16051 = vst [vmem:[#allocation46_spill] sm:$0xff] %v12729_v12 }
 0x14b   : > { %v12713_v22 = vsel %vm4446_vm4, %v4450_v13, %v4452_v23  ;;  %v12716_v9 = vsel %vm4446_vm4, %v4452_v23, %v4454_v0 }
 0x14c   : > { %10626 = vmatmul.mubr.msk.bf16.gmra.mxu1 %vm1588_vm11, %v12444_v2  ;;  %v4447_v2 = vrot.slane %v9605_v1, 3  ;;  %16048 = vst [vmem:[#allocation43_spill] sm:$0xff] %v12713_v22  ;;  %16049 = vst [vmem:[#allocation44_spill] sm:$0xff] %v12716_v9  ;;  %v12735_v1 = vld [vmem:[#allocation2 + $0xa0] ss:$0 sps:$4 sm:$0x77]  }
 0x14d   : > { %10629 = vmatprep.mubr.msk.bf16.mxu1 %vm1588_vm11, %v12447_v19  ;;  %v4448_v19 = vrot.slane %v12656_v20, 3 }
 0x14f   : > { %10540 = vmatmul.mubr.msk.bf16.gmra.mxu0 %vm1588_vm11, %v12401_v11  ;;  %v12669_v11 = vld [vmem:[#allocation2 + $0x48] sm:$0xff]   ;;  %v12701_v29 = vsel %vm4446_vm4, %v4447_v2, %v4448_v19  ;;  %v12704_v4 = vsel %vm4446_vm4, %v4448_v19, %v4450_v13  ;;  %v4466_v2 = vrot.slane %v12681_v61, 3  ;;  %v4468_v19 = vrot.slane %v12683_v59, 3 }
 0x150   : > { %10583 = vmatprep.mubr.msk.bf16.mxu0 %vm1588_vm11, %v12433_v35  ;;  %v12673_v35 = vld [vmem:[#allocation2 + $0x58] sm:$0xff]   ;;  %16047 = vst [vmem:[#allocation42_spill] sm:$0xff] %v12704_v4  ;;  %v4460_v57 = vrot.slane %v12669_v11, 3  ;;  %v4470_v13 = vrot.slane %v12685_v28, 3 }
 0x151   : > { %v4464_v21 = vrot.slane %v12673_v35, 3 }
 0x153   : > { %v12747_v23 = vsel %vm4446_vm4, %v4462_v10, %v4464_v21  ;;  %v12752_v12 = vsel %vm4446_vm4, %v4464_v21, %v4466_v2 }
 0x154   : > { %10630 = vmatmul.mubr.msk.bf16.gmra.mxu1 %vm1588_vm11, %v12466_v17  ;;  %v12698_v17 = vld [vmem:[#allocation2 + $0x80] sm:$0xff]   ;;  %16054 = vst [vmem:[#allocation49_spill] sm:$0xff] %v12747_v23  ;;  %16055 = vst [vmem:[#allocation50_spill] sm:$0xff] %v12752_v12  ;;  %v4478_v23 = vrot.slane %v12721_v27, 3 }
 0x155   : > { %10633 = vmatprep.mubr.msk.bf16.mxu1 %vm1588_vm11, %v12469_v54  ;;  %v12710_v54 = vld [vmem:[#allocation2 + $0x88] sm:$0xff]  }
 0x157   : > { %10584 = vmatmul.mubr.msk.bf16.vlgmr.msra.gmra.mxu0 %vm1588_vm11, %v12453_v15  ;;  %v12726_v15 = vsel %vm4446_vm4, %v4454_v0, %v4456_v34  ;;  %v4472_v0 = vrot.slane %v12696_v32, 3  ;;  %v4474_v34 = vrot.slane %v12698_v17, 3 }
 0x158   : > { %10658 = vmatpush3.bf16.msra.mxu0 %v3778_v48  ;;  %10587 = vmatprep.mubr.msk.bf16.mxu0 %vm1588_vm11, %v12460_v41  ;;  %16050 = vst [vmem:[#allocation45_spill] sm:$0xff] %v12726_v15  ;;  %v12738_v41 = vsel %vm4446_vm4, %v4458_v51, %v4460_v57  ;;  %v12744_v48 = vsel %vm4446_vm4, %v4460_v57, %v4462_v10  ;;  %v4476_v15 = vrot.slane %v12710_v54, 3 }
 0x159   : > { %11175 = vmatprep.subr.msk.bf16.mxu0 %vm1643_vm10, %v12694_v3  ;;  %16052 = vst [vmem:[#allocation47_spill] sm:$0xff] %v12738_v41  ;;  %16053 = vst [vmem:[#allocation48_spill] sm:$0xff] %v12744_v48  ;;  %v12755_v51 = vsel %vm4446_vm4, %v4466_v2, %v4468_v19  ;;  %v12758_v41 = vsel %vm4446_vm4, %v4468_v19, %v4470_v13  ;;  %v12762_v57 = vsel %vm4446_vm4, %v4470_v13, %v4472_v0 }
 0x15a   : > { %16056 = vst [vmem:[#allocation51_spill] sm:$0xff] %v12755_v51  ;;  %16057 = vst [vmem:[#allocation52_spill] sm:$0xff] %v12758_v41  ;;  %v12765_v10 = vsel %vm4446_vm4, %v4472_v0, %v4474_v34  ;;  %v4480_v48 = vrot.slane %v12723_v52, 3  ;;  %v12772_v21 = vsel %vm4446_vm4, %v4474_v34, %v4476_v15  ;;  %v4482_v2 = vrot.slane %v12735_v1, 3 }
 0x15b   : > { %16058 = vst [vmem:[#allocation53_spill] sm:$0xff] %v12762_v57  ;;  %16059 = vst [vmem:[#allocation54_spill] sm:$0xff] %v12765_v10  ;;  %v12778_v19 = vsel %vm4446_vm4, %v4476_v15, %v4478_v23 }
 0x15c   : > { %10634 = vmatmul.mubr.msk.bf16.gmra.mxu1 %vm1588_vm11, %v12490_v7  ;;  %16060 = vst [vmem:[#allocation55_spill] sm:$0xff] %v12772_v21  ;;  %16061 = vst [vmem:[#allocation56_spill] sm:$0xff] %v12778_v19  ;;  %v12781_v13 = vsel %vm4446_vm4, %v4478_v23, %v4480_v48  ;;  %v12786_v0 = vsel %vm4446_vm4, %v4480_v48, %v4482_v2  ;;  %v4009_v23 = vshrl.u32 %v12656_v20, 16 }
 0x15d   : > { %10637 = vmatprep.mubr.msk.bf16.mxu1 %vm1588_vm11, %v12493_v18  ;;  %16062 = vst [vmem:[#allocation57_spill] sm:$0xff] %v12781_v13  ;;  %16063 = vst [vmem:[#allocation58_spill] sm:$0xff] %v12786_v0  ;;  %v12835_v0 = vld [vmem:[#allocation2 + $0x98] ss:$0 sps:$4 sm:$0x33]  }
 0x15e   : > { %v4011_v13 = vrot.slane %v4009_v23, 2  ;;  %v3282_v23 = vrot.slane %v12835_v0, 2 }
 0x15f   : > { %10588 = vmatmul.mubr.msk.bf16.gmra.mxu0 %vm1588_vm11, %v12475_v14 }
 0x160   : > { %10591 = vmatprep.mubr.msk.bf16.mxu0 %vm1588_vm11, %v12486_v26 }
 0x162   : > { %v10471_v7 = vpop.f32.mrf.mxu1 }
 0x164   : > { %10638 = vmatmul.mubr.msk.bf16.gmra.mxu1 %vm1588_vm11, %v12510_v16  ;;  %v1897_v18 = vpop.f32.mrf.mxu1 }
 0x165   : > { %10641 = vmatprep.mubr.msk.bf16.mxu1 %vm1588_vm11, %v12513_v43 }
 0x166   : > { %v10472_v15 = vpop.f32.mrf.mxu1 }
 0x167   : > { %10592 = vmatmul.mubr.msk.bf16.gmra.mxu0 %vm1588_vm11, %v12497_v58 }
 0x168   : > { %10595 = vmatprep.mubr.msk.bf16.mxu0 %vm1588_vm11, %v12504_v47  ;;  %v1900_v14 = vpop.f32.mrf.mxu1  ;;  %v3554_v47 = vld [vmem:[#allocation2 + $0x10] sm:$0xc] }
 0x16a   : > { %v10475_v48 = vpop.f32.mrf.mxu1 }
 0x16c   : > { %10642 = vmatmul.mubr.msk.bf16.gmra.mxu1 %vm1588_vm11, %v12534_v40  ;;  %v1913_v26 = vpop.f32.mrf.mxu1 }
 0x16d   : > { %10645 = vmatprep.mubr.msk.bf16.mxu1 %vm1588_vm11, %v12537_v30 }
 0x16e   : > { %v10476_v16 = vpop.f32.mrf.mxu1 }
 0x16f   : > { %10596 = vmatmul.mubr.msk.bf16.gmra.mxu0 %vm1588_vm11, %v12519_v56  ;;  %v12819_v56 = vcombine.low %v3554_v47, %v12652_v36 }
 0x170   : > { %10599 = vmatprep.mubr.msk.bf16.mxu0 %vm1588_vm11, %v12530_v6  ;;  %v12806_v58 = vpop.f32.mrf.mxu1 }
 0x171   : > { %v4004_v36 = vshll.u32 %v12819_v56, 16 }
 0x172   : > { %v12808_v43 = vpop.f32.mrf.mxu1 }
 0x174   : > { %10646 = vmatmul.mubr.msk.bf16.gmra.mxu1 %vm1588_vm11, %v12556_v55  ;;  %v12812_v40 = vpop.f32.mrf.mxu1  ;;  %v4012_v55 = vshll.u32 %v12656_v20, 16 }
 0x175   : > { %10649 = vmatprep.mubr.msk.bf16.mxu1 %vm1588_vm11, %v12559_v53 }
 0x176   : > { %v12821_v6 = vpop.f32.mrf.mxu1  ;;  %v4014_v19 = vrot.slane %v4012_v55, 3  ;;  %v4018_v55 = vshrl.u32 %v12658_v8, 16 }
 0x177   : > { %10600 = vmatmul.mubr.msk.bf16.gmra.mxu0 %vm1588_vm11, %v12541_v33  ;;  %v4001_v33 = vshrl.u32 %v12819_v56, 16 }
 0x178   : > { %10603 = vmatprep.mubr.msk.bf16.mxu0 %vm1588_vm11, %v12550_v62  ;;  %v10433_v30 = vpop.f32.mrf.mxu0  ;;  %v12827_v34 = vpop.f32.mrf.mxu1  ;;  %v4020_v51 = vrot.slane %v4018_v55, 2 }
 0x179   : > { %v12829_v2 = vadd.f32 %v10471_v7, %v10433_v30  ;;  %v4003_v30 = vrot.slane %v4001_v33, 2 }
 0x17a   : > { %v1681_v53 = vpop.f32.mrf.mxu0 }
 0x17b   : > { %v12833_v47 = vadd.f32 %v1897_v18, %v1681_v53  ;;  %v12839_v21 = vpop.f32.mrf.mxu1  ;;  %v4006_v53 = vrot.slane %v4004_v36, 3 }
 0x17c   : > { %10650 = vmatmul.mubr.msk.bf16.gmra.mxu1 %vm1588_vm11, %v12577_v50  ;;  %v10434_v62 = vpop.f32.mrf.mxu0 }
 0x17d   : > { %10653 = vmatprep.mubr.msk.bf16.mxu1 %vm1588_vm11, %v12582_v44  ;;  %v12843_v7 = vadd.f32 %v10472_v15, %v10434_v62  ;;  %v12847_v10 = vpop.f32.mrf.mxu1  ;;  %v4021_v44 = vshll.u32 %v12658_v8, 16  ;;  %v4015_v15 = vor.u32 %v4014_v19, %v4011_v13  ;;  %v4027_v62 = vshrl.u32 %v12661_v46, 16 }
 0x17e   : > { %v1684_v18 = vpop.f32.mrf.mxu0  ;;  %v4007_v57 = vor.u32 %v4006_v53, %v4003_v30 }
 0x17f   : > { %10604 = vmatmul.mubr.msk.bf16.gmra.mxu0 %vm1588_vm11, %v12565_v38  ;;  %v12851_v50 = vadd.f32 %v1900_v14, %v1684_v18  ;;  %v4030_v38 = vshll.u32 %v12661_v46, 16  ;;  %v12858_v33 = vpop.f32.mrf.mxu1  ;;  %v16064_v14 = vrot.slane %v12544_v42, 2  ;;  %v4023_v12 = vrot.slane %v4021_v44, 3 }
 0x180   : > { %10607 = vmatprep.mubr.msk.bf16.mxu0 %vm1588_vm11, %v12574_v39  ;;  %v4016_v13 = vsel %vm3999_vm5, %v4007_v57, %v4015_v15  ;;  %v4029_v9 = vrot.slane %v4027_v62, 2  ;;  %v4036_v57 = vshrl.u32 %v12663_v63, 16  ;;  %v4045_v44 = vshrl.u32 %v12665_v25, 16 }
 0x181   : > { %v12860_v41 = vpop.f32.mrf.mxu1  ;;  %v3283_v18 = vsel %vm3246_vm1, %v16064_v14, %v3282_v23  ;;  %v4032_v22 = vrot.slane %v4030_v38, 3  ;;  %v4024_v53 = vor.u32 %v4023_v12, %v4020_v51  ;;  %v4039_v23 = vshll.u32 %v12663_v63, 16 }
 0x182   : > { %v10437_v36 = vpop.f32.mrf.mxu0  ;;  %v4048_v62 = vshll.u32 %v12665_v25, 16  ;;  %v4038_v51 = vrot.slane %v4036_v57, 2 }
 0x183   : > { %v12862_v39 = vadd.f32 %v10475_v48, %v10437_v36  ;;  %v4033_v55 = vor.u32 %v4032_v22, %v4029_v9  ;;  %v4025_v12 = vsel %vm3999_vm5, %v4015_v15, %v4024_v53  ;;  %v4041_v36 = vrot.slane %v4039_v23, 3 }
 0x184   : > { %10654 = vmatmul.mubr.msk.bf16.gmra.mxu1 %vm1588_vm11, %v3283_v18  ;;  %v1697_v19 = vpop.f32.mrf.mxu0  ;;  %v4047_v9 = vrot.slane %v4045_v44, 2  ;;  %v4050_v18 = vrot.slane %v4048_v62, 3  ;;  %v4057_v23 = vshll.u32 %v12667_v5, 16 }
 0x185   : > { %v12869_v4 = vadd.f32 %v1913_v26, %v1697_v19  ;;  %10697 = vmatprep.mubr.msk.bf16.mxu1 %vm1588_vm11, %v4016_v13  ;;  %v4034_v22 = vsel %vm3999_vm5, %v4024_v53, %v4033_v55  ;;  %v4054_v53 = vshrl.u32 %v12667_v5, 16 }
 0x186   : > { %v10438_v48 = vpop.f32.mrf.mxu0  ;;  %v12874_v42 = vpop.f32.mrf.mxu1  ;;  %v4051_v44 = vor.u32 %v4050_v18, %v4047_v9  ;;  %v4059_v9 = vrot.slane %v4057_v23, 3  ;;  %v4084_v23 = vshll.u32 %v12673_v35, 16 }
 0x187   : > { %10608 = vmatmul.mubr.msk.bf16.gmra.mxu0 %vm1588_vm11, %v12586_v37  ;;  %v12878_v30 = vadd.f32 %v10476_v16, %v10438_v48  ;;  %v2965_v16 = vshll.u32 %v12835_v0, 16  ;;  %v4042_v48 = vor.u32 %v4041_v36, %v4038_v51 }
 0x188   : > { %10611 = vmatprep.mubr.msk.bf16.mxu0 %vm1588_vm11, %v12595_v60  ;;  %v1700_v26 = vpop.f32.mrf.mxu0  ;;  %v12884_v37 = vpop.f32.mrf.mxu1  ;;  %v2962_v60 = vshrl.u32 %v12835_v0, 16 }
 0x189   : > { %v12887_v38 = vadd.f32 %v12806_v58, %v1700_v26  ;;  %v2967_v58 = vrot.slane %v2965_v16, 2  ;;  %v4043_v36 = vsel %vm3999_vm5, %v4033_v55, %v4042_v48 }
 0x18a   : > { %v12892_v14 = vpop.f32.mrf.mxu1  ;;  %v2964_v13 = vrot.slane %v2962_v60, 1 }
 0x18c   : > { %10698 = vmatmul.mubr.msk.bf16.vlgmr.msra.gmra.mxu1 %vm1588_vm11, %v4025_v12  ;;  %v12904_v57 = vpop.f32.mrf.mxu1  ;;  %v2968_v62 = vor.u32 %v2967_v58, %v2964_v13  ;;  %v3686_v12 = vrot.slane %v12819_v56, 2 }
 0x18d   : > { %10701 = vmatprep.mubr.msk.bf16.mxu1 %vm1588_vm11, %v4034_v22 }
 0x18e   : > { %v10441_v19 = vpop.f32.mrf.mxu0 }
 0x18f   : > { %10612 = vmatmul.mubr.msk.bf16.gmra.mxu0 %vm1588_vm11, %v12605_v24  ;;  %v12900_v0 = vadd.f32 %v12808_v43, %v10441_v19  ;;  %v4063_v24 = vshrl.u32 %v12669_v11, 16  ;;  %v4066_v43 = vshll.u32 %v12669_v11, 16  ;;  %v4052_v19 = vsel %vm3999_vm5, %v4042_v48, %v4051_v44 }
 0x190   : > { %10615 = vmatprep.mubr.msk.bf16.mxu0 %vm1588_vm11, %v12615_v49  ;;  %v1713_v15 = vpop.f32.mrf.mxu0  ;;  %v3687_v49 = vrot.slane %v12656_v20, 2  ;;  %v4075_v48 = vshll.u32 %v12671_v45, 16 }
 0x191   : > { %v12909_v26 = vadd.f32 %v12812_v40, %v1713_v15  ;;  %v4056_v40 = vrot.slane %v4054_v53, 2  ;;  %v4065_v20 = vrot.slane %v4063_v24, 2  ;;  %v4068_v13 = vrot.slane %v4066_v43, 3 }
 0x192   : > { %v10442_v60 = vpop.f32.mrf.mxu0  ;;  %v12919_v22 = vpop.f32.mrf.mxu1  ;;  %v3688_v55 = vsel %vm3246_vm1, %v3686_v12, %v3687_v49  ;;  %v4072_v15 = vshrl.u32 %v12671_v45, 16  ;;  %v3689_v43 = vrot.slane %v12658_v8, 2  ;;  %v3691_v12 = vrot.slane %v12661_v46, 2 }
 0x193   : > { %v12915_v16 = vadd.f32 %v12821_v6, %v10442_v60  ;;  %v2969_v6 = vsel %vm2799_vm2, %v12607_v31, %v2968_v62  ;;  %v4069_v53 = vor.u32 %v4068_v13, %v4065_v20  ;;  %v4081_v31 = vshrl.u32 %v12673_v35, 16 }
 0x194   : > { %v1716_v51 = vpop.f32.mrf.mxu0  ;;  %10702 = vmatmul.mubr.msk.bf16.gmra.mxu1 %vm1588_vm11, %v4043_v36  ;;  %v12929_v56 = vpop.f32.mrf.mxu1 }
 0x195   : > { %v12922_v18 = vadd.f32 %v12827_v34, %v1716_v51  ;;  %10705 = vmatprep.mubr.msk.bf16.mxu1 %vm1588_vm11, %v4052_v19  ;;  %v4060_v34 = vor.u32 %v4059_v9, %v4056_v40  ;;  %v4539_v51 = vsel %vm1643_vm10, %v12694_v3, 0  ;;  %v4074_v9 = vrot.slane %v4072_v15, 2 }
 0x196   : > { %v12934_v58 = vpop.f32.mrf.mxu1  ;;  %v4077_v19 = vrot.slane %v4075_v48, 3  ;;  %v4083_v13 = vrot.slane %v4081_v31, 2  ;;  %v4093_v48 = vshll.u32 %v12681_v61, 16 }
 0x197   : > { %10616 = vmatmul.mubr.msk.bf16.gmra.mxu0 %vm1588_vm11, %v2969_v6  ;;  %v4061_v40 = vsel %vm3999_vm5, %v4051_v44, %v4060_v34  ;;  %v4070_v8 = vsel %vm3999_vm5, %v4060_v34, %v4069_v53  ;;  %v3690_v6 = vsel %vm3246_vm1, %v3687_v49, %v3689_v43  ;;  %v3692_v44 = vsel %vm3246_vm1, %v3689_v43, %v3691_v12 }
 0x198   : > { %10659 = vmatprep.mubr.msk.bf16.mxu0 %vm1588_vm11, %v3688_v55  ;;  %v12941_v62 = vpop.f32.mrf.mxu1  ;;  %v4078_v34 = vor.u32 %v4077_v19, %v4074_v9  ;;  %v4090_v49 = vshrl.u32 %v12681_v61, 16  ;;  %v3693_v43 = vrot.slane %v12663_v63, 2  ;;  %v4095_v19 = vrot.slane %v4093_v48, 3 }
 0x199   : > { %v4120_v48 = vshll.u32 %v12696_v32, 16 }
 0x19a   : > { %v4092_v9 = vrot.slane %v4090_v49, 2  ;;  %v4117_v49 = vshrl.u32 %v12696_v32, 16 }
 0x19b   : > { %v10445_v24 = vpop.f32.mrf.mxu0 }
 0x19c   : > { %v12944_v60 = vadd.f32 %v12839_v21, %v10445_v24  ;;  %10706 = vmatmul.mubr.msk.bf16.gmra.mxu1 %vm1588_vm11, %v4061_v40  ;;  %v4086_v21 = vrot.slane %v4084_v23, 3  ;;  %v4099_v24 = vshrl.u32 %v12683_v59, 16  ;;  %v4079_v40 = vsel %vm3999_vm5, %v4069_v53, %v4078_v34 }
 0x19d   : > { %v1729_v36 = vpop.f32.mrf.mxu0  ;;  %10709 = vmatprep.mubr.msk.bf16.mxu1 %vm1588_vm11, %v4070_v8  ;;  %v12957_v3 = vpop.f32.mrf.mxu1 }
 0x19e   : > { %v12951_v20 = vadd.f32 %v12847_v10, %v1729_v36  ;;  %v4087_v23 = vor.u32 %v4086_v21, %v4083_v13  ;;  %v4101_v8 = vrot.slane %v4099_v24, 2  ;;  %v3694_v21 = vsel %vm3246_vm1, %v3691_v12, %v3693_v43 }
 0x19f   : > { %v10446_v46 = vpop.f32.mrf.mxu0  ;;  %10660 = vmatmul.mubr.msk.bf16.vlgmr.msra.gmra.mxu0 %vm1588_vm11, %v3690_v6  ;;  %v12965_v15 = vpop.f32.mrf.mxu1 }
 0x1a0   : > { %v12962_v10 = vadd.f32 %v12858_v33, %v10446_v46  ;;  %10734 = vmatpush3.bf16.msra.mxu0 %v4539_v51  ;;  %10663 = vmatprep.mubr.msk.bf16.mxu0 %vm1588_vm11, %v3692_v44  ;;  %v4102_v33 = vshll.u32 %v12683_v59, 16  ;;  %v3695_v51 = vrot.slane %v12665_v25, 2  ;;  %v4096_v46 = vor.u32 %v4095_v19, %v4092_v9 }
 0x1a1   : > { %v1732_v55 = vpop.f32.mrf.mxu0  ;;  %v12976_v36 = vpop.f32.mrf.mxu1  ;;  %v4108_v44 = vshrl.u32 %v12685_v28, 16 }
 0x1a2   : > { %v12970_v31 = vadd.f32 %v12860_v41, %v1732_v55  ;;  %v4088_v41 = vsel %vm3999_vm5, %v4078_v34, %v4087_v23  ;;  %v4104_v13 = vrot.slane %v4102_v33, 3  ;;  %v3696_v63 = vsel %vm3246_vm1, %v3693_v43, %v3695_v51 }
 0x1a3   : > { %v12985_v25 = vpop.f32.mrf.mxu1  ;;  %v4111_v55 = vshll.u32 %v12685_v28, 16  ;;  %v3697_v33 = vrot.slane %v12667_v5, 2  ;;  %v3699_v43 = vrot.slane %v12669_v11, 2  ;;  %v4097_v19 = vsel %vm3999_vm5, %v4087_v23, %v4096_v46 }
 0x1a4   : > { %10710 = vmatmul.mubr.msk.bf16.gmra.mxu1 %vm1588_vm11, %v4079_v40  ;;  %v4105_v34 = vor.u32 %v4104_v13, %v4101_v8  ;;  %v4119_v5 = vrot.slane %v4117_v49, 2 }
 0x1a5   : > { %10713 = vmatprep.mubr.msk.bf16.mxu1 %vm1588_vm11, %v4088_v41  ;;  %v4110_v41 = vrot.slane %v4108_v44, 2  ;;  %v4113_v8 = vrot.slane %v4111_v55, 3  ;;  %v3700_v23 = vsel %vm3246_vm1, %v3697_v33, %v3699_v43 }
 0x1a7   : > { %v10449_v6 = vpop.f32.mrf.mxu0  ;;  %10664 = vmatmul.mubr.msk.bf16.gmra.mxu0 %vm1588_vm11, %v3694_v21  ;;  %v4114_v55 = vor.u32 %v4113_v8, %v4110_v41  ;;  %v3703_v41 = vrot.slane %v12673_v35, 2 }
 0x1a8   : > { %v12988_v53 = vadd.f32 %v12874_v42, %v10449_v6  ;;  %10667 = vmatprep.mubr.msk.bf16.mxu0 %vm1588_vm11, %v3696_v63  ;;  %v4122_v6 = vrot.slane %v4120_v48, 3  ;;  %v3698_v63 = vsel %vm3246_vm1, %v3695_v51, %v3697_v33  ;;  %v4138_v33 = vshll.u32 %v12710_v54, 16 }
 0x1a9   : > { %v1745_v12 = vpop.f32.mrf.mxu0 }
 0x1aa   : > { %v12996_v24 = vadd.f32 %v12884_v37, %v1745_v12  ;;  %v13000_v40 = vpop.f32.mrf.mxu1  ;;  %v4106_v37 = vsel %vm3999_vm5, %v4096_v46, %v4105_v34  ;;  %v4129_v12 = vshll.u32 %v12698_v17, 16  ;;  %v4123_v48 = vor.u32 %v4122_v6, %v4119_v5 }
 0x1ab   : > { %v10450_v42 = vpop.f32.mrf.mxu0 }
 0x1ac   : > { %v13003_v9 = vadd.f32 %v12892_v14, %v10450_v42  ;;  %10714 = vmatmul.mubr.msk.bf16.gmra.mxu1 %vm1588_vm11, %v4097_v19  ;;  %v13008_v21 = vpop.f32.mrf.mxu1  ;;  %v4135_v42 = vshrl.u32 %v12710_v54, 16 }
 0x1ad   : > { %v1748_v13 = vpop.f32.mrf.mxu0  ;;  %10717 = vmatprep.mubr.msk.bf16.mxu1 %vm1588_vm11, %v4106_v37  ;;  %v4115_v37 = vsel %vm3999_vm5, %v4105_v34, %v4114_v55 }
 0x1ae   : > { %v13011_v11 = vadd.f32 %v12904_v57, %v1748_v13  ;;  %v13017_v44 = vpop.f32.mrf.mxu1  ;;  %v4126_v57 = vshrl.u32 %v12698_v17, 16 }
 0x1af   : > { %v10453_v14 = vpop.f32.mrf.mxu0  ;;  %10668 = vmatmul.mubr.msk.bf16.gmra.mxu0 %vm1588_vm11, %v3698_v63 }
 0x1b0   : > { %v13020_v46 = vadd.f32 %v12919_v22, %v10453_v14  ;;  %10671 = vmatprep.mubr.msk.bf16.mxu0 %vm1588_vm11, %v3700_v23  ;;  %v13025_v49 = vpop.f32.mrf.mxu1  ;;  %v3701_v22 = vrot.slane %v12671_v45, 2  ;;  %v4128_v63 = vrot.slane %v4126_v57, 2  ;;  %v4131_v14 = vrot.slane %v4129_v12, 3 }
 0x1b1   : > { %v1761_v51 = vpop.f32.mrf.mxu0  ;;  %v4137_v23 = vrot.slane %v4135_v42, 2  ;;  %v4147_v42 = vshll.u32 %v12721_v27, 16 }
 0x1b2   : > { %v13030_v19 = vadd.f32 %v12929_v56, %v1761_v51  ;;  %v4124_v56 = vsel %vm3999_vm5, %v4114_v55, %v4123_v48  ;;  %v4140_v51 = vrot.slane %v4138_v33, 3  ;;  %v3702_v35 = vsel %vm3246_vm1, %v3699_v43, %v3701_v22 }
 0x1b3   : > { %v10454_v13 = vpop.f32.mrf.mxu0  ;;  %v3704_v34 = vsel %vm3246_vm1, %v3701_v22, %v3703_v41  ;;  %v4132_v55 = vor.u32 %v4131_v14, %v4128_v63  ;;  %v4156_v22 = vshll.u32 %v12723_v52, 16  ;;  %v3707_v63 = vrot.slane %v12683_v59, 2 }
 0x1b4   : > { %v13035_v8 = vadd.f32 %v12934_v58, %v10454_v13  ;;  %v13038_v6 = vpop.f32.mrf.mxu1  ;;  %10718 = vmatmul.mubr.msk.bf16.gmra.mxu1 %vm1588_vm11, %v4115_v37  ;;  %v4141_v13 = vor.u32 %v4140_v51, %v4137_v23  ;;  %v4153_v37 = vshrl.u32 %v12723_v52, 16  ;;  %v4149_v51 = vrot.slane %v4147_v42, 3 }
 0x1b5   : > { %v1764_v5 = vpop.f32.mrf.mxu0  ;;  %10721 = vmatprep.mubr.msk.bf16.mxu1 %vm1588_vm11, %v4124_v56 }
 0x1b6   : > { %v13043_v45 = vadd.f32 %v12941_v62, %v1764_v5  ;;  %v13049_v57 = vpop.f32.mrf.mxu1  ;;  %v4144_v62 = vshrl.u32 %v12721_v27, 16 }
 0x1b7   : > { %v10457_v58 = vpop.f32.mrf.mxu0  ;;  %10672 = vmatmul.mubr.msk.bf16.gmra.mxu0 %vm1588_vm11, %v3702_v35 }
 0x1b8   : > { %v13052_v12 = vadd.f32 %v12957_v3, %v10457_v58  ;;  %10675 = vmatprep.mubr.msk.bf16.mxu0 %vm1588_vm11, %v3704_v34  ;;  %v13057_v33 = vpop.f32.mrf.mxu1  ;;  %v3705_v3 = vrot.slane %v12681_v61, 2  ;;  %v4133_v58 = vsel %vm3999_vm5, %v4123_v48, %v4132_v55  ;;  %v4146_v23 = vrot.slane %v4144_v62, 2 }
 0x1b9   : > { %v1777_v43 = vpop.f32.mrf.mxu0  ;;  %v4155_v61 = vrot.slane %v4153_v37, 2  ;;  %v4162_v37 = vshrl.u32 %v12735_v1, 16 }
 0x1ba   : > { %16065 = vst [vmem:[#allocation59_spill] sm:$0xff] %v13052_v12  ;;  %v13062_v5 = vadd.f32 %v12965_v15, %v1777_v43  ;;  %v13066_v14 = vpop.f32.mrf.mxu1  ;;  %v4142_v15 = vsel %vm3999_vm5, %v4132_v55, %v4141_v13  ;;  %v4158_v43 = vrot.slane %v4156_v22, 3  ;;  %v3708_v48 = vsel %vm3246_vm1, %v3705_v3, %v3707_v63 }
 0x1bb   : > { %v10458_v56 = vpop.f32.mrf.mxu0  ;;  %16066 = vst [vmem:[#allocation60_spill] sm:$0xff] %v13066_v14  ;;  %v3706_v14 = vsel %vm3246_vm1, %v3703_v41, %v3705_v3  ;;  %v4150_v55 = vor.u32 %v4149_v51, %v4146_v23  ;;  %v4164_v51 = vrot.slane %v4162_v37, 2 }
 0x1bc   : > { %v13069_v35 = vadd.f32 %v12976_v36, %v10458_v56  ;;  %v13072_v12 = vpop.f32.mrf.mxu1  ;;  %10722 = vmatmul.mubr.msk.bf16.gmra.mxu1 %vm1588_vm11, %v4133_v58  ;;  %v4159_v56 = vor.u32 %v4158_v43, %v4155_v61 }
 0x1bd   : > { %v1780_v34 = vpop.f32.mrf.mxu0  ;;  %10725 = vmatprep.mubr.msk.bf16.mxu1 %vm1588_vm11, %v4142_v15  ;;  %v4151_v23 = vsel %vm3999_vm5, %v4141_v13, %v4150_v55 }
 0x1be   : > { %v13077_v59 = vadd.f32 %v12985_v25, %v1780_v34  ;;  %v2614_v62 = vpop.f32.mrf.mxu1  ;;  %v4165_v25 = vshll.u32 %v12735_v1, 16  ;;  %v3711_v34 = vrot.slane %v12696_v32, 2 }
 0x1bf   : > { %v10461_v36 = vpop.f32.mrf.mxu0  ;;  %10676 = vmatmul.mubr.msk.bf16.gmra.mxu0 %vm1588_vm11, %v3706_v14  ;;  %v3709_v14 = vrot.slane %v12685_v28, 2 }
 0x1c0   : > { %v13084_v42 = vadd.f32 %v13000_v40, %v10461_v36  ;;  %10679 = vmatprep.mubr.msk.bf16.mxu0 %vm1588_vm11, %v3708_v48  ;;  %v10548_v41 = vpop.f32.mrf.mxu1  ;;  %v4167_v1 = vrot.slane %v4165_v25, 3 }
 0x1c1   : > { %v1793_v22 = vpop.f32.mrf.mxu0  ;;  %v3710_v32 = vsel %vm3246_vm1, %v3707_v63, %v3709_v14  ;;  %v3713_v63 = vrot.slane %v12698_v17, 2 }
 0x1c2   : > { %v13090_v58 = vadd.f32 %v13008_v21, %v1793_v22  ;;  %v13094_v40 = vpop.f32.mrf.mxu1  ;;  %v4160_v21 = vsel %vm3999_vm5, %v4150_v55, %v4159_v56  ;;  %v4168_v37 = vor.u32 %v4167_v1, %v4164_v51 }
 0x1c3   : > { %v10462_v3 = vpop.f32.mrf.mxu0 }
 0x1c4   : > { %v13097_v15 = vadd.f32 %v13017_v44, %v10462_v3  ;;  %v10551_v48 = vpop.f32.mrf.mxu1  ;;  %10726 = vmatmul.mubr.msk.bf16.gmra.mxu1 %vm1588_vm11, %v4151_v23  ;;  %v3712_v44 = vsel %vm3246_vm1, %v3709_v14, %v3711_v34  ;;  %v3715_v3 = vrot.slane %v12710_v54, 2 }
 0x1c5   : > { %v1796_v36 = vpop.f32.mrf.mxu0  ;;  %10729 = vmatprep.mubr.msk.bf16.mxu1 %vm1588_vm11, %v4160_v21 }
 0x1c6   : > { %v13103_v28 = vadd.f32 %v13025_v49, %v1796_v36  ;;  %v2630_v13 = vpop.f32.mrf.mxu1  ;;  %v3716_v17 = vsel %vm3246_vm1, %v3713_v63, %v3715_v3 }
 0x1c7   : > { %v10465_v61 = vpop.f32.mrf.mxu0  ;;  %10680 = vmatmul.mubr.msk.bf16.gmra.mxu0 %vm1588_vm11, %v3710_v32 }
 0x1c8   : > { %v13110_v43 = vadd.f32 %v13038_v6, %v10465_v61  ;;  %10683 = vmatprep.mubr.msk.bf16.mxu0 %vm1588_vm11, %v3712_v44  ;;  %v10552_v25 = vpop.f32.mrf.mxu1  ;;  %v4169_v6 = vsel %vm3999_vm5, %v4159_v56, %v4168_v37  ;;  %v3717_v61 = vrot.slane %v12721_v27, 2  ;;  %v3719_v37 = vrot.slane %v12723_v52, 2  ;;  %v11248_v27 = vld [vmem:[#allocation2 + $0xa0] ss:$0 sps:$4 sm:$0x33]  }
 0x1c9   : > { %v1809_v55 = vpop.f32.mrf.mxu0 }
 0x1ca   : > { %v13114_v49 = vadd.f32 %v13049_v57, %v1809_v55  ;;  %v13118_v23 = vpop.f32.mrf.mxu1  ;;  %v3714_v57 = vsel %vm3246_vm1, %v3711_v34, %v3713_v63  ;;  %v3720_v52 = vsel %vm3246_vm1, %v3717_v61, %v3719_v37 }
 0x1cb   : > { %v10466_v22 = vpop.f32.mrf.mxu0 }
 0x1cc   : > { %v13121_v14 = vadd.f32 %v13057_v33, %v10466_v22  ;;  %v10555_v51 = vpop.f32.mrf.mxu1  ;;  %10730 = vmatmul.mubr.msk.bf16.gmra.mxu1 %vm1588_vm11, %v4169_v6 }
 0x1cd   : > { %v13124_v36 = vpop.f32.mrf.mxu0 }
 0x1ce   : > { %v2646_v54 = vpop.f32.mrf.mxu1 }
 0x1cf   : > { %v10509_v1 = vpop.f32.mrf.mxu0  ;;  %10684 = vmatmul.mubr.msk.bf16.gmra.mxu0 %vm1588_vm11, %v3714_v57 }
 0x1d0   : > { %v2320_v21 = vadd.f32 %v10509_v1, %v12829_v2  ;;  %10687 = vmatprep.mubr.msk.bf16.mxu0 %vm1588_vm11, %v3716_v17  ;;  %v10556_v32 = vpop.f32.mrf.mxu1 }
 0x1d1   : > { %v2175_v33 = vpop.f32.mrf.mxu0 }
 0x1d2   : > { %v2318_v56 = vadd.f32 %v2175_v33, %v12833_v47  ;;  %v13135_v44 = vadd.f32 %v13072_v12, %v2320_v21  ;;  %v13138_v55 = vpop.f32.mrf.mxu1  ;;  %v3718_v47 = vsel %vm3246_vm1, %v3715_v3, %v3717_v61  ;;  %v3721_v33 = vrot.slane %v11248_v27, 2 }
 0x1d3   : > { %v10510_v34 = vpop.f32.mrf.mxu0 }
 0x1d4   : > { %v2321_v63 = vadd.f32 %v10510_v34, %v12843_v7  ;;  %v13141_v22 = vadd.f32 %v2614_v62, %v2318_v56  ;;  %v10559_v6 = vpop.f32.mrf.mxu1 }
 0x1d5   : > { %v2178_v2 = vpop.f32.mrf.mxu0 }
 0x1d6   : > { %v13144_v57 = vadd.f32 %v2178_v2, %v12851_v50  ;;  %v13147_v1 = vadd.f32 %v10548_v41, %v2321_v63  ;;  %v2662_v17 = vpop.f32.mrf.mxu1 }
 0x1d7   : > { %v10513_v12 = vpop.f32.mrf.mxu0  ;;  %10688 = vmatmul.mubr.msk.bf16.gmra.mxu0 %vm1588_vm11, %v3718_v47  ;;  %v3722_v47 = vsel %vm3246_vm1, %v3719_v37, %v3721_v33 }
 0x1d8   : > { %v2324_v7 = vadd.f32 %v10513_v12, %v12862_v39  ;;  %10691 = vmatprep.mubr.msk.bf16.mxu0 %vm1588_vm11, %v3720_v52  ;;  %v10560_v21 = vpop.f32.mrf.mxu1 }
 0x1d9   : > { %v2191_v62 = vpop.f32.mrf.mxu0 }
 0x1da   : > { %v2322_v50 = vadd.f32 %v2191_v62, %v12869_v4  ;;  %v13154_v56 = vadd.f32 %v10551_v48, %v2324_v7  ;;  %v13156_v41 = vpop.f32.mrf.mxu1 }
 0x1db   : > { %v10514_v3 = vpop.f32.mrf.mxu0 }
 0x1dc   : > { %v2325_v34 = vadd.f32 %v10514_v3, %v12878_v30  ;;  %v13159_v63 = vadd.f32 %v2630_v13, %v2322_v50  ;;  %v10563_v2 = vpop.f32.mrf.mxu1 }
 0x1dd   : > { %v2194_v61 = vpop.f32.mrf.mxu0 }
 0x1de   : > { %v13162_v39 = vadd.f32 %v2194_v61, %v12887_v38  ;;  %v13165_v12 = vadd.f32 %v10552_v25, %v2325_v34  ;;  %v2678_v48 = vpop.f32.mrf.mxu1  ;;  %v16067_v34 = vld [vmem:[#allocation42_spill] sm:$0xff]  ;;  %v16068_v61 = vld [vmem:[#allocation43_spill] sm:$0xff] }
 0x1df   : > { %v10517_v4 = vpop.f32.mrf.mxu0  ;;  %10692 = vmatmul.mubr.msk.bf16.gmra.mxu0 %vm1588_vm11, %v3722_v47 }
 0x1e0   : > { %v2328_v27 = vadd.f32 %v10517_v4, %v12900_v0  ;;  %10735 = vmatprep.mubr.msk.bf16.mxu0 %vm1588_vm11, %v12701_v29  ;;  %v10564_v13 = vpop.f32.mrf.mxu1 }
 0x1e1   : > { %v2207_v30 = vpop.f32.mrf.mxu0 }
 0x1e2   : > { %v2326_v52 = vadd.f32 %v2207_v30, %v12909_v26  ;;  %v13172_v7 = vadd.f32 %v10555_v51, %v2328_v27  ;;  %v13174_v62 = vpop.f32.mrf.mxu1 }
 0x1e3   : > { %v10518_v38 = vpop.f32.mrf.mxu0 }
 0x1e4   : > { %v2329_v25 = vadd.f32 %v10518_v38, %v12915_v16  ;;  %v13177_v37 = vadd.f32 %v2646_v54, %v2326_v52  ;;  %v10567_v33 = vpop.f32.mrf.mxu1 }
 0x1e5   : > { %v2210_v50 = vpop.f32.mrf.mxu0 }
 0x1e6   : > { %v13180_v0 = vadd.f32 %v2210_v50, %v12922_v18  ;;  %v13182_v3 = vadd.f32 %v10556_v32, %v2329_v25  ;;  %v2694_v26 = vpop.f32.mrf.mxu1 }
 0x1e7   : > { %v10521_v29 = vpop.f32.mrf.mxu0  ;;  %10736 = vmatmul.mubr.msk.bf16.vlgmr.msra.gmra.mxu0 %vm1588_vm11, %v16067_v34  ;;  %v16071_v34 = vld [vmem:[#allocation45_spill] sm:$0xff] }
 0x1e8   : > { %v2332_v51 = vadd.f32 %v10521_v29, %v12944_v60  ;;  %10739 = vmatprep.mubr.msk.bf16.mxu0 %vm1588_vm11, %v16068_v61  ;;  %v10568_v54 = vpop.f32.mrf.mxu1  ;;  %v16070_v29 = vld [vmem:[#allocation44_spill] sm:$0xff] }
 0x1e9   : > { %v2223_v16 = vpop.f32.mrf.mxu0 }
 0x1ea   : > { %v2330_v47 = vadd.f32 %v2223_v16, %v12951_v20  ;;  %v13190_v4 = vadd.f32 %v10559_v6, %v2332_v51  ;;  %v13192_v27 = vpop.f32.mrf.mxu1 }
 0x1eb   : > { %v10522_v18 = vpop.f32.mrf.mxu0  ;;  %16069 = vst [vmem:[#allocation42_spill] sm:$0xff] %v13192_v27 }
 0x1ec   : > { %v2333_v32 = vadd.f32 %v10522_v18, %v12962_v10  ;;  %v13195_v30 = vadd.f32 %v2662_v17, %v2330_v47  ;;  %v10571_v38 = vpop.f32.mrf.mxu1 }
 0x1ed   : > { %v2226_v52 = vpop.f32.mrf.mxu0 }
 0x1ee   : > { %v13198_v60 = vadd.f32 %v2226_v52, %v12970_v31  ;;  %v13200_v25 = vadd.f32 %v10560_v21, %v2333_v32  ;;  %v2710_v20 = vpop.f32.mrf.mxu1 }
 0x1ef   : > { %v10525_v50 = vpop.f32.mrf.mxu0  ;;  %10740 = vmatmul.mubr.msk.bf16.gmra.mxu0 %vm1588_vm11, %v16070_v29  ;;  %v16073_v29 = vld [vmem:[#allocation46_spill] sm:$0xff] }
 0x1f0   : > { %v2336_v6 = vadd.f32 %v10525_v50, %v12988_v53  ;;  %10743 = vmatprep.mubr.msk.bf16.mxu0 %vm1588_vm11, %v16071_v34  ;;  %v10572_v17 = vpop.f32.mrf.mxu1 }
 0x1f1   : > { %v2239_v10 = vpop.f32.mrf.mxu0 }
 0x1f2   : > { %v2334_v51 = vadd.f32 %v2239_v10, %v12996_v24  ;;  %v13208_v61 = vadd.f32 %v10563_v2, %v2336_v6  ;;  %v13210_v16 = vpop.f32.mrf.mxu1  ;;  %v16074_v6 = vld [vmem:[#allocation47_spill] sm:$0xff] }
 0x1f3   : > { %v10526_v31 = vpop.f32.mrf.mxu0  ;;  %16072 = vst [vmem:[#allocation43_spill] sm:$0xff] %v13210_v16  ;;  %v16081_v16 = vld [vmem:[#allocation50_spill] sm:$0xff] }
 0x1f4   : > { %v2337_v21 = vadd.f32 %v10526_v31, %v13003_v9  ;;  %v13213_v47 = vadd.f32 %v2678_v48, %v2334_v51  ;;  %v10575_v32 = vpop.f32.mrf.mxu1 }
 0x1f5   : > { %v2242_v18 = vpop.f32.mrf.mxu0 }
 0x1f6   : > { %v13216_v53 = vadd.f32 %v2242_v18, %v13011_v11  ;;  %v13218_v52 = vadd.f32 %v10564_v13, %v2337_v21  ;;  %v2726_v24 = vpop.f32.mrf.mxu1 }
 0x1f7   : > { %v10529_v50 = vpop.f32.mrf.mxu0  ;;  %10744 = vmatmul.mubr.msk.bf16.gmra.mxu0 %vm1588_vm11, %v16073_v29 }
 0x1f8   : > { %v2340_v2 = vadd.f32 %v10529_v50, %v13020_v46  ;;  %10747 = vmatprep.mubr.msk.bf16.mxu0 %vm1588_vm11, %v16074_v6  ;;  %v10576_v48 = vpop.f32.mrf.mxu1  ;;  %v16076_v6 = vld [vmem:[#allocation48_spill] sm:$0xff] }
 0x1f9   : > { %v2255_v9 = vpop.f32.mrf.mxu0 }
 0x1fa   : > { %v2338_v34 = vadd.f32 %v2255_v9, %v13030_v19  ;;  %v13226_v10 = vadd.f32 %v10567_v33, %v2340_v2  ;;  %v13228_v51 = vpop.f32.mrf.mxu1  ;;  %v16077_v33 = vld [vmem:[#allocation59_spill] sm:$0xff]  ;;  %v16078_v9 = vld [vmem:[#allocation49_spill] sm:$0xff] }
 0x1fb   : > { %v10530_v11 = vpop.f32.mrf.mxu0  ;;  %16075 = vst [vmem:[#allocation44_spill] sm:$0xff] %v13228_v51 }
 0x1fc   : > { %v2341_v13 = vadd.f32 %v10530_v11, %v13035_v8  ;;  %v13231_v31 = vadd.f32 %v2694_v26, %v2338_v34  ;;  %v10579_v18 = vpop.f32.mrf.mxu1 }
 0x1fd   : > { %v2258_v21 = vpop.f32.mrf.mxu0 }
 0x1fe   : > { %v13234_v46 = vadd.f32 %v2258_v21, %v13043_v45  ;;  %v13236_v50 = vadd.f32 %v10568_v54, %v2341_v13  ;;  %v2742_v19 = vpop.f32.mrf.mxu1 }
 0x1ff   : > { %v10533_v29 = vpop.f32.mrf.mxu0  ;;  %10748 = vmatmul.mubr.msk.bf16.gmra.mxu0 %vm1588_vm11, %v16076_v6 }
 0x200   : > { %v2344_v2 = vadd.f32 %v10533_v29, %v16077_v33  ;;  %10751 = vmatprep.mubr.msk.bf16.mxu0 %vm1588_vm11, %v16078_v9  ;;  %v10580_v26 = vpop.f32.mrf.mxu1 }
 0x201   : > { %v2271_v8 = vpop.f32.mrf.mxu0 }
 0x202   : > { %v2342_v34 = vadd.f32 %v2271_v8, %v13062_v5  ;;  %v13244_v11 = vadd.f32 %v10571_v38, %v2344_v2  ;;  %v13246_v21 = vpop.f32.mrf.mxu1  ;;  %v16082_v2 = vld [vmem:[#allocation51_spill] sm:$0xff] }
 0x203   : > { %v10534_v45 = vpop.f32.mrf.mxu0  ;;  %16079 = vst [vmem:[#allocation45_spill] sm:$0xff] %v13246_v21 }
 0x204   : > { %v2345_v54 = vadd.f32 %v10534_v45, %v13069_v35  ;;  %v13249_v13 = vadd.f32 %v2710_v20, %v2342_v34  ;;  %v10623_v51 = vpop.f32.mrf.mxu1  ;;  %v11250_v35 = vld [vmem:[%s15945_s6 + $0x38] sm:$0xff]  }
 0x205   : > { %v2274_v6 = vpop.f32.mrf.mxu0  ;;  %10771 = vmatprep.subr.bf16.mxu1 %v11250_v35 }
 0x206   : > { %v13252_v29 = vadd.f32 %v2274_v6, %v13077_v59  ;;  %v13254_v33 = vadd.f32 %v10572_v17, %v2345_v54  ;;  %v3375_v5 = vpop.f32.mrf.mxu1  ;;  %10772 = vmatpush3.bf16.msra.mxu1 %v11250_v35 }
 0x207   : > { %v10537_v9 = vpop.f32.mrf.mxu0  ;;  %10752 = vmatmul.mubr.msk.bf16.gmra.mxu0 %vm1588_vm11, %v16081_v16 }
 0x208   : > { %16080 = vst [vmem:[#allocation46_spill] sm:$0xff] %v13252_v29  ;;  %v2348_v38 = vadd.f32 %v10537_v9, %v13084_v42  ;;  %10755 = vmatprep.mubr.msk.bf16.mxu0 %vm1588_vm11, %v16082_v2  ;;  %v10624_v8 = vpop.f32.mrf.mxu1 }
 0x209   : > { %v2287_v20 = vpop.f32.mrf.mxu0 }
 0x20a   : > { %v2346_v59 = vadd.f32 %v2287_v20, %v13090_v58  ;;  %v13265_v17 = vadd.f32 %v10575_v32, %v2348_v38  ;;  %v13267_v45 = vpop.f32.mrf.mxu1  ;;  %v16085_v58 = vld [vmem:[#allocation52_spill] sm:$0xff]  ;;  %v16086_v20 = vld [vmem:[#allocation53_spill] sm:$0xff] }
 0x20b   : > { %v10538_v34 = vpop.f32.mrf.mxu0  ;;  %16083 = vst [vmem:[#allocation47_spill] sm:$0xff] %v13267_v45 }
 0x20c   : > { %v2349_v42 = vadd.f32 %v10538_v34, %v13097_v15  ;;  %v13270_v16 = vadd.f32 %v2726_v24, %v2346_v59  ;;  %v10627_v6 = vpop.f32.mrf.mxu1 }
 0x20d   : > { %v2290_v54 = vpop.f32.mrf.mxu0 }
 0x20e   : > { %v13273_v9 = vadd.f32 %v2290_v54, %v13103_v28  ;;  %v13275_v2 = vadd.f32 %v10576_v48, %v2349_v42  ;;  %v3391_v32 = vpop.f32.mrf.mxu1 }
 0x20f   : > { %v10541_v21 = vpop.f32.mrf.mxu0  ;;  %10756 = vmatmul.mubr.msk.bf16.gmra.mxu0 %vm1588_vm11, %v16085_v58 }
 0x210   : > { %16084 = vst [vmem:[#allocation48_spill] sm:$0xff] %v13273_v9  ;;  %v2352_v38 = vadd.f32 %v10541_v21, %v13110_v43  ;;  %10759 = vmatprep.mubr.msk.bf16.mxu0 %vm1588_vm11, %v16086_v20  ;;  %v10628_v24 = vpop.f32.mrf.mxu1  ;;  %v16088_v20 = vld [vmem:[#allocation54_spill] sm:$0xff] }
 0x211   : > { %v2303_v15 = vpop.f32.mrf.mxu0 }
 0x212   : > { %v2350_v35 = vadd.f32 %v2303_v15, %v13114_v49  ;;  %v13283_v59 = vadd.f32 %v10579_v18, %v2352_v38  ;;  %v13285_v34 = vpop.f32.mrf.mxu1  ;;  %v16089_v18 = vld [vmem:[#allocation55_spill] sm:$0xff] }
 0x213   : > { %v10542_v28 = vpop.f32.mrf.mxu0  ;;  %16087 = vst [vmem:[#allocation59_spill] sm:$0xff] %v13285_v34  ;;  %v16092_v34 = vld [vmem:[#allocation57_spill] sm:$0xff] }
 0x214   : > { %v2353_v48 = vadd.f32 %v10542_v28, %v13121_v14  ;;  %v13288_v42 = vadd.f32 %v2742_v19, %v2350_v35  ;;  %v10631_v58 = vpop.f32.mrf.mxu1 }
 0x215   : > { %v13290_v54 = vpop.f32.mrf.mxu0 }
 0x216   : > { %v13292_v43 = vadd.f32 %v10580_v26, %v2353_v48  ;;  %v3407_v45 = vpop.f32.mrf.mxu1  ;;  %v11251_v26 = vld [vmem:[%s15945_s6 + $0x30] sm:$0xff]  }
 0x217   : > { %v10585_v21 = vpop.f32.mrf.mxu0  ;;  %10760 = vmatmul.mubr.msk.bf16.gmra.mxu0 %vm1588_vm11, %v16088_v20  ;;  %10773 = vmatprep.subr.bf16.mxu1 %v11251_v26 }
 0x218   : > { %v3206_v49 = vadd.f32 %v10585_v21, %v13135_v44  ;;  %10763 = vmatprep.mubr.msk.bf16.mxu0 %vm1588_vm11, %v16089_v18  ;;  %v10632_v15 = vpop.f32.mrf.mxu1  ;;  %10774 = vmatpush3.bf16.msra.mxu1 %v11251_v26 }
 0x219   : > { %v3061_v38 = vpop.f32.mrf.mxu0 }
 0x21a   : > { %v3204_v14 = vadd.f32 %v3061_v38, %v13141_v22  ;;  %v13300_v19 = vadd.f32 %v10623_v51, %v3206_v49  ;;  %v13305_v28 = vpop.f32.mrf.mxu1  ;;  %v16091_v51 = vld [vmem:[#allocation56_spill] sm:$0xff] }
 0x21b   : > { %v10586_v35 = vpop.f32.mrf.mxu0  ;;  %16090 = vst [vmem:[#allocation49_spill] sm:$0xff] %v13305_v28 }
 0x21c   : > { %v3207_v48 = vadd.f32 %v10586_v35, %v13147_v1  ;;  %v13308_v20 = vadd.f32 %v3375_v5, %v3204_v14  ;;  %v10635_v21 = vpop.f32.mrf.mxu1 }
 0x21d   : > { %v13310_v44 = vpop.f32.mrf.mxu0 }
 0x21e   : > { %v13312_v18 = vadd.f32 %v10624_v8, %v3207_v48  ;;  %v3423_v49 = vpop.f32.mrf.mxu1 }
 0x21f   : > { %v10589_v22 = vpop.f32.mrf.mxu0  ;;  %10764 = vmatmul.mubr.msk.bf16.gmra.mxu0 %vm1588_vm11, %v16091_v51 }
 0x220   : > { %v3210_v38 = vadd.f32 %v10589_v22, %v13154_v56  ;;  %10767 = vmatprep.mubr.msk.bf16.mxu0 %vm1588_vm11, %v16092_v34  ;;  %v10636_v5 = vpop.f32.mrf.mxu1  ;;  %v16095_v34 = vld [vmem:[#allocation58_spill] sm:$0xff] }
 0x221   : > { %v3077_v1 = vpop.f32.mrf.mxu0 }
 0x222   : > { %v3208_v14 = vadd.f32 %v3077_v1, %v13159_v63  ;;  %v13320_v35 = vadd.f32 %v10627_v6, %v3210_v38  ;;  %v13322_v26 = vpop.f32.mrf.mxu1 }
 0x223   : > { %v10590_v28 = vpop.f32.mrf.mxu0  ;;  %16093 = vst [vmem:[#allocation50_spill] sm:$0xff] %v13322_v26 }
 0x224   : > { %v3211_v8 = vadd.f32 %v10590_v28, %v13165_v12  ;;  %v13325_v48 = vadd.f32 %v3391_v32, %v3208_v14  ;;  %v10639_v9 = vpop.f32.mrf.mxu1 }
 0x225   : > { %v13327_v51 = vpop.f32.mrf.mxu0 }
 0x226   : > { %16094 = vst [vmem:[#allocation51_spill] sm:$0xff] %v13327_v51  ;;  %v13329_v56 = vadd.f32 %v10628_v24, %v3211_v8  ;;  %v3439_v29 = vpop.f32.mrf.mxu1 }
 0x227   : > { %v10593_v22 = vpop.f32.mrf.mxu0  ;;  %10768 = vmatmul.mubr.msk.bf16.gmra.mxu0 %vm1588_vm11, %v16095_v34 }
 0x228   : > { %v3214_v63 = vadd.f32 %v10593_v22, %v13172_v7  ;;  %v10640_v38 = vpop.f32.mrf.mxu1 }
 0x229   : > { %v3093_v6 = vpop.f32.mrf.mxu0 }
 0x22a   : > { %v3212_v1 = vadd.f32 %v3093_v6, %v13177_v37  ;;  %v13335_v26 = vadd.f32 %v10631_v58, %v3214_v63  ;;  %v13337_v32 = vpop.f32.mrf.mxu1 }
 0x22b   : > { %v10594_v12 = vpop.f32.mrf.mxu0  ;;  %16096 = vst [vmem:[#allocation52_spill] sm:$0xff] %v13337_v32 }
 0x22c   : > { %v3215_v28 = vadd.f32 %v10594_v12, %v13182_v3  ;;  %v13340_v24 = vadd.f32 %v3407_v45, %v3212_v1  ;;  %v10643_v8 = vpop.f32.mrf.mxu1 }
 0x22d   : > { %v13342_v14 = vpop.f32.mrf.mxu0 }
 0x22e   : > { %16097 = vst [vmem:[#allocation53_spill] sm:$0xff] %v13342_v14  ;;  %v13344_v34 = vadd.f32 %v10632_v15, %v3215_v28  ;;  %v3455_v7 = vpop.f32.mrf.mxu1  ;;  %v408_v28 = vld [vmem:[#allocation3 + $0x8] sm:$0x3] }
 0x22f   : > { %v10597_v51 = vpop.f32.mrf.mxu0 }
 0x230   : > { %v3218_v22 = vadd.f32 %v10597_v51, %v13190_v4  ;;  %v10644_v37 = vpop.f32.mrf.mxu1  ;;  %v16100_v4 = vmov 0 }
 0x231   : > { %v3109_v27 = vpop.f32.mrf.mxu0  ;;  %v16101_v4 = vsel %vm13358_vm7, 4294967295, %v16100_v4 }
 0x232   : > { %v3216_v58 = vadd.f32 %v3109_v27, %v13195_v30  ;;  %v13348_v63 = vadd.f32 %v10635_v21, %v3218_v22  ;;  %v13350_v3 = vpop.f32.mrf.mxu1  ;;  %16102 = vst [vmem:[#allocation56_spill] sm:$0xff] %v16101_v4 }
 0x233   : > { %v10598_v6 = vpop.f32.mrf.mxu0  ;;  %16098 = vst [vmem:[#allocation54_spill] sm:$0xff] %v13350_v3 }
 0x234   : > { %v3219_v45 = vadd.f32 %v10598_v6, %v13200_v25  ;;  %v13353_v1 = vadd.f32 %v3423_v49, %v3216_v58  ;;  %v10647_v12 = vpop.f32.mrf.mxu1  ;;  %v409_v25 = vsel %vm13358_vm7, 0, %v408_v28  ;;  %v11252_v28 = vld [vmem:[%s15945_s6 + $0x28] sm:$0xff]  }
 0x235   : > { %v13355_v15 = vpop.f32.mrf.mxu0  ;;  %410 = vst [vmem:[#allocation3 + $0x8] sm:$0x3] %v409_v25  ;;  %10775 = vmatprep.subr.bf16.mxu1 %v11252_v28 }
 0x236   : > { %16099 = vst [vmem:[#allocation55_spill] sm:$0xff] %v13355_v15  ;;  %v13362_v51 = vadd.f32 %v10636_v5, %v3219_v45  ;;  %v3471_v30 = vpop.f32.mrf.mxu1  ;;  %10776 = vmatpush3.bf16.msra.mxu1 %v11252_v28 }
 0x237   : > { %v10601_v27 = vpop.f32.mrf.mxu0 }
 0x238   : > { %v3222_v21 = vadd.f32 %v10601_v27, %v13208_v61  ;;  %v10648_v3 = vpop.f32.mrf.mxu1 }
 0x239   : > { %v3125_v22 = vpop.f32.mrf.mxu0 }
 0x23a   : > { %v3220_v49 = vadd.f32 %v3125_v22, %v13213_v47  ;;  %v13368_v58 = vadd.f32 %v10639_v9, %v3222_v21  ;;  %v13370_v32 = vpop.f32.mrf.mxu1 }
 0x23b   : > { %v10602_v6 = vpop.f32.mrf.mxu0  ;;  %16103 = vst [vmem:[#allocation57_spill] sm:$0xff] %v13370_v32 }
 0x23c   : > { %v3223_v5 = vadd.f32 %v10602_v6, %v13218_v52  ;;  %v13373_v45 = vadd.f32 %v3439_v29, %v3220_v49  ;;  %v10651_v61 = vpop.f32.mrf.mxu1 }
 0x23d   : > { %v13375_v15 = vpop.f32.mrf.mxu0 }
 0x23e   : > { %16104 = vst [vmem:[#allocation58_spill] sm:$0xff] %v13375_v15  ;;  %v13377_v27 = vadd.f32 %v10640_v38, %v3223_v5  ;;  %v3487_v9 = vpop.f32.mrf.mxu1 }
 0x23f   : > { %v10605_v47 = vpop.f32.mrf.mxu0 }
 0x240   : > { %v3226_v21 = vadd.f32 %v10605_v47, %v13226_v10  ;;  %v10652_v25 = vpop.f32.mrf.mxu1 }
 0x241   : > { %v3141_v22 = vpop.f32.mrf.mxu0 }
 0x242   : > { %v3224_v52 = vadd.f32 %v3141_v22, %v13231_v31  ;;  %v13384_v29 = vadd.f32 %v10643_v8, %v3226_v21  ;;  %v13386_v6 = vpop.f32.mrf.mxu1 }
 0x243   : > { %v10606_v49 = vpop.f32.mrf.mxu0  ;;  %16105 = vst [vmem:[#allocation61_spill] sm:$0xff] %v13386_v6 }
 0x244   : > { %v3227_v38 = vadd.f32 %v10606_v49, %v13236_v50  ;;  %v13389_v5 = vadd.f32 %v3455_v7, %v3224_v52  ;;  %v10655_v32 = vpop.f32.mrf.mxu1 }
 0x245   : > { %v13391_v4 = vpop.f32.mrf.mxu0 }
 0x246   : > { %v13393_v15 = vadd.f32 %v10644_v37, %v3227_v38  ;;  %v3503_v47 = vpop.f32.mrf.mxu1 }
 0x247   : > { %v10609_v10 = vpop.f32.mrf.mxu0 }
 0x248   : > { %v3230_v28 = vadd.f32 %v10609_v10, %v13244_v11  ;;  %v10656_v31 = vpop.f32.mrf.mxu1 }
 0x249   : > { %v3157_v14 = vpop.f32.mrf.mxu0 }
 0x24a   : > { %v3228_v8 = vadd.f32 %v3157_v14, %v13249_v13  ;;  %v13397_v21 = vadd.f32 %v10647_v12, %v3230_v28  ;;  %v13399_v6 = vpop.f32.mrf.mxu1 }
 0x24b   : > { %v10610_v22 = vpop.f32.mrf.mxu0 }
 0x24c   : > { %v3231_v50 = vadd.f32 %v10610_v22, %v13254_v33  ;;  %v13402_v7 = vadd.f32 %v3471_v30, %v3228_v8  ;;  %v13406_v37 = vpop.f32.mrf.mxu1 }
 0x24d   : > { %v13404_v52 = vpop.f32.mrf.mxu0 }
 0x24e   : > { %v13408_v49 = vadd.f32 %v10648_v3, %v3231_v50  ;;  %v13410_v38 = vpop.f32.mrf.mxu1  ;;  %v11253_v3 = vld [vmem:[%s15945_s6 + $0x18] sm:$0xff]  }
 0x24f   : > { %v10613_v11 = vpop.f32.mrf.mxu0  ;;  %10815 = vmatprep.subr.bf16.mxu0 %v11253_v3 }
 0x250   : > { %v3234_v13 = vadd.f32 %v10613_v11, %v13265_v17  ;;  %v13413_v12 = vpop.f32.mrf.mxu1  ;;  %10816 = vmatpush3.bf16.msra.mxu0 %v11253_v3 }
 0x251   : > { %v3173_v14 = vpop.f32.mrf.mxu0 }
 0x252   : > { %v3232_v10 = vadd.f32 %v3173_v14, %v13270_v16  ;;  %v13416_v28 = vadd.f32 %v10651_v61, %v3234_v13  ;;  %v13418_v30 = vpop.f32.mrf.mxu1 }
 0x253   : > { %v10614_v33 = vpop.f32.mrf.mxu0  ;;  %16106 = vst [vmem:[#allocation62_spill] sm:$0xff] %v13418_v30 }
 0x254   : > { %v3235_v8 = vadd.f32 %v10614_v33, %v13275_v2  ;;  %v13424_v22 = vadd.f32 %v3487_v9, %v3232_v10  ;;  %v13428_v17 = vpop.f32.mrf.mxu1  ;;  %v11254_v10 = vld [vmem:[%s15945_s6 + $0x20] sm:$0xff]  }
 0x255   : > { %v13426_v50 = vpop.f32.mrf.mxu0  ;;  %10777 = vmatprep.subr.bf16.mxu1 %v11254_v10 }
 0x256   : > { %v13430_v11 = vadd.f32 %v10652_v25, %v3235_v8  ;;  %v13432_v61 = vpop.f32.mrf.mxu1  ;;  %v11255_v25 = vld [vmem:[%s15945_s6 + $0x10] sm:$0xff]   ;;  %10778 = vmatpush3.bf16.msra.mxu1 %v11254_v10 }
 0x257   : > { %v10617_v16 = vpop.f32.mrf.mxu0  ;;  %10817 = vmatprep.subr.bf16.mxu0 %v11255_v25 }
 0x258   : > { %v3238_v13 = vadd.f32 %v10617_v16, %v13283_v59  ;;  %v13435_v30 = vpop.f32.mrf.mxu1  ;;  %10818 = vmatpush3.bf16.msra.mxu0 %v11255_v25  ;;  %v11256_v16 = vld [vmem:[%s15945_s6 + $0x8] sm:$0xff]  }
 0x259   : > { %v3189_v14 = vpop.f32.mrf.mxu0  ;;  %16107 = vst [vmem:[#allocation63_spill] sm:$0xff] %v13435_v30  ;;  %10819 = vmatprep.subr.bf16.mxu0 %v11256_v16 }
 0x25a   : > { %v3236_v2 = vadd.f32 %v3189_v14, %v13288_v42  ;;  %v13438_v9 = vadd.f32 %v10655_v32, %v3238_v13  ;;  %v13446_v3 = vpop.f32.mrf.mxu1 }
 0x25b   : > { %v10618_v33 = vpop.f32.mrf.mxu0  ;;  %16108 = vst [vmem:[#allocation64_spill] sm:$0xff] %v13446_v3 }
 0x25c   : > { %v3239_v59 = vadd.f32 %v10618_v33, %v13292_v43  ;;  %v13449_v8 = vadd.f32 %v3503_v47, %v3236_v2  ;;  %v13453_v32 = vpop.f32.mrf.mxu1  ;;  %10820 = vmatpush3.bf16.msra.mxu0 %v11256_v16  ;;  %v11257_v16 = vld [vmem:[%s15945_s6] sm:$0xff]  }
 0x25d   : > { %v13451_v42 = vpop.f32.mrf.mxu0  ;;  %16109 = vst [vmem:[#allocation65_spill] sm:$0xff] %v13453_v32  ;;  %10821 = vmatprep.subr.bf16.mxu0 %v11257_v16 }
 0x25e   : > { %v13458_v13 = vadd.f32 %v10656_v31, %v3239_v59  ;;  %v13460_v3 = vpop.f32.mrf.mxu1 }
 0x25f   : > { %v10661_v14 = vpop.f32.mrf.mxu0  ;;  %16110 = vst [vmem:[#allocation66_spill] sm:$0xff] %v13460_v3 }
 0x260   : > { %v13463_v43 = vadd.f32 %v10661_v14, %v13300_v19  ;;  %v13465_v2 = vpop.f32.mrf.mxu1  ;;  %v5451_v14 = vld [vmem:[#allocation3] sm:$0xf]  ;;  %10822 = vmatpush3.bf16.msra.mxu0 %v11257_v16 }
 0x261   : > { %v3814_v47 = vpop.f32.mrf.mxu0  ;;  %16111 = vst [vmem:[#allocation67_spill] sm:$0xff] %v13465_v2 }
 0x262   : > { %v13468_v10 = vadd.f32 %v3814_v47, %v13308_v20  ;;  %v13470_v33 = vpop.f32.mrf.mxu1  ;;  %v5452_v20 = vld [vmem:[#allocation3 + $0x4] sm:$0xf] }
 0x263   : > { %v10662_v25 = vpop.f32.mrf.mxu0  ;;  %16112 = vst [vmem:[#allocation68_spill] sm:$0xff] %v13470_v33  ;;  %v13487_v33 = vcombine.low %v5451_v14, %v5452_v20 }
 0x264   : > { %v13473_v31 = vadd.f32 %v10662_v25, %v13312_v18  ;;  %v13477_v3 = vpop.f32.mrf.mxu1 }
 0x265   : > { %v13475_v59 = vpop.f32.mrf.mxu0  ;;  %16113 = vst [vmem:[#allocation69_spill] sm:$0xff] %v13477_v3  ;;  %10823 = vmatprep.mubr.msk.bf16.mxu0 %vm4869_vm3, %v13487_v33 }
 0x266   : > { %v13479_v19 = vpop.f32.mrf.mxu1 }
 0x267   : > { %v10665_v32 = vpop.f32.mrf.mxu0  ;;  %16114 = vst [vmem:[#allocation70_spill] sm:$0xff] %v13479_v19 }
 0x268   : > { %v13485_v47 = vadd.f32 %v10665_v32, %v13320_v35  ;;  %v13489_v25 = vpop.f32.mrf.mxu1 }
 0x269   : > { %v3830_v18 = vpop.f32.mrf.mxu0  ;;  %16115 = vst [vmem:[#allocation71_spill] sm:$0xff] %v13489_v25 }
 0x26a   : > { %v13492_v3 = vadd.f32 %v3830_v18, %v13325_v48  ;;  %v13496_v2 = vpop.f32.mrf.mxu1 }
 0x26b   : > { %v10666_v19 = vpop.f32.mrf.mxu0  ;;  %16116 = vst [vmem:[#allocation72_spill] sm:$0xff] %v13496_v2 }
 0x26c   : > { %v13499_v35 = vadd.f32 %v10666_v19, %v13329_v56  ;;  %v13503_v14 = vpop.f32.mrf.mxu1 }
 0x26d   : > { %v13501_v32 = vpop.f32.mrf.mxu0  ;;  %16118 = vst [vmem:[#allocation74_spill] sm:$0xff] %v13503_v14 }
 0x26e   : > { %16117 = vst [vmem:[#allocation73_spill] sm:$0xff] %v13499_v35  ;;  %v13508_v48 = vpop.f32.mrf.mxu1 }
 0x26f   : > { %v10669_v20 = vpop.f32.mrf.mxu0  ;;  %16119 = vst [vmem:[#allocation75_spill] sm:$0xff] %v13508_v48 }
 0x270   : > { %v13506_v25 = vadd.f32 %v10669_v20, %v13335_v26  ;;  %v13516_v56 = vpop.f32.mrf.mxu1 }
 0x271   : > { %v3846_v16 = vpop.f32.mrf.mxu0  ;;  %16121 = vst [vmem:[#allocation77_spill] sm:$0xff] %v13516_v56 }
 0x272   : > { %v13511_v18 = vadd.f32 %v3846_v16, %v13340_v24  ;;  %v13523_v26 = vpop.f32.mrf.mxu1  ;;  %v11261_v24 = vld [vmem:[%s15945_s6 + $0x58] sm:$0xff]  }
 0x273   : > { %v10670_v30 = vpop.f32.mrf.mxu0  ;;  %16123 = vst [vmem:[#allocation79_spill] sm:$0xff] %v13523_v26  ;;  %10859 = vmatprep.subr.bf16.mxu1 %v11261_v24 }
 0x274   : > { %v13514_v2 = vadd.f32 %v10670_v30, %v13344_v34  ;;  %v13534_v56 = vpop.f32.mrf.mxu1 }
 0x275   : > { %v13518_v19 = vpop.f32.mrf.mxu0  ;;  %16124 = vst [vmem:[#allocation80_spill] sm:$0xff] %v13534_v56 }
 0x276   : > { %16120 = vst [vmem:[#allocation76_spill] sm:$0xff] %v13514_v2  ;;  %v13541_v26 = vpop.f32.mrf.mxu1 }
 0x277   : > { %v10673_v35 = vpop.f32.mrf.mxu0  ;;  %16125 = vst [vmem:[#allocation81_spill] sm:$0xff] %v13541_v26 }
 0x278   : > { %v13521_v14 = vadd.f32 %v10673_v35, %v13348_v63 }
 0x279   : > { %v3862_v20 = vpop.f32.mrf.mxu0 }
 0x27a   : > { %16122 = vst [vmem:[#allocation78_spill] sm:$0xff] %v13521_v14  ;;  %v13529_v16 = vadd.f32 %v3862_v20, %v13353_v1 }
 0x27b   : > { %v10674_v34 = vpop.f32.mrf.mxu0 }
 0x27c   : > { %v13532_v30 = vadd.f32 %v10674_v34, %v13362_v51  ;;  %v13549_v51 = vpop.f32.mrf.mxu1 }
 0x27d   : > { %v13536_v48 = vpop.f32.mrf.mxu0  ;;  %16127 = vst [vmem:[#allocation83_spill] sm:$0xff] %v13549_v51 }
 0x27e   : > { %v13553_v56 = vpop.f32.mrf.mxu1 }
 0x27f   : > { %v10677_v63 = vpop.f32.mrf.mxu0  ;;  %16128 = vst [vmem:[#allocation84_spill] sm:$0xff] %v13553_v56 }
 0x280   : > { %v13539_v35 = vadd.f32 %v10677_v63, %v13368_v58 }
 0x281   : > { %v3878_v14 = vpop.f32.mrf.mxu0 }
 0x282   : > { %v13544_v2 = vadd.f32 %v3878_v14, %v13373_v45  ;;  %v13561_v14 = vpop.f32.mrf.mxu1 }
 0x283   : > { %v10678_v1 = vpop.f32.mrf.mxu0  ;;  %16130 = vst [vmem:[#allocation86_spill] sm:$0xff] %v13561_v14 }
 0x284   : > { %v13547_v20 = vadd.f32 %v10678_v1, %v13377_v27 }
 0x285   : > { %v13551_v24 = vpop.f32.mrf.mxu0 }
 0x286   : > { %16126 = vst [vmem:[#allocation82_spill] sm:$0xff] %v13547_v20  ;;  %v13568_v20 = vpop.f32.mrf.mxu1 }
 0x287   : > { %v10681_v34 = vpop.f32.mrf.mxu0  ;;  %16132 = vst [vmem:[#allocation88_spill] sm:$0xff] %v13568_v20 }
 0x288   : > { %v13556_v58 = vadd.f32 %v10681_v34, %v13384_v29 }
 0x289   : > { %v3894_v63 = vpop.f32.mrf.mxu0 }
 0x28a   : > { %v13559_v26 = vadd.f32 %v3894_v63, %v13389_v5  ;;  %v13576_v63 = vpop.f32.mrf.mxu1 }
 0x28b   : > { %v10682_v45 = vpop.f32.mrf.mxu0 }
 0x28c   : > { %16129 = vst [vmem:[#allocation85_spill] sm:$0xff] %v13559_v26  ;;  %v13564_v27 = vadd.f32 %v10682_v45, %v13393_v15  ;;  %v16133_v45 = vld [vmem:[#allocation60_spill] sm:$0xff]  ;;  %v13585_v20 = vpop.f32.mrf.mxu1 }
 0x28d   : > { %v13566_v1 = vpop.f32.mrf.mxu0  ;;  %16134 = vst [vmem:[#allocation60_spill] sm:$0xff] %v13585_v20 }
 0x28e   : > { %16131 = vst [vmem:[#allocation87_spill] sm:$0xff] %v13564_v27  ;;  %v2029_v27 = vadd.f32 %v16133_v45, %v13124_v36  ;;  %v2770_v36 = vadd.f32 %v13156_v41, %v13198_v60  ;;  %v16142_v41 = vld [vmem:[#allocation48_spill] sm:$0xff] }
 0x28f   : > { %v10685_v51 = vpop.f32.mrf.mxu0  ;;  %v16143_v60 = vld [vmem:[#allocation44_spill] sm:$0xff] }
 0x290   : > { %v13571_v56 = vadd.f32 %v10685_v51, %v13397_v21  ;;  %v2758_v51 = vadd.f32 %v13094_v40, %v13144_v57  ;;  %v16137_v40 = vld [vmem:[#allocation42_spill] sm:$0xff] }
 0x291   : > { %v3910_v29 = vpop.f32.mrf.mxu0  ;;  %v2778_v57 = vadd.f32 %v16137_v40, %v13234_v46 }
 0x292   : > { %v13574_v34 = vadd.f32 %v3910_v29, %v13402_v7  ;;  %v2351_v7 = vadd.f32 %v13290_v54, %v2029_v27  ;;  %v2774_v54 = vadd.f32 %v13174_v62, %v13216_v53  ;;  %v16139_v27 = vld [vmem:[#allocation43_spill] sm:$0xff] }
 0x293   : > { %v10686_v5 = vpop.f32.mrf.mxu0  ;;  %v16144_v62 = vld [vmem:[#allocation55_spill] sm:$0xff]  ;;  %v3225_v40 = vadd.f32 %v13391_v4, %v2778_v57  ;;  %v16150_v57 = vld [vmem:[#allocation50_spill] sm:$0xff] }
 0x294   : > { %v13579_v14 = vadd.f32 %v10686_v5, %v13408_v49  ;;  %v2762_v49 = vadd.f32 %v13118_v23, %v13162_v39  ;;  %v2766_v5 = vadd.f32 %v13138_v55, %v13180_v0  ;;  %v16141_v0 = vld [vmem:[#allocation53_spill] sm:$0xff]  ;;  %v3217_v53 = vadd.f32 %v16144_v62, %v2770_v36  ;;  %v16148_v36 = vld [vmem:[#allocation59_spill] sm:$0xff] }
 0x295   : > { %v13581_v15 = vpop.f32.mrf.mxu0 }
 0x296   : > { %v3213_v20 = vadd.f32 %v16141_v0, %v2766_v5  ;;  %v16147_v0 = vld [vmem:[#allocation47_spill] sm:$0xff] }
 0x297   : > { %v10689_v26 = vpop.f32.mrf.mxu0 }
 0x298   : > { %v13588_v21 = vadd.f32 %v10689_v26, %v13416_v28  ;;  %v3205_v28 = vadd.f32 %v13310_v44, %v2758_v51  ;;  %v16138_v26 = vld [vmem:[#allocation46_spill] sm:$0xff] }
 0x299   : > { %v3926_v29 = vpop.f32.mrf.mxu0  ;;  %v2782_v23 = vadd.f32 %v16139_v27, %v16138_v26  ;;  %v16145_v51 = vld [vmem:[#allocation58_spill] sm:$0xff]  ;;  %v16146_v26 = vld [vmem:[#allocation45_spill] sm:$0xff] }
 0x29a   : > { %16135 = vst [vmem:[#allocation89_spill] sm:$0xff] %v13588_v21  ;;  %v13600_v45 = vadd.f32 %v3926_v29, %v13424_v22  ;;  %v16140_v21 = vld [vmem:[#allocation51_spill] sm:$0xff]  ;;  %v2786_v22 = vadd.f32 %v16143_v60, %v16142_v41  ;;  %v13613_v29 = vpop.f32.mrf.mxu1  ;;  %v3221_v46 = vadd.f32 %v16145_v51, %v2774_v54  ;;  %v2790_v27 = vadd.f32 %v16146_v26, %v2351_v7  ;;  %v16149_v54 = vld [vmem:[#allocation49_spill] sm:$0xff] }
 0x29b   : > { %v10690_v39 = vpop.f32.mrf.mxu0  ;;  %v3209_v55 = vadd.f32 %v16140_v21, %v2762_v49  ;;  %v3229_v21 = vadd.f32 %v13404_v52, %v2782_v23  ;;  %v3519_v41 = vadd.f32 %v16147_v0, %v3205_v28  ;;  %v3527_v62 = vadd.f32 %v16149_v54, %v3213_v20  ;;  %v16151_v23 = vld [vmem:[#allocation52_spill] sm:$0xff]  ;;  %v16154_v0 = vld [vmem:[#allocation61_spill] sm:$0xff] }
 0x29c   : > { %16136 = vst [vmem:[#allocation90_spill] sm:$0xff] %v13600_v45  ;;  %v13616_v44 = vadd.f32 %v10690_v39, %v13430_v11  ;;  %v3233_v49 = vadd.f32 %v13426_v50, %v2786_v22  ;;  %v3237_v5 = vadd.f32 %v13451_v42, %v2790_v27  ;;  %v5601_v39 = vshll.u32 %v13487_v33, 16  ;;  %v13631_v4 = vpop.f32.mrf.mxu1  ;;  %v16152_v22 = vld [vmem:[#allocation54_spill] sm:$0xff]  ;;  %v16153_v27 = vld [vmem:[#allocation57_spill] sm:$0xff] }
 0x29d   : > { %v13622_v45 = vpop.f32.mrf.mxu0  ;;  %v3523_v60 = vadd.f32 %v16148_v36, %v3209_v55  ;;  %v3958_v52 = vadd.f32 %v13475_v59, %v3519_v41  ;;  %v3531_v50 = vadd.f32 %v16150_v57, %v3217_v53  ;;  %v3535_v42 = vadd.f32 %v16151_v23, %v3221_v46 }
 0x29e   : > { %v3539_v28 = vadd.f32 %v16152_v22, %v3225_v40  ;;  %v3543_v55 = vadd.f32 %v16153_v27, %v3229_v21  ;;  %v3547_v20 = vadd.f32 %v16154_v0, %v3233_v49  ;;  %v13648_v59 = vadd.f32 %v13399_v6, %v3237_v5  ;;  %v10728_v40 = vpop.f32.mrf.mxu1  ;;  %v16155_v49 = vld [vmem:[#allocation62_spill] sm:$0xff]  ;;  %v16165_v22 = vld [vmem:[#allocation69_spill] sm:$0xff]  ;;  %v16167_v0 = vld [vmem:[#allocation71_spill] sm:$0xff] }
 0x29f   : > { %v10693_v11 = vpop.f32.mrf.mxu0  ;;  %v3962_v26 = vadd.f32 %v13501_v32, %v3523_v60  ;;  %v5599_v53 = vshrl.u32 %v13487_v33, 16  ;;  %v5603_v46 = vrot.slane %v5601_v39, 1  ;;  %v4406_v32 = vadd.f32 %v13406_v37, %v13463_v43  ;;  %v16156_v43 = vld [vmem:[#allocation73_spill] sm:$0xff] }
 0x2a0   : > { %v13634_v7 = vadd.f32 %v10693_v11, %v13438_v9  ;;  %v3966_v9 = vadd.f32 %v13518_v19, %v3527_v62  ;;  %v4407_v19 = vadd.f32 %v13413_v12, %v13473_v31  ;;  %v3970_v21 = vadd.f32 %v13536_v48, %v3531_v50  ;;  %v16158_v12 = vld [vmem:[#allocation64_spill] sm:$0xff]  ;;  %v16159_v48 = vld [vmem:[#allocation65_spill] sm:$0xff]  ;;  %v4376_v50 = vpop.f32.mrf.mxu1 }
 0x2a1   : > { %v3942_v51 = vpop.f32.mrf.mxu0  ;;  %v4405_v33 = vadd.f32 %v16155_v49, %v3958_v52  ;;  %v4410_v5 = vadd.f32 %v13428_v17, %v13485_v47  ;;  %v3974_v37 = vadd.f32 %v13551_v24, %v3535_v42  ;;  %v13676_v31 = vadd.f32 %v16158_v12, %v3962_v26  ;;  %v13685_v17 = vld [vmem:[%s15944_s5] ss:$0 sm:$0xff]  ;;  %v16161_v47 = vld [vmem:[#allocation76_spill] sm:$0xff]  ;;  %v16162_v24 = vld [vmem:[#allocation67_spill] sm:$0xff] }
 0x2a2   : > { %v13644_v36 = vadd.f32 %v3942_v51, %v13449_v8  ;;  %v4404_v8 = vadd.f32 %v13410_v38, %v13468_v10  ;;  %v16157_v38 = vld [vmem:[#allocation63_spill] sm:$0xff]  ;;  %v13680_v39 = vadd.f32 %v16159_v48, %v13506_v25  ;;  %v13693_v54 = vadd.f32 %v16162_v24, %v16161_v47  ;;  %v16163_v62 = vld [vmem:[#allocation68_spill] sm:$0xff]  ;;  %v16164_v42 = vld [vmem:[#allocation78_spill] sm:$0xff] }
 0x2a3   : > { %v10694_v11 = vpop.f32.mrf.mxu0  ;;  %v13673_v10 = vadd.f32 %v16157_v38, %v16156_v43  ;;  %v13696_v52 = vadd.f32 %v16163_v62, %v3966_v9  ;;  %v13698_v57 = vor.u32 %v5603_v46, %v5599_v53  ;;  %v3978_v25 = vadd.f32 %v13566_v1, %v3539_v28  ;;  %v16168_v9 = vld [vmem:[#allocation72_spill] sm:$0xff]  ;;  %v16169_v1 = vld [vmem:[#allocation74_spill] sm:$0xff]  ;;  %v16170_v46 = vld [vmem:[#allocation75_spill] sm:$0xff] }
 0x2a4   : > { %v13652_v41 = vadd.f32 %v10694_v11, %v13458_v13  ;;  %v13668_v13 = vadd.f32 %v13432_v61, %v13492_v3  ;;  %v16160_v61 = vld [vmem:[#allocation66_spill] sm:$0xff]  ;;  %v13703_v51 = vadd.f32 %v16165_v22, %v16164_v42  ;;  %v13711_v11 = vadd.f32 %v16167_v0, %v13532_v30  ;;  %v16172_v38 = vld [vmem:[#allocation77_spill] sm:$0xff]  ;;  %v16173_v30 = vld [vmem:[#allocation79_spill] sm:$0xff]  ;;  %v10731_v42 = vpop.f32.mrf.mxu1 }
 0x2a5   : > { %v13661_v6 = vpop.f32.mrf.mxu0  ;;  %v13689_v3 = vadd.f32 %v16160_v61, %v13511_v18  ;;  %v16166_v18 = vld [vmem:[#allocation70_spill] sm:$0xff]  ;;  %v13714_v53 = vadd.f32 %v16168_v9, %v3970_v21  ;;  %v13718_v28 = vadd.f32 %v16169_v1, %v13539_v35  ;;  %v13730_v48 = vadd.f32 %v16173_v30, %v3974_v37  ;;  %v16174_v35 = vld [vmem:[#allocation80_spill] sm:$0xff]  ;;  %v16176_v47 = vld [vmem:[#allocation81_spill] sm:$0xff] }
 0x2a6   : > { %v13707_v26 = vadd.f32 %v16166_v18, %v13529_v16  ;;  %v16171_v43 = vld [vmem:[#allocation82_spill] sm:$0xff]  ;;  %v3982_v21 = vadd.f32 %v13581_v15, %v3543_v55  ;;  %v13735_v61 = vadd.f32 %v16174_v35, %v13556_v58  ;;  %v16177_v62 = vld [vmem:[#allocation87_spill] sm:$0xff]  ;;  %v3986_v55 = vadd.f32 %v13622_v45, %v3547_v20  ;;  %v16181_v1 = vld [vmem:[#allocation88_spill] sm:$0xff] }
 0x2a7   : > { %v10737_v60 = vpop.f32.mrf.mxu0  ;;  %v13727_v12 = vadd.f32 %v16172_v38, %v16171_v43  ;;  %v16180_v0 = vld [vmem:[#allocation86_spill] sm:$0xff]  ;;  %v16182_v45 = vld [vmem:[#allocation5_spill] sm:$0xff]  ;;  %v16183_v38 = vld [vmem:[#allocation60_spill] sm:$0xff] }
 0x2a8   : > { %v4720_v23 = vadd.f32 %v10737_v60, %v4406_v32  ;;  %v13722_v32 = vadd.f32 %v16170_v46, %v13544_v2  ;;  %v16175_v2 = vld [vmem:[#allocation85_spill] sm:$0xff]  ;;  %v13758_v9 = vadd.f32 %v16180_v0, %v13571_v56  ;;  %v13762_v46 = vadd.f32 %v16181_v1, %v13574_v34  ;;  %v16185_v34 = vld [vmem:[#allocation90_spill] sm:$0xff] }
 0x2a9   : > { %v4575_v27 = vpop.f32.mrf.mxu0  ;;  %v13739_v24 = vadd.f32 %v16176_v47, %v16175_v2  ;;  %v13771_v30 = vadd.f32 %v16183_v38, %v3982_v21  ;;  %v16184_v56 = vld [vmem:[#allocation89_spill] sm:$0xff]  ;;  %v13779_v35 = vadd.f32 %v13631_v4, %v16185_v34  ;;  %v16186_v2 = vld [vmem:[#allocation6_spill] sm:$0xff] }
 0x2aa   : > { %v4763_v16 = vadd.f32 %v13685_v17, %v4720_v23  ;;  %v4718_v49 = vadd.f32 %v4575_v27, %v4404_v8  ;;  %v16178_v8 = vld [vmem:[#allocation83_spill] sm:$0xff]  ;;  %v16179_v27 = vld [vmem:[#allocation84_spill] sm:$0xff] }
 0x2ab   : > { %v10738_v60 = vpop.f32.mrf.mxu0  ;;  %v13743_v23 = vadd.f32 %v16178_v8, %v16177_v62  ;;  %v13747_v15 = vadd.f32 %v16179_v27, %v3978_v25  ;;  %v16187_v27 = vld [vmem:[#allocation7_spill] sm:$0xff] }
 0x2ac   : > { %v4799_v22 = vmax.f32 %v4763_v16, 0.0  ;;  %v4761_v37 = vadd.f32 %v13685_v17, %v4718_v49  ;;  %v4721_v18 = vadd.f32 %v10738_v60, %v4407_v19  ;;  %v13766_v19 = vadd.f32 %v13576_v63, %v13579_v14  ;;  %v4389_v63 = vpop.f32.mrf.mxu1 }
 0x2ad   : > { %v4578_v58 = vpop.f32.mrf.mxu0  ;;  %v13775_v60 = vadd.f32 %v13613_v29, %v16184_v56  ;;  %v13782_v14 = vadd.f32 %v10728_v40, %v13616_v44  ;;  %v13794_v44 = vadd.f32 %v4389_v63, %v13644_v36  ;;  %v5410_v63 = vld [vmem:[#allocation3 + $0x8] sm:$0xe] }
 0x2ae   : > { %v4835_v20 = vmul.f32 %v4799_v22, %v16182_v45  ;;  %v4797_v25 = vmax.f32 %v4761_v37, 0.0  ;;  %v4764_v16 = vadd.f32 %v13685_v17, %v4721_v18  ;;  %v4719_v49 = vadd.f32 %v4578_v58, %v4405_v33  ;;  %v10732_v34 = vpop.f32.mrf.mxu1 }
 0x2af   : > { %v10741_v43 = vpop.f32.mrf.mxu0  ;;  %v13788_v22 = vadd.f32 %v4376_v50, %v3986_v55  ;;  %v13791_v37 = vadd.f32 %v10731_v42, %v13634_v7 }
 0x2b0   : > { %4872 = vst.msk [vmem:[%s13754_s10 + $0x10] sm:$0xff] %vm4869_vm3, %v4835_v20  ;;  %v10026_v33 = vpack.c.bf16 %v4835_v20, %v4835_v20  ;;  %v4833_v47 = vmul.f32 %v4797_v25, %v16186_v2  ;;  %v4800_v21 = vmax.f32 %v4764_v16, 0.0  ;;  %v4762_v62 = vadd.f32 %v13685_v17, %v4719_v49  ;;  %v16188_v25 = vld [vmem:[#allocation8_spill] sm:$0xff] }
 0x2b1   : > { %v4724_v8 = vadd.f32 %v10741_v43, %v4410_v5  ;;  %v4591_v29 = vpop.f32.mrf.mxu0  ;;  %v13801_v5 = vadd.f32 %v13661_v6, %v13648_v59 }
 0x2b2   : > { %v5034_v4 = vshrl.u32 %v10026_v33, 16  ;;  %v5037_v40 = vshll.u32 %v10026_v33, 16  ;;  %4870 = vst.msk [vmem:[%s13754_s10] sm:$0xff] %vm4869_vm3, %v4833_v47  ;;  %v10024_v18 = vpack.c.bf16 %v4833_v47, %v4833_v47  ;;  %v4836_v58 = vmul.f32 %v4800_v21, %v16187_v27  ;;  %v16189_v21 = vld [vmem:[#allocation12_spill] sm:$0xff] }
 0x2b3   : > { %v4798_v50 = vmax.f32 %v4762_v62, 0.0  ;;  %v4767_v55 = vadd.f32 %v13685_v17, %v4724_v8  ;;  %v4722_v7 = vadd.f32 %v4591_v29, %v13668_v13  ;;  %v10742_v42 = vpop.f32.mrf.mxu0 }
 0x2b4   : > { %v5036_v0 = vrot.slane %v5034_v4, 6  ;;  %v5039_v36 = vrot.slane %v5037_v40, 7  ;;  %v5015_v1 = vshrl.u32 %v10024_v18, 16  ;;  %v5018_v45 = vshll.u32 %v10024_v18, 16  ;;  %4873 = vst.msk [vmem:[%s13754_s10 + $0x18] sm:$0xff] %vm4869_vm3, %v4836_v58 }
 0x2b5   : > { %v10027_v20 = vpack.c.bf16 %v4836_v58, %v4836_v58  ;;  %v4834_v16 = vmul.f32 %v4798_v50, %v16188_v25  ;;  %v4803_v49 = vmax.f32 %v4767_v55, 0.0  ;;  %v4765_v59 = vadd.f32 %v13685_v17, %v4722_v7  ;;  %v4594_v6 = vpop.f32.mrf.mxu0 }
 0x2b6   : > { %v5040_v43 = vor.u32 %v5039_v36, %v5036_v0  ;;  %v5017_v38 = vrot.slane %v5015_v1, 6  ;;  %v5020_v56 = vrot.slane %v5018_v45, 7  ;;  %v4725_v13 = vadd.f32 %v10742_v42, %v13673_v10  ;;  %v13820_v10 = vld [vmem:[%s15945_s6 + $0x78] sm:$0xff]  }
 0x2b7   : > { %v5044_v33 = vshrl.u32 %v10027_v20, 16  ;;  %v5047_v2 = vshll.u32 %v10027_v20, 16  ;;  %4871 = vst.msk [vmem:[%s13754_s10 + $0x8] sm:$0xff] %vm4869_vm3, %v4834_v16  ;;  %v10025_v47 = vpack.c.bf16 %v4834_v16, %v4834_v16  ;;  %v4839_v62 = vmul.f32 %v4803_v49, %v16189_v21  ;;  %v10745_v8 = vpop.f32.mrf.mxu0  ;;  %10903 = vmatprep.subr.bf16.mxu0 %v13820_v10  ;;  %v16193_v21 = vld [vmem:[#allocation11_spill] sm:$0xff] }
 0x2b8   : > { %v5021_v29 = vor.u32 %v5020_v56, %v5017_v38  ;;  %v4801_v4 = vmax.f32 %v4765_v59, 0.0  ;;  %v4768_v40 = vadd.f32 %v13685_v17, %v4725_v13  ;;  %v13815_v18 = vadd.f32 %v10732_v34, %v13652_v41  ;;  %v16191_v41 = vld [vmem:[#allocation10_spill] sm:$0xff] }
 0x2b9   : > { %v5046_v27 = vrot.slane %v5044_v33, 6  ;;  %v5049_v58 = vrot.slane %v5047_v2, 7  ;;  %v5024_v50 = vshrl.u32 %v10025_v47, 16  ;;  %v5027_v55 = vshll.u32 %v10025_v47, 16  ;;  %4876 = vst.msk [vmem:[%s13754_s10 + $0x30] sm:$0xff] %vm4869_vm3, %v4839_v62  ;;  %v4607_v7 = vpop.f32.mrf.mxu0 }
 0x2ba   : > { %v5042_v42 = vrot.slane %v5040_v43, 4  ;;  %v5411_v36 = vsel %vm11481_vm9, %v5021_v29, %v5410_v63  ;;  %v10030_v1 = vpack.c.bf16 %v4839_v62, %v4839_v62  ;;  %v4837_v45 = vmul.f32 %v4801_v4, %v16191_v41 }
 0x2bb   : > { %5412 = vst [vmem:[#allocation3 + $0x8] sm:$0xe] %v5411_v36  ;;  %v5050_v20 = vor.u32 %v5049_v58, %v5046_v27  ;;  %v5026_v25 = vrot.slane %v5024_v50, 6  ;;  %v5029_v16 = vrot.slane %v5027_v55, 7  ;;  %v4804_v49 = vmax.f32 %v4768_v40, 0.0  ;;  %v10746_v59 = vpop.f32.mrf.mxu0 }
 0x2bc   : > { %v5074_v38 = vshrl.u32 %v10030_v1, 16  ;;  %v5077_v56 = vshll.u32 %v10030_v1, 16  ;;  %4874 = vst.msk [vmem:[%s13754_s10 + $0x20] sm:$0xff] %vm4869_vm3, %v4837_v45  ;;  %v10028_v13 = vpack.c.bf16 %v4837_v45, %v4837_v45  ;;  %v4723_v34 = vadd.f32 %v4594_v6, %v13676_v31 }
 0x2bd   : > { %v5022_v63 = vrot.slane %v5021_v29, 4  ;;  %v5051_v2 = vsel %vm11839_vm13, %v5042_v42, %v5050_v20  ;;  %v5030_v47 = vor.u32 %v5029_v16, %v5026_v25  ;;  %v4840_v62 = vmul.f32 %v4804_v49, %v16193_v21  ;;  %v4610_v4 = vpop.f32.mrf.mxu0  ;;  %v16194_v21 = vld [vmem:[#allocation9_spill] sm:$0xff] }
 0x2be   : > { %5415 = vst.msk [vmem:[#allocation3 + $0x14] sm:$0xf] %vm403_vm0, %v5051_v2  ;;  %v5076_v40 = vrot.slane %v5074_v38, 6  ;;  %v5079_v27 = vrot.slane %v5077_v56, 7  ;;  %v5054_v58 = vshrl.u32 %v10028_v13, 16  ;;  %v5057_v50 = vshll.u32 %v10028_v13, 16 }
 0x2bf   : > { %v5031_v55 = vsel %vm11839_vm13, %v5022_v63, %v5030_v47  ;;  %v5032_v0 = vrot.slane %v5030_v47, 4  ;;  %4877 = vst.msk [vmem:[%s13754_s10 + $0x38] sm:$0xff] %vm4869_vm3, %v4840_v62  ;;  %v10031_v31 = vpack.c.bf16 %v4840_v62, %v4840_v62  ;;  %v4766_v6 = vadd.f32 %v13685_v17, %v4723_v34  ;;  %v10749_v29 = vpop.f32.mrf.mxu0 }
 0x2c0   : > { %5413 = vst.msk [vmem:[#allocation3 + $0xc] sm:$0xf] %vm403_vm0, %v5031_v55  ;;  %v13841_v42 = vor.u32 %v5079_v27, %v5076_v40  ;;  %v5056_v36 = vrot.slane %v5054_v58, 6  ;;  %v5059_v1 = vrot.slane %v5057_v50, 7  ;;  %v4728_v41 = vadd.f32 %v10745_v8, %v13680_v39  ;;  %v16195_v50 = vld [vmem:[#allocation17_spill] sm:$0xff] }
 0x2c1   : > { %v5041_v45 = vsel %vm11839_vm13, %v5032_v0, %v5040_v43  ;;  %v5084_v25 = vshrl.u32 %v10031_v31, 16  ;;  %v5087_v16 = vshll.u32 %v10031_v31, 16  ;;  %v4802_v49 = vmax.f32 %v4766_v6, 0.0  ;;  %v4623_v38 = vpop.f32.mrf.mxu0 }
 0x2c2   : > { %v5052_v56 = vrot.slane %v5050_v20, 4  ;;  %5414 = vst.msk [vmem:[#allocation3 + $0x10] sm:$0xf] %vm403_vm0, %v5041_v45  ;;  %v5060_v13 = vor.u32 %v5059_v1, %v5056_v36  ;;  %v4771_v34 = vadd.f32 %v13685_v17, %v4728_v41  ;;  %v4726_v63 = vadd.f32 %v4607_v7, %v13689_v3  ;;  %v11280_v36 = vld [vmem:[%s15945_s6 + $0x70] sm:$0xff]  }
 0x2c3   : > { %v5086_v2 = vrot.slane %v5084_v25, 6  ;;  %v5089_v47 = vrot.slane %v5087_v16, 7  ;;  %v4838_v39 = vmul.f32 %v4802_v49, %v16194_v21  ;;  %v4729_v8 = vadd.f32 %v10746_v59, %v13693_v54  ;;  %v13851_v43 = vpop.f32.mrf.mxu0 }
 0x2c4   : > { %v5082_v62 = vrot.slane %v13841_v42, 4  ;;  %v5061_v20 = vsel %vm11839_vm13, %v5052_v56, %v5060_v13  ;;  %v4807_v40 = vmax.f32 %v4771_v34, 0.0  ;;  %v4769_v27 = vadd.f32 %v13685_v17, %v4726_v63 }
 0x2c5   : > { %5416 = vst.msk [vmem:[#allocation3 + $0x18] sm:$0xf] %vm403_vm0, %v5061_v20  ;;  %v13858_v58 = vor.u32 %v5089_v47, %v5086_v2  ;;  %v10029_v3 = vpack.c.bf16 %v4838_v39, %v4838_v39  ;;  %v4772_v54 = vadd.f32 %v13685_v17, %v4729_v8  ;;  %v4727_v7 = vadd.f32 %v4610_v4, %v13696_v52  ;;  %v13864_v59 = vpop.f32.mrf.mxu0 }
 0x2c6   : > { %4875 = vst.msk [vmem:[%s13754_s10 + $0x28] sm:$0xff] %vm4869_vm3, %v4838_v39  ;;  %v4843_v55 = vmul.f32 %v4807_v40, %v16195_v50  ;;  %v4805_v0 = vmax.f32 %v4769_v27, 0.0  ;;  %v4732_v31 = vadd.f32 %v10749_v29, %v13703_v51  ;;  %v4730_v6 = vadd.f32 %v4623_v38, %v13707_v26  ;;  %v16196_v26 = vld [vmem:[#allocation15_spill] sm:$0xff]  ;;  %v16197_v39 = vld [vmem:[#allocation16_spill] sm:$0xff] }
 0x2c7   : > { %v5062_v1 = vrot.slane %v5060_v13, 4  ;;  %v5091_v41 = vsel %vm11839_vm13, %v5082_v62, %v13858_v58  ;;  %v5064_v45 = vshrl.u32 %v10029_v3, 16  ;;  %v5067_v52 = vshll.u32 %v10029_v3, 16  ;;  %v13875_v4 = vld [vmem:[#allocation3 + $0x8] sm:$0xff]   ;;  %v13884_v34 = vpop.f32.mrf.mxu0  ;;  %v11282_v3 = vld [vmem:[%s15945_s6 + $0x68] sm:$0xff]  }
 0x2c8   : > { %5419 = vst.msk [vmem:[#allocation3 + $0x24] sm:$0xf] %vm403_vm0, %v5091_v41  ;;  %v10034_v51 = vpack.c.bf16 %v4843_v55, %v4843_v55  ;;  %v4841_v29 = vmul.f32 %v4805_v0, %v16196_v26  ;;  %v4808_v25 = vmax.f32 %v4772_v54, 0.0  ;;  %v4770_v16 = vadd.f32 %v13685_v17, %v4727_v7  ;;  %10824 = vmatmul.mubr.msk.bf16.vlgmr.msra.gmra.mxu0 %vm4869_vm3, %v13875_v4 }
 0x2c9   : > { %4880 = vst.msk [vmem:[%s13754_s10 + $0x50] sm:$0xff] %vm4869_vm3, %v4843_v55  ;;  %v5066_v49 = vrot.slane %v5064_v45, 6  ;;  %v5069_v38 = vrot.slane %v5067_v52, 7  ;;  %v4775_v56 = vadd.f32 %v13685_v17, %v4732_v31  ;;  %v4773_v13 = vadd.f32 %v13685_v17, %v4730_v6  ;;  %v13888_v63 = vld [vmem:[#allocation3 + $0x10] sm:$0xff]   ;;  %10904 = vmatpush3.bf16.msra.mxu0 %v13820_v10  ;;  %v16198_v6 = vld [vmem:[#allocation14_spill] sm:$0xff]  ;;  %v13904_v45 = vpop.f32.mrf.mxu0 }
 0x2ca   : > { %v5114_v2 = vshrl.u32 %v10034_v51, 16  ;;  %v5117_v47 = vshll.u32 %v10034_v51, 16  ;;  %4878 = vst.msk [vmem:[%s13754_s10 + $0x40] sm:$0xff] %vm4869_vm3, %v4841_v29  ;;  %v10032_v21 = vpack.c.bf16 %v4841_v29, %v4841_v29  ;;  %v4844_v8 = vmul.f32 %v4808_v25, %v16197_v39  ;;  %10827 = vmatprep.mubr.msk.bf16.mxu0 %vm4869_vm3, %v13888_v63  ;;  %10905 = vmatprep.subr.bf16.mxu0 %v11280_v36  ;;  %v16199_v29 = vld [vmem:[#allocation21_spill] sm:$0xff] }
 0x2cb   : > { %v5070_v62 = vor.u32 %v5069_v38, %v5066_v49  ;;  %v4806_v20 = vmax.f32 %v4770_v16, 0.0  ;;  %v4811_v40 = vmax.f32 %v4775_v56, 0.0  ;;  %v4809_v27 = vmax.f32 %v4773_v13, 0.0 }
 0x2cc   : > { %v5116_v54 = vrot.slane %v5114_v2, 6  ;;  %v5119_v7 = vrot.slane %v5117_v47, 7  ;;  %v5094_v50 = vshrl.u32 %v10032_v21, 16  ;;  %v5097_v55 = vshll.u32 %v10032_v21, 16  ;;  %4881 = vst.msk [vmem:[%s13754_s10 + $0x58] sm:$0xff] %vm4869_vm3, %v4844_v8  ;;  %v16200_v47 = vld [vmem:[#allocation19_spill] sm:$0xff] }
 0x2cd   : > { %v5071_v10 = vsel %vm11839_vm13, %v5062_v1, %v5070_v62  ;;  %v5072_v0 = vrot.slane %v5070_v62, 4  ;;  %v10035_v31 = vpack.c.bf16 %v4844_v8, %v4844_v8  ;;  %v4842_v41 = vmul.f32 %v4806_v20, %v16198_v6  ;;  %10906 = vmatpush3.bf16.msra.mxu0 %v11280_v36  ;;  %v11285_v1 = vld [vmem:[%s15945_s6 + $0x60] sm:$0xff]   ;;  %v10754_v20 = vpop.f32.mrf.mxu0 }
 0x2ce   : > { %5417 = vst.msk [vmem:[#allocation3 + $0x1c] sm:$0xf] %vm403_vm0, %v5071_v10  ;;  %v13907_v52 = vor.u32 %v5119_v7, %v5116_v54  ;;  %v5096_v51 = vrot.slane %v5094_v50, 6  ;;  %v5099_v26 = vrot.slane %v5097_v55, 7  ;;  %v4847_v25 = vmul.f32 %v4811_v40, %v16199_v29  ;;  %10907 = vmatprep.subr.bf16.mxu0 %v11282_v3 }
 0x2cf   : > { %v5081_v16 = vsel %vm11839_vm13, %v5072_v0, %v13841_v42  ;;  %v5124_v49 = vshrl.u32 %v10035_v31, 16  ;;  %v5127_v38 = vshll.u32 %v10035_v31, 16  ;;  %4879 = vst.msk [vmem:[%s13754_s10 + $0x48] sm:$0xff] %vm4869_vm3, %v4842_v41  ;;  %v10033_v56 = vpack.c.bf16 %v4842_v41, %v4842_v41 }
 0x2d0   : > { %v5092_v13 = vrot.slane %v13858_v58, 4  ;;  %5418 = vst.msk [vmem:[#allocation3 + $0x20] sm:$0xf] %vm403_vm0, %v5081_v16  ;;  %v5100_v36 = vor.u32 %v5099_v26, %v5096_v51  ;;  %v10038_v2 = vpack.c.bf16 %v4847_v25, %v4847_v25  ;;  %v4845_v21 = vmul.f32 %v4809_v27, %v16200_v47 }
 0x2d1   : > { %4884 = vst.msk [vmem:[%s13754_s10 + $0x70] sm:$0xff] %vm4869_vm3, %v4847_v25  ;;  %v5126_v39 = vrot.slane %v5124_v49, 6  ;;  %v5129_v8 = vrot.slane %v5127_v38, 7  ;;  %v5104_v42 = vshrl.u32 %v10033_v56, 16  ;;  %v5107_v62 = vshll.u32 %v10033_v56, 16  ;;  %10908 = vmatpush3.bf16.msra.mxu0 %v11282_v3  ;;  %v4642_v25 = vpop.f32.mrf.mxu0 }
 0x2d2   : > { %v5122_v40 = vrot.slane %v13907_v52, 4  ;;  %v5101_v54 = vsel %vm11839_vm13, %v5092_v13, %v5100_v36  ;;  %v5154_v7 = vshrl.u32 %v10038_v2, 16  ;;  %v5157_v58 = vshll.u32 %v10038_v2, 16  ;;  %4882 = vst.msk [vmem:[%s13754_s10 + $0x60] sm:$0xff] %vm4869_vm3, %v4845_v21  ;;  %10909 = vmatprep.subr.bf16.mxu0 %v11285_v1 }
 0x2d3   : > { %5420 = vst.msk [vmem:[#allocation3 + $0x28] sm:$0xf] %vm403_vm0, %v5101_v54  ;;  %v5130_v50 = vor.u32 %v5129_v8, %v5126_v39  ;;  %v5106_v55 = vrot.slane %v5104_v42, 6  ;;  %v5109_v27 = vrot.slane %v5107_v62, 7  ;;  %v10036_v10 = vpack.c.bf16 %v4845_v21, %v4845_v21  ;;  %v13958_v42 = vpop.f32.mrf.mxu0 }
 0x2d4   : > { %v5156_v0 = vrot.slane %v5154_v7, 6  ;;  %v5159_v31 = vrot.slane %v5157_v58, 7  ;;  %v4733_v6 = vadd.f32 %v13851_v43, %v13711_v11  ;;  %v4731_v41 = vadd.f32 %v13864_v59, %v13714_v53 }
 0x2d5   : > { %v5102_v51 = vrot.slane %v5100_v36, 4  ;;  %v5131_v26 = vsel %vm11839_vm13, %v5122_v40, %v5130_v50  ;;  %v5110_v3 = vor.u32 %v5109_v27, %v5106_v55  ;;  %v5134_v29 = vshrl.u32 %v10036_v10, 16  ;;  %v13935_v16 = vld [vmem:[#allocation3 + $0x18] sm:$0xff]   ;;  %10910 = vmatpush3.bf16.msra.mxu0 %v11285_v1  ;;  %v16201_v40 = vld [vmem:[#allocation20_spill] sm:$0xff] }
 0x2d6   : > { %5423 = vst.msk [vmem:[#allocation3 + $0x34] sm:$0xf] %vm403_vm0, %v5131_v26  ;;  %v13938_v49 = vor.u32 %v5159_v31, %v5156_v0  ;;  %v5137_v38 = vshll.u32 %v10036_v10, 16  ;;  %v4776_v56 = vadd.f32 %v13685_v17, %v4733_v6  ;;  %v4774_v11 = vadd.f32 %v13685_v17, %v4731_v41  ;;  %10828 = vmatmul.mubr.msk.bf16.gmra.mxu0 %vm4869_vm3, %v13935_v16  ;;  %v16203_v0 = vld [vmem:[#allocation25_spill] sm:$0xff]  ;;  %v4655_v26 = vpop.f32.mrf.mxu0 }
 0x2d7   : > { %v5111_v53 = vsel %vm11839_vm13, %v5102_v51, %v5110_v3  ;;  %v5112_v43 = vrot.slane %v5110_v3, 4  ;;  %v5136_v59 = vrot.slane %v5134_v29, 6  ;;  %v4736_v13 = vadd.f32 %v13884_v34, %v13718_v28  ;;  %v13948_v36 = vld [vmem:[#allocation3 + $0x20] sm:$0xff]  }
 0x2d8   : > { %v5132_v2 = vrot.slane %v5130_v50, 4  ;;  %5421 = vst.msk [vmem:[#allocation3 + $0x2c] sm:$0xf] %vm403_vm0, %v5111_v53  ;;  %v5139_v47 = vrot.slane %v5137_v38, 7  ;;  %v4812_v21 = vmax.f32 %v4776_v56, 0.0  ;;  %v4810_v39 = vmax.f32 %v4774_v11, 0.0  ;;  %10831 = vmatprep.mubr.msk.bf16.mxu0 %vm4869_vm3, %v13948_v36 }
 0x2d9   : > { %v5121_v1 = vsel %vm11839_vm13, %v5112_v43, %v13907_v52  ;;  %v4779_v8 = vadd.f32 %v13685_v17, %v4736_v13  ;;  %v4734_v28 = vadd.f32 %v13904_v45, %v13722_v32  ;;  %v4737_v34 = vadd.f32 %v10754_v20, %v13727_v12  ;;  %v16202_v52 = vld [vmem:[#allocation18_spill] sm:$0xff]  ;;  %v16204_v53 = vld [vmem:[#allocation23_spill] sm:$0xff] }
 0x2da   : > { %5422 = vst.msk [vmem:[#allocation3 + $0x30] sm:$0xf] %vm403_vm0, %v5121_v1  ;;  %v5140_v62 = vor.u32 %v5139_v47, %v5136_v59  ;;  %v4848_v54 = vmul.f32 %v4812_v21, %v16201_v40  ;;  %v4846_v7 = vmul.f32 %v4810_v39, %v16202_v52  ;;  %v5614_v58 = vshll.u32 %v13888_v63, 16  ;;  %v16205_v59 = vld [vmem:[#allocation24_spill] sm:$0xff] }
 0x2db   : > { %v5162_v50 = vrot.slane %v13938_v49, 4  ;;  %v4815_v32 = vmax.f32 %v4779_v8, 0.0  ;;  %v4777_v12 = vadd.f32 %v13685_v17, %v4734_v28  ;;  %v4780_v45 = vadd.f32 %v13685_v17, %v4737_v34 }
 0x2dc   : > { %v5141_v20 = vsel %vm11839_vm13, %v5132_v2, %v5140_v62  ;;  %v5142_v55 = vrot.slane %v5140_v62, 4  ;;  %4885 = vst.msk [vmem:[%s13754_s10 + $0x78] sm:$0xff] %vm4869_vm3, %v4848_v54  ;;  %v10039_v27 = vpack.c.bf16 %v4848_v54, %v4848_v54  ;;  %4883 = vst.msk [vmem:[%s13754_s10 + $0x68] sm:$0xff] %vm4869_vm3, %v4846_v7  ;;  %v10037_v10 = vpack.c.bf16 %v4846_v7, %v4846_v7  ;;  %v10758_v54 = vpop.f32.mrf.mxu0 }
 0x2dd   : > { %5424 = vst.msk [vmem:[#allocation3 + $0x38] sm:$0xf] %vm403_vm0, %v5141_v20  ;;  %v4851_v31 = vmul.f32 %v4815_v32, %v16203_v0  ;;  %v4813_v6 = vmax.f32 %v4777_v12, 0.0  ;;  %v4816_v41 = vmax.f32 %v4780_v45, 0.0  ;;  %v13977_v51 = vrot.slane %v5614_v58, 1 }
 0x2de   : > { %v5164_v3 = vshrl.u32 %v10039_v27, 16  ;;  %v5167_v29 = vshll.u32 %v10039_v27, 16  ;;  %v5144_v38 = vshrl.u32 %v10037_v10, 16  ;;  %v5147_v56 = vshll.u32 %v10037_v10, 16 }
 0x2df   : > { %4888 = vst.msk [vmem:[%s13754_s10 + $0x90] sm:$0xff] %vm4869_vm3, %v4851_v31  ;;  %v10042_v11 = vpack.c.bf16 %v4851_v31, %v4851_v31  ;;  %v4849_v43 = vmul.f32 %v4813_v6, %v16204_v53  ;;  %v4852_v13 = vmul.f32 %v4816_v41, %v16205_v59  ;;  %v4735_v2 = vadd.f32 %v4642_v25, %v13730_v48  ;;  %v13984_v47 = vld [vmem:[#allocation3 + $0x28] sm:$0xff]  }
 0x2e0   : > { %v5166_v21 = vrot.slane %v5164_v3, 6  ;;  %v5169_v39 = vrot.slane %v5167_v29, 7  ;;  %v5146_v1 = vrot.slane %v5144_v38, 6  ;;  %v5149_v8 = vrot.slane %v5147_v56, 7  ;;  %10832 = vmatmul.mubr.msk.bf16.gmra.mxu0 %vm4869_vm3, %v13984_v47  ;;  %v4658_v38 = vpop.f32.mrf.mxu0 }
 0x2e1   : > { %v5194_v28 = vshrl.u32 %v10042_v11, 16  ;;  %v5197_v34 = vshll.u32 %v10042_v11, 16  ;;  %4886 = vst.msk [vmem:[%s13754_s10 + $0x80] sm:$0xff] %vm4869_vm3, %v4849_v43  ;;  %v10040_v62 = vpack.c.bf16 %v4849_v43, %v4849_v43  ;;  %4889 = vst.msk [vmem:[%s13754_s10 + $0x98] sm:$0xff] %vm4869_vm3, %v4852_v13  ;;  %v10043_v40 = vpack.c.bf16 %v4852_v13, %v4852_v13  ;;  %v13992_v52 = vld [vmem:[#allocation3 + $0x30] sm:$0xff]  }
 0x2e2   : > { %v5170_v48 = vor.u32 %v5169_v39, %v5166_v21  ;;  %v5150_v25 = vor.u32 %v5149_v8, %v5146_v1  ;;  %v4778_v7 = vadd.f32 %v13685_v17, %v4735_v2  ;;  %v5606_v58 = vshll.u32 %v13875_v4, 16  ;;  %10835 = vmatprep.mubr.msk.bf16.mxu0 %vm4869_vm3, %v13992_v52  ;;  %v16206_v21 = vld [vmem:[#allocation22_spill] sm:$0xff] }
 0x2e3   : > { %v5196_v32 = vrot.slane %v5194_v28, 6  ;;  %v5199_v12 = vrot.slane %v5197_v34, 7  ;;  %v5174_v45 = vshrl.u32 %v10040_v62, 16  ;;  %v5177_v20 = vshll.u32 %v10040_v62, 16  ;;  %v10761_v62 = vpop.f32.mrf.mxu0 }
 0x2e4   : > { %v5171_v27 = vsel %vm11839_vm13, %v5162_v50, %v5170_v48  ;;  %v5172_v10 = vrot.slane %v5170_v48, 4  ;;  %v5151_v0 = vsel %vm11839_vm13, %v5142_v55, %v5150_v25  ;;  %v5152_v31 = vrot.slane %v5150_v25, 4  ;;  %v11267_v48 = vld [vmem:[%s15945_s6 + $0x50] sm:$0xff]  }
 0x2e5   : > { %5427 = vst.msk [vmem:[#allocation3 + $0x44] sm:$0xf] %vm403_vm0, %v5171_v27  ;;  %5425 = vst.msk [vmem:[#allocation3 + $0x3c] sm:$0xf] %vm403_vm0, %v5151_v0  ;;  %v14004_v6 = vor.u32 %v5199_v12, %v5196_v32  ;;  %v5176_v41 = vrot.slane %v5174_v45, 6  ;;  %v5179_v3 = vrot.slane %v5177_v20, 7  ;;  %v14056_v0 = vpop.f32.mrf.mxu0 }
 0x2e6   : > { %v5204_v29 = vshrl.u32 %v10043_v40, 16  ;;  %v5161_v56 = vsel %vm11839_vm13, %v5152_v31, %v13938_v49  ;;  %v5207_v50 = vshll.u32 %v10043_v40, 16  ;;  %v4814_v11 = vmax.f32 %v4778_v7, 0.0  ;;  %v11273_v45 = vld [vmem:[%s15945_s6 + $0x48] sm:$0xff]  }
 0x2e7   : > { %v5608_v53 = vrot.slane %v5606_v58, 1  ;;  %5426 = vst.msk [vmem:[#allocation3 + $0x40] sm:$0xf] %vm403_vm0, %v5161_v56  ;;  %v5202_v55 = vrot.slane %v14004_v6, 4  ;;  %v14011_v43 = vor.u32 %v5179_v3, %v5176_v41  ;;  %v5610_v13 = vshrl.u32 %v13875_v4, 16  ;;  %v16207_v56 = vld [vmem:[#allocation29_spill] sm:$0xff] }
 0x2e8   : > { %v5206_v59 = vrot.slane %v5204_v29, 6  ;;  %v5209_v2 = vrot.slane %v5207_v50, 7  ;;  %v4850_v39 = vmul.f32 %v4814_v11, %v16206_v21  ;;  %v4740_v49 = vadd.f32 %v13958_v42, %v13735_v61  ;;  %v16208_v11 = vld [vmem:[#allocation27_spill] sm:$0xff] }
 0x2e9   : > { %v5609_v1 = vsel %vm1439_vm14, %v13698_v57, %v5608_v53  ;;  %v5181_v8 = vsel %vm11839_vm13, %v5172_v10, %v14011_v43  ;;  %v5182_v28 = vrot.slane %v14011_v43, 4  ;;  %v5612_v34 = vor.u32 %v5610_v13, %v5608_v53 }
 0x2ea   : > { %10779 = vmatprep.mubr.msk.bf16.mxu1 %vm4869_vm3, %v5609_v1  ;;  %v4738_v4 = vadd.f32 %v4655_v26, %v13739_v24  ;;  %5428 = vst.msk [vmem:[#allocation3 + $0x48] sm:$0xf] %vm403_vm0, %v5181_v8  ;;  %v14026_v40 = vor.u32 %v5209_v2, %v5206_v59  ;;  %v10041_v57 = vpack.c.bf16 %v4850_v39, %v4850_v39  ;;  %v5618_v7 = vshrl.u32 %v13888_v63, 16  ;;  %v11351_v63 = vld [vmem:[%s15945_s6 + $0x58] sm:$0xff]   ;;  %v16210_v8 = vld [vmem:[#allocation26_spill] sm:$0xff] }
 0x2eb   : > { %4887 = vst.msk [vmem:[%s13754_s10 + $0x88] sm:$0xff] %vm4869_vm3, %v4850_v39  ;;  %v4783_v61 = vadd.f32 %v13685_v17, %v4740_v49  ;;  %v4741_v42 = vadd.f32 %v10758_v54, %v13743_v23  ;;  %v5617_v25 = vsel %vm1439_vm14, %v5612_v34, %v13977_v51  ;;  %v4739_v26 = vadd.f32 %v4658_v38, %v13747_v15  ;;  %v16209_v1 = vld [vmem:[#allocation28_spill] sm:$0xff] }
 0x2ec   : > { %v4781_v24 = vadd.f32 %v13685_v17, %v4738_v4  ;;  %v5211_v58 = vsel %vm11839_vm13, %v5202_v55, %v14026_v40  ;;  %v5212_v32 = vrot.slane %v14026_v40, 4  ;;  %v5184_v23 = vshrl.u32 %v10041_v57, 16  ;;  %10780 = vmatmul.mubr.msk.bf16.vlgmr.msra.gmra.mxu1 %vm4869_vm3, %v5617_v25  ;;  %v14045_v12 = vld [vmem:[#allocation3 + $0x38] sm:$0xff]   ;;  %v10762_v4 = vpop.f32.mrf.mxu0 }
 0x2ed   : > { %v5187_v54 = vshll.u32 %v10041_v57, 16  ;;  %5431 = vst.msk [vmem:[#allocation3 + $0x54] sm:$0xf] %vm403_vm0, %v5211_v58  ;;  %v4819_v15 = vmax.f32 %v4783_v61, 0.0  ;;  %10860 = vmatpush3.bf16.msra.mxu1 %v11351_v63  ;;  %v4784_v27 = vadd.f32 %v13685_v17, %v4741_v42  ;;  %v4782_v10 = vadd.f32 %v13685_v17, %v4739_v26  ;;  %10836 = vmatmul.mubr.msk.bf16.gmra.mxu0 %vm4869_vm3, %v14045_v12  ;;  %v11279_v61 = vld [vmem:[%s15945_s6 + $0x40] sm:$0xff]  }
 0x2ee   : > { %v4817_v20 = vmax.f32 %v4781_v24, 0.0  ;;  %v5186_v31 = vrot.slane %v5184_v23, 6  ;;  %v5620_v3 = vor.u32 %v5618_v7, %v13977_v51  ;;  %v5622_v29 = vshll.u32 %v13935_v16, 16  ;;  %10861 = vmatprep.subr.bf16.mxu1 %v11267_v48  ;;  %v14062_v38 = vld [vmem:[#allocation3 + $0x40] sm:$0xff]  }
 0x2ef   : > { %v5189_v41 = vrot.slane %v5187_v54, 7  ;;  %v4855_v50 = vmul.f32 %v4819_v15, %v16207_v56  ;;  %v4820_v55 = vmax.f32 %v4784_v27, 0.0  ;;  %v4818_v43 = vmax.f32 %v4782_v10, 0.0  ;;  %10839 = vmatprep.mubr.msk.bf16.mxu0 %vm4869_vm3, %v14062_v38  ;;  %v11289_v27 = vld [vmem:[%s15945_s6 + $0x98] sm:$0xff]  }
 0x2f0   : > { %v4853_v53 = vmul.f32 %v4817_v20, %v16208_v11  ;;  %v5624_v13 = vrot.slane %v5622_v29, 1  ;;  %v5626_v2 = vshrl.u32 %v13935_v16, 16  ;;  %v4744_v51 = vadd.f32 %v10761_v62, %v13758_v9  ;;  %v4674_v20 = vpop.f32.mrf.mxu0 }
 0x2f1   : > { %v5190_v59 = vor.u32 %v5189_v41, %v5186_v31  ;;  %4892 = vst.msk [vmem:[%s13754_s10 + $0xb0] sm:$0xff] %vm4869_vm3, %v4855_v50  ;;  %v10046_v21 = vpack.c.bf16 %v4855_v50, %v4855_v50  ;;  %v4856_v49 = vmul.f32 %v4820_v55, %v16209_v1  ;;  %v4854_v34 = vmul.f32 %v4818_v43, %v16210_v8 }
 0x2f2   : > { %4890 = vst.msk [vmem:[%s13754_s10 + $0xa0] sm:$0xff] %vm4869_vm3, %v4853_v53  ;;  %v10044_v39 = vpack.c.bf16 %v4853_v53, %v4853_v53  ;;  %10862 = vmatpush3.bf16.msra.mxu1 %v11267_v48  ;;  %v5625_v62 = vsel %vm1439_vm14, %v5620_v3, %v5624_v13  ;;  %v14079_v57 = vor.u32 %v5626_v2, %v5624_v13  ;;  %v5630_v56 = vshll.u32 %v13948_v36, 16  ;;  %v16211_v13 = vld [vmem:[#allocation33_spill] sm:$0xff] }
 0x2f3   : > { %v5191_v9 = vsel %vm11839_vm13, %v5182_v28, %v5190_v59  ;;  %v5192_v16 = vrot.slane %v5190_v59, 4  ;;  %10863 = vmatprep.subr.bf16.mxu1 %v11273_v45  ;;  %v5234_v42 = vshrl.u32 %v10046_v21, 16  ;;  %v5237_v25 = vshll.u32 %v10046_v21, 16  ;;  %4893 = vst.msk [vmem:[%s13754_s10 + $0xb8] sm:$0xff] %vm4869_vm3, %v4856_v49  ;;  %4891 = vst.msk [vmem:[%s13754_s10 + $0xa8] sm:$0xff] %vm4869_vm3, %v4854_v34  ;;  %10783 = vmatprep.mubr.msk.bf16.mxu1 %vm4869_vm3, %v5625_v62  ;;  %v4392_v21 = vpop.f32.mrf.mxu1 }
 0x2f4   : > { %5429 = vst.msk [vmem:[#allocation3 + $0x4c] sm:$0xf] %vm403_vm0, %v5191_v9  ;;  %v5214_v24 = vshrl.u32 %v10044_v39, 16  ;;  %v5217_v26 = vshll.u32 %v10044_v39, 16  ;;  %v10047_v48 = vpack.c.bf16 %v4856_v49, %v4856_v49  ;;  %v10045_v7 = vpack.c.bf16 %v4854_v34, %v4854_v34 }
 0x2f5   : > { %v5201_v28 = vsel %vm11839_vm13, %v5192_v16, %v14004_v6  ;;  %v4787_v58 = vadd.f32 %v13685_v17, %v4744_v51  ;;  %v5236_v23 = vrot.slane %v5234_v42, 6  ;;  %v5239_v54 = vrot.slane %v5237_v25, 7  ;;  %v10765_v51 = vpop.f32.mrf.mxu0 }
 0x2f6   : > { %5430 = vst.msk [vmem:[#allocation3 + $0x50] sm:$0xf] %vm403_vm0, %v5201_v28  ;;  %v5216_v15 = vrot.slane %v5214_v24, 6  ;;  %v5219_v63 = vrot.slane %v5217_v26, 7  ;;  %10864 = vmatpush3.bf16.msra.mxu1 %v11273_v45  ;;  %v5244_v10 = vshrl.u32 %v10047_v48, 16  ;;  %v5247_v31 = vshll.u32 %v10047_v48, 16 }
 0x2f7   : > { %v5224_v41 = vshrl.u32 %v10045_v7, 16  ;;  %v5227_v6 = vshll.u32 %v10045_v7, 16  ;;  %10865 = vmatprep.subr.bf16.mxu1 %v11279_v61  ;;  %v5240_v3 = vor.u32 %v5239_v54, %v5236_v23  ;;  %v4823_v17 = vmax.f32 %v4787_v58, 0.0  ;;  %v4687_v25 = vpop.f32.mrf.mxu0 }
 0x2f8   : > { %v5220_v29 = vor.u32 %v5219_v63, %v5216_v15  ;;  %v5246_v50 = vrot.slane %v5244_v10, 6  ;;  %v5249_v11 = vrot.slane %v5247_v31, 7  ;;  %v5632_v49 = vrot.slane %v5630_v56, 1  ;;  %v16214_v56 = vld [vmem:[#allocation30_spill] sm:$0xff] }
 0x2f9   : > { %v5226_v53 = vrot.slane %v5224_v41, 6  ;;  %v5229_v55 = vrot.slane %v5227_v6, 7  ;;  %v5242_v45 = vrot.slane %v5240_v3, 4  ;;  %v4859_v2 = vmul.f32 %v4823_v17, %v16211_v13 }
 0x2fa   : > { %v5221_v43 = vsel %vm11839_vm13, %v5212_v32, %v5220_v29  ;;  %v5222_v59 = vrot.slane %v5220_v29, 4  ;;  %10866 = vmatpush3.bf16.msra.mxu1 %v11279_v61  ;;  %v14105_v39 = vor.u32 %v5249_v11, %v5246_v50  ;;  %v4742_v8 = vadd.f32 %v14056_v0, %v13762_v46  ;;  %v16213_v29 = vld [vmem:[#allocation32_spill] sm:$0xff] }
 0x2fb   : > { %5432 = vst.msk [vmem:[#allocation3 + $0x58] sm:$0xf] %vm403_vm0, %v5221_v43  ;;  %v5230_v1 = vor.u32 %v5229_v55, %v5226_v53  ;;  %v14109_v34 = vld [vmem:[#allocation3 + $0x48] sm:$0xff]   ;;  %10947 = vmatprep.subr.bf16.mxu1 %v11289_v27  ;;  %v10050_v40 = vpack.c.bf16 %v4859_v2, %v4859_v2  ;;  %v4745_v32 = vadd.f32 %v10762_v4, %v13766_v19  ;;  %v5634_v61 = vshrl.u32 %v13948_v36, 16  ;;  %v14135_v4 = vld [vmem:[%s15944_s5] ss:$0 sm:$0xff] }
 0x2fc   : > { %4896 = vst.msk [vmem:[%s13754_s10 + $0xd0] sm:$0xff] %vm4869_vm3, %v4859_v2  ;;  %v4743_v9 = vadd.f32 %v4674_v20, %v13771_v30  ;;  %v14116_v16 = vadd.f32 %v4392_v21, %v13801_v5  ;;  %v5251_v62 = vsel %vm11839_vm13, %v5242_v45, %v14105_v39  ;;  %10840 = vmatmul.mubr.msk.bf16.gmra.mxu0 %vm4869_vm3, %v14109_v34  ;;  %v5252_v24 = vrot.slane %v14105_v39, 4  ;;  %v16212_v27 = vld [vmem:[#allocation31_spill] sm:$0xff] }
 0x2fd   : > { %v5231_v46 = vsel %vm11839_vm13, %v5222_v59, %v5230_v1  ;;  %v5232_v0 = vrot.slane %v5230_v1, 4  ;;  %v14126_v42 = vld [vmem:[#allocation3 + $0x50] sm:$0xff]   ;;  %5435 = vst.msk [vmem:[#allocation3 + $0x64] sm:$0xf] %vm403_vm0, %v5251_v62  ;;  %v5274_v19 = vshrl.u32 %v10050_v40, 16  ;;  %v5277_v30 = vshll.u32 %v10050_v40, 16 }
 0x2fe   : > { %5433 = vst.msk [vmem:[#allocation3 + $0x5c] sm:$0xf] %vm403_vm0, %v5231_v46  ;;  %v5633_v5 = vsel %vm1439_vm14, %v14079_v57, %v5632_v49  ;;  %v4785_v36 = vadd.f32 %v14135_v4, %v4742_v8  ;;  %v4788_v28 = vadd.f32 %v14135_v4, %v4745_v32  ;;  %v4786_v48 = vadd.f32 %v14135_v4, %v4743_v9 }
 0x2ff   : > { %v5241_v26 = vsel %vm11839_vm13, %v5232_v0, %v5240_v3  ;;  %10784 = vmatmul.mubr.msk.bf16.gmra.mxu1 %vm4869_vm3, %v5633_v5  ;;  %v5276_v57 = vrot.slane %v5274_v19, 6  ;;  %v5279_v7 = vrot.slane %v5277_v30, 7  ;;  %v5638_v23 = vshll.u32 %v13984_v47, 16  ;;  %10843 = vmatprep.mubr.msk.bf16.mxu0 %vm4869_vm3, %v14126_v42  ;;  %v10766_v3 = vpop.f32.mrf.mxu0  ;;  %v16215_v19 = vld [vmem:[#allocation37_spill] sm:$0xff] }
 0x300   : > { %5434 = vst.msk [vmem:[#allocation3 + $0x60] sm:$0xf] %vm403_vm0, %v5241_v26  ;;  %v4821_v58 = vmax.f32 %v4785_v36, 0.0  ;;  %v4824_v54 = vmax.f32 %v4788_v28, 0.0  ;;  %v4822_v15 = vmax.f32 %v4786_v48, 0.0  ;;  %v5642_v63 = vshrl.u32 %v13984_v47, 16 }
 0x301   : > { %v4748_v20 = vadd.f32 %v10765_v51, %v13775_v60  ;;  %v5636_v31 = vor.u32 %v5634_v61, %v5632_v49  ;;  %v5640_v41 = vrot.slane %v5638_v23, 1  ;;  %v5646_v6 = vshll.u32 %v13992_v52, 16  ;;  %v14159_v60 = vld [vmem:[%s15945_s6 + $0xb8] sm:$0xff]   ;;  %v4690_v40 = vpop.f32.mrf.mxu0 }
 0x302   : > { %v4857_v10 = vmul.f32 %v4821_v58, %v16212_v27  ;;  %v4860_v17 = vmul.f32 %v4824_v54, %v16213_v29  ;;  %v4858_v50 = vmul.f32 %v4822_v15, %v16214_v56  ;;  %v4746_v53 = vadd.f32 %v4687_v25, %v13779_v35  ;;  %10991 = vmatprep.subr.bf16.mxu0 %v14159_v60  ;;  %v16216_v29 = vld [vmem:[#allocation35_spill] sm:$0xff] }
 0x303   : > { %v4791_v11 = vadd.f32 %v14135_v4, %v4748_v20  ;;  %v5280_v47 = vor.u32 %v5279_v7, %v5276_v57  ;;  %v5641_v45 = vsel %vm1439_vm14, %v5636_v31, %v5640_v41  ;;  %v5644_v43 = vor.u32 %v5642_v63, %v5640_v41  ;;  %v10769_v23 = vpop.f32.mrf.mxu0 }
 0x304   : > { %4894 = vst.msk [vmem:[%s13754_s10 + $0xc0] sm:$0xff] %vm4869_vm3, %v4857_v10  ;;  %v10048_v55 = vpack.c.bf16 %v4857_v10, %v4857_v10  ;;  %4897 = vst.msk [vmem:[%s13754_s10 + $0xd8] sm:$0xff] %vm4869_vm3, %v4860_v17  ;;  %v10051_v59 = vpack.c.bf16 %v4860_v17, %v4860_v17  ;;  %v10049_v13 = vpack.c.bf16 %v4858_v50, %v4858_v50  ;;  %10787 = vmatprep.mubr.msk.bf16.mxu1 %vm4869_vm3, %v5641_v45 }
 0x305   : > { %4895 = vst.msk [vmem:[%s13754_s10 + $0xc8] sm:$0xff] %vm4869_vm3, %v4858_v50  ;;  %v4827_v35 = vmax.f32 %v4791_v11, 0.0  ;;  %v5648_v2 = vrot.slane %v5646_v6, 1  ;;  %v14169_v51 = vld [vmem:[#allocation3 + $0x58] sm:$0xff]   ;;  %v4789_v49 = vadd.f32 %v14135_v4, %v4746_v53  ;;  %v4749_v8 = vadd.f32 %v10766_v3, %v13782_v14  ;;  %v4703_v11 = vpop.f32.mrf.mxu0 }
 0x306   : > { %v5254_v21 = vshrl.u32 %v10048_v55, 16  ;;  %v5257_v1 = vshll.u32 %v10048_v55, 16  ;;  %v5284_v32 = vshrl.u32 %v10051_v59, 16  ;;  %v5287_v9 = vshll.u32 %v10051_v59, 16  ;;  %10844 = vmatmul.mubr.msk.bf16.gmra.mxu0 %vm4869_vm3, %v14169_v51  ;;  %v16217_v59 = vld [vmem:[#allocation36_spill] sm:$0xff] }
 0x307   : > { %v5264_v62 = vshrl.u32 %v10049_v13, 16  ;;  %v5267_v46 = vshll.u32 %v10049_v13, 16  ;;  %v4863_v30 = vmul.f32 %v4827_v35, %v16215_v19  ;;  %v5649_v5 = vsel %vm1439_vm14, %v5644_v43, %v5648_v2  ;;  %v14178_v36 = vld [vmem:[#allocation3 + $0x60] sm:$0xff]  }
 0x308   : > { %v5256_v0 = vrot.slane %v5254_v21, 6  ;;  %v5259_v61 = vrot.slane %v5257_v1, 7  ;;  %v5286_v25 = vrot.slane %v5284_v32, 6  ;;  %v5289_v26 = vrot.slane %v5287_v9, 7  ;;  %10788 = vmatmul.mubr.msk.bf16.gmra.mxu1 %vm4869_vm3, %v5649_v5  ;;  %10847 = vmatprep.mubr.msk.bf16.mxu0 %vm4869_vm3, %v14178_v36 }
 0x309   : > { %v5266_v14 = vrot.slane %v5264_v62, 6  ;;  %v5269_v28 = vrot.slane %v5267_v46, 7  ;;  %4900 = vst.msk [vmem:[%s13754_s10 + $0xf0] sm:$0xff] %vm4869_vm3, %v4863_v30  ;;  %v10054_v57 = vpack.c.bf16 %v4863_v30, %v4863_v30  ;;  %v4825_v7 = vmax.f32 %v4789_v49, 0.0  ;;  %v10770_v46 = vpop.f32.mrf.mxu0 }
 0x30a   : > { %v5260_v48 = vor.u32 %v5259_v61, %v5256_v0  ;;  %v4792_v58 = vadd.f32 %v14135_v4, %v4749_v8  ;;  %v5282_v54 = vrot.slane %v5280_v47, 4  ;;  %v5290_v15 = vor.u32 %v5289_v26, %v5286_v25 }
 0x30b   : > { %v5270_v63 = vor.u32 %v5269_v28, %v5266_v14  ;;  %v4747_v20 = vadd.f32 %v4690_v40, %v13788_v22  ;;  %v5314_v31 = vshrl.u32 %v10054_v57, 16  ;;  %v5317_v41 = vshll.u32 %v10054_v57, 16 }
 0x30c   : > { %v5261_v27 = vsel %vm11839_vm13, %v5252_v24, %v5260_v48  ;;  %v5262_v10 = vrot.slane %v5260_v48, 4  ;;  %v5291_v6 = vsel %vm11839_vm13, %v5282_v54, %v5290_v15  ;;  %v4861_v17 = vmul.f32 %v4825_v7, %v16216_v29 }
 0x30d   : > { %5436 = vst.msk [vmem:[#allocation3 + $0x68] sm:$0xf] %vm403_vm0, %v5261_v27  ;;  %v5272_v3 = vrot.slane %v5270_v63, 4  ;;  %v5650_v56 = vshrl.u32 %v13992_v52, 16  ;;  %5439 = vst.msk [vmem:[#allocation3 + $0x74] sm:$0xf] %vm403_vm0, %v5291_v6  ;;  %v4790_v52 = vadd.f32 %v14135_v4, %v4747_v20  ;;  %v4753_v54 = vadd.f32 %v10770_v46, %v13815_v18 }
 0x30e   : > { %v5271_v22 = vsel %vm11839_vm13, %v5262_v10, %v5270_v63  ;;  %v5316_v39 = vrot.slane %v5314_v31, 6  ;;  %v5319_v24 = vrot.slane %v5317_v41, 7  ;;  %v4828_v50 = vmax.f32 %v4792_v58, 0.0  ;;  %4898 = vst.msk [vmem:[%s13754_s10 + $0xe0] sm:$0xff] %vm4869_vm3, %v4861_v17 }
 0x30f   : > { %v5292_v53 = vrot.slane %v5290_v15, 4  ;;  %v5281_v55 = vsel %vm11839_vm13, %v5272_v3, %v5280_v47  ;;  %5437 = vst.msk [vmem:[#allocation3 + $0x6c] sm:$0xf] %vm403_vm0, %v5271_v22  ;;  %v10052_v45 = vpack.c.bf16 %v4861_v17, %v4861_v17  ;;  %v5652_v35 = vor.u32 %v5650_v56, %v5648_v2  ;;  %v16218_v2 = vld [vmem:[#allocation34_spill] sm:$0xff]  ;;  %v4706_v15 = vpop.f32.mrf.mxu0 }
 0x310   : > { %5438 = vst.msk [vmem:[#allocation3 + $0x70] sm:$0xf] %vm403_vm0, %v5281_v55  ;;  %v14206_v43 = vor.u32 %v5319_v24, %v5316_v39  ;;  %v4864_v13 = vmul.f32 %v4828_v50, %v16217_v59  ;;  %v5654_v21 = vshll.u32 %v14045_v12, 16  ;;  %v4826_v8 = vmax.f32 %v4790_v52, 0.0 }
 0x311   : > { %v5294_v1 = vshrl.u32 %v10052_v45, 16  ;;  %v5297_v49 = vshll.u32 %v10052_v45, 16  ;;  %v4752_v47 = vadd.f32 %v10769_v23, %v13791_v37  ;;  %v5658_v9 = vshrl.u32 %v14045_v12, 16 }
 0x312   : > { %4901 = vst.msk [vmem:[%s13754_s10 + $0xf8] sm:$0xff] %vm4869_vm3, %v4864_v13  ;;  %v10055_v40 = vpack.c.bf16 %v4864_v13, %v4864_v13  ;;  %v5656_v32 = vrot.slane %v5654_v21, 1  ;;  %v5662_v62 = vshll.u32 %v14062_v38, 16  ;;  %v4862_v19 = vmul.f32 %v4826_v8, %v16218_v2  ;;  %v16222_v2 = vld [vmem:[#allocation38_spill] sm:$0xff] }
 0x313   : > { %v5296_v0 = vrot.slane %v5294_v1, 6  ;;  %v5299_v61 = vrot.slane %v5297_v49, 7  ;;  %v4795_v30 = vadd.f32 %v14135_v4, %v4752_v47  ;;  %v4750_v23 = vadd.f32 %v4703_v11, %v13794_v44  ;;  %v16219_v44 = vld [vmem:[#allocation41_spill] sm:$0xff]  ;;  %v16221_v47 = vld [vmem:[#allocation40_spill] sm:$0xff] }
 0x314   : > { %v5324_v5 = vshrl.u32 %v10055_v40, 16  ;;  %v5327_v25 = vshll.u32 %v10055_v40, 16  ;;  %v5657_v37 = vsel %vm1439_vm14, %v5652_v35, %v5656_v32  ;;  %v5660_v26 = vor.u32 %v5658_v9, %v5656_v32  ;;  %4899 = vst.msk [vmem:[%s13754_s10 + $0xe8] sm:$0xff] %vm4869_vm3, %v4862_v19  ;;  %v16220_v35 = vld [vmem:[#allocation39_spill] sm:$0xff] }
 0x315   : > { %v5300_v14 = vor.u32 %v5299_v61, %v5296_v0  ;;  %v10053_v28 = vpack.c.bf16 %v4862_v19, %v4862_v19  ;;  %10791 = vmatprep.mubr.msk.bf16.mxu1 %vm4869_vm3, %v5657_v37  ;;  %v4831_v48 = vmax.f32 %v4795_v30, 0.0  ;;  %v5664_v57 = vrot.slane %v5662_v62, 1 }
 0x316   : > { %v5326_v7 = vrot.slane %v5324_v5, 6  ;;  %v5329_v58 = vrot.slane %v5327_v25, 7  ;;  %v14223_v63 = vld [vmem:[#allocation3 + $0x68] sm:$0xff]   ;;  %v5322_v20 = vrot.slane %v14206_v43, 4  ;;  %v4793_v29 = vadd.f32 %v14135_v4, %v4750_v23 }
 0x317   : > { %v5301_v27 = vsel %vm11839_vm13, %v5292_v53, %v5300_v14  ;;  %v5304_v10 = vshrl.u32 %v10053_v28, 16  ;;  %v5307_v31 = vshll.u32 %v10053_v28, 16  ;;  %v14228_v41 = vld [vmem:[#allocation3 + $0x70] sm:$0xff]   ;;  %v4867_v3 = vmul.f32 %v4831_v48, %v16219_v44  ;;  %10848 = vmatmul.mubr.msk.bf16.gmra.mxu0 %vm4869_vm3, %v14223_v63 }
 0x318   : > { %5440 = vst.msk [vmem:[#allocation3 + $0x78] sm:$0xf] %vm403_vm0, %v5301_v27  ;;  %v14231_v6 = vor.u32 %v5329_v58, %v5326_v7  ;;  %v5665_v18 = vsel %vm1439_vm14, %v5660_v26, %v5664_v57  ;;  %v4796_v22 = vadd.f32 %v14135_v4, %v4753_v54  ;;  %v4751_v39 = vadd.f32 %v4706_v15, %v14116_v16 }
 0x319   : > { %v5306_v17 = vrot.slane %v5304_v10, 6  ;;  %v5309_v56 = vrot.slane %v5307_v31, 7  ;;  %10792 = vmatmul.mubr.msk.bf16.gmra.mxu1 %vm4869_vm3, %v5665_v18  ;;  %10851 = vmatprep.mubr.msk.bf16.mxu0 %vm4869_vm3, %v14228_v41  ;;  %v5302_v24 = vrot.slane %v5300_v14, 4  ;;  %4904 = vst.msk [vmem:[%s13754_s10 + $0x110] sm:$0xff] %vm4869_vm3, %v4867_v3  ;;  %v10058_v11 = vpack.c.bf16 %v4867_v3, %v4867_v3  ;;  %v5448_v31 = vld [vmem:[#allocation3 + $0x98] sm:$0x3] }
 0x31a   : > { %v5331_v50 = vsel %vm11839_vm13, %v5322_v20, %v14231_v6  ;;  %v4829_v53 = vmax.f32 %v4793_v29, 0.0  ;;  %v4832_v45 = vmax.f32 %v4796_v22, 0.0  ;;  %v4794_v52 = vadd.f32 %v14135_v4, %v4751_v39 }
 0x31b   : > { %5443 = vst.msk [vmem:[#allocation3 + $0x84] sm:$0xf] %vm403_vm0, %v5331_v50  ;;  %v5310_v55 = vor.u32 %v5309_v56, %v5306_v17  ;;  %v5666_v16 = vshrl.u32 %v14062_v38, 16  ;;  %v5354_v59 = vshrl.u32 %v10058_v11, 16  ;;  %v5357_v13 = vshll.u32 %v10058_v11, 16 }
 0x31c   : > { %v4865_v21 = vmul.f32 %v4829_v53, %v16220_v35  ;;  %v5670_v1 = vshll.u32 %v14109_v34, 16  ;;  %v4868_v40 = vmul.f32 %v4832_v45, %v16221_v47  ;;  %v4830_v32 = vmax.f32 %v4794_v52, 0.0 }
 0x31d   : > { %v5311_v49 = vsel %vm11839_vm13, %v5302_v24, %v5310_v55  ;;  %v5312_v8 = vrot.slane %v5310_v55, 4  ;;  %v5356_v9 = vrot.slane %v5354_v59, 6  ;;  %v5359_v4 = vrot.slane %v5357_v13, 7 }
 0x31e   : > { %5441 = vst.msk [vmem:[#allocation3 + $0x7c] sm:$0xf] %vm403_vm0, %v5311_v49  ;;  %v10056_v62 = vpack.c.bf16 %v4865_v21, %v4865_v21  ;;  %v5668_v46 = vor.u32 %v5666_v16, %v5664_v57  ;;  %v10059_v61 = vpack.c.bf16 %v4868_v40, %v4868_v40  ;;  %v4866_v19 = vmul.f32 %v4830_v32, %v16222_v2 }
 0x31f   : > { %4902 = vst.msk [vmem:[%s13754_s10 + $0x100] sm:$0xff] %vm4869_vm3, %v4865_v21  ;;  %v5321_v0 = vsel %vm11839_vm13, %v5312_v8, %v14206_v43  ;;  %4905 = vst.msk [vmem:[%s13754_s10 + $0x118] sm:$0xff] %vm4869_vm3, %v4868_v40  ;;  %v5672_v30 = vrot.slane %v5670_v1, 1  ;;  %v5332_v5 = vrot.slane %v14231_v6, 4  ;;  %v5360_v25 = vor.u32 %v5359_v4, %v5356_v9 }
 0x320   : > { %5442 = vst.msk [vmem:[#allocation3 + $0x80] sm:$0xf] %vm403_vm0, %v5321_v0  ;;  %v5334_v37 = vshrl.u32 %v10056_v62, 16  ;;  %v5337_v26 = vshll.u32 %v10056_v62, 16  ;;  %v5364_v14 = vshrl.u32 %v10059_v61, 16  ;;  %v5367_v28 = vshll.u32 %v10059_v61, 16 }
 0x321   : > { %4903 = vst.msk [vmem:[%s13754_s10 + $0x108] sm:$0xff] %vm4869_vm3, %v4866_v19  ;;  %v10057_v48 = vpack.c.bf16 %v4866_v19, %v4866_v19  ;;  %v5673_v43 = vsel %vm1439_vm14, %v5668_v46, %v5672_v30  ;;  %v5362_v57 = vrot.slane %v5360_v25, 4  ;;  %v5674_v23 = vshrl.u32 %v14109_v34, 16  ;;  %v14301_v62 = vld [vmem:[#allocation3 + $0xc] sm:$0xf]  ;;  %v14307_v61 = vld [vmem:[#allocation3 + $0x10] sm:$0xff]  }
 0x322   : > { %v5336_v7 = vrot.slane %v5334_v37, 6  ;;  %v5339_v58 = vrot.slane %v5337_v26, 7  ;;  %10795 = vmatprep.mubr.msk.bf16.mxu1 %vm4869_vm3, %v5673_v43  ;;  %v5366_v54 = vrot.slane %v5364_v14, 6  ;;  %v5369_v15 = vrot.slane %v5367_v28, 7  ;;  %v6238_v14 = vld [vmem:[#allocation3] sm:$0xe] }
 0x323   : > { %v5344_v20 = vshrl.u32 %v10057_v48, 16  ;;  %v5347_v27 = vshll.u32 %v10057_v48, 16  ;;  %v5676_v6 = vor.u32 %v5674_v23, %v5672_v30  ;;  %v5678_v44 = vshll.u32 %v14126_v42, 16  ;;  %v6579_v30 = vld [vmem:[#allocation3 + $0x8] sm:$0xe]  ;;  %v14318_v28 = vld [vmem:[#allocation3 + $0x18] sm:$0xff]  }
 0x324   : > { %v5340_v10 = vor.u32 %v5339_v58, %v5336_v7  ;;  %v5686_v3 = vshll.u32 %v14169_v51, 16  ;;  %v5370_v18 = vor.u32 %v5369_v15, %v5366_v54  ;;  %v5682_v56 = vshrl.u32 %v14126_v42, 16  ;;  %v14322_v7 = vld [vmem:[#allocation3 + $0x20] sm:$0xff]  }
 0x325   : > { %v5346_v29 = vrot.slane %v5344_v20, 6  ;;  %v5349_v17 = vrot.slane %v5347_v27, 7  ;;  %v14275_v22 = vld [vmem:[#allocation3 + $0x78] sm:$0xff]   ;;  %v5680_v50 = vrot.slane %v5678_v44, 1  ;;  %v5694_v52 = vshll.u32 %v14178_v36, 16  ;;  %v14327_v20 = vld [vmem:[#allocation3 + $0x28] sm:$0xff]  }
 0x326   : > { %v5341_v39 = vsel %vm11839_vm13, %v5332_v5, %v5340_v10  ;;  %v5342_v24 = vrot.slane %v5340_v10, 4  ;;  %v5688_v11 = vrot.slane %v5686_v3, 1  ;;  %v5371_v53 = vsel %vm11839_vm13, %v5362_v57, %v5370_v18  ;;  %10852 = vmatmul.mubr.msk.bf16.gmra.mxu0 %vm4869_vm3, %v14275_v22  ;;  %v14311_v5 = vld [vmem:[#allocation3 + $0x10] sm:$0xff]  }
 0x327   : > { %5444 = vst.msk [vmem:[#allocation3 + $0x88] sm:$0xf] %vm403_vm0, %v5341_v39  ;;  %v5372_v55 = vrot.slane %v5370_v18, 4  ;;  %v5350_v45 = vor.u32 %v5349_v17, %v5346_v29  ;;  %v14285_v16 = vld [vmem:[#allocation3 + $0x80] sm:$0xff]   ;;  %5447 = vst.msk [vmem:[#allocation3 + $0x94] sm:$0xf] %vm403_vm0, %v5371_v53  ;;  %v5681_v59 = vsel %vm1439_vm14, %v5676_v6, %v5680_v50  ;;  %v5684_v13 = vor.u32 %v5682_v56, %v5680_v50 }
 0x328   : > { %v5690_v35 = vshrl.u32 %v14169_v51, 16  ;;  %10796 = vmatmul.mubr.msk.bf16.gmra.mxu1 %vm4869_vm3, %v5681_v59  ;;  %v5696_v47 = vrot.slane %v5694_v52, 1  ;;  %10855 = vmatprep.mubr.msk.bf16.mxu0 %vm4869_vm3, %v14285_v16  ;;  %v5702_v9 = vshll.u32 %v14223_v63, 16  ;;  %v5710_v4 = vshll.u32 %v14228_v41, 16  ;;  %v14330_v44 = vld [vmem:[#allocation3 + $0x30] sm:$0xff]   ;;  %v14337_v17 = vld [vmem:[#allocation3 + $0x38] sm:$0xff]  }
 0x329   : > { %v5449_v1 = vsel %vm13358_vm7, %v5372_v55, %v5448_v31  ;;  %v5351_v49 = vsel %vm11839_vm13, %v5342_v24, %v5350_v45  ;;  %v5352_v8 = vrot.slane %v5350_v45, 4  ;;  %v5689_v40 = vsel %vm1439_vm14, %v5684_v13, %v5688_v11  ;;  %v11354_v31 = vld [vmem:[#allocation3 + $0x4] sm:$0xf]  ;;  %v11355_v50 = vld [vmem:[#allocation3 + $0x8] sm:$0xff]  }
 0x32a   : > { %5450 = vst [vmem:[#allocation3 + $0x98] sm:$0x3] %v5449_v1  ;;  %5445 = vst.msk [vmem:[#allocation3 + $0x8c] sm:$0xf] %vm403_vm0, %v5351_v49  ;;  %v5692_v32 = vor.u32 %v5690_v35, %v5688_v11  ;;  %10799 = vmatprep.mubr.msk.bf16.mxu1 %vm4869_vm3, %v5689_v40  ;;  %v5698_v0 = vshrl.u32 %v14178_v36, 16  ;;  %v5704_v2 = vrot.slane %v5702_v9, 1  ;;  %v9740_v6 = vcombine.low %v6238_v14, %v11354_v31 }
 0x32b   : > { %v5361_v46 = vsel %vm11839_vm13, %v5352_v8, %v5360_v25  ;;  %v5718_v19 = vshll.u32 %v14275_v22, 16  ;;  %v6254_v37 = vrot.slane %v14311_v5, 1  ;;  %v5706_v33 = vshrl.u32 %v14223_v63, 16  ;;  %v14339_v56 = vld [vmem:[#allocation3 + $0x40] sm:$0xff]   ;;  %v11356_v49 = vld [vmem:[#allocation3 + $0x18] sm:$0xff]   ;;  %v14383_v31 = vld [vmem:[#allocation3 + $0x50] sm:$0xff]  }
 0x32c   : > { %5446 = vst.msk [vmem:[#allocation3 + $0x90] sm:$0xf] %vm403_vm0, %v5361_v46  ;;  %v5700_v26 = vor.u32 %v5698_v0, %v5696_v47  ;;  %v14316_v25 = vcombine.low %v6579_v30, %v14301_v62  ;;  %v5697_v48 = vsel %vm1439_vm14, %v5692_v32, %v5696_v47  ;;  %v5712_v43 = vrot.slane %v5710_v4, 1  ;;  %v11357_v32 = vld [vmem:[#allocation3 + $0x20] sm:$0xff]  }
 0x32d   : > { %v5726_v57 = vshll.u32 %v14285_v16, 16  ;;  %v5720_v23 = vrot.slane %v5718_v19, 1  ;;  %v6719_v15 = vrot.slane %v14307_v61, 1  ;;  %v5708_v27 = vor.u32 %v5706_v33, %v5704_v2 }
 0x32e   : > { %v5705_v58 = vsel %vm1439_vm14, %v5700_v26, %v5704_v2  ;;  %v6718_v54 = vrot.slane %v14316_v25, 1  ;;  %v5714_v10 = vshrl.u32 %v14228_v41, 16  ;;  %v5722_v3 = vshrl.u32 %v14275_v22, 16  ;;  %v11358_v2 = vld [vmem:[#allocation3 + $0x28] sm:$0xff]  }
 0x32f   : > { %v5730_v29 = vshrl.u32 %v14285_v16, 16  ;;  %v5728_v24 = vrot.slane %v5726_v57, 1  ;;  %v6252_v11 = vrot.slane %v11355_v50, 1  ;;  %v6721_v52 = vrot.slane %v14318_v28, 1 }
 0x330   : > { %10800 = vmatmul.mubr.msk.bf16.gmra.mxu1 %vm4869_vm3, %v5697_v48  ;;  %v5716_v39 = vor.u32 %v5714_v10, %v5712_v43  ;;  %v5724_v53 = vor.u32 %v5722_v3, %v5720_v23  ;;  %v6720_v55 = vsel %vm2046_vm15, %v6718_v54, %v6719_v15  ;;  %v5713_v59 = vsel %vm1439_vm14, %v5708_v27, %v5712_v43 }
 0x331   : > { %v14334_v18 = vld [vmem:[#allocation3 + $0x88] sm:$0xff]   ;;  %10803 = vmatprep.mubr.msk.bf16.mxu1 %vm4869_vm3, %v5705_v58  ;;  %v6251_v21 = vrot.slane %v9740_v6, 1  ;;  %v6723_v1 = vrot.slane %v14322_v7, 1  ;;  %v6256_v8 = vrot.slane %v11356_v49, 1  ;;  %v6725_v47 = vrot.slane %v14327_v20, 1  ;;  %v14412_v49 = vld [vmem:[#allocation3 + $0x70] sm:$0xff]  }
 0x332   : > { %10856 = vmatmul.mubr.msk.bf16.gmra.mxu0 %vm4869_vm3, %v14334_v18  ;;  %v5734_v45 = vshll.u32 %v14334_v18, 16  ;;  %v5721_v13 = vsel %vm1439_vm14, %v5716_v39, %v5720_v23  ;;  %v6727_v40 = vrot.slane %v14330_v44, 1  ;;  %v6258_v9 = vrot.slane %v11357_v32, 1  ;;  %v14370_v23 = vld [vmem:[#allocation3 + $0x48] sm:$0xff]   ;;  %v14393_v39 = vld [vmem:[#allocation3 + $0x58] sm:$0xff]  }
 0x333   : > { %10911 = vmatprep.mubr.msk.bf16.mxu0 %vm4869_vm3, %v6720_v55  ;;  %v14350_v35 = vld [vmem:[#allocation3 + $0x90] ss:$0 sps:$4 sm:$0x11]   ;;  %v5732_v4 = vor.u32 %v5730_v29, %v5728_v24  ;;  %v6260_v19 = vrot.slane %v11358_v2, 1  ;;  %v5729_v30 = vsel %vm1439_vm14, %v5724_v53, %v5728_v24  ;;  %v6722_v26 = vsel %vm2046_vm15, %v6719_v15, %v6721_v52  ;;  %v11308_v6 = vld [vmem:[%s15945_s6 + $0xb0] sm:$0xff]  }
 0x334   : > { %v5736_v46 = vrot.slane %v5734_v45, 1  ;;  %v5742_v0 = vshll.u32 %v14350_v35, 16  ;;  %v6729_v33 = vrot.slane %v14337_v17, 1  ;;  %v6731_v14 = vrot.slane %v14339_v56, 1  ;;  %v14403_v45 = vld [vmem:[#allocation3 + $0x60] sm:$0xff]  }
 0x335   : > { %v5738_v48 = vshrl.u32 %v14334_v18, 16  ;;  %v14362_v43 = vsel %vm2046_vm15, %v6251_v21, %v6252_v11  ;;  %v6724_v57 = vsel %vm2046_vm15, %v6721_v52, %v6723_v1  ;;  %v14368_v58 = vsel %vm2046_vm15, %v6252_v11, %v6254_v37  ;;  %v11359_v11 = vld [vmem:[#allocation3 + $0x30] sm:$0xff]   ;;  %v14405_v52 = vld [vmem:[#allocation3 + $0x68] sm:$0xff]  }
 0x336   : > { %v14376_v54 = vsel %vm2046_vm15, %v6254_v37, %v6256_v8  ;;  %v6726_v15 = vsel %vm2046_vm15, %v6723_v1, %v6725_v47  ;;  %v6728_v27 = vsel %vm2046_vm15, %v6725_v47, %v6727_v40  ;;  %v14381_v10 = vsel %vm2046_vm15, %v6256_v8, %v6258_v9 }
 0x337   : > { %v5737_v5 = vsel %vm1439_vm14, %v5732_v4, %v5736_v46  ;;  %v5740_v3 = vor.u32 %v5738_v48, %v5736_v46  ;;  %v5744_v37 = vrot.slane %v5742_v0, 1  ;;  %v14391_v29 = vsel %vm2046_vm15, %v6258_v9, %v6260_v19  ;;  %v11310_v9 = vld [vmem:[%s15945_s6 + $0xa8] sm:$0xff]  }
 0x338   : > { %10804 = vmatmul.mubr.msk.bf16.gmra.mxu1 %vm4869_vm3, %v5713_v59  ;;  %v14397_v24 = vsel %vm2046_vm15, %v6727_v40, %v6729_v33  ;;  %v14400_v50 = vsel %vm2046_vm15, %v6729_v33, %v6731_v14  ;;  %v6262_v53 = vrot.slane %v11359_v11, 1  ;;  %v15993_v55 = vrot.slane %v14045_v12, 1 }
 0x339   : > { %10807 = vmatprep.mubr.msk.bf16.mxu1 %vm4869_vm3, %v5721_v13  ;;  %v6733_v59 = vrot.slane %v14370_v23, 1  ;;  %v15992_v13 = vrot.slane %v14109_v34, 1  ;;  %v6270_v21 = vrot.slane %v14126_v42, 1  ;;  %v6272_v1 = vrot.slane %v14169_v51, 1 }
 0x33a   : > { %10912 = vmatmul.mubr.msk.bf16.vlgmr.msra.gmra.mxu0 %vm4869_vm3, %v6722_v26  ;;  %v6735_v8 = vrot.slane %v14383_v31, 1  ;;  %v6274_v40 = vrot.slane %v14178_v36, 1  ;;  %v6276_v32 = vrot.slane %v14223_v63, 1  ;;  %v5745_v42 = vsel %vm1439_vm14, %v5740_v3, %v5744_v37 }
 0x33b   : > { %10915 = vmatprep.mubr.msk.bf16.mxu0 %vm4869_vm3, %v6724_v57  ;;  %10992 = vmatpush3.bf16.msra.mxu0 %v14159_v60  ;;  %v6737_v51 = vrot.slane %v14393_v39, 1  ;;  %v14427_v60 = vsel %vm2046_vm15, %v15992_v13, %v6270_v21  ;;  %v14430_v4 = vsel %vm2046_vm15, %v6270_v21, %v6272_v1  ;;  %v6739_v36 = vrot.slane %v14403_v45, 1 }
 0x33c   : > { %10993 = vmatprep.subr.bf16.mxu0 %v11308_v6  ;;  %v6741_v63 = vrot.slane %v14405_v52, 1  ;;  %v14435_v46 = vsel %vm2046_vm15, %v6272_v1, %v6274_v40  ;;  %v14438_v0 = vsel %vm2046_vm15, %v6274_v40, %v6276_v32  ;;  %v14441_v2 = vsel %vm2046_vm15, %v6260_v19, %v6262_v53 }
 0x33d   : > { %v15991_v26 = vrot.slane %v14412_v49, 1  ;;  %v6278_v33 = vrot.slane %v14228_v41, 1  ;;  %v6280_v48 = vrot.slane %v14275_v22, 1  ;;  %v14450_v57 = vsel %vm2046_vm15, %v6262_v53, %v15993_v55  ;;  %v11312_v41 = vld [vmem:[%s15945_s6 + $0xa0] sm:$0xff]   ;;  %v7520_v53 = vld [vmem:[#allocation3 + $0x8] sm:$0xc] }
 0x33e   : > { %v14453_v3 = vsel %vm2046_vm15, %v6731_v14, %v6733_v59  ;;  %v6282_v19 = vrot.slane %v14285_v16, 1  ;;  %v6284_v37 = vrot.slane %v14334_v18, 1  ;;  %v14462_v22 = vsel %vm2046_vm15, %v6733_v59, %v6735_v8  ;;  %v14656_v55 = vld [vmem:[#allocation3 + $0x90] sm:$0xff]  }
 0x33f   : > { %10994 = vmatpush3.bf16.msra.mxu0 %v11308_v6  ;;  %v14468_v14 = vsel %vm2046_vm15, %v6276_v32, %v6278_v33  ;;  %v14471_v16 = vsel %vm2046_vm15, %v6278_v33, %v6280_v48  ;;  %v14475_v18 = vsel %vm2046_vm15, %v6737_v51, %v6739_v36  ;;  %v14478_v6 = vsel %vm2046_vm15, %v6739_v36, %v6741_v63 }
 0x340   : > { %10808 = vmatmul.mubr.msk.bf16.gmra.mxu1 %vm4869_vm3, %v5729_v30  ;;  %10995 = vmatprep.subr.bf16.mxu0 %v11310_v9  ;;  %v14465_v30 = vsel %vm2046_vm15, %v6735_v8, %v6737_v51  ;;  %v14484_v11 = vsel %vm2046_vm15, %v6282_v19, %v6284_v37  ;;  %v14490_v59 = vsel %vm2046_vm15, %v6741_v63, %v15991_v26  ;;  %v7534_v21 = vrot.slane %v14307_v61, 2 }
 0x341   : > { %10811 = vmatprep.mubr.msk.bf16.mxu1 %vm4869_vm3, %v5737_v5  ;;  %v14481_v5 = vsel %vm2046_vm15, %v6280_v48, %v6282_v19  ;;  %v6286_v1 = vrot.slane %v14350_v35, 1  ;;  %v7060_v8 = vshrl.u32 %v14316_v25, 16  ;;  %v7063_v40 = vshll.u32 %v14316_v25, 16 }
 0x342   : > { %10916 = vmatmul.mubr.msk.bf16.gmra.mxu0 %vm4869_vm3, %v6726_v15  ;;  %v9851_v15 = vcombine.low %v7520_v53, %v14301_v62  ;;  %v7068_v32 = vshrl.u32 %v14307_v61, 16  ;;  %v7538_v62 = vrot.slane %v14322_v7, 2 }
 0x343   : > { %10919 = vmatprep.mubr.msk.bf16.mxu0 %vm4869_vm3, %v6728_v27  ;;  %10996 = vmatpush3.bf16.msra.mxu0 %v11310_v9  ;;  %v7071_v27 = vshll.u32 %v14307_v61, 16  ;;  %v14500_v36 = vsel %vm2046_vm15, %v6284_v37, %v6286_v1  ;;  %v7536_v9 = vrot.slane %v14318_v28, 2  ;;  %v7062_v63 = vrot.slane %v7060_v8, 1 }
 0x344   : > { %10997 = vmatprep.subr.bf16.mxu0 %v11312_v41  ;;  %v7533_v51 = vrot.slane %v9851_v15, 2  ;;  %v7065_v33 = vrot.slane %v7063_v40, 2  ;;  %v7070_v35 = vrot.slane %v7068_v32, 1  ;;  %v7077_v37 = vshrl.u32 %v14318_v28, 16 }
 0x345   : > { %v7073_v48 = vrot.slane %v7071_v27, 2  ;;  %v14508_v25 = vsel %vm3246_vm1, %v7534_v21, %v7536_v9  ;;  %v14511_v61 = vsel %vm3246_vm1, %v7536_v9, %v7538_v62  ;;  %v7080_v1 = vshll.u32 %v14318_v28, 16 }
 0x346   : > { %v14505_v19 = vsel %vm3246_vm1, %v7533_v51, %v7534_v21  ;;  %v7066_v53 = vor.u32 %v7065_v33, %v7062_v63  ;;  %v7086_v8 = vshrl.u32 %v14322_v7, 16  ;;  %v7089_v21 = vshll.u32 %v14322_v7, 16 }
 0x347   : > { %10998 = vmatpush3.bf16.msra.mxu0 %v11312_v41  ;;  %v7074_v15 = vor.u32 %v7073_v48, %v7070_v35  ;;  %v7079_v41 = vrot.slane %v7077_v37, 1  ;;  %v7540_v40 = vrot.slane %v14327_v20, 2  ;;  %v7542_v32 = vrot.slane %v14330_v44, 2 }
 0x348   : > { %10812 = vmatmul.mubr.msk.bf16.gmra.mxu1 %vm4869_vm3, %v5745_v42  ;;  %v14525_v42 = vld [vmem:[%s15945_s6 + $0xf8] sm:$0xff]   ;;  %v7082_v27 = vrot.slane %v7080_v1, 2  ;;  %v7095_v51 = vshrl.u32 %v14327_v20, 16  ;;  %v7091_v7 = vrot.slane %v7089_v21, 2  ;;  %v7098_v33 = vshll.u32 %v14327_v20, 16 }
 0x349   : > { %10867 = vmatprep.mubr.msk.bf16.mxu1 %vm4869_vm3, %v14362_v43  ;;  %v14530_v28 = vsel %vm2799_vm2, %v7066_v53, %v7074_v15  ;;  %v7088_v43 = vrot.slane %v7086_v8, 1  ;;  %v14536_v9 = vsel %vm3246_vm1, %v7538_v62, %v7540_v40  ;;  %v14539_v63 = vsel %vm3246_vm1, %v7540_v40, %v7542_v32  ;;  %11079 = vmatprep.subr.bf16.mxu0 %v14525_v42  ;;  %v11295_v8 = vld [vmem:[%s15945_s6 + $0x90] sm:$0xff]  }
 0x34a   : > { %10920 = vmatmul.mubr.msk.bf16.gmra.mxu0 %vm4869_vm3, %v14397_v24  ;;  %v7083_v24 = vor.u32 %v7082_v27, %v7079_v41  ;;  %v7097_v35 = vrot.slane %v7095_v51, 1  ;;  %v7104_v48 = vshrl.u32 %v14330_v44, 16  ;;  %v7107_v37 = vshll.u32 %v14330_v44, 16 }
 0x34b   : > { %10923 = vmatprep.mubr.msk.bf16.mxu0 %vm4869_vm3, %v14400_v50  ;;  %v7092_v53 = vor.u32 %v7091_v7, %v7088_v43  ;;  %v7100_v1 = vrot.slane %v7098_v33, 2  ;;  %v7544_v50 = vrot.slane %v14337_v17, 2  ;;  %v7546_v62 = vrot.slane %v14339_v56, 2 }
 0x34c   : > { %v14551_v20 = vsel %vm2799_vm2, %v7074_v15, %v7083_v24  ;;  %v7106_v21 = vrot.slane %v7104_v48, 1  ;;  %v7109_v41 = vrot.slane %v7107_v37, 2  ;;  %v7113_v40 = vshrl.u32 %v14337_v17, 16 }
 0x34d   : > { %v14555_v27 = vsel %vm2799_vm2, %v7083_v24, %v7092_v53  ;;  %v7101_v44 = vor.u32 %v7100_v1, %v7097_v35  ;;  %v14558_v43 = vsel %vm3246_vm1, %v7542_v32, %v7544_v50  ;;  %v14561_v51 = vsel %vm3246_vm1, %v7544_v50, %v7546_v62  ;;  %v11360_v24 = vld [vmem:[%s15945_s6 + $0x98] sm:$0xff]  }
 0x34e   : > { %v7110_v7 = vor.u32 %v7109_v41, %v7106_v21  ;;  %v7115_v15 = vrot.slane %v7113_v40, 1  ;;  %v7116_v33 = vshll.u32 %v14337_v17, 16  ;;  %v7122_v48 = vshrl.u32 %v14339_v56, 16  ;;  %v11301_v17 = vld [vmem:[%s15945_s6 + $0x88] sm:$0xff]  }
 0x34f   : > { %v14573_v32 = vsel %vm2799_vm2, %v7092_v53, %v7101_v44  ;;  %v7125_v35 = vshll.u32 %v14339_v56, 16  ;;  %v7550_v37 = vrot.slane %v14383_v31, 2  ;;  %v7131_v50 = vshrl.u32 %v14370_v23, 16 }
 0x350   : > { %10868 = vmatmul.mubr.msk.bf16.vlgmr.msra.gmra.mxu1 %vm4869_vm3, %v14368_v58  ;;  %v7548_v58 = vrot.slane %v14370_v23, 2  ;;  %v14584_v1 = vsel %vm2799_vm2, %v7101_v44, %v7110_v7  ;;  %v7124_v53 = vrot.slane %v7122_v48, 1  ;;  %v7134_v41 = vshll.u32 %v14370_v23, 16 }
 0x351   : > { %10948 = vmatpush3.bf16.msra.mxu1 %v11360_v24  ;;  %10871 = vmatprep.mubr.msk.bf16.mxu1 %vm4869_vm3, %v14376_v54  ;;  %v7118_v54 = vrot.slane %v7116_v33, 2  ;;  %v7127_v56 = vrot.slane %v7125_v35, 2  ;;  %v7133_v24 = vrot.slane %v7131_v50, 1  ;;  %v7140_v44 = vshrl.u32 %v14383_v31, 16 }
 0x352   : > { %10924 = vmatmul.mubr.msk.bf16.gmra.mxu0 %vm4869_vm3, %v14453_v3  ;;  %10949 = vmatprep.subr.bf16.mxu1 %v11295_v8  ;;  %v14590_v21 = vsel %vm3246_vm1, %v7546_v62, %v7548_v58  ;;  %v14593_v3 = vsel %vm3246_vm1, %v7548_v58, %v7550_v37  ;;  %v7143_v33 = vshll.u32 %v14383_v31, 16  ;;  %v7136_v26 = vrot.slane %v7134_v41, 2  ;;  %v11307_v62 = vld [vmem:[%s15945_s6 + $0x80] sm:$0xff]  }
 0x353   : > { %10927 = vmatprep.mubr.msk.bf16.mxu0 %vm4869_vm3, %v14462_v22  ;;  %v7119_v40 = vor.u32 %v7118_v54, %v7115_v15  ;;  %v7128_v48 = vor.u32 %v7127_v56, %v7124_v53  ;;  %v7552_v22 = vrot.slane %v14393_v39, 2  ;;  %v7554_v35 = vrot.slane %v14403_v45, 2 }
 0x354   : > { %v7142_v15 = vrot.slane %v7140_v44, 1  ;;  %v7145_v58 = vrot.slane %v7143_v33, 2  ;;  %v7149_v54 = vshrl.u32 %v14393_v39, 16  ;;  %v7152_v41 = vshll.u32 %v14393_v39, 16 }
 0x355   : > { %10950 = vmatpush3.bf16.msra.mxu1 %v11295_v8  ;;  %v14604_v23 = vsel %vm2799_vm2, %v7110_v7, %v7119_v40  ;;  %v14608_v31 = vsel %vm2799_vm2, %v7119_v40, %v7128_v48  ;;  %v7137_v8 = vor.u32 %v7136_v26, %v7133_v24  ;;  %v14611_v53 = vsel %vm3246_vm1, %v7550_v37, %v7552_v22  ;;  %v14622_v26 = vld [vmem:[#allocation3 + $0x78] sm:$0xff]   ;;  %v14624_v37 = vld [vmem:[#allocation3 + $0x80] sm:$0xff]  }
 0x356   : > { %10951 = vmatprep.subr.bf16.mxu1 %v11301_v17  ;;  %v14614_v50 = vsel %vm3246_vm1, %v7552_v22, %v7554_v35  ;;  %v7146_v56 = vor.u32 %v7145_v58, %v7142_v15  ;;  %v7151_v7 = vrot.slane %v7149_v54, 1  ;;  %v7158_v44 = vshrl.u32 %v14403_v45, 16 }
 0x357   : > { %v14627_v40 = vsel %vm2799_vm2, %v7128_v48, %v7137_v8  ;;  %v7161_v24 = vshll.u32 %v14403_v45, 16  ;;  %v7558_v33 = vrot.slane %v14412_v49, 2  ;;  %v7167_v45 = vshrl.u32 %v14405_v52, 16 }
 0x358   : > { %10872 = vmatmul.mubr.msk.bf16.gmra.mxu1 %vm4869_vm3, %v14381_v10  ;;  %v7556_v10 = vrot.slane %v14405_v52, 2  ;;  %v14640_v39 = vsel %vm2799_vm2, %v7137_v8, %v7146_v56  ;;  %v7160_v48 = vrot.slane %v7158_v44, 1  ;;  %v7170_v58 = vshll.u32 %v14405_v52, 16  ;;  %v14654_v44 = vld [vmem:[#allocation3 + $0x88] sm:$0xff]  }
 0x359   : > { %10875 = vmatprep.mubr.msk.bf16.mxu1 %vm4869_vm3, %v14391_v29  ;;  %10952 = vmatpush3.bf16.msra.mxu1 %v11301_v17  ;;  %v14637_v29 = vld [vmem:[%s15945_s6 + $0xd8] sm:$0xff]   ;;  %16224 = vst [vmem:[#allocation42_spill] sm:$0xff] %v14640_v39  ;;  %v7154_v17 = vrot.slane %v7152_v41, 2  ;;  %v7163_v22 = vrot.slane %v7161_v24, 2  ;;  %v7169_v13 = vrot.slane %v7167_v45, 1  ;;  %v7176_v8 = vshrl.u32 %v14412_v49, 16 }
 0x35a   : > { %10928 = vmatmul.mubr.msk.bf16.gmra.mxu0 %vm4869_vm3, %v14465_v30  ;;  %10953 = vmatprep.subr.bf16.mxu1 %v11307_v62  ;;  %v14646_v15 = vsel %vm3246_vm1, %v7554_v35, %v7556_v10  ;;  %v14649_v30 = vsel %vm3246_vm1, %v7556_v10, %v7558_v33  ;;  %v7179_v41 = vshll.u32 %v14412_v49, 16  ;;  %v7172_v24 = vrot.slane %v7170_v58, 2 }
 0x35b   : > { %10931 = vmatprep.mubr.msk.bf16.mxu0 %vm4869_vm3, %v14475_v18  ;;  %v7155_v54 = vor.u32 %v7154_v17, %v7151_v7  ;;  %v7164_v18 = vor.u32 %v7163_v22, %v7160_v48  ;;  %v7560_v35 = vrot.slane %v14622_v26, 2  ;;  %v7562_v10 = vrot.slane %v14624_v37, 2 }
 0x35c   : > { %v7178_v7 = vrot.slane %v7176_v8, 1  ;;  %v7181_v17 = vrot.slane %v7179_v41, 2  ;;  %v7185_v45 = vshrl.u32 %v14622_v26, 16  ;;  %v7173_v39 = vor.u32 %v7172_v24, %v7169_v13 }
 0x35d   : > { %10954 = vmatpush3.bf16.msra.mxu1 %v11307_v62  ;;  %v14662_v52 = vsel %vm2799_vm2, %v7146_v56, %v7155_v54  ;;  %v14666_v47 = vsel %vm2799_vm2, %v7155_v54, %v7164_v18  ;;  %v14669_v62 = vsel %vm3246_vm1, %v7558_v33, %v7560_v35  ;;  %v14672_v48 = vsel %vm3246_vm1, %v7560_v35, %v7562_v10 }
 0x35e   : > { %11035 = vmatprep.subr.bf16.mxu1 %v14637_v29  ;;  %v7182_v22 = vor.u32 %v7181_v17, %v7178_v7  ;;  %v7187_v56 = vrot.slane %v7185_v45, 1  ;;  %v7188_v58 = vshll.u32 %v14622_v26, 16  ;;  %v7194_v8 = vshrl.u32 %v14624_v37, 16 }
 0x35f   : > { %v14681_v13 = vsel %vm2799_vm2, %v7164_v18, %v7173_v39  ;;  %v7197_v33 = vshll.u32 %v14624_v37, 16  ;;  %v7564_v54 = vrot.slane %v14654_v44, 2  ;;  %v15994_v41 = vrot.slane %v14656_v55, 2 }
 0x360   : > { %10876 = vmatmul.mubr.msk.bf16.gmra.mxu1 %vm4869_vm3, %v14441_v2  ;;  %16225 = vst [vmem:[#allocation46_spill] sm:$0xff] %v14681_v13  ;;  %v14689_v2 = vsel %vm2799_vm2, %v7173_v39, %v7182_v22  ;;  %v7190_v24 = vrot.slane %v7188_v58, 2  ;;  %v7196_v35 = vrot.slane %v7194_v8, 1  ;;  %v7203_v7 = vshrl.u32 %v14654_v44, 16 }
 0x361   : > { %10879 = vmatprep.mubr.msk.bf16.mxu1 %vm4869_vm3, %v14450_v57  ;;  %16226 = vst [vmem:[#allocation43_spill] sm:$0xff] %v14689_v2  ;;  %v7199_v57 = vrot.slane %v7197_v33, 2  ;;  %v14695_v18 = vsel %vm3246_vm1, %v7562_v10, %v7564_v54  ;;  %v14700_v17 = vsel %vm3246_vm1, %v7564_v54, %v15994_v41  ;;  %v7212_v58 = vshrl.u32 %v14656_v55, 16 }
 0x362   : > { %10932 = vmatmul.mubr.msk.bf16.gmra.mxu0 %vm4869_vm3, %v14478_v6  ;;  %16227 = vst [vmem:[#allocation51_spill] sm:$0xff] %v14695_v18  ;;  %16228 = vst [vmem:[#allocation53_spill] sm:$0xff] %v14700_v17  ;;  %v7206_v6 = vshll.u32 %v14654_v44, 16  ;;  %v7191_v39 = vor.u32 %v7190_v24, %v7187_v56  ;;  %v7205_v45 = vrot.slane %v7203_v7, 1  ;;  %v7215_v8 = vshll.u32 %v14656_v55, 16 }
 0x363   : > { %10935 = vmatprep.mubr.msk.bf16.mxu0 %vm4869_vm3, %v14490_v59  ;;  %v6745_v2 = vrot.slane %v14622_v26, 1  ;;  %v7200_v59 = vor.u32 %v7199_v57, %v7196_v35  ;;  %v6747_v10 = vrot.slane %v14624_v37, 1  ;;  %v7214_v18 = vrot.slane %v7212_v58, 1  ;;  %v14805_v58 = vld [vmem:[#allocation3 + $0x50] sm:$0xff]  }
 0x364   : > { %v7208_v33 = vrot.slane %v7206_v6, 2  ;;  %v14708_v13 = vsel %vm2799_vm2, %v7182_v22, %v7191_v39  ;;  %v7217_v54 = vrot.slane %v7215_v8, 2  ;;  %v16229_v41 = vrot.slane %v14062_v38, 1 }
 0x365   : > { %v16230_v56 = vrot.slane %v14045_v12, 1  ;;  %v14716_v7 = vsel %vm2799_vm2, %v7191_v39, %v7200_v59  ;;  %v16231_v26 = vrot.slane %v14109_v34, 1  ;;  %v16233_v12 = vrot.slane %v14412_v49, 1 }
 0x366   : > { %v7209_v17 = vor.u32 %v7208_v33, %v7205_v45  ;;  %v16232_v37 = vmov %v16229_v41  ;;  %v14724_v35 = vor.u32 %v7217_v54, %v7214_v18  ;;  %v6748_v6 = vsel %vm2046_vm15, %v6745_v2, %v6747_v10  ;;  %v14802_v45 = vld [vmem:[#allocation3 + $0x48] sm:$0xff]   ;;  %v14810_v33 = vld [vmem:[#allocation3 + $0x58] sm:$0xff]  }
 0x367   : > { %v6267_v24 = vsel %vm2046_vm15, %v16230_v56, %v16229_v41  ;;  %v6269_v22 = vsel %vm2046_vm15, %v16232_v37, %v16231_v26  ;;  %v6746_v41 = vsel %vm2046_vm15, %v16233_v12, %v6745_v2  ;;  %v6749_v34 = vrot.slane %v14654_v44, 1  ;;  %v14798_v44 = vld [vmem:[#allocation3 + $0x38] sm:$0xff]   ;;  %v14814_v54 = vld [vmem:[#allocation3 + $0x68] sm:$0xff]   ;;  %v14820_v37 = vld [vmem:[#allocation3 + $0x70] sm:$0xff]  }
 0x368   : > { %10880 = vmatmul.mubr.msk.bf16.gmra.mxu1 %vm4869_vm3, %v6267_v24  ;;  %v14731_v57 = vsel %vm2799_vm2, %v7200_v59, %v7209_v17  ;;  %v14737_v38 = vsel %vm2799_vm2, %v7209_v17, %v14724_v35  ;;  %v6751_v18 = vrot.slane %v14656_v55, 1  ;;  %v11309_v17 = vld [vmem:[#allocation3 + $0x98] ss:$0 sps:$4 sm:$0x11]   ;;  %v14824_v12 = vld [vmem:[#allocation3 + $0x80] sm:$0xff]  }
 0x369   : > { %10883 = vmatprep.mubr.msk.bf16.mxu1 %vm4869_vm3, %v6269_v22  ;;  %v6750_v49 = vsel %vm2046_vm15, %v6747_v10, %v6749_v34  ;;  %v6753_v39 = vrot.slane %v11309_v17, 1  ;;  %v14812_v10 = vld [vmem:[#allocation3 + $0x60] sm:$0xff]   ;;  %v14822_v22 = vld [vmem:[#allocation3 + $0x78] sm:$0xff]   ;;  %v8828_v17 = vrot.slane %v14802_v45, 3 }
 0x36a   : > { %10936 = vmatmul.mubr.msk.bf16.gmra.mxu0 %vm4869_vm3, %v6746_v41  ;;  %v6752_v2 = vsel %vm2046_vm15, %v6749_v34, %v6751_v18 }
 0x36b   : > { %10939 = vmatprep.mubr.msk.bf16.mxu0 %vm4869_vm3, %v6748_v6  ;;  %v8824_v6 = vrot.slane %v14798_v44, 3 }
 0x370   : > { %10884 = vmatmul.mubr.msk.bf16.gmra.mxu1 %vm4869_vm3, %v14427_v60  ;;  %v6754_v60 = vsel %vm2046_vm15, %v6751_v18, %v6753_v39  ;;  %v14831_v18 = vld [vmem:[#allocation3 + $0x88] sm:$0xff]   ;;  %v14845_v39 = vld [vmem:[#allocation3 + $0xa0] ss:$0 sps:$4 sm:$0x77]  }
 0x371   : > { %10887 = vmatprep.mubr.msk.bf16.mxu1 %vm4869_vm3, %v14430_v4  ;;  %v11318_v4 = vld [vmem:[%s15945_s6 + $0xf0] sm:$0xff]  }
 0x372   : > { %10940 = vmatmul.mubr.msk.bf16.gmra.mxu0 %vm4869_vm3, %v6750_v49 }
 0x373   : > { %10943 = vmatprep.mubr.msk.bf16.mxu0 %vm4869_vm3, %v6752_v2 }
 0x378   : > { %10888 = vmatmul.mubr.msk.bf16.gmra.mxu1 %vm4869_vm3, %v14435_v46  ;;  %v11320_v46 = vld [vmem:[%s15945_s6 + $0xe8] sm:$0xff]  }
 0x379   : > { %10891 = vmatprep.mubr.msk.bf16.mxu1 %vm4869_vm3, %v14438_v0  ;;  %v11323_v0 = vld [vmem:[%s15945_s6 + $0xe0] sm:$0xff]  }
 0x37a   : > { %10944 = vmatmul.mubr.msk.bf16.gmra.mxu0 %vm4869_vm3, %v6754_v60 }
 0x37b   : > { %10999 = vmatprep.mubr.msk.bf16.mxu0 %vm4869_vm3, %v14505_v19  ;;  %v8802_v19 = vld [vmem:[#allocation3 + $0x10] sm:$0x8] }
 0x380   : > { %10892 = vmatmul.mubr.msk.bf16.gmra.mxu1 %vm4869_vm3, %v14468_v14 }
 0x381   : > { %10895 = vmatprep.mubr.msk.bf16.mxu1 %vm4869_vm3, %v14471_v16  ;;  %v14784_v16 = vld [vmem:[#allocation3 + $0x18] sm:$0xff]  }
 0x382   : > { %11000 = vmatmul.mubr.msk.bf16.vlgmr.msra.gmra.mxu0 %vm4869_vm3, %v14508_v25  ;;  %v14790_v25 = vld [vmem:[#allocation3 + $0x14] sm:$0xf]  ;;  %v8816_v8 = vrot.slane %v14784_v16, 3 }
 0x383   : > { %11003 = vmatprep.mubr.msk.bf16.mxu0 %vm4869_vm3, %v14511_v61  ;;  %11080 = vmatpush3.bf16.msra.mxu0 %v14525_v42  ;;  %v14792_v61 = vld [vmem:[#allocation3 + $0x20] sm:$0xff]   ;;  %v14794_v42 = vld [vmem:[#allocation3 + $0x28] sm:$0xff]  }
 0x384   : > { %11081 = vmatprep.subr.bf16.mxu0 %v11318_v4  ;;  %v8818_v24 = vrot.slane %v14792_v61, 3  ;;  %v8820_v26 = vrot.slane %v14794_v42, 3 }
 0x386   : > { %v14840_v2 = vsel %vm4446_vm4, %v8818_v24, %v8820_v26 }
 0x387   : > { %11082 = vmatpush3.bf16.msra.mxu0 %v11318_v4  ;;  %16236 = vst [vmem:[#allocation55_spill] sm:$0xff] %v14840_v2 }
 0x388   : > { %10896 = vmatmul.mubr.msk.bf16.gmra.mxu1 %vm4869_vm3, %v14481_v5  ;;  %11083 = vmatprep.subr.bf16.mxu0 %v11320_v46  ;;  %v14780_v14 = vpop.f32.mrf.mxu0 }
 0x389   : > { %10899 = vmatprep.mubr.msk.bf16.mxu1 %vm4869_vm3, %v14484_v11  ;;  %v14796_v11 = vld [vmem:[#allocation3 + $0x30] sm:$0xff]  }
 0x38a   : > { %11004 = vmatmul.mubr.msk.bf16.gmra.mxu0 %vm4869_vm3, %v14536_v9  ;;  %v14788_v5 = vpop.f32.mrf.mxu0  ;;  %v14800_v9 = vld [vmem:[#allocation3 + $0x40] sm:$0xff]   ;;  %v8822_v41 = vrot.slane %v14796_v11, 3 }
 0x38b   : > { %11007 = vmatprep.mubr.msk.bf16.mxu0 %vm4869_vm3, %v14539_v63  ;;  %11084 = vmatpush3.bf16.msra.mxu0 %v11320_v46  ;;  %v9962_v63 = vcombine.low %v8802_v19, %v14790_v25  ;;  %v8826_v34 = vrot.slane %v14800_v9, 3  ;;  %v14862_v19 = vld [vmem:[#allocation3 + $0x98] sm:$0xff]  }
 0x38c   : > { %11085 = vmatprep.subr.bf16.mxu0 %v11323_v0  ;;  %v14808_v59 = vpop.f32.mrf.mxu0  ;;  %v14851_v60 = vsel %vm4446_vm4, %v8822_v41, %v8824_v6 }
 0x38d   : > { %v8815_v56 = vrot.slane %v9962_v63, 3  ;;  %16238 = vst [vmem:[#allocation45_spill] sm:$0xff] %v14851_v60  ;;  %v14854_v4 = vsel %vm4446_vm4, %v8824_v6, %v8826_v34  ;;  %v8830_v63 = vrot.slane %v14805_v58, 3  ;;  %v11314_v60 = vld [vmem:[%s15945_s6 + $0xd0] sm:$0xff]  }
 0x38e   : > { %16239 = vst [vmem:[#allocation47_spill] sm:$0xff] %v14854_v4  ;;  %v14858_v46 = vpop.f32.mrf.mxu0  ;;  %v8844_v4 = vrot.slane %v14831_v18, 3 }
 0x38f   : > { %11086 = vmatpush3.bf16.msra.mxu0 %v11323_v0  ;;  %v14834_v49 = vsel %vm4446_vm4, %v8815_v56, %v8816_v8  ;;  %v14860_v0 = vld [vmem:[#allocation3 + $0x90] sm:$0xff]   ;;  %v8834_v56 = vrot.slane %v14812_v10, 3  ;;  %v14875_v6 = vsel %vm4446_vm4, %v8828_v17, %v8830_v63 }
 0x390   : > { %10900 = vmatmul.mubr.msk.bf16.gmra.mxu1 %vm4869_vm3, %v14500_v36  ;;  %16234 = vst [vmem:[#allocation48_spill] sm:$0xff] %v14834_v49  ;;  %v14837_v36 = vsel %vm4446_vm4, %v8816_v8, %v8818_v24  ;;  %v8832_v8 = vrot.slane %v14810_v33, 3  ;;  %v8836_v24 = vrot.slane %v14814_v54, 3  ;;  %16241 = vst [vmem:[#allocation49_spill] sm:$0xff] %v14875_v6  ;;  %v8848_v6 = vrot.slane %v14862_v19, 3 }
 0x391   : > { %10955 = vmatprep.mubr.msk.bf16.mxu1 %vm4869_vm3, %v14530_v28  ;;  %16235 = vst [vmem:[#allocation44_spill] sm:$0xff] %v14837_v36  ;;  %v14848_v28 = vsel %vm4446_vm4, %v8820_v26, %v8822_v41  ;;  %v8838_v26 = vrot.slane %v14820_v37, 3  ;;  %v8842_v41 = vrot.slane %v14824_v12, 3 }
 0x392   : > { %11008 = vmatmul.mubr.msk.bf16.gmra.mxu0 %vm4869_vm3, %v14558_v43  ;;  %16237 = vst [vmem:[#allocation58_spill] sm:$0xff] %v14848_v28  ;;  %v14865_v43 = vsel %vm4446_vm4, %v8826_v34, %v8828_v17  ;;  %v14878_v34 = vsel %vm4446_vm4, %v8830_v63, %v8832_v8  ;;  %v14888_v28 = vsel %vm4446_vm4, %v8834_v56, %v8836_v24 }
 0x393   : > { %11011 = vmatprep.mubr.msk.bf16.mxu0 %vm4869_vm3, %v14561_v51  ;;  %16240 = vst [vmem:[#allocation59_spill] sm:$0xff] %v14865_v43  ;;  %v8840_v51 = vrot.slane %v14822_v22, 3  ;;  %16242 = vst [vmem:[#allocation50_spill] sm:$0xff] %v14878_v34  ;;  %v14881_v43 = vsel %vm4446_vm4, %v8832_v8, %v8834_v56  ;;  %v14891_v2 = vsel %vm4446_vm4, %v8836_v24, %v8838_v26  ;;  %v8846_v34 = vrot.slane %v14860_v0, 3 }
 0x394   : > { %16243 = vst [vmem:[#allocation52_spill] sm:$0xff] %v14881_v43  ;;  %16244 = vst [vmem:[#allocation54_spill] sm:$0xff] %v14888_v28  ;;  %v14902_v43 = vsel %vm4446_vm4, %v8842_v41, %v8844_v4  ;;  %v8850_v56 = vrot.slane %v14845_v39, 3  ;;  %v16256_v28 = vld [vmem:[#allocation43_spill] sm:$0xff] }
 0x395   : > { %16245 = vst [vmem:[#allocation57_spill] sm:$0xff] %v14891_v2  ;;  %v14894_v17 = vsel %vm4446_vm4, %v8838_v26, %v8840_v51  ;;  %v14897_v63 = vsel %vm4446_vm4, %v8840_v51, %v8842_v41  ;;  %16248 = vst [vmem:[#allocation73_spill] sm:$0xff] %v14902_v43  ;;  %v14915_v26 = vsel %vm4446_vm4, %v8844_v4, %v8846_v34  ;;  %v11317_v4 = vld [vmem:[%s15945_s6 + $0xc0] sm:$0xff]  }
 0x396   : > { %16246 = vst [vmem:[#allocation61_spill] sm:$0xff] %v14894_v17  ;;  %16247 = vst [vmem:[#allocation62_spill] sm:$0xff] %v14897_v63  ;;  %v14899_v8 = vpop.f32.mrf.mxu0  ;;  %v14918_v51 = vsel %vm4446_vm4, %v8846_v34, %v8848_v6  ;;  %v14921_v41 = vsel %vm4446_vm4, %v8848_v6, %v8850_v56  ;;  %v16252_v56 = vld [vmem:[#allocation42_spill] sm:$0xff]  ;;  %v8368_v63 = vshrl.u32 %v14794_v42, 16 }
 0x397   : > { %16249 = vst [vmem:[#allocation63_spill] sm:$0xff] %v14915_v26  ;;  %16250 = vst [vmem:[#allocation64_spill] sm:$0xff] %v14918_v51  ;;  %v8359_v51 = vshrl.u32 %v14792_v61, 16  ;;  %v8362_v26 = vshll.u32 %v14792_v61, 16 }
 0x398   : > { %10956 = vmatmul.mubr.msk.bf16.vlgmr.msra.gmra.mxu1 %vm4869_vm3, %v14551_v20  ;;  %v14912_v24 = vpop.f32.mrf.mxu0  ;;  %16251 = vst [vmem:[#allocation65_spill] sm:$0xff] %v14921_v41  ;;  %v11315_v20 = vld [vmem:[%s15945_s6 + $0xc8] sm:$0xff]  }
 0x399   : > { %11036 = vmatpush3.bf16.msra.mxu1 %v14637_v29  ;;  %10959 = vmatprep.mubr.msk.bf16.mxu1 %vm4869_vm3, %v14555_v27 }
 0x39a   : > { %11012 = vmatmul.mubr.msk.bf16.gmra.mxu0 %vm4869_vm3, %v14590_v21  ;;  %11037 = vmatprep.subr.bf16.mxu1 %v11314_v60  ;;  %v14930_v27 = vpop.f32.mrf.mxu0 }
 0x39b   : > { %11015 = vmatprep.mubr.msk.bf16.mxu0 %vm4869_vm3, %v14593_v3  ;;  %v14948_v3 = vld [vmem:[%s15945_s6 + $0x118] sm:$0xff]  }
 0x39c   : > { %v14932_v29 = vpop.f32.mrf.mxu0 }
 0x39d   : > { %11038 = vmatpush3.bf16.msra.mxu1 %v11314_v60 }
 0x39e   : > { %11039 = vmatprep.subr.bf16.mxu1 %v11315_v20 }
 0x3a0   : > { %10960 = vmatmul.mubr.msk.bf16.gmra.mxu1 %vm4869_vm3, %v14573_v32  ;;  %v14941_v21 = vpop.f32.mrf.mxu0 }
 0x3a1   : > { %10963 = vmatprep.mubr.msk.bf16.mxu1 %vm4869_vm3, %v14584_v1  ;;  %11040 = vmatpush3.bf16.msra.mxu1 %v11315_v20 }
 0x3a2   : > { %11016 = vmatmul.mubr.msk.bf16.gmra.mxu0 %vm4869_vm3, %v14611_v53  ;;  %11041 = vmatprep.subr.bf16.mxu1 %v11317_v4  ;;  %v14952_v60 = vpop.f32.mrf.mxu0 }
 0x3a3   : > { %11019 = vmatprep.mubr.msk.bf16.mxu0 %vm4869_vm3, %v14614_v50 }
 0x3a4   : > { %v14954_v32 = vpop.f32.mrf.mxu0 }
 0x3a5   : > { %11042 = vmatpush3.bf16.msra.mxu1 %v11317_v4 }
 0x3a6   : > { %11123 = vmatprep.subr.bf16.mxu1 %v14948_v3  ;;  %v14963_v1 = vpop.f32.mrf.mxu0 }
 0x3a8   : > { %10964 = vmatmul.mubr.msk.bf16.gmra.mxu1 %vm4869_vm3, %v14604_v23 }
 0x3a9   : > { %10967 = vmatprep.mubr.msk.bf16.mxu1 %vm4869_vm3, %v14608_v31 }
 0x3aa   : > { %11020 = vmatmul.mubr.msk.bf16.gmra.mxu0 %vm4869_vm3, %v14646_v15 }
 0x3ab   : > { %11023 = vmatprep.mubr.msk.bf16.mxu0 %vm4869_vm3, %v14649_v30 }
 0x3ac   : > { %v10781_v53 = vpop.f32.mrf.mxu1 }
 0x3ad   : > { %v14968_v50 = vadd.f32 %v14780_v14, %v10781_v53  ;;  %v14970_v34 = vpop.f32.mrf.mxu0  ;;  %v7861_v14 = vld [vmem:[#allocation3 + $0x10] sm:$0xc]  ;;  %v8350_v53 = vshrl.u32 %v14784_v16, 16 }
 0x3ae   : > { %v5858_v6 = vpop.f32.mrf.mxu1 }
 0x3af   : > { %v14973_v23 = vadd.f32 %v14788_v5, %v5858_v6  ;;  %v14977_v15 = vpop.f32.mrf.mxu0 }
 0x3b0   : > { %10968 = vmatmul.mubr.msk.bf16.gmra.mxu1 %vm4869_vm3, %v14627_v40  ;;  %v10782_v31 = vpop.f32.mrf.mxu1  ;;  %v14992_v40 = vcombine.low %v7861_v14, %v14790_v25  ;;  %v16253_v25 = vld [vmem:[#allocation51_spill] sm:$0xff]  ;;  %v15010_v14 = vld [vmem:[#allocation3 + $0x98] ss:$0 sps:$4 sm:$0x33]  }
 0x3b1   : > { %10971 = vmatprep.mubr.msk.bf16.mxu1 %vm4869_vm3, %v16252_v56  ;;  %v14982_v30 = vadd.f32 %v14808_v59, %v10782_v31  ;;  %v14994_v4 = vpop.f32.mrf.mxu0  ;;  %v8353_v59 = vshll.u32 %v14784_v16, 16  ;;  %v16254_v56 = vld [vmem:[#allocation53_spill] sm:$0xff] }
 0x3b2   : > { %11024 = vmatmul.mubr.msk.bf16.gmra.mxu0 %vm4869_vm3, %v14669_v62  ;;  %v5861_v20 = vpop.f32.mrf.mxu1  ;;  %v8342_v62 = vshrl.u32 %v14992_v40, 16  ;;  %v8345_v6 = vshll.u32 %v14992_v40, 16 }
 0x3b3   : > { %11027 = vmatprep.mubr.msk.bf16.mxu0 %vm4869_vm3, %v14672_v48  ;;  %v14989_v5 = vadd.f32 %v14858_v46, %v5861_v20  ;;  %v15002_v48 = vpop.f32.mrf.mxu0  ;;  %v8352_v46 = vrot.slane %v8350_v53, 2  ;;  %v8355_v31 = vrot.slane %v8353_v59, 3  ;;  %v8371_v53 = vshll.u32 %v14794_v42, 16 }
 0x3b4   : > { %v8347_v20 = vrot.slane %v8345_v6, 3  ;;  %v16255_v6 = vld [vmem:[#allocation46_spill] sm:$0xff] }
 0x3b8   : > { %10972 = vmatmul.mubr.msk.bf16.gmra.mxu1 %vm4869_vm3, %v14662_v52  ;;  %v8344_v52 = vrot.slane %v8342_v62, 2  ;;  %v7568_v62 = vrot.slane %v15010_v14, 2 }
 0x3b9   : > { %10975 = vmatprep.mubr.msk.bf16.mxu1 %vm4869_vm3, %v14666_v47  ;;  %v8356_v47 = vor.u32 %v8355_v31, %v8352_v46  ;;  %v16257_v46 = vrot.slane %v14656_v55, 2 }
 0x3ba   : > { %11028 = vmatmul.mubr.msk.bf16.gmra.mxu0 %vm4869_vm3, %v16253_v25  ;;  %v8348_v17 = vor.u32 %v8347_v20, %v8344_v52  ;;  %v8370_v52 = vrot.slane %v8368_v63, 2  ;;  %v8373_v20 = vrot.slane %v8371_v53, 3  ;;  %v8386_v63 = vshrl.u32 %v14798_v44, 16 }
 0x3bb   : > { %11031 = vmatprep.mubr.msk.bf16.mxu0 %vm4869_vm3, %v16254_v56  ;;  %v7569_v31 = vsel %vm3246_vm1, %v16257_v46, %v7568_v62  ;;  %v8389_v53 = vshll.u32 %v14798_v44, 16 }
 0x3bc   : > { %v15012_v41 = vpop.f32.mrf.mxu0 }
 0x3be   : > { %v15018_v59 = vpop.f32.mrf.mxu0 }
 0x3bf   : > { %v10785_v43 = vpop.f32.mrf.mxu1 }
 0x3c0   : > { %v15021_v25 = vadd.f32 %v14899_v8, %v10785_v43  ;;  %10976 = vmatmul.mubr.msk.bf16.gmra.mxu1 %vm4869_vm3, %v16255_v6  ;;  %v15026_v2 = vpop.f32.mrf.mxu0  ;;  %v8361_v43 = vrot.slane %v8359_v51, 2  ;;  %v8364_v8 = vrot.slane %v8362_v26, 3  ;;  %v8357_v6 = vsel %vm3999_vm5, %v8348_v17, %v8356_v47 }
 0x3c1   : > { %v5874_v56 = vpop.f32.mrf.mxu1  ;;  %10979 = vmatprep.mubr.msk.bf16.mxu1 %vm4869_vm3, %v16256_v28  ;;  %v8377_v26 = vshrl.u32 %v14796_v11, 16  ;;  %v8374_v17 = vor.u32 %v8373_v20, %v8370_v52  ;;  %v8388_v52 = vrot.slane %v8386_v63, 2  ;;  %v8391_v20 = vrot.slane %v8389_v53, 3 }
 0x3c2   : > { %v15034_v36 = vadd.f32 %v14912_v24, %v5874_v56  ;;  %11032 = vmatmul.mubr.msk.bf16.gmra.mxu0 %vm4869_vm3, %v7569_v31  ;;  %v15042_v55 = vpop.f32.mrf.mxu0  ;;  %v8365_v51 = vor.u32 %v8364_v8, %v8361_v43  ;;  %v8380_v56 = vshll.u32 %v14796_v11, 16  ;;  %v8398_v63 = vshll.u32 %v14800_v9, 16 }
 0x3c3   : > { %v10786_v49 = vpop.f32.mrf.mxu1  ;;  %11087 = vmatprep.mubr.msk.bf16.mxu0 %vm4869_vm3, %v8357_v6  ;;  %v8379_v31 = vrot.slane %v8377_v26, 2 }
 0x3c4   : > { %v15040_v28 = vadd.f32 %v14930_v27, %v10786_v49  ;;  %v8382_v43 = vrot.slane %v8380_v56, 3  ;;  %v8375_v6 = vsel %vm3999_vm5, %v8365_v51, %v8374_v17 }
 0x3c5   : > { %v5877_v62 = vpop.f32.mrf.mxu1 }
 0x3c6   : > { %v15045_v24 = vadd.f32 %v14932_v29, %v5877_v62  ;;  %v15051_v46 = vpop.f32.mrf.mxu0  ;;  %v8366_v29 = vsel %vm3999_vm5, %v8356_v47, %v8365_v51  ;;  %v7224_v47 = vshll.u32 %v15010_v14, 16  ;;  %v8383_v56 = vor.u32 %v8382_v43, %v8379_v31 }
 0x3c7   : > { %v8395_v51 = vshrl.u32 %v14800_v9, 16 }
 0x3c8   : > { %10980 = vmatmul.mubr.msk.bf16.gmra.mxu1 %vm4869_vm3, %v14708_v13  ;;  %v10789_v49 = vpop.f32.mrf.mxu1  ;;  %v8384_v31 = vsel %vm3999_vm5, %v8374_v17, %v8383_v56  ;;  %v8416_v17 = vshll.u32 %v14805_v58, 16 }
 0x3c9   : > { %10983 = vmatprep.mubr.msk.bf16.mxu1 %vm4869_vm3, %v14716_v7  ;;  %v15058_v27 = vadd.f32 %v14941_v21, %v10789_v49  ;;  %v15067_v7 = vpop.f32.mrf.mxu0  ;;  %v7221_v21 = vshrl.u32 %v15010_v14, 16  ;;  %v8404_v49 = vshrl.u32 %v14802_v45, 16  ;;  %v7226_v14 = vrot.slane %v7224_v47, 2 }
 0x3ca   : > { %11088 = vmatmul.mubr.msk.bf16.vlgmr.msra.gmra.mxu0 %vm4869_vm3, %v8366_v29  ;;  %v5890_v8 = vpop.f32.mrf.mxu1  ;;  %v8407_v29 = vshll.u32 %v14802_v45, 16  ;;  %v8397_v43 = vrot.slane %v8395_v51, 2  ;;  %v8000_v47 = vrot.slane %v14992_v40, 2 }
 0x3cb   : > { %v15064_v13 = vadd.f32 %v14952_v60, %v5890_v8  ;;  %11091 = vmatprep.mubr.msk.bf16.mxu0 %vm4869_vm3, %v8375_v6  ;;  %v8392_v60 = vor.u32 %v8391_v20, %v8388_v52  ;;  %v15081_v6 = vpop.f32.mrf.mxu0  ;;  %v8400_v52 = vrot.slane %v8398_v63, 3  ;;  %v8422_v63 = vshrl.u32 %v14810_v33, 16 }
 0x3cc   : > { %v10790_v62 = vpop.f32.mrf.mxu1 }
 0x3cd   : > { %v15072_v26 = vadd.f32 %v14954_v32, %v10790_v62  ;;  %v7223_v32 = vrot.slane %v7221_v21, 1  ;;  %v8393_v20 = vsel %vm3999_vm5, %v8383_v56, %v8392_v60  ;;  %v8409_v62 = vrot.slane %v8407_v29, 3 }
 0x3ce   : > { %v5893_v53 = vpop.f32.mrf.mxu1  ;;  %v8425_v56 = vshll.u32 %v14810_v33, 16 }
 0x3cf   : > { %v15079_v8 = vadd.f32 %v14963_v1, %v5893_v53  ;;  %v8406_v1 = vrot.slane %v8404_v49, 2  ;;  %v15091_v53 = vpop.f32.mrf.mxu0  ;;  %v7227_v21 = vor.u32 %v7226_v14, %v7223_v32 }
 0x3d0   : > { %10984 = vmatmul.mubr.msk.bf16.gmra.mxu1 %vm4869_vm3, %v14731_v57  ;;  %v8001_v57 = vrot.slane %v14784_v16, 2 }
 0x3d1   : > { %16258 = vst [vmem:[#allocation66_spill] sm:$0xff] %v15079_v8  ;;  %10987 = vmatprep.mubr.msk.bf16.mxu1 %vm4869_vm3, %v14737_v38  ;;  %v8401_v8 = vor.u32 %v8400_v52, %v8397_v43  ;;  %v8413_v38 = vshrl.u32 %v14805_v58, 16  ;;  %v8410_v51 = vor.u32 %v8409_v62, %v8406_v1  ;;  %v7228_v49 = vsel %vm2799_vm2, %v14724_v35, %v7227_v21 }
 0x3d2   : > { %11092 = vmatmul.mubr.msk.bf16.gmra.mxu0 %vm4869_vm3, %v8384_v31  ;;  %v8002_v16 = vsel %vm3246_vm1, %v8000_v47, %v8001_v57  ;;  %v8418_v43 = vrot.slane %v8416_v17, 3  ;;  %v8427_v1 = vrot.slane %v8425_v56, 3  ;;  %v8003_v21 = vrot.slane %v14792_v61, 2  ;;  %v11332_v61 = vld [vmem:[%s15945_s6 + $0x110] sm:$0xff]  }
 0x3d3   : > { %11095 = vmatprep.mubr.msk.bf16.mxu0 %vm4869_vm3, %v8393_v20  ;;  %v8402_v40 = vsel %vm3999_vm5, %v8392_v60, %v8401_v8  ;;  %v8415_v31 = vrot.slane %v8413_v38, 2  ;;  %v8411_v35 = vsel %vm3999_vm5, %v8401_v8, %v8410_v51  ;;  %v8424_v20 = vrot.slane %v8422_v63, 2 }
 0x3d4   : > { %v8431_v8 = vshrl.u32 %v14812_v10, 16  ;;  %v8434_v63 = vshll.u32 %v14812_v10, 16 }
 0x3d5   : > { %v8419_v17 = vor.u32 %v8418_v43, %v8415_v31 }
 0x3d6   : > { %v8433_v43 = vrot.slane %v8431_v8, 2 }
 0x3d7   : > { %v15101_v29 = vpop.f32.mrf.mxu0  ;;  %v8420_v31 = vsel %vm3999_vm5, %v8410_v51, %v8419_v17  ;;  %v8009_v51 = vrot.slane %v14798_v44, 2 }
 0x3d8   : > { %10988 = vmatmul.mubr.msk.bf16.gmra.mxu1 %vm4869_vm3, %v7228_v49 }
 0x3d9   : > { %v10793_v32 = vpop.f32.mrf.mxu1  ;;  %11043 = vmatprep.mubr.msk.bf16.mxu1 %vm4869_vm3, %v8002_v16  ;;  %v15112_v62 = vpop.f32.mrf.mxu0  ;;  %v8440_v16 = vshrl.u32 %v14814_v54, 16 }
 0x3da   : > { %v15107_v14 = vadd.f32 %v14970_v34, %v10793_v32  ;;  %11096 = vmatmul.mubr.msk.bf16.gmra.mxu0 %vm4869_vm3, %v8402_v40  ;;  %v8005_v34 = vrot.slane %v14794_v42, 2  ;;  %v8443_v42 = vshll.u32 %v14814_v54, 16 }
 0x3db   : > { %v5906_v52 = vpop.f32.mrf.mxu1  ;;  %11099 = vmatprep.mubr.msk.bf16.mxu0 %vm4869_vm3, %v8411_v35  ;;  %v15128_v49 = vpop.f32.mrf.mxu0 }
 0x3dc   : > { %v15116_v47 = vadd.f32 %v14977_v15, %v5906_v52  ;;  %v8428_v15 = vor.u32 %v8427_v1, %v8424_v20  ;;  %v8006_v40 = vsel %vm3246_vm1, %v8003_v21, %v8005_v34  ;;  %v8436_v52 = vrot.slane %v8434_v63, 3  ;;  %v11338_v1 = vld [vmem:[%s15945_s6 + $0x108] sm:$0xff]  }
 0x3dd   : > { %v10794_v60 = vpop.f32.mrf.mxu1  ;;  %v15143_v35 = vpop.f32.mrf.mxu0  ;;  %v8445_v20 = vrot.slane %v8443_v42, 3 }
 0x3de   : > { %v15121_v38 = vadd.f32 %v14994_v4, %v10794_v60  ;;  %v8004_v4 = vsel %vm3246_vm1, %v8001_v57, %v8003_v21  ;;  %v8429_v57 = vsel %vm3999_vm5, %v8419_v17, %v8428_v15  ;;  %v8437_v21 = vor.u32 %v8436_v52, %v8433_v43 }
 0x3df   : > { %v5909_v56 = vpop.f32.mrf.mxu1  ;;  %v8449_v60 = vshrl.u32 %v14820_v37, 16  ;;  %v8452_v17 = vshll.u32 %v14820_v37, 16 }
 0x3e0   : > { %v15134_v32 = vadd.f32 %v15002_v48, %v5909_v56  ;;  %11044 = vmatmul.mubr.msk.bf16.vlgmr.msra.gmra.mxu1 %vm4869_vm3, %v8004_v4  ;;  %v8442_v48 = vrot.slane %v8440_v16, 2  ;;  %v8458_v56 = vshrl.u32 %v14822_v22, 16  ;;  %v8461_v16 = vshll.u32 %v14822_v22, 16 }
 0x3e1   : > { %11124 = vmatpush3.bf16.msra.mxu1 %v14948_v3  ;;  %11047 = vmatprep.mubr.msk.bf16.mxu1 %vm4869_vm3, %v8006_v40  ;;  %v8007_v3 = vrot.slane %v14796_v11, 2  ;;  %v11343_v11 = vld [vmem:[%s15945_s6 + $0x100] sm:$0xff]   ;;  %v8451_v43 = vrot.slane %v8449_v60, 2  ;;  %v8454_v52 = vrot.slane %v8452_v17, 3 }
 0x3e2   : > { %11100 = vmatmul.mubr.msk.bf16.gmra.mxu0 %vm4869_vm3, %v8420_v31  ;;  %11125 = vmatprep.subr.bf16.mxu1 %v11332_v61  ;;  %v8446_v63 = vor.u32 %v8445_v20, %v8442_v48  ;;  %v8438_v31 = vsel %vm3999_vm5, %v8428_v15, %v8437_v21  ;;  %v8460_v20 = vrot.slane %v8458_v56, 2  ;;  %v8470_v56 = vshll.u32 %v14824_v12, 16 }
 0x3e3   : > { %11103 = vmatprep.mubr.msk.bf16.mxu0 %vm4869_vm3, %v8429_v57  ;;  %v8008_v44 = vsel %vm3246_vm1, %v8005_v34, %v8007_v3  ;;  %v8010_v42 = vsel %vm3246_vm1, %v8007_v3, %v8009_v51  ;;  %v8463_v3 = vrot.slane %v8461_v16, 3  ;;  %v8455_v17 = vor.u32 %v8454_v52, %v8451_v43 }
 0x3e4   : > { %v8447_v34 = vsel %vm3999_vm5, %v8437_v21, %v8446_v63  ;;  %v8467_v21 = vshrl.u32 %v14824_v12, 16 }
 0x3e5   : > { %11126 = vmatpush3.bf16.msra.mxu1 %v11332_v61  ;;  %v8456_v52 = vsel %vm3999_vm5, %v8446_v63, %v8455_v17  ;;  %v8017_v63 = vrot.slane %v14810_v33, 2 }
 0x3e6   : > { %v15153_v8 = vpop.f32.mrf.mxu0  ;;  %11127 = vmatprep.subr.bf16.mxu1 %v11338_v1 }
 0x3e8   : > { %v10797_v61 = vpop.f32.mrf.mxu1  ;;  %11048 = vmatmul.mubr.msk.bf16.gmra.mxu1 %vm4869_vm3, %v8008_v44  ;;  %v15163_v4 = vpop.f32.mrf.mxu0  ;;  %v8011_v44 = vrot.slane %v14800_v9, 2  ;;  %v8476_v9 = vshrl.u32 %v14831_v18, 16 }
 0x3e9   : > { %v15166_v40 = vadd.f32 %v15012_v41, %v10797_v61  ;;  %11051 = vmatprep.mubr.msk.bf16.mxu1 %vm4869_vm3, %v8010_v42  ;;  %11128 = vmatpush3.bf16.msra.mxu1 %v11338_v1  ;;  %v8013_v1 = vrot.slane %v14802_v45, 2  ;;  %v8479_v42 = vshll.u32 %v14831_v18, 16 }
 0x3ea   : > { %v5922_v57 = vpop.f32.mrf.mxu1  ;;  %11104 = vmatmul.mubr.msk.bf16.gmra.mxu0 %vm4869_vm3, %v8438_v31  ;;  %v15172_v48 = vpop.f32.mrf.mxu0  ;;  %11129 = vmatprep.subr.bf16.mxu1 %v11343_v11  ;;  %v8012_v45 = vsel %vm3246_vm1, %v8009_v51, %v8011_v44  ;;  %v8478_v51 = vrot.slane %v8476_v9, 2  ;;  %v8488_v9 = vshll.u32 %v14860_v0, 16 }
 0x3eb   : > { %v15175_v41 = vadd.f32 %v15018_v59, %v5922_v57  ;;  %11107 = vmatprep.mubr.msk.bf16.mxu0 %vm4869_vm3, %v8447_v34  ;;  %v8464_v59 = vor.u32 %v8463_v3, %v8460_v20  ;;  %v8014_v43 = vsel %vm3246_vm1, %v8011_v44, %v8013_v1  ;;  %v8469_v57 = vrot.slane %v8467_v21, 2 }
 0x3ec   : > { %v10798_v15 = vpop.f32.mrf.mxu1  ;;  %v15185_v61 = vpop.f32.mrf.mxu0  ;;  %v8472_v34 = vrot.slane %v8470_v56, 3 }
 0x3ed   : > { %v15181_v60 = vadd.f32 %v15026_v2, %v10798_v15  ;;  %11130 = vmatpush3.bf16.msra.mxu1 %v11343_v11  ;;  %v8481_v15 = vrot.slane %v8479_v42, 3 }
 0x3ee   : > { %v5925_v16 = vpop.f32.mrf.mxu1 }
 0x3ef   : > { %v15190_v31 = vadd.f32 %v15042_v55, %v5925_v16  ;;  %v8465_v55 = vsel %vm3999_vm5, %v8455_v17, %v8464_v59  ;;  %v8485_v17 = vshrl.u32 %v14860_v0, 16 }
 0x3f0   : > { %v10801_v2 = vpop.f32.mrf.mxu1  ;;  %11052 = vmatmul.mubr.msk.bf16.gmra.mxu1 %vm4869_vm3, %v8012_v45  ;;  %v8473_v45 = vor.u32 %v8472_v34, %v8469_v57  ;;  %v8494_v57 = vshrl.u32 %v14862_v19, 16  ;;  %v8497_v34 = vshll.u32 %v14862_v19, 16 }
 0x3f1   : > { %v15196_v11 = vadd.f32 %v15051_v46, %v10801_v2  ;;  %11055 = vmatprep.mubr.msk.bf16.mxu1 %vm4869_vm3, %v8014_v43  ;;  %v8015_v46 = vrot.slane %v14805_v58, 2  ;;  %v8482_v2 = vor.u32 %v8481_v15, %v8478_v51 }
 0x3f2   : > { %v5938_v20 = vpop.f32.mrf.mxu1  ;;  %v15200_v3 = vpop.f32.mrf.mxu0  ;;  %11108 = vmatmul.mubr.msk.bf16.gmra.mxu0 %vm4869_vm3, %v8456_v52 }
 0x3f3   : > { %v15205_v44 = vadd.f32 %v15067_v7, %v5938_v20  ;;  %11111 = vmatprep.mubr.msk.bf16.mxu0 %vm4869_vm3, %v8465_v55  ;;  %v8016_v43 = vsel %vm3246_vm1, %v8013_v1, %v8015_v46  ;;  %v8487_v55 = vrot.slane %v8485_v17, 2  ;;  %v8490_v1 = vrot.slane %v8488_v9, 3 }
 0x3f4   : > { %v10802_v16 = vpop.f32.mrf.mxu1  ;;  %v15210_v21 = vpop.f32.mrf.mxu0  ;;  %v8496_v17 = vrot.slane %v8494_v57, 2  ;;  %v8499_v9 = vrot.slane %v8497_v34, 3 }
 0x3f5   : > { %v15213_v56 = vadd.f32 %v15081_v6, %v10802_v16  ;;  %v8018_v6 = vsel %vm3246_vm1, %v8015_v46, %v8017_v63  ;;  %v8483_v46 = vsel %vm3999_vm5, %v8473_v45, %v8482_v2 }
 0x3f6   : > { %v5941_v42 = vpop.f32.mrf.mxu1  ;;  %v15217_v7 = vpop.f32.mrf.mxu0  ;;  %v8500_v34 = vor.u32 %v8499_v9, %v8496_v17  ;;  %v8023_v17 = vrot.slane %v14820_v37, 2  ;;  %v8025_v9 = vrot.slane %v14822_v22, 2 }
 0x3f7   : > { %v15220_v58 = vadd.f32 %v15091_v53, %v5941_v42  ;;  %v8474_v53 = vsel %vm3999_vm5, %v8464_v59, %v8473_v45  ;;  %v8019_v42 = vrot.slane %v14812_v10, 2  ;;  %v8503_v45 = vshrl.u32 %v14845_v39, 16 }
 0x3f8   : > { %v10805_v33 = vpop.f32.mrf.mxu1  ;;  %11056 = vmatmul.mubr.msk.bf16.gmra.mxu1 %vm4869_vm3, %v8016_v43  ;;  %v15225_v52 = vpop.f32.mrf.mxu0  ;;  %v8021_v43 = vrot.slane %v14814_v54, 2 }
 0x3f9   : > { %v15230_v20 = vadd.f32 %v15101_v29, %v10805_v33  ;;  %11059 = vmatprep.mubr.msk.bf16.mxu1 %vm4869_vm3, %v8018_v6  ;;  %v8491_v6 = vor.u32 %v8490_v1, %v8487_v55  ;;  %v8020_v54 = vsel %vm3246_vm1, %v8017_v63, %v8019_v42  ;;  %v8505_v1 = vrot.slane %v8503_v45, 2 }
 0x3fa   : > { %v5954_v51 = vpop.f32.mrf.mxu1  ;;  %v15234_v15 = vpop.f32.mrf.mxu0  ;;  %11112 = vmatmul.mubr.msk.bf16.gmra.mxu0 %vm4869_vm3, %v8474_v53  ;;  %v8022_v57 = vsel %vm3246_vm1, %v8019_v42, %v8021_v43 }
 0x3fb   : > { %v15239_v16 = vadd.f32 %v15112_v62, %v5954_v51  ;;  %11115 = vmatprep.mubr.msk.bf16.mxu0 %vm4869_vm3, %v8483_v46  ;;  %v8506_v62 = vshll.u32 %v14845_v39, 16  ;;  %v8492_v39 = vsel %vm3999_vm5, %v8482_v2, %v8491_v6  ;;  %v8501_v63 = vsel %vm3999_vm5, %v8491_v6, %v8500_v34 }
 0x3fc   : > { %v10806_v29 = vpop.f32.mrf.mxu1  ;;  %v15244_v59 = vpop.f32.mrf.mxu0 }
 0x3fd   : > { %v15247_v33 = vadd.f32 %v15128_v49, %v10806_v29 }
 0x3fe   : > { %v5957_v53 = vpop.f32.mrf.mxu1  ;;  %v15251_v51 = vpop.f32.mrf.mxu0 }
 0x3ff   : > { %v15254_v10 = vadd.f32 %v15143_v35, %v5957_v53  ;;  %v8508_v35 = vrot.slane %v8506_v62, 3 }
 0x400   : > { %v10809_v46 = vpop.f32.mrf.mxu1  ;;  %11060 = vmatmul.mubr.msk.bf16.gmra.mxu1 %vm4869_vm3, %v8020_v54  ;;  %v15259_v49 = vpop.f32.mrf.mxu0 }
 0x401   : > { %v15262_v55 = vadd.f32 %v15153_v8, %v10809_v46  ;;  %11063 = vmatprep.mubr.msk.bf16.mxu1 %vm4869_vm3, %v8022_v57  ;;  %v8509_v62 = vor.u32 %v8508_v35, %v8505_v1  ;;  %v8026_v57 = vsel %vm3246_vm1, %v8023_v17, %v8025_v9 }
 0x402   : > { %v5970_v29 = vpop.f32.mrf.mxu1  ;;  %v15266_v53 = vpop.f32.mrf.mxu0  ;;  %11116 = vmatmul.mubr.msk.bf16.gmra.mxu0 %vm4869_vm3, %v8492_v39 }
 0x403   : > { %v15271_v42 = vadd.f32 %v15163_v4, %v5970_v29  ;;  %11119 = vmatprep.mubr.msk.bf16.mxu0 %vm4869_vm3, %v8501_v63  ;;  %v8024_v4 = vsel %vm3246_vm1, %v8021_v43, %v8023_v17  ;;  %v8027_v43 = vrot.slane %v14824_v12, 2  ;;  %v8029_v63 = vrot.slane %v14831_v18, 2 }
 0x404   : > { %v10810_v8 = vpop.f32.mrf.mxu1  ;;  %v15276_v2 = vpop.f32.mrf.mxu0 }
 0x405   : > { %v15279_v45 = vadd.f32 %v15172_v48, %v10810_v8  ;;  %v8510_v48 = vsel %vm3999_vm5, %v8500_v34, %v8509_v62  ;;  %v8028_v62 = vsel %vm3246_vm1, %v8025_v9, %v8027_v43  ;;  %v8030_v12 = vsel %vm3246_vm1, %v8027_v43, %v8029_v63 }
 0x406   : > { %v5973_v54 = vpop.f32.mrf.mxu1  ;;  %v15281_v46 = vpop.f32.mrf.mxu0 }
 0x407   : > { %v15284_v6 = vadd.f32 %v15185_v61, %v5973_v54 }
 0x408   : > { %v10813_v37 = vpop.f32.mrf.mxu1  ;;  %11064 = vmatmul.mubr.msk.bf16.gmra.mxu1 %vm4869_vm3, %v8024_v4  ;;  %v15289_v22 = vpop.f32.mrf.mxu0 }
 0x409   : > { %v15292_v39 = vadd.f32 %v15200_v3, %v10813_v37  ;;  %11067 = vmatprep.mubr.msk.bf16.mxu1 %vm4869_vm3, %v8026_v57 }
 0x40a   : > { %v5986_v1 = vpop.f32.mrf.mxu1  ;;  %v15296_v35 = vpop.f32.mrf.mxu0  ;;  %11120 = vmatmul.mubr.msk.bf16.gmra.mxu0 %vm4869_vm3, %v8510_v48 }
 0x40b   : > { %v15300_v61 = vadd.f32 %v15210_v21, %v5986_v1 }
 0x40c   : > { %v10814_v29 = vpop.f32.mrf.mxu1  ;;  %v6899_v17 = vpop.f32.mrf.mxu0 }
 0x40d   : > { %v15305_v3 = vadd.f32 %v15217_v7, %v10814_v29 }
 0x40e   : > { %v5989_v8 = vpop.f32.mrf.mxu1  ;;  %v15307_v54 = vpop.f32.mrf.mxu0 }
 0x40f   : > { %v15310_v34 = vadd.f32 %v15225_v52, %v5989_v8  ;;  %v8031_v52 = vrot.slane %v14860_v0, 2  ;;  %v8033_v8 = vrot.slane %v14862_v19, 2 }
 0x410   : > { %v10869_v4 = vpop.f32.mrf.mxu1  ;;  %11068 = vmatmul.mubr.msk.bf16.gmra.mxu1 %vm4869_vm3, %v8028_v62  ;;  %v15315_v21 = vpop.f32.mrf.mxu0 }
 0x411   : > { %v6545_v18 = vadd.f32 %v10869_v4, %v14968_v50  ;;  %11071 = vmatprep.mubr.msk.bf16.mxu1 %vm4869_vm3, %v8030_v12  ;;  %v11345_v12 = vld [vmem:[#allocation3 + $0xa0] ss:$0 sps:$4 sm:$0x33]  }
 0x412   : > { %v6400_v7 = vpop.f32.mrf.mxu1  ;;  %v15319_v37 = vpop.f32.mrf.mxu0 }
 0x413   : > { %v6543_v57 = vadd.f32 %v6400_v7, %v14973_v23  ;;  %v15324_v9 = vadd.f32 %v15234_v15, %v6545_v18  ;;  %v8032_v23 = vsel %vm3246_vm1, %v8029_v63, %v8031_v52 }
 0x414   : > { %v10870_v48 = vpop.f32.mrf.mxu1  ;;  %v6915_v1 = vpop.f32.mrf.mxu0 }
 0x415   : > { %v6546_v43 = vadd.f32 %v10870_v48, %v14982_v30  ;;  %v15328_v29 = vadd.f32 %v15244_v59, %v6543_v57  ;;  %v8034_v30 = vsel %vm3246_vm1, %v8031_v52, %v8033_v8  ;;  %v8035_v57 = vrot.slane %v11345_v12, 2 }
 0x416   : > { %v6403_v50 = vpop.f32.mrf.mxu1  ;;  %v10926_v62 = vpop.f32.mrf.mxu0 }
 0x417   : > { %v6544_v4 = vadd.f32 %v6403_v50, %v14989_v5  ;;  %v15334_v0 = vadd.f32 %v15251_v51, %v6546_v43 }
 0x418   : > { %v10873_v15 = vpop.f32.mrf.mxu1  ;;  %11072 = vmatmul.mubr.msk.bf16.gmra.mxu1 %vm4869_vm3, %v8032_v23  ;;  %v6918_v18 = vpop.f32.mrf.mxu0 }
 0x419   : > { %v6549_v59 = vadd.f32 %v10873_v15, %v15021_v25  ;;  %11075 = vmatprep.mubr.msk.bf16.mxu1 %vm4869_vm3, %v8034_v30  ;;  %v15341_v19 = vadd.f32 %v15259_v49, %v6544_v4  ;;  %v8036_v4 = vsel %vm3246_vm1, %v8033_v8, %v8035_v57  ;;  %v16259_v30 = vld [vmem:[#allocation48_spill] sm:$0xff] }
 0x41a   : > { %v6416_v5 = vpop.f32.mrf.mxu1  ;;  %v10929_v7 = vpop.f32.mrf.mxu0 }
 0x41b   : > { %v6547_v63 = vadd.f32 %v6416_v5, %v15034_v36  ;;  %v15345_v51 = vadd.f32 %v15266_v53, %v6549_v59 }
 0x41c   : > { %v10874_v48 = vpop.f32.mrf.mxu1  ;;  %v6931_v43 = vpop.f32.mrf.mxu0 }
 0x41d   : > { %v6550_v52 = vadd.f32 %v10874_v48, %v15040_v28  ;;  %v15349_v50 = vadd.f32 %v15276_v2, %v6547_v63 }
 0x41e   : > { %v6419_v25 = vpop.f32.mrf.mxu1  ;;  %v10930_v23 = vpop.f32.mrf.mxu0 }
 0x41f   : > { %v6548_v49 = vadd.f32 %v6419_v25, %v15045_v24  ;;  %v15354_v15 = vadd.f32 %v15281_v46, %v6550_v52  ;;  %v16260_v52 = vld [vmem:[#allocation66_spill] sm:$0xff] }
 0x420   : > { %v10877_v36 = vpop.f32.mrf.mxu1  ;;  %11076 = vmatmul.mubr.msk.bf16.gmra.mxu1 %vm4869_vm3, %v8036_v4  ;;  %v6934_v53 = vpop.f32.mrf.mxu0  ;;  %v16261_v4 = vld [vmem:[#allocation44_spill] sm:$0xff] }
 0x421   : > { %v6553_v12 = vadd.f32 %v10877_v36, %v15058_v27  ;;  %11131 = vmatprep.mubr.msk.bf16.mxu1 %vm4869_vm3, %v16259_v30  ;;  %v15361_v28 = vadd.f32 %v15289_v22, %v6548_v49  ;;  %v16262_v36 = vld [vmem:[#allocation55_spill] sm:$0xff] }
 0x422   : > { %v6432_v2 = vpop.f32.mrf.mxu1  ;;  %v10933_v59 = vpop.f32.mrf.mxu0 }
 0x423   : > { %v6551_v24 = vadd.f32 %v6432_v2, %v15064_v13  ;;  %v15365_v8 = vadd.f32 %v15296_v35, %v6553_v12 }
 0x424   : > { %v10878_v46 = vpop.f32.mrf.mxu1  ;;  %v6947_v5 = vpop.f32.mrf.mxu0 }
 0x425   : > { %v6554_v63 = vadd.f32 %v10878_v46, %v15072_v26  ;;  %v15368_v57 = vadd.f32 %v6899_v17, %v6551_v24 }
 0x426   : > { %v6435_v27 = vpop.f32.mrf.mxu1  ;;  %v10934_v48 = vpop.f32.mrf.mxu0 }
 0x427   : > { %v6552_v25 = vadd.f32 %v6435_v27, %v16260_v52  ;;  %v15372_v22 = vadd.f32 %v15307_v54, %v6554_v63 }
 0x428   : > { %v10881_v49 = vpop.f32.mrf.mxu1  ;;  %11132 = vmatmul.mubr.msk.bf16.vlgmr.msra.gmra.mxu1 %vm4869_vm3, %v16261_v4  ;;  %v6950_v13 = vpop.f32.mrf.mxu0  ;;  %v16264_v4 = vld [vmem:[#allocation45_spill] sm:$0xff] }
 0x429   : > { %v6557_v35 = vadd.f32 %v10881_v49, %v15107_v14  ;;  %11135 = vmatprep.mubr.msk.bf16.mxu1 %vm4869_vm3, %v16262_v36  ;;  %v15380_v26 = vadd.f32 %v15315_v21, %v6552_v25  ;;  %v16263_v25 = vld [vmem:[#allocation58_spill] sm:$0xff] }
 0x42a   : > { %v6448_v17 = vpop.f32.mrf.mxu1  ;;  %v10937_v12 = vpop.f32.mrf.mxu0 }
 0x42b   : > { %v6555_v30 = vadd.f32 %v6448_v17, %v15116_v47  ;;  %v15384_v54 = vadd.f32 %v15319_v37, %v6557_v35 }
 0x42c   : > { %v10882_v2 = vpop.f32.mrf.mxu1  ;;  %v6963_v24 = vpop.f32.mrf.mxu0 }
 0x42d   : > { %v6558_v46 = vadd.f32 %v10882_v2, %v15121_v38  ;;  %v15387_v63 = vadd.f32 %v6915_v1, %v6555_v30 }
 0x42e   : > { %v6451_v14 = vpop.f32.mrf.mxu1  ;;  %v10938_v27 = vpop.f32.mrf.mxu0 }
 0x42f   : > { %v6556_v52 = vadd.f32 %v6451_v14, %v15134_v32  ;;  %v15390_v49 = vadd.f32 %v10926_v62, %v6558_v46 }
 0x430   : > { %v10885_v21 = vpop.f32.mrf.mxu1  ;;  %11136 = vmatmul.mubr.msk.bf16.gmra.mxu1 %vm4869_vm3, %v16263_v25  ;;  %v6966_v47 = vpop.f32.mrf.mxu0 }
 0x431   : > { %v6561_v37 = vadd.f32 %v10885_v21, %v15166_v40  ;;  %11139 = vmatprep.mubr.msk.bf16.mxu1 %vm4869_vm3, %v16264_v4  ;;  %v15397_v35 = vadd.f32 %v6918_v18, %v6556_v52  ;;  %v16265_v52 = vld [vmem:[#allocation47_spill] sm:$0xff] }
 0x432   : > { %v6464_v38 = vpop.f32.mrf.mxu1  ;;  %v10941_v1 = vpop.f32.mrf.mxu0 }
 0x433   : > { %v6559_v36 = vadd.f32 %v6464_v38, %v15175_v41  ;;  %v15400_v17 = vadd.f32 %v10929_v7, %v6561_v37  ;;  %v16266_v7 = vld [vmem:[#allocation59_spill] sm:$0xff] }
 0x434   : > { %v10886_v32 = vpop.f32.mrf.mxu1  ;;  %v6979_v62 = vpop.f32.mrf.mxu0 }
 0x435   : > { %v6562_v30 = vadd.f32 %v10886_v32, %v15181_v60  ;;  %v15403_v2 = vadd.f32 %v6931_v43, %v6559_v36 }
 0x436   : > { %v6467_v46 = vpop.f32.mrf.mxu1  ;;  %v10942_v14 = vpop.f32.mrf.mxu0 }
 0x437   : > { %v6560_v40 = vadd.f32 %v6467_v46, %v15190_v31  ;;  %v15406_v21 = vadd.f32 %v10930_v23, %v6562_v30 }
 0x438   : > { %v10889_v18 = vpop.f32.mrf.mxu1  ;;  %11140 = vmatmul.mubr.msk.bf16.gmra.mxu1 %vm4869_vm3, %v16265_v52  ;;  %v6982_v25 = vpop.f32.mrf.mxu0 }
 0x439   : > { %v6565_v41 = vadd.f32 %v10889_v18, %v15196_v11  ;;  %11143 = vmatprep.mubr.msk.bf16.mxu1 %vm4869_vm3, %v16266_v7  ;;  %v15413_v37 = vadd.f32 %v6934_v53, %v6560_v40  ;;  %v16267_v40 = vld [vmem:[#allocation49_spill] sm:$0xff] }
 0x43a   : > { %v6480_v60 = vpop.f32.mrf.mxu1  ;;  %v10945_v43 = vpop.f32.mrf.mxu0 }
 0x43b   : > { %v6563_v4 = vadd.f32 %v6480_v60, %v15205_v44  ;;  %v15416_v38 = vadd.f32 %v10933_v59, %v6565_v41  ;;  %v16268_v59 = vld [vmem:[#allocation50_spill] sm:$0xff] }
 0x43c   : > { %v10890_v31 = vpop.f32.mrf.mxu1  ;;  %v6995_v23 = vpop.f32.mrf.mxu0 }
 0x43d   : > { %v6566_v36 = vadd.f32 %v10890_v31, %v15213_v56  ;;  %v15419_v32 = vadd.f32 %v6947_v5, %v6563_v4 }
 0x43e   : > { %v6483_v30 = vpop.f32.mrf.mxu1  ;;  %v10946_v46 = vpop.f32.mrf.mxu0 }
 0x43f   : > { %v6564_v11 = vadd.f32 %v6483_v30, %v15220_v58  ;;  %v15422_v18 = vadd.f32 %v10934_v48, %v6566_v36 }
 0x440   : > { %v10893_v53 = vpop.f32.mrf.mxu1  ;;  %11144 = vmatmul.mubr.msk.bf16.gmra.mxu1 %vm4869_vm3, %v16267_v40  ;;  %v6998_v52 = vpop.f32.mrf.mxu0 }
 0x441   : > { %v6569_v44 = vadd.f32 %v10893_v53, %v15230_v20  ;;  %11147 = vmatprep.mubr.msk.bf16.mxu1 %vm4869_vm3, %v16268_v59  ;;  %v15429_v41 = vadd.f32 %v6950_v13, %v6564_v11  ;;  %v16269_v11 = vld [vmem:[#allocation52_spill] sm:$0xff] }
 0x442   : > { %v6496_v56 = vpop.f32.mrf.mxu1  ;;  %v11001_v5 = vpop.f32.mrf.mxu0 }
 0x443   : > { %v6567_v7 = vadd.f32 %v6496_v56, %v15239_v16  ;;  %v15432_v60 = vadd.f32 %v10937_v12, %v6569_v44  ;;  %v16270_v12 = vld [vmem:[#allocation54_spill] sm:$0xff] }
 0x444   : > { %v10894_v58 = vpop.f32.mrf.mxu1  ;;  %v7682_v48 = vpop.f32.mrf.mxu0 }
 0x445   : > { %v6570_v4 = vadd.f32 %v10894_v58, %v15247_v33  ;;  %v15435_v31 = vadd.f32 %v6963_v24, %v6567_v7 }
 0x446   : > { %v6499_v36 = vpop.f32.mrf.mxu1  ;;  %v11002_v30 = vpop.f32.mrf.mxu0 }
 0x447   : > { %v6568_v20 = vadd.f32 %v6499_v36, %v15254_v10  ;;  %v15438_v53 = vadd.f32 %v10938_v27, %v6570_v4 }
 0x448   : > { %v10897_v13 = vpop.f32.mrf.mxu1  ;;  %11148 = vmatmul.mubr.msk.bf16.gmra.mxu1 %vm4869_vm3, %v16269_v11  ;;  %v7685_v40 = vpop.f32.mrf.mxu0 }
 0x449   : > { %v6573_v16 = vadd.f32 %v10897_v13, %v15262_v55  ;;  %11151 = vmatprep.mubr.msk.bf16.mxu1 %vm4869_vm3, %v16270_v12  ;;  %v15445_v44 = vadd.f32 %v6966_v47, %v6568_v20  ;;  %v16271_v20 = vld [vmem:[#allocation57_spill] sm:$0xff] }
 0x44a   : > { %v6512_v33 = vpop.f32.mrf.mxu1  ;;  %v11005_v24 = vpop.f32.mrf.mxu0 }
 0x44b   : > { %v6571_v59 = vadd.f32 %v6512_v33, %v15271_v42  ;;  %v15448_v56 = vadd.f32 %v10941_v1, %v6573_v16  ;;  %v16272_v1 = vld [vmem:[#allocation61_spill] sm:$0xff] }
 0x44c   : > { %v10898_v10 = vpop.f32.mrf.mxu1  ;;  %v7698_v27 = vpop.f32.mrf.mxu0 }
 0x44d   : > { %v6574_v7 = vadd.f32 %v10898_v10, %v15279_v45  ;;  %v15451_v58 = vadd.f32 %v6979_v62, %v6571_v59 }
 0x44e   : > { %v6515_v4 = vpop.f32.mrf.mxu1  ;;  %v11006_v36 = vpop.f32.mrf.mxu0 }
 0x44f   : > { %v6572_v55 = vadd.f32 %v6515_v4, %v15284_v6  ;;  %v15454_v13 = vadd.f32 %v10942_v14, %v6574_v7 }
 0x450   : > { %v10901_v47 = vpop.f32.mrf.mxu1  ;;  %11152 = vmatmul.mubr.msk.bf16.gmra.mxu1 %vm4869_vm3, %v16271_v20  ;;  %v7701_v11 = vpop.f32.mrf.mxu0 }
 0x451   : > { %v6577_v42 = vadd.f32 %v10901_v47, %v15292_v39  ;;  %11155 = vmatprep.mubr.msk.bf16.mxu1 %vm4869_vm3, %v16272_v1  ;;  %v15461_v16 = vadd.f32 %v6982_v25, %v6572_v55  ;;  %v16273_v55 = vld [vmem:[#allocation62_spill] sm:$0xff] }
 0x452   : > { %v6528_v45 = vpop.f32.mrf.mxu1  ;;  %v11009_v62 = vpop.f32.mrf.mxu0 }
 0x453   : > { %v6575_v12 = vadd.f32 %v6528_v45, %v15300_v61  ;;  %v15464_v33 = vadd.f32 %v10945_v43, %v6577_v42  ;;  %v16274_v43 = vld [vmem:[#allocation73_spill] sm:$0xff] }
 0x454   : > { %v10902_v6 = vpop.f32.mrf.mxu1  ;;  %v7714_v14 = vpop.f32.mrf.mxu0 }
 0x455   : > { %v6578_v59 = vadd.f32 %v10902_v6, %v15305_v3  ;;  %v15467_v10 = vadd.f32 %v6995_v23, %v6575_v12 }
 0x456   : > { %v6531_v7 = vpop.f32.mrf.mxu1  ;;  %v11010_v4 = vpop.f32.mrf.mxu0 }
 0x457   : > { %v6576_v39 = vadd.f32 %v6531_v7, %v15310_v34  ;;  %v15470_v47 = vadd.f32 %v10946_v46, %v6578_v59 }
 0x458   : > { %v10957_v25 = vpop.f32.mrf.mxu1  ;;  %11156 = vmatmul.mubr.msk.bf16.gmra.mxu1 %vm4869_vm3, %v16273_v55  ;;  %v7717_v20 = vpop.f32.mrf.mxu0 }
 0x459   : > { %v7486_v61 = vadd.f32 %v10957_v25, %v15324_v9  ;;  %11159 = vmatprep.mubr.msk.bf16.mxu1 %vm4869_vm3, %v16274_v43  ;;  %v15477_v42 = vadd.f32 %v6998_v52, %v6576_v39  ;;  %v16275_v39 = vld [vmem:[#allocation63_spill] sm:$0xff] }
 0x45a   : > { %v7341_v3 = vpop.f32.mrf.mxu1  ;;  %v11013_v23 = vpop.f32.mrf.mxu0 }
 0x45b   : > { %v7484_v1 = vadd.f32 %v7341_v3, %v15328_v29  ;;  %v15480_v45 = vadd.f32 %v11001_v5, %v7486_v61  ;;  %v16276_v5 = vld [vmem:[#allocation64_spill] sm:$0xff] }
 0x45c   : > { %v10958_v34 = vpop.f32.mrf.mxu1  ;;  %v7730_v46 = vpop.f32.mrf.mxu0 }
 0x45d   : > { %v7487_v12 = vadd.f32 %v10958_v34, %v15334_v0  ;;  %v15483_v6 = vadd.f32 %v7682_v48, %v7484_v1 }
 0x45e   : > { %v7344_v59 = vpop.f32.mrf.mxu1  ;;  %v11014_v7 = vpop.f32.mrf.mxu0 }
 0x45f   : > { %v7485_v9 = vadd.f32 %v7344_v59, %v15341_v19  ;;  %v15486_v25 = vadd.f32 %v11002_v30, %v7487_v12 }
 0x460   : > { %v10961_v52 = vpop.f32.mrf.mxu1  ;;  %11160 = vmatmul.mubr.msk.bf16.gmra.mxu1 %vm4869_vm3, %v16275_v39  ;;  %v7733_v55 = vpop.f32.mrf.mxu0 }
 0x461   : > { %v7490_v29 = vadd.f32 %v10961_v52, %v15345_v51  ;;  %11163 = vmatprep.mubr.msk.bf16.mxu1 %vm4869_vm3, %v16276_v5  ;;  %v15493_v61 = vadd.f32 %v7685_v40, %v7485_v9  ;;  %v16277_v9 = vld [vmem:[#allocation65_spill] sm:$0xff] }
 0x462   : > { %v7357_v0 = vpop.f32.mrf.mxu1  ;;  %v11017_v48 = vpop.f32.mrf.mxu0 }
 0x463   : > { %v7488_v43 = vadd.f32 %v7357_v0, %v15349_v50  ;;  %v15496_v3 = vadd.f32 %v11005_v24, %v7490_v29 }
 0x464   : > { %v10962_v19 = vpop.f32.mrf.mxu1  ;;  %v7746_v30 = vpop.f32.mrf.mxu0 }
 0x465   : > { %v7491_v1 = vadd.f32 %v10962_v19, %v15354_v15  ;;  %v15499_v34 = vadd.f32 %v7698_v27, %v7488_v43 }
 0x466   : > { %v7360_v12 = vpop.f32.mrf.mxu1  ;;  %v11018_v59 = vpop.f32.mrf.mxu0 }
 0x467   : > { %v7489_v51 = vadd.f32 %v7360_v12, %v15361_v28  ;;  %v15502_v52 = vadd.f32 %v11006_v36, %v7491_v1 }
 0x468   : > { %v10965_v40 = vpop.f32.mrf.mxu1  ;;  %11164 = vmatmul.mubr.msk.bf16.gmra.mxu1 %vm4869_vm3, %v16277_v9  ;;  %v7749_v39 = vpop.f32.mrf.mxu0 }
 0x469   : > { %v7494_v50 = vadd.f32 %v10965_v40, %v15365_v8  ;;  %v15507_v24 = vadd.f32 %v7701_v11, %v7489_v51 }
 0x46a   : > { %v7373_v29 = vpop.f32.mrf.mxu1  ;;  %v11021_v5 = vpop.f32.mrf.mxu0 }
 0x46b   : > { %v7492_v15 = vadd.f32 %v7373_v29, %v15368_v57  ;;  %v15510_v27 = vadd.f32 %v11009_v62, %v7494_v50 }
 0x46c   : > { %v10966_v0 = vpop.f32.mrf.mxu1  ;;  %v7762_v43 = vpop.f32.mrf.mxu0 }
 0x46d   : > { %v7495_v28 = vadd.f32 %v10966_v0, %v15372_v22  ;;  %v15513_v36 = vadd.f32 %v7714_v14, %v7492_v15 }
 0x46e   : > { %v7376_v19 = vpop.f32.mrf.mxu1  ;;  %v11022_v1 = vpop.f32.mrf.mxu0 }
 0x46f   : > { %v7493_v12 = vadd.f32 %v7376_v19, %v15380_v26  ;;  %v15516_v9 = vadd.f32 %v11010_v4, %v7495_v28 }
 0x470   : > { %v10969_v8 = vpop.f32.mrf.mxu1  ;;  %v7765_v11 = vpop.f32.mrf.mxu0 }
 0x471   : > { %v7498_v51 = vadd.f32 %v10969_v8, %v15384_v54  ;;  %v15519_v40 = vadd.f32 %v7717_v20, %v7493_v12 }
 0x472   : > { %v7389_v57 = vpop.f32.mrf.mxu1  ;;  %v11025_v62 = vpop.f32.mrf.mxu0 }
 0x473   : > { %v7496_v50 = vadd.f32 %v7389_v57, %v15387_v63  ;;  %v15522_v29 = vadd.f32 %v11013_v23, %v7498_v51 }
 0x474   : > { %v10970_v22 = vpop.f32.mrf.mxu1  ;;  %v7778_v14 = vpop.f32.mrf.mxu0 }
 0x475   : > { %v7499_v15 = vadd.f32 %v10970_v22, %v15390_v49  ;;  %v15525_v0 = vadd.f32 %v7730_v46, %v7496_v50 }
 0x476   : > { %v7392_v26 = vpop.f32.mrf.mxu1  ;;  %v11026_v20 = vpop.f32.mrf.mxu0 }
 0x477   : > { %v7497_v4 = vadd.f32 %v7392_v26, %v15397_v35  ;;  %v15528_v28 = vadd.f32 %v11014_v7, %v7499_v15 }
 0x478   : > { %v10973_v54 = vpop.f32.mrf.mxu1  ;;  %v7781_v49 = vpop.f32.mrf.mxu0 }
 0x479   : > { %v7502_v19 = vadd.f32 %v10973_v54, %v15400_v17  ;;  %v15531_v12 = vadd.f32 %v7733_v55, %v7497_v4 }
 0x47a   : > { %v7405_v63 = vpop.f32.mrf.mxu1  ;;  %v11029_v17 = vpop.f32.mrf.mxu0 }
 0x47b   : > { %v7500_v23 = vadd.f32 %v7405_v63, %v15403_v2  ;;  %v15534_v8 = vadd.f32 %v11017_v48, %v7502_v19 }
 0x47c   : > { %v10974_v51 = vpop.f32.mrf.mxu1 }
 0x47d   : > { %v7503_v46 = vadd.f32 %v10974_v51, %v15406_v21  ;;  %v15537_v57 = vadd.f32 %v7746_v30, %v7500_v23  ;;  %v7794_v21 = vpop.f32.mrf.mxu0 }
 0x47e   : > { %v7408_v35 = vpop.f32.mrf.mxu1 }
 0x47f   : > { %v7501_v7 = vadd.f32 %v7408_v35, %v15413_v37  ;;  %v15540_v50 = vadd.f32 %v11018_v59, %v7503_v46 }
 0x480   : > { %v10977_v22 = vpop.f32.mrf.mxu1 }
 0x481   : > { %v7506_v55 = vadd.f32 %v10977_v22, %v15416_v38  ;;  %v15543_v15 = vadd.f32 %v7749_v39, %v7501_v7  ;;  %v11030_v38 = vpop.f32.mrf.mxu0 }
 0x482   : > { %v7421_v2 = vpop.f32.mrf.mxu1 }
 0x483   : > { %v7504_v48 = vadd.f32 %v7421_v2, %v15419_v32  ;;  %v15546_v26 = vadd.f32 %v11021_v5, %v7506_v55 }
 0x484   : > { %v10978_v4 = vpop.f32.mrf.mxu1 }
 0x485   : > { %v7507_v30 = vadd.f32 %v10978_v4, %v15422_v18  ;;  %v15549_v54 = vadd.f32 %v7762_v43, %v7504_v48  ;;  %v7797_v18 = vpop.f32.mrf.mxu0 }
 0x486   : > { %v7424_v37 = vpop.f32.mrf.mxu1 }
 0x487   : > { %v7505_v59 = vadd.f32 %v7424_v37, %v15429_v41  ;;  %v15552_v19 = vadd.f32 %v11022_v1, %v7507_v30 }
 0x488   : > { %v10981_v63 = vpop.f32.mrf.mxu1 }
 0x489   : > { %v7510_v39 = vadd.f32 %v10981_v63, %v15432_v60  ;;  %v15555_v23 = vadd.f32 %v7765_v11, %v7505_v59  ;;  %v11033_v60 = vpop.f32.mrf.mxu0 }
 0x48a   : > { %v7437_v32 = vpop.f32.mrf.mxu1 }
 0x48b   : > { %v7508_v5 = vadd.f32 %v7437_v32, %v15435_v31  ;;  %v15558_v51 = vadd.f32 %v11025_v62, %v7510_v39  ;;  %v7810_v48 = vpop.f32.mrf.mxu0 }
 0x48c   : > { %v10982_v46 = vpop.f32.mrf.mxu1 }
 0x48d   : > { %v7511_v43 = vadd.f32 %v10982_v46, %v15438_v53  ;;  %v15561_v35 = vadd.f32 %v7778_v14, %v7508_v5  ;;  %v11034_v37 = vpop.f32.mrf.mxu0 }
 0x48e   : > { %v7440_v41 = vpop.f32.mrf.mxu1 }
 0x48f   : > { %v7509_v1 = vadd.f32 %v7440_v41, %v15445_v44  ;;  %v15564_v7 = vadd.f32 %v11026_v20, %v7511_v43  ;;  %v7813_v39 = vpop.f32.mrf.mxu0 }
 0x490   : > { %v10985_v22 = vpop.f32.mrf.mxu1 }
 0x491   : > { %v7514_v11 = vadd.f32 %v10985_v22, %v15448_v56  ;;  %v15567_v55 = vadd.f32 %v7781_v49, %v7509_v1  ;;  %v15590_v46 = vpop.f32.mrf.mxu0 }
 0x492   : > { %v7453_v31 = vpop.f32.mrf.mxu1 }
 0x493   : > { %v7512_v62 = vadd.f32 %v7453_v31, %v15451_v58  ;;  %v15570_v2 = vadd.f32 %v11029_v17, %v7514_v11 }
 0x494   : > { %v10986_v53 = vpop.f32.mrf.mxu1 }
 0x495   : > { %v7515_v14 = vadd.f32 %v10986_v53, %v15454_v13  ;;  %v15573_v4 = vadd.f32 %v7794_v21, %v7512_v62 }
 0x496   : > { %v7456_v44 = vpop.f32.mrf.mxu1 }
 0x497   : > { %v7513_v20 = vadd.f32 %v7456_v44, %v15461_v16  ;;  %v15576_v30 = vadd.f32 %v11030_v38, %v7515_v14 }
 0x498   : > { %v10989_v56 = vpop.f32.mrf.mxu1 }
 0x499   : > { %v7518_v49 = vadd.f32 %v10989_v56, %v15464_v33  ;;  %v15579_v59 = vadd.f32 %v7797_v18, %v7513_v20 }
 0x49a   : > { %v7469_v58 = vpop.f32.mrf.mxu1 }
 0x49b   : > { %v7516_v17 = vadd.f32 %v7469_v58, %v15467_v10  ;;  %v15582_v63 = vadd.f32 %v11033_v60, %v7518_v49 }
 0x49c   : > { %v10990_v13 = vpop.f32.mrf.mxu1 }
 0x49d   : > { %v7519_v21 = vadd.f32 %v10990_v13, %v15470_v47  ;;  %v15585_v32 = vadd.f32 %v7810_v48, %v7516_v17  ;;  %v15600_v47 = vpop.f32.mrf.mxu0 }
 0x49e   : > { %v7472_v16 = vpop.f32.mrf.mxu1 }
 0x49f   : > { %v7517_v38 = vadd.f32 %v7472_v16, %v15477_v42  ;;  %v15588_v5 = vadd.f32 %v11034_v37, %v7519_v21  ;;  %v15608_v11 = vpop.f32.mrf.mxu0 }
 0x4a0   : > { %v11045_v33 = vpop.f32.mrf.mxu1 }
 0x4a1   : > { %v15593_v18 = vadd.f32 %v11045_v33, %v15480_v45  ;;  %v15595_v10 = vadd.f32 %v7813_v39, %v7517_v38  ;;  %v15616_v48 = vpop.f32.mrf.mxu0 }
 0x4a2   : > { %v8149_v43 = vpop.f32.mrf.mxu1 }
 0x4a3   : > { %v15598_v41 = vadd.f32 %v8149_v43, %v15483_v6  ;;  %v15624_v44 = vpop.f32.mrf.mxu0 }
 0x4a4   : > { %v11046_v1 = vpop.f32.mrf.mxu1 }
 0x4a5   : > { %v15603_v22 = vadd.f32 %v11046_v1, %v15486_v25  ;;  %v15632_v56 = vpop.f32.mrf.mxu0 }
 0x4a6   : > { %v8152_v42 = vpop.f32.mrf.mxu1 }
 0x4a7   : > { %v15606_v60 = vadd.f32 %v8152_v42, %v15493_v61  ;;  %v15640_v17 = vpop.f32.mrf.mxu0 }
 0x4a8   : > { %v11049_v45 = vpop.f32.mrf.mxu1 }
 0x4a9   : > { %v15611_v31 = vadd.f32 %v11049_v45, %v15496_v3  ;;  %v15648_v21 = vpop.f32.mrf.mxu0 }
 0x4aa   : > { %v8165_v62 = vpop.f32.mrf.mxu1 }
 0x4ab   : > { %v15614_v6 = vadd.f32 %v8165_v62, %v15499_v34  ;;  %v15656_v33 = vpop.f32.mrf.mxu0 }
 0x4ac   : > { %v11050_v53 = vpop.f32.mrf.mxu1 }
 0x4ad   : > { %v15619_v25 = vadd.f32 %v11050_v53, %v15502_v52  ;;  %v15664_v42 = vpop.f32.mrf.mxu0 }
 0x4ae   : > { %v8168_v14 = vpop.f32.mrf.mxu1 }
 0x4af   : > { %v15622_v61 = vadd.f32 %v8168_v14, %v15507_v24  ;;  %v15672_v53 = vpop.f32.mrf.mxu0 }
 0x4b0   : > { %v11053_v20 = vpop.f32.mrf.mxu1 }
 0x4b1   : > { %v15627_v3 = vadd.f32 %v11053_v20, %v15510_v27 }
 0x4b2   : > { %v8181_v37 = vpop.f32.mrf.mxu1 }
 0x4b3   : > { %v15630_v34 = vadd.f32 %v8181_v37, %v15513_v36  ;;  %v15680_v37 = vpop.f32.mrf.mxu0 }
 0x4b4   : > { %v11054_v49 = vpop.f32.mrf.mxu1 }
 0x4b5   : > { %v15635_v52 = vadd.f32 %v11054_v49, %v15516_v9 }
 0x4b6   : > { %v8184_v58 = vpop.f32.mrf.mxu1 }
 0x4b7   : > { %v15638_v24 = vadd.f32 %v8184_v58, %v15519_v40 }
 0x4b8   : > { %v11057_v39 = vpop.f32.mrf.mxu1 }
 0x4b9   : > { %v15643_v27 = vadd.f32 %v11057_v39, %v15522_v29  ;;  %v15688_v39 = vpop.f32.mrf.mxu0 }
 0x4ba   : > { %v8197_v13 = vpop.f32.mrf.mxu1 }
 0x4bb   : > { %v15646_v36 = vadd.f32 %v8197_v13, %v15525_v0 }
 0x4bc   : > { %v11058_v16 = vpop.f32.mrf.mxu1 }
 0x4bd   : > { %v15651_v9 = vadd.f32 %v11058_v16, %v15528_v28 }
 0x4be   : > { %v8200_v38 = vpop.f32.mrf.mxu1 }
 0x4bf   : > { %v15654_v40 = vadd.f32 %v8200_v38, %v15531_v12  ;;  %v15696_v38 = vpop.f32.mrf.mxu0 }
 0x4c0   : > { %v11061_v43 = vpop.f32.mrf.mxu1 }
 0x4c1   : > { %v15659_v29 = vadd.f32 %v11061_v43, %v15534_v8 }
 0x4c2   : > { %v8213_v1 = vpop.f32.mrf.mxu1 }
 0x4c3   : > { %v15662_v0 = vadd.f32 %v8213_v1, %v15537_v57 }
 0x4c4   : > { %v11062_v45 = vpop.f32.mrf.mxu1 }
 0x4c5   : > { %v15667_v28 = vadd.f32 %v11062_v45, %v15540_v50  ;;  %v15704_v45 = vpop.f32.mrf.mxu0 }
 0x4c6   : > { %v8216_v62 = vpop.f32.mrf.mxu1 }
 0x4c7   : > { %v15670_v12 = vadd.f32 %v8216_v62, %v15543_v15 }
 0x4c8   : > { %v11065_v14 = vpop.f32.mrf.mxu1 }
 0x4c9   : > { %v15675_v8 = vadd.f32 %v11065_v14, %v15546_v26 }
 0x4ca   : > { %v8229_v20 = vpop.f32.mrf.mxu1 }
 0x4cb   : > { %v15678_v57 = vadd.f32 %v8229_v20, %v15549_v54  ;;  %v15712_v20 = vpop.f32.mrf.mxu0 }
 0x4cc   : > { %v11066_v49 = vpop.f32.mrf.mxu1 }
 0x4cd   : > { %v15683_v50 = vadd.f32 %v11066_v49, %v15552_v19 }
 0x4ce   : > { %v8232_v58 = vpop.f32.mrf.mxu1 }
 0x4cf   : > { %v15686_v15 = vadd.f32 %v8232_v58, %v15555_v23 }
 0x4d0   : > { %v11069_v13 = vpop.f32.mrf.mxu1 }
 0x4d1   : > { %v15691_v26 = vadd.f32 %v11069_v13, %v15558_v51  ;;  %v15720_v13 = vpop.f32.mrf.mxu0 }
 0x4d2   : > { %v8245_v16 = vpop.f32.mrf.mxu1 }
 0x4d3   : > { %v15694_v54 = vadd.f32 %v8245_v16, %v15561_v35 }
 0x4d4   : > { %v11070_v43 = vpop.f32.mrf.mxu1 }
 0x4d5   : > { %v15699_v19 = vadd.f32 %v11070_v43, %v15564_v7 }
 0x4d6   : > { %v8248_v1 = vpop.f32.mrf.mxu1 }
 0x4d7   : > { %v15702_v23 = vadd.f32 %v8248_v1, %v15567_v55  ;;  %v15728_v1 = vpop.f32.mrf.mxu0 }
 0x4d8   : > { %v11073_v62 = vpop.f32.mrf.mxu1 }
 0x4d9   : > { %v15707_v51 = vadd.f32 %v11073_v62, %v15570_v2 }
 0x4da   : > { %v8261_v14 = vpop.f32.mrf.mxu1 }
 0x4db   : > { %v15710_v35 = vadd.f32 %v8261_v14, %v15573_v4 }
 0x4dc   : > { %v11074_v49 = vpop.f32.mrf.mxu1 }
 0x4dd   : > { %v15715_v7 = vadd.f32 %v11074_v49, %v15576_v30  ;;  %v8768_v49 = vadd.f32 %v15590_v46, %v15593_v18 }
 0x4de   : > { %v8264_v58 = vpop.f32.mrf.mxu1 }
 0x4df   : > { %v15718_v55 = vadd.f32 %v8264_v58, %v15579_v59 }
 0x4e0   : > { %v11077_v16 = vpop.f32.mrf.mxu1 }
 0x4e1   : > { %v15723_v2 = vadd.f32 %v11077_v16, %v15582_v63  ;;  %v15738_v63 = vpop.f32.mrf.mxu0 }
 0x4e2   : > { %v8277_v43 = vpop.f32.mrf.mxu1 }
 0x4e3   : > { %v15726_v4 = vadd.f32 %v8277_v43, %v15585_v32  ;;  %v15743_v32 = vld [vmem:[%s15946_s7] ss:$0 sm:$0xff]  ;;  %v15750_v46 = vpop.f32.mrf.mxu0 }
 0x4e4   : > { %v11078_v62 = vpop.f32.mrf.mxu1 }
 0x4e5   : > { %v15731_v30 = vadd.f32 %v11078_v62, %v15588_v5  ;;  %v8766_v5 = vadd.f32 %v15600_v47, %v15598_v41 }
 0x4e6   : > { %v8280_v14 = vpop.f32.mrf.mxu1 }
 0x4e7   : > { %v15734_v59 = vadd.f32 %v8280_v14, %v15595_v10  ;;  %v8769_v14 = vadd.f32 %v15608_v11, %v15603_v22 }
 0x4e8   : > { %v11133_v58 = vpop.f32.mrf.mxu1 }
 0x4e9   : > { %16278 = vst [vmem:[#allocation76_spill] sm:$0xff] %v15734_v59  ;;  %v9109_v16 = vadd.f32 %v11133_v58, %v8768_v49  ;;  %v8767_v58 = vadd.f32 %v15616_v48, %v15606_v60  ;;  %v15766_v59 = vpop.f32.mrf.mxu0  ;;  %v8770_v48 = vadd.f32 %v15632_v56, %v15614_v6  ;;  %v8771_v56 = vadd.f32 %v15648_v21, %v15622_v61 }
 0x4ea   : > { %v8964_v43 = vpop.f32.mrf.mxu1  ;;  %v8774_v21 = vadd.f32 %v15664_v42, %v15630_v34  ;;  %v8775_v42 = vadd.f32 %v15680_v37, %v15638_v24  ;;  %v8778_v37 = vadd.f32 %v15696_v38, %v15646_v36  ;;  %v8779_v38 = vadd.f32 %v15712_v20, %v15654_v40 }
 0x4eb   : > { %v9152_v62 = vadd.f32 %v15743_v32, %v9109_v16  ;;  %v9107_v10 = vadd.f32 %v8964_v43, %v8766_v5  ;;  %v8772_v43 = vadd.f32 %v15624_v44, %v15611_v31  ;;  %v8782_v20 = vadd.f32 %v15728_v1, %v15662_v0 }
 0x4ec   : > { %v11134_v18 = vpop.f32.mrf.mxu1  ;;  %v8783_v0 = vadd.f32 %v15750_v46, %v15670_v12 }
 0x4ed   : > { %v9188_v49 = vmax.f32 %v9152_v62, 0.0  ;;  %v9150_v41 = vadd.f32 %v15743_v32, %v9107_v10  ;;  %v9110_v47 = vadd.f32 %v11134_v18, %v8769_v14 }
 0x4ee   : > { %v8967_v16 = vpop.f32.mrf.mxu1 }
 0x4ef   : > { %9224 = vst.msk [vmem:[%s15756_s26 + $0x10] sm:$0xff] %vm4869_vm3, %v9188_v49  ;;  %v9186_v22 = vmax.f32 %v9150_v41, 0.0  ;;  %v9153_v11 = vadd.f32 %v15743_v32, %v9110_v47  ;;  %v9108_v5 = vadd.f32 %v8967_v16, %v8767_v58  ;;  %v8773_v41 = vadd.f32 %v15640_v17, %v15619_v25  ;;  %v15778_v47 = vpop.f32.mrf.mxu0 }
 0x4f0   : > { %v11137_v62 = vpop.f32.mrf.mxu1  ;;  %v8786_v12 = vadd.f32 %v15778_v47, %v15678_v57 }
 0x4f1   : > { %9222 = vst.msk [vmem:[%s15756_s26] sm:$0xff] %vm4869_vm3, %v9186_v22  ;;  %v9189_v10 = vmax.f32 %v9153_v11, 0.0  ;;  %v9151_v14 = vadd.f32 %v15743_v32, %v9108_v5  ;;  %v9113_v60 = vadd.f32 %v11137_v62, %v8772_v43  ;;  %v8776_v43 = vadd.f32 %v15656_v33, %v15627_v3  ;;  %v15790_v62 = vpop.f32.mrf.mxu0 }
 0x4f2   : > { %v8980_v18 = vpop.f32.mrf.mxu1 }
 0x4f3   : > { %9225 = vst.msk [vmem:[%s15756_s26 + $0x18] sm:$0xff] %vm4869_vm3, %v9189_v10  ;;  %v9187_v49 = vmax.f32 %v9151_v14, 0.0  ;;  %v9156_v31 = vadd.f32 %v15743_v32, %v9113_v60  ;;  %v9111_v44 = vadd.f32 %v8980_v18, %v8770_v48 }
 0x4f4   : > { %v11138_v58 = vpop.f32.mrf.mxu1 }
 0x4f5   : > { %9223 = vst.msk [vmem:[%s15756_s26 + $0x8] sm:$0xff] %vm4869_vm3, %v9187_v49  ;;  %v9192_v16 = vmax.f32 %v9156_v31, 0.0  ;;  %v9154_v22 = vadd.f32 %v15743_v32, %v9111_v44  ;;  %v9114_v6 = vadd.f32 %v11138_v58, %v8773_v41  ;;  %v8777_v49 = vadd.f32 %v15672_v53, %v15635_v52  ;;  %v15802_v31 = vpop.f32.mrf.mxu0 }
 0x4f6   : > { %v8983_v11 = vpop.f32.mrf.mxu1  ;;  %v8787_v57 = vadd.f32 %v15802_v31, %v15686_v15 }
 0x4f7   : > { %9228 = vst.msk [vmem:[%s15756_s26 + $0x30] sm:$0xff] %vm4869_vm3, %v9192_v16  ;;  %v9190_v5 = vmax.f32 %v9154_v22, 0.0  ;;  %v9157_v25 = vadd.f32 %v15743_v32, %v9114_v6  ;;  %v9112_v17 = vadd.f32 %v8983_v11, %v8771_v56  ;;  %v8780_v6 = vadd.f32 %v15688_v39, %v15643_v27  ;;  %v15814_v56 = vpop.f32.mrf.mxu0 }
 0x4f8   : > { %v11141_v10 = vpop.f32.mrf.mxu1 }
 0x4f9   : > { %9226 = vst.msk [vmem:[%s15756_s26 + $0x20] sm:$0xff] %vm4869_vm3, %v9190_v5  ;;  %v9193_v14 = vmax.f32 %v9157_v25, 0.0  ;;  %v9155_v60 = vadd.f32 %v15743_v32, %v9112_v17  ;;  %v9117_v61 = vadd.f32 %v11141_v10, %v8776_v43  ;;  %v8781_v10 = vadd.f32 %v15704_v45, %v15651_v9 }
 0x4fa   : > { %v8996_v48 = vpop.f32.mrf.mxu1 }
 0x4fb   : > { %9229 = vst.msk [vmem:[%s15756_s26 + $0x38] sm:$0xff] %vm4869_vm3, %v9193_v14  ;;  %v9191_v18 = vmax.f32 %v9155_v60, 0.0  ;;  %v9160_v3 = vadd.f32 %v15743_v32, %v9117_v61  ;;  %v9115_v33 = vadd.f32 %v8996_v48, %v8774_v21  ;;  %v15826_v14 = vpop.f32.mrf.mxu0 }
 0x4fc   : > { %v11142_v44 = vpop.f32.mrf.mxu1  ;;  %v8790_v15 = vadd.f32 %v15826_v14, %v15694_v54 }
 0x4fd   : > { %9227 = vst.msk [vmem:[%s15756_s26 + $0x28] sm:$0xff] %vm4869_vm3, %v9191_v18  ;;  %v9196_v41 = vmax.f32 %v9160_v3, 0.0  ;;  %v9158_v58 = vadd.f32 %v15743_v32, %v9115_v33  ;;  %v9118_v34 = vadd.f32 %v11142_v44, %v8777_v49  ;;  %v8784_v3 = vadd.f32 %v15720_v13, %v15659_v29  ;;  %v15838_v33 = vpop.f32.mrf.mxu0 }
 0x4fe   : > { %v8999_v16 = vpop.f32.mrf.mxu1 }
 0x4ff   : > { %9232 = vst.msk [vmem:[%s15756_s26 + $0x50] sm:$0xff] %vm4869_vm3, %v9196_v41  ;;  %v9194_v22 = vmax.f32 %v9158_v58, 0.0  ;;  %v9161_v52 = vadd.f32 %v15743_v32, %v9118_v34  ;;  %v9116_v53 = vadd.f32 %v8999_v16, %v8775_v42  ;;  %v8785_v42 = vadd.f32 %v15738_v63, %v15667_v28  ;;  %v8722_v16 = vpop.f32.mrf.mxu0 }
 0x500   : > { %v11145_v11 = vpop.f32.mrf.mxu1  ;;  %v8788_v63 = vadd.f32 %v15766_v59, %v15675_v8  ;;  %v8789_v59 = vadd.f32 %v15790_v62, %v15683_v50  ;;  %v8792_v62 = vadd.f32 %v15814_v56, %v15691_v26  ;;  %v8793_v56 = vadd.f32 %v15838_v33, %v15699_v19 }
 0x501   : > { %9230 = vst.msk [vmem:[%s15756_s26 + $0x40] sm:$0xff] %vm4869_vm3, %v9194_v22  ;;  %v9197_v5 = vmax.f32 %v9161_v52, 0.0  ;;  %v9159_v25 = vadd.f32 %v15743_v32, %v9116_v53  ;;  %v9121_v24 = vadd.f32 %v11145_v11, %v8780_v6  ;;  %v8791_v54 = vadd.f32 %v8722_v16, %v15702_v23 }
 0x502   : > { %v9012_v17 = vpop.f32.mrf.mxu1 }
 0x503   : > { %9233 = vst.msk [vmem:[%s15756_s26 + $0x58] sm:$0xff] %vm4869_vm3, %v9197_v5  ;;  %v9195_v43 = vmax.f32 %v9159_v25, 0.0  ;;  %v9164_v27 = vadd.f32 %v15743_v32, %v9121_v24  ;;  %v9119_v39 = vadd.f32 %v9012_v17, %v8778_v37  ;;  %v11117_v25 = vpop.f32.mrf.mxu0 }
 0x504   : > { %v11146_v60 = vpop.f32.mrf.mxu1  ;;  %v8796_v19 = vadd.f32 %v11117_v25, %v15707_v51 }
 0x505   : > { %9231 = vst.msk [vmem:[%s15756_s26 + $0x48] sm:$0xff] %vm4869_vm3, %v9195_v43  ;;  %v9200_v61 = vmax.f32 %v9164_v27, 0.0  ;;  %v9162_v21 = vadd.f32 %v15743_v32, %v9119_v39  ;;  %v9122_v36 = vadd.f32 %v11146_v60, %v8781_v10  ;;  %v8735_v10 = vpop.f32.mrf.mxu0 }
 0x506   : > { %v9015_v48 = vpop.f32.mrf.mxu1  ;;  %v8794_v23 = vadd.f32 %v8735_v10, %v15710_v35 }
 0x507   : > { %9236 = vst.msk [vmem:[%s15756_s26 + $0x70] sm:$0xff] %vm4869_vm3, %v9200_v61  ;;  %v9198_v18 = vmax.f32 %v9162_v21, 0.0  ;;  %v9165_v9 = vadd.f32 %v15743_v32, %v9122_v36  ;;  %v9120_v45 = vadd.f32 %v9015_v48, %v8779_v38 }
 0x508   : > { %v11149_v49 = vpop.f32.mrf.mxu1 }
 0x509   : > { %9234 = vst.msk [vmem:[%s15756_s26 + $0x60] sm:$0xff] %vm4869_vm3, %v9198_v18  ;;  %v9201_v44 = vmax.f32 %v9165_v9, 0.0  ;;  %v9163_v41 = vadd.f32 %v15743_v32, %v9120_v45  ;;  %v9125_v40 = vadd.f32 %v11149_v49, %v8784_v3  ;;  %v11118_v18 = vpop.f32.mrf.mxu0 }
 0x50a   : > { %v9028_v58 = vpop.f32.mrf.mxu1  ;;  %v8797_v51 = vadd.f32 %v11118_v18, %v15715_v7 }
 0x50b   : > { %9237 = vst.msk [vmem:[%s15756_s26 + $0x78] sm:$0xff] %vm4869_vm3, %v9201_v44  ;;  %v9199_v34 = vmax.f32 %v9163_v41, 0.0  ;;  %v9168_v29 = vadd.f32 %v15743_v32, %v9125_v40  ;;  %v9123_v13 = vadd.f32 %v9028_v58, %v8782_v20  ;;  %v8738_v40 = vpop.f32.mrf.mxu0 }
 0x50c   : > { %v11150_v22 = vpop.f32.mrf.mxu1  ;;  %v8795_v35 = vadd.f32 %v8738_v40, %v15718_v55 }
 0x50d   : > { %9235 = vst.msk [vmem:[%s15756_s26 + $0x68] sm:$0xff] %vm4869_vm3, %v9199_v34  ;;  %v9204_v52 = vmax.f32 %v9168_v29, 0.0  ;;  %v9166_v53 = vadd.f32 %v15743_v32, %v9123_v13  ;;  %v9126_v6 = vadd.f32 %v11150_v22, %v8785_v42  ;;  %v11121_v33 = vpop.f32.mrf.mxu0 }
 0x50e   : > { %v9031_v1 = vpop.f32.mrf.mxu1  ;;  %v8800_v7 = vadd.f32 %v11121_v33, %v15723_v2 }
 0x50f   : > { %9240 = vst.msk [vmem:[%s15756_s26 + $0x90] sm:$0xff] %vm4869_vm3, %v9204_v52  ;;  %v9202_v11 = vmax.f32 %v9166_v53, 0.0  ;;  %v9169_v5 = vadd.f32 %v15743_v32, %v9126_v6  ;;  %v9124_v28 = vadd.f32 %v9031_v1, %v8783_v0 }
 0x510   : > { %v11153_v24 = vpop.f32.mrf.mxu1 }
 0x511   : > { %9238 = vst.msk [vmem:[%s15756_s26 + $0x80] sm:$0xff] %vm4869_vm3, %v9202_v11  ;;  %v9205_v37 = vmax.f32 %v9169_v5, 0.0  ;;  %v9167_v17 = vadd.f32 %v15743_v32, %v9124_v28  ;;  %v9129_v43 = vadd.f32 %v11153_v24, %v8788_v63  ;;  %v8751_v28 = vpop.f32.mrf.mxu0 }
 0x512   : > { %v9044_v46 = vpop.f32.mrf.mxu1  ;;  %v8798_v55 = vadd.f32 %v8751_v28, %v15726_v4 }
 0x513   : > { %9241 = vst.msk [vmem:[%s15756_s26 + $0x98] sm:$0xff] %vm4869_vm3, %v9205_v37  ;;  %v9203_v27 = vmax.f32 %v9167_v17, 0.0  ;;  %v9172_v39 = vadd.f32 %v15743_v32, %v9129_v43  ;;  %v9127_v8 = vadd.f32 %v9044_v46, %v8786_v12 }
 0x514   : > { %v11154_v60 = vpop.f32.mrf.mxu1 }
 0x515   : > { %9239 = vst.msk [vmem:[%s15756_s26 + $0x88] sm:$0xff] %vm4869_vm3, %v9203_v27  ;;  %v9208_v61 = vmax.f32 %v9172_v39, 0.0  ;;  %v9170_v21 = vadd.f32 %v15743_v32, %v9127_v8  ;;  %v9130_v36 = vadd.f32 %v11154_v60, %v8789_v59  ;;  %v11122_v27 = vpop.f32.mrf.mxu0 }
 0x516   : > { %v9047_v47 = vpop.f32.mrf.mxu1 }
 0x517   : > { %9244 = vst.msk [vmem:[%s15756_s26 + $0xb0] sm:$0xff] %vm4869_vm3, %v9208_v61  ;;  %v9206_v38 = vmax.f32 %v9170_v21, 0.0  ;;  %v9173_v48 = vadd.f32 %v15743_v32, %v9130_v36  ;;  %v9128_v50 = vadd.f32 %v9047_v47, %v8787_v57  ;;  %v8801_v36 = vadd.f32 %v11122_v27, %v15731_v30  ;;  %v8754_v57 = vpop.f32.mrf.mxu0 }
 0x518   : > { %v11157_v9 = vpop.f32.mrf.mxu1 }
 0x519   : > { %9242 = vst.msk [vmem:[%s15756_s26 + $0xa0] sm:$0xff] %vm4869_vm3, %v9206_v38  ;;  %v9209_v45 = vmax.f32 %v9173_v48, 0.0  ;;  %v9171_v3 = vadd.f32 %v15743_v32, %v9128_v50  ;;  %v9133_v49 = vadd.f32 %v11157_v9, %v8792_v62  ;;  %v16279_v50 = vld [vmem:[#allocation76_spill] sm:$0xff] }
 0x51a   : > { %v9060_v31 = vpop.f32.mrf.mxu1  ;;  %v8799_v62 = vadd.f32 %v8754_v57, %v16279_v50 }
 0x51b   : > { %9245 = vst.msk [vmem:[%s15756_s26 + $0xb8] sm:$0xff] %vm4869_vm3, %v9209_v45  ;;  %v9207_v44 = vmax.f32 %v9171_v3, 0.0  ;;  %v9176_v41 = vadd.f32 %v15743_v32, %v9133_v49  ;;  %v9131_v26 = vadd.f32 %v9060_v31, %v8790_v15 }
 0x51c   : > { %v11158_v20 = vpop.f32.mrf.mxu1 }
 0x51d   : > { %9243 = vst.msk [vmem:[%s15756_s26 + $0xa8] sm:$0xff] %vm4869_vm3, %v9207_v44  ;;  %v9212_v58 = vmax.f32 %v9176_v41, 0.0  ;;  %v9174_v34 = vadd.f32 %v15743_v32, %v9131_v26  ;;  %v9134_v29 = vadd.f32 %v11158_v20, %v8793_v56 }
 0x51e   : > { %v9063_v14 = vpop.f32.mrf.mxu1 }
 0x51f   : > { %9248 = vst.msk [vmem:[%s15756_s26 + $0xd0] sm:$0xff] %vm4869_vm3, %v9212_v58  ;;  %v9210_v13 = vmax.f32 %v9174_v34, 0.0  ;;  %v9177_v42 = vadd.f32 %v15743_v32, %v9134_v29  ;;  %v9132_v22 = vadd.f32 %v9063_v14, %v8791_v54 }
 0x520   : > { %v11161_v52 = vpop.f32.mrf.mxu1 }
 0x521   : > { %9246 = vst.msk [vmem:[%s15756_s26 + $0xc0] sm:$0xff] %vm4869_vm3, %v9210_v13  ;;  %v9213_v53 = vmax.f32 %v9177_v42, 0.0  ;;  %v9175_v6 = vadd.f32 %v15743_v32, %v9132_v22  ;;  %v9137_v0 = vadd.f32 %v11161_v52, %v8796_v19 }
 0x522   : > { %v9076_v16 = vpop.f32.mrf.mxu1 }
 0x523   : > { %9249 = vst.msk [vmem:[%s15756_s26 + $0xd8] sm:$0xff] %vm4869_vm3, %v9213_v53  ;;  %v9211_v1 = vmax.f32 %v9175_v6, 0.0  ;;  %v9180_v11 = vadd.f32 %v15743_v32, %v9137_v0  ;;  %v9135_v5 = vadd.f32 %v9076_v16, %v8794_v23 }
 0x524   : > { %v11162_v63 = vpop.f32.mrf.mxu1 }
 0x525   : > { %9247 = vst.msk [vmem:[%s15756_s26 + $0xc8] sm:$0xff] %vm4869_vm3, %v9211_v1  ;;  %v9216_v25 = vmax.f32 %v9180_v11, 0.0  ;;  %v9178_v24 = vadd.f32 %v15743_v32, %v9135_v5  ;;  %v9138_v37 = vadd.f32 %v11162_v63, %v8797_v51 }
 0x526   : > { %v9079_v17 = vpop.f32.mrf.mxu1 }
 0x527   : > { %9252 = vst.msk [vmem:[%s15756_s26 + $0xf0] sm:$0xff] %vm4869_vm3, %v9216_v25  ;;  %v9214_v43 = vmax.f32 %v9178_v24, 0.0  ;;  %v9181_v12 = vadd.f32 %v15743_v32, %v9138_v37  ;;  %v9136_v46 = vadd.f32 %v9079_v17, %v8795_v35 }
 0x528   : > { %v11165_v39 = vpop.f32.mrf.mxu1 }
 0x529   : > { %9250 = vst.msk [vmem:[%s15756_s26 + $0xe0] sm:$0xff] %vm4869_vm3, %v9214_v43  ;;  %v9217_v8 = vmax.f32 %v9181_v12, 0.0  ;;  %v9179_v59 = vadd.f32 %v15743_v32, %v9136_v46  ;;  %v9141_v10 = vadd.f32 %v11165_v39, %v8800_v7 }
 0x52a   : > { %v9092_v60 = vpop.f32.mrf.mxu1 }
 0x52b   : > { %9253 = vst.msk [vmem:[%s15756_s26 + $0xf8] sm:$0xff] %vm4869_vm3, %v9217_v8  ;;  %v9215_v61 = vmax.f32 %v9179_v59, 0.0  ;;  %v9184_v21 = vadd.f32 %v15743_v32, %v9141_v10  ;;  %v9139_v2 = vadd.f32 %v9092_v60, %v8798_v55 }
 0x52c   : > { %v11166_v47 = vpop.f32.mrf.mxu1 }
 0x52d   : > { %9251 = vst.msk [vmem:[%s15756_s26 + $0xe8] sm:$0xff] %vm4869_vm3, %v9215_v61  ;;  %v9220_v38 = vmax.f32 %v9184_v21, 0.0  ;;  %v9182_v48 = vadd.f32 %v15743_v32, %v9139_v2  ;;  %v9142_v4 = vadd.f32 %v11166_v47, %v8801_v36 }
 0x52e   : > { %v9095_v18 = vpop.f32.mrf.mxu1 }
 0x52f   : > { %9256 = vst.msk [vmem:[%s15756_s26 + $0x110] sm:$0xff] %vm4869_vm3, %v9220_v38  ;;  %v9218_v9 = vmax.f32 %v9182_v48, 0.0  ;;  %v9185_v45 = vadd.f32 %v15743_v32, %v9142_v4  ;;  %v9140_v3 = vadd.f32 %v9095_v18, %v8799_v62 }
 0x531   : > { %9254 = vst.msk [vmem:[%s15756_s26 + $0x100] sm:$0xff] %vm4869_vm3, %v9218_v9  ;;  %v9221_v30 = vmax.f32 %v9185_v45, 0.0  ;;  %v9183_v49 = vadd.f32 %v15743_v32, %v9140_v3 }
 0x533   : > { %9257 = vst.msk [vmem:[%s15756_s26 + $0x118] sm:$0xff] %vm4869_vm3, %v9221_v30  ;;  %v9219_v15 = vmax.f32 %v9183_v49, 0.0 }
 0x535   : > { %9255 = vst.msk [vmem:[%s15756_s26 + $0x108] sm:$0xff] %vm4869_vm3, %v9219_v15 }
 0x536 PF: > { %s20_s30 = sadd.s32 1, %s11367_s30  }
 0x537   : > { %p17_p4 = scmp.ge.s32.totalorder %s20_s30, 4  }
 0x539   :  { %19 = sbr.rel (!%p17_p4) target bundleno = 1 (0x1), region = 110 }

</bundles_post_ra>
